<compile_context>
chip_gen: v5e
topology: v5e:2x2
jax: 0.10.0
libtpu: 0.0.40
codegen_flags: <defaults>
</compile_context>

<pallas_src>
import jax
import jax.numpy as jnp
from jax.experimental import pallas as pl
from jax.experimental.pallas import tpu as pltpu


# ----------------------------------------------------------------------------
# Hoisted input projection: one (N, K) x (K, 3H) MXU matmul (+ bias) covering
# every timestep at once (bf16 operands, f32 accumulate).
# ----------------------------------------------------------------------------
def _proj_bias_kernel(x_ref, w_ref, b_ref, o_ref):
    o_ref[...] = (
        jnp.dot(x_ref[...], w_ref[...], preferred_element_type=jnp.float32)
        + b_ref[...]
    )


def project(x, w_bf16, b_f32):
    n = x.shape[0]
    m = w_bf16.shape[1]
    return pl.pallas_call(
        _proj_bias_kernel,
        out_shape=jax.ShapeDtypeStruct((n, m), jnp.float32),
    )(x.astype(jnp.bfloat16), w_bf16, b_f32)


# ----------------------------------------------------------------------------
# Encoder: GRU recurrence with the input projection precomputed. Single grid
# step; the whole sequence loops inside the kernel (unrolled fori_loop).
# ----------------------------------------------------------------------------
def _gru_encoder_kernel(gx_ref, whh_ref, bhh_ref, ctx_ref):
    S, B, H3 = gx_ref.shape
    H = H3 // 3
    whh = whh_ref[...]          # (H, 3H) bf16
    bhh = bhh_ref[...]          # (1, 3H) f32

    def step(t, h):
        gx = gx_ref[t]          # (B, 3H) f32  = x_t @ W_ih + b_ih (precomputed)
        gh = jnp.dot(h.astype(jnp.bfloat16), whh,
                     preferred_element_type=jnp.float32) + bhh
        r = jax.nn.sigmoid(gx[:, :H] + gh[:, :H])
        z = jax.nn.sigmoid(gx[:, H:2 * H] + gh[:, H:2 * H])
        n = jnp.tanh(gx[:, 2 * H:] + r * gh[:, 2 * H:])
        h_new = (1.0 - z) * n + z * h
        ctx_ref[t] = h_new
        return h_new

    jax.lax.fori_loop(0, S, step, jnp.zeros((B, H), jnp.float32), unroll=True)


def run_encoder(gx_all, whh, bhh):
    S, B, H3 = gx_all.shape
    H = H3 // 3
    return pl.pallas_call(
        _gru_encoder_kernel,
        out_shape=jax.ShapeDtypeStruct((S, B, H), jnp.float32),
    )(gx_all, whh, bhh)


# ----------------------------------------------------------------------------
# Decoder: attention + GRU cell loop, then ONE batched vocab matmul + masked CE
# (integer targets, logsumexp; no one-hot). Single grid step, all VMEM-resident.
# ----------------------------------------------------------------------------
def _attn_decoder_kernel(gy_ref, ctx_ref, amask_ref, h0_ref,
                         watt_ref, whh_ref, bhh_ref,
                         tgt_ref, wout_ref, bout_ref,
                         loss_ref, hs_scr):
    T1, B, H3 = gy_ref.shape
    H = H3 // 3

    ctx = ctx_ref[...]          # (B, S, H) f32 encoder states (VMEM resident)
    amask = amask_ref[...]      # (B, S) additive mask: 0 real, -1e9 src pad
    watt = watt_ref[...]        # (H, 3H) bf16
    whh = whh_ref[...]          # (H, 3H) bf16
    bhh = bhh_ref[...]          # (1, 3H) f32

    def step(t, h):
        # dot attention; softmax reduction is lane-wise (S on the lane axis)
        scores = jnp.sum(ctx * h[:, None, :], axis=-1) + amask     # (B, S)
        alpha = jax.nn.softmax(scores, axis=-1)                    # (B, S)
        att = jnp.sum(alpha[:, :, None] * ctx, axis=1)             # (B, H)

        gx = gy_ref[t] + jnp.dot(att.astype(jnp.bfloat16), watt,
                                 preferred_element_type=jnp.float32)
        gh = jnp.dot(h.astype(jnp.bfloat16), whh,
                     preferred_element_type=jnp.float32) + bhh
        r = jax.nn.sigmoid(gx[:, :H] + gh[:, :H])
        z = jax.nn.sigmoid(gx[:, H:2 * H] + gh[:, H:2 * H])
        n = jnp.tanh(gx[:, 2 * H:] + r * gh[:, 2 * H:])
        h_new = (1.0 - z) * n + z * h

        hs_scr[pl.ds(t * B, B), :] = h_new                         # stash h_t
        return h_new

    jax.lax.fori_loop(0, T1, step, h0_ref[...], unroll=True)

    # Batched vocab projection over all (T-1)*B rows; masked CE without one-hot.
    hs = hs_scr[...]                                               # (T1*B, H)
    logits = jnp.dot(hs.astype(jnp.bfloat16), wout_ref[...],
                     preferred_element_type=jnp.float32) + bout_ref[...]
    mx = jnp.max(logits, axis=-1, keepdims=True)
    lse = mx + jnp.log(jnp.sum(jnp.exp(logits - mx), axis=-1, keepdims=True))
    tgt = tgt_ref[...]                                             # (T1*B, 1)
    cols = jax.lax.broadcasted_iota(jnp.int32, logits.shape, 1)
    picked = jnp.sum(jnp.where(cols == tgt, logits, 0.0),
                     axis=-1, keepdims=True)
    tmask = (tgt != 0).astype(jnp.float32)                         # ignore pad=0
    loss_ref[...] = jnp.sum((lse - picked) * tmask, keepdims=True)


def run_decoder(gy_all, ctx_bsh, amask, h0, watt, whh, bhh, tgt_flat, wout, bout):
    T1, B, H3 = gy_all.shape
    H = H3 // 3
    return pl.pallas_call(
        _attn_decoder_kernel,
        out_shape=jax.ShapeDtypeStruct((1, 1), jnp.float32),
        scratch_shapes=[pltpu.VMEM((T1 * B, H), jnp.float32)],
    )(gy_all, ctx_bsh, amask, h0, watt, whh, bhh, tgt_flat, wout, bout)


# ----------------------------------------------------------------------------
# Parameter init (kaiming-normal-style, deterministic; src emb pad row zeroed,
# mirroring reset_parameters). MXU weight matrices are stored in bf16.
# ----------------------------------------------------------------------------
def init_params(key, V_src, V_tgt, E, H):
    def kaiming(k, shape, dtype=jnp.float32):
        fan_in = shape[0]
        w = jax.random.normal(k, shape, jnp.float32) * jnp.sqrt(2.0 / fan_in)
        return w.astype(dtype)

    bf16 = jnp.bfloat16
    ks = jax.random.split(key, 10)
    return {
        "src_emb": kaiming(ks[0], (V_src, E)).at[0].set(0.0),   # pad row zeroed
        "tgt_emb": kaiming(ks[1], (V_tgt, E)),
        # encoder GRU
        "enc_wih": kaiming(ks[2], (E, 3 * H), bf16),
        "enc_whh": kaiming(ks[3], (H, 3 * H), bf16),
        "enc_bih": jnp.zeros((1, 3 * H), jnp.float32),
        "enc_bhh": jnp.zeros((1, 3 * H), jnp.float32),
        # decoder (W_ih split into embedding part W_y and attention part W_att)
        "dec_winit": kaiming(ks[4], (H, H)),
        "dec_wy": kaiming(ks[5], (E, 3 * H), bf16),
        "dec_watt": kaiming(ks[6], (H, 3 * H), bf16),
        "dec_whh": kaiming(ks[7], (H, 3 * H), bf16),
        "dec_bih": jnp.zeros((1, 3 * H), jnp.float32),
        "dec_bhh": jnp.zeros((1, 3 * H), jnp.float32),
        "dec_wout": kaiming(ks[8], (H, V_tgt), bf16),
        "dec_bout": jnp.zeros((1, V_tgt), jnp.float32),
    }


# ----------------------------------------------------------------------------
# Full forward (matches SumRNN.forward: encode -> decode -> loss / n_items).
# ----------------------------------------------------------------------------
@jax.jit
def sumrnn_forward(input_ids, decoder_input_ids, params):
    H = params["enc_whh"].shape[0]
    E = params["src_emb"].shape[1]

    # ---- encode(): (B,S) -> (S,B) -> embed -> hoisted projection -> GRU ----
    src_tb = input_ids.T                                      # (S, B)
    S, B = src_tb.shape
    x_emb = jnp.take(params["src_emb"], src_tb, axis=0)       # (S, B, E)
    gx_all = project(x_emb.reshape(S * B, E),
                     params["enc_wih"], params["enc_bih"]).reshape(S, B, 3 * H)
    ctx = run_encoder(gx_all, params["enc_whh"], params["enc_bhh"])  # (S,B,H)

    # ---- decoder prep (wrapper-side; h0 init hoisted out of the kernel) ----
    ctx_bsh = jnp.transpose(ctx, (1, 0, 2))                   # (B, S, H)
    smask = (input_ids != 0).astype(jnp.float32)              # (B, S) src mask
    amask = (1.0 - smask) * (-1e9)                            # additive attn mask
    denom = jnp.maximum(jnp.sum(smask, axis=1, keepdims=True), 1.0)
    mean_ctx = jnp.einsum("bs,bsh->bh", smask, ctx_bsh) / denom
    h0 = jnp.tanh(mean_ctx @ params["dec_winit"])             # (B, H)

    dec_tb = decoder_input_ids.T                              # (T, B)
    inp_tb = dec_tb[:-1]                                      # (T-1, B) inputs
    tgt_tb = dec_tb[1:]                                       # (T-1, B) targets
    T1 = inp_tb.shape[0]
    y_emb = jnp.take(params["tgt_emb"], inp_tb, axis=0)       # (T-1, B, E)
    gy_all = project(y_emb.reshape(T1 * B, E),
                     params["dec_wy"], params["dec_bih"]).reshape(T1, B, 3 * H)
    tgt_flat = tgt_tb.reshape(T1 * B, 1).astype(jnp.int32)

    loss_sum = run_decoder(gy_all, ctx_bsh, amask, h0,
                           params["dec_watt"], params["dec_whh"],
                           params["dec_bhh"], tgt_flat,
                           params["dec_wout"], params["dec_bout"])[0, 0]

    # n_items = torch.nonzero(decoder_input_ids.permute(1,0)[1:]).shape[0]
    n_items = jnp.sum(tgt_tb != 0).astype(jnp.float32)
    loss = loss_sum / jnp.maximum(n_items, 1.0)               # div-by-zero guard
    return {"loss": loss, "n_items": n_items}


if __name__ == "__main__":
    B, S, T = 8, 8, 8
    E, H = 128, 128                 # lane-dense (multiples of 128); 3H = 384
    V_src, V_tgt = 256, 256

    key = jax.random.PRNGKey(0)
    k_p, k_src, k_tgt = jax.random.split(key, 3)
    params = init_params(k_p, V_src, V_tgt, E, H)

    # token 0 is pad; sample real tokens from [1, V)
    input_ids = jax.random.randint(k_src, (B, S), 1, V_src, dtype=jnp.int32)
    decoder_input_ids = jax.random.randint(k_tgt, (B, T), 1, V_tgt, dtype=jnp.int32)

    out = sumrnn_forward(input_ids, decoder_input_ids, params)
    jax.block_until_ready(out["loss"])
    assert jnp.isfinite(out["loss"])
    print("KERNEL_OK")
</pallas_src>

<mosaic_0001>
module attributes {stable_mosaic.version = 11 : i64} {
  func.func @_proj_bias_kernel(%arg0: memref<64x128xbf16, #tpu.memory_space<vmem>>, %arg1: memref<128x384xbf16, #tpu.memory_space<vmem>>, %arg2: memref<1x384xf32, #tpu.memory_space<vmem>>, %arg3: memref<64x384xf32, #tpu.memory_space<vmem>>) attributes {dimension_semantics = [], scalar_prefetch = 0 : i64, scratch_operands = 0 : i64, tpu.core_type = #tpu.core_type<tc>} {
    %c0 = arith.constant 0 : index
    %c0_0 = arith.constant 0 : index
    %0 = vector.load %arg0[%c0, %c0_0] : memref<64x128xbf16, #tpu.memory_space<vmem>>, vector<64x128xbf16>
    %c0_1 = arith.constant 0 : index
    %c0_2 = arith.constant 0 : index
    %1 = vector.load %arg1[%c0_1, %c0_2] : memref<128x384xbf16, #tpu.memory_space<vmem>>, vector<128x384xbf16>
    %cst = arith.constant dense<0.000000e+00> : vector<64x384xf32>
    %2 = tpu.matmul %0, %1, %cst {dimension_numbers = #tpu.dot_dimension_numbers<[1], [0], [0], [1], [0, 0, 1, 1], [], []>} : vector<64x128xbf16>, vector<128x384xbf16>, vector<64x384xf32> -> vector<64x384xf32>
    %c0_3 = arith.constant 0 : index
    %c0_4 = arith.constant 0 : index
    %3 = vector.load %arg2[%c0_3, %c0_4] : memref<1x384xf32, #tpu.memory_space<vmem>>, vector<1x384xf32>
    %4 = vector.broadcast %3 : vector<1x384xf32> to vector<64x384xf32>
    %5 = arith.addf %2, %4 : vector<64x384xf32>
    %c0_5 = arith.constant 0 : index
    %c0_6 = arith.constant 0 : index
    %6 = vector.load %arg3[%c0_5, %c0_6] : memref<64x384xf32, #tpu.memory_space<vmem>>, vector<64x384xf32>
    tpu.vector_store %arg3[%c0_5, %c0_6], %5 {strides = array<i32>} : memref<64x384xf32, #tpu.memory_space<vmem>>, vector<64x384xf32>,
    return
  }
}

module attributes {stable_mosaic.version = 11 : i64} {
  func.func @_gru_encoder_kernel(%arg0: memref<8x8x384xf32, #tpu.memory_space<vmem>>, %arg1: memref<128x384xbf16, #tpu.memory_space<vmem>>, %arg2: memref<1x384xf32, #tpu.memory_space<vmem>>, %arg3: memref<8x8x128xf32, #tpu.memory_space<vmem>>) attributes {dimension_semantics = [], scalar_prefetch = 0 : i64, scratch_operands = 0 : i64, tpu.core_type = #tpu.core_type<tc>} {
    %c0 = arith.constant 0 : index
    %c0_0 = arith.constant 0 : index
    %0 = vector.load %arg1[%c0, %c0_0] : memref<128x384xbf16, #tpu.memory_space<vmem>>, vector<128x384xbf16>
    %c0_1 = arith.constant 0 : index
    %c0_2 = arith.constant 0 : index
    %1 = vector.load %arg2[%c0_1, %c0_2] : memref<1x384xf32, #tpu.memory_space<vmem>>, vector<1x384xf32>
    %cst = arith.constant 0.000000e+00 : f32
    %2 = vector.broadcast %cst : f32 to vector<8x128xf32>
    %c0_i32 = arith.constant 0 : i32
    %3 = arith.index_cast %c0_i32 : i32 to index
    %c0_3 = arith.constant 0 : index
    %c0_4 = arith.constant 0 : index
    %4 = vector.load %arg0[%3, %c0_3, %c0_4] : memref<8x8x384xf32, #tpu.memory_space<vmem>>, vector<1x8x384xf32>
    %5 = vector.shape_cast %4 : vector<1x8x384xf32> to vector<8x384xf32>
    %6 = arith.truncf %2 : vector<8x128xf32> to vector<8x128xbf16>
    %cst_5 = arith.constant dense<0.000000e+00> : vector<8x384xf32>
    %7 = tpu.matmul %6, %0, %cst_5 {dimension_numbers = #tpu.dot_dimension_numbers<[1], [0], [0], [1], [0, 0, 1, 1], [], []>} : vector<8x128xbf16>, vector<128x384xbf16>, vector<8x384xf32> -> vector<8x384xf32>
    %8 = vector.broadcast %1 : vector<1x384xf32> to vector<8x384xf32>
    %9 = arith.addf %7, %8 : vector<8x384xf32>
    %10 = vector.extract_strided_slice %5 {offsets = [0, 0], sizes = [8, 128], strides = [1, 1]} : vector<8x384xf32> to vector<8x128xf32>
    %11 = vector.extract_strided_slice %9 {offsets = [0, 0], sizes = [8, 128], strides = [1, 1]} : vector<8x384xf32> to vector<8x128xf32>
    %12 = arith.addf %10, %11 : vector<8x128xf32>
    %13 = arith.negf %12 : vector<8x128xf32>
    %14 = math.exp %13 : vector<8x128xf32>
    %cst_6 = arith.constant 1.000000e+00 : f32
    %15 = vector.broadcast %cst_6 : f32 to vector<8x128xf32>
    %16 = arith.addf %15, %14 : vector<8x128xf32>
    %17 = arith.divf %15, %16 : vector<8x128xf32>
    %18 = vector.extract_strided_slice %5 {offsets = [0, 128], sizes = [8, 128], strides = [1, 1]} : vector<8x384xf32> to vector<8x128xf32>
    %19 = vector.extract_strided_slice %9 {offsets = [0, 128], sizes = [8, 128], strides = [1, 1]} : vector<8x384xf32> to vector<8x128xf32>
    %20 = arith.addf %18, %19 : vector<8x128xf32>
    %21 = arith.negf %20 : vector<8x128xf32>
    %22 = math.exp %21 : vector<8x128xf32>
    %cst_7 = arith.constant 1.000000e+00 : f32
    %23 = vector.broadcast %cst_7 : f32 to vector<8x128xf32>
    %24 = arith.addf %23, %22 : vector<8x128xf32>
    %25 = arith.divf %23, %24 : vector<8x128xf32>
    %26 = vector.extract_strided_slice %5 {offsets = [0, 256], sizes = [8, 128], strides = [1, 1]} : vector<8x384xf32> to vector<8x128xf32>
    %27 = vector.extract_strided_slice %9 {offsets = [0, 256], sizes = [8, 128], strides = [1, 1]} : vector<8x384xf32> to vector<8x128xf32>
    %28 = arith.mulf %17, %27 : vector<8x128xf32>
    %29 = arith.addf %26, %28 : vector<8x128xf32>
    %30 = math.tanh %29 : vector<8x128xf32>
    %cst_8 = arith.constant 1.000000e+00 : f32
    %31 = vector.broadcast %cst_8 : f32 to vector<8x128xf32>
    %32 = arith.subf %31, %25 : vector<8x128xf32>
    %33 = arith.mulf %32, %30 : vector<8x128xf32>
    %34 = arith.mulf %25, %2 : vector<8x128xf32>
    %35 = arith.addf %33, %34 : vector<8x128xf32>
    %36 = arith.index_cast %c0_i32 : i32 to index
    %c0_9 = arith.constant 0 : index
    %c0_10 = arith.constant 0 : index
    %37 = vector.load %arg3[%36, %c0_9, %c0_10] : memref<8x8x128xf32, #tpu.memory_space<vmem>>, vector<1x8x128xf32>
    %38 = vector.shape_cast %37 : vector<1x8x128xf32> to vector<8x128xf32>
    %39 = vector.shape_cast %35 : vector<8x128xf32> to vector<1x8x128xf32>
    tpu.vector_store %arg3[%36, %c0_9, %c0_10], %39 {strides = array<i32>} : memref<8x8x128xf32, #tpu.memory_space<vmem>>, vector<1x8x128xf32>,
    %c1_i32 = arith.constant 1 : i32
    %40 = arith.index_cast %c1_i32 : i32 to index
    %c0_11 = arith.constant 0 : index
    %c0_12 = arith.constant 0 : index
    %41 = vector.load %arg0[%40, %c0_11, %c0_12] : memref<8x8x384xf32, #tpu.memory_space<vmem>>, vector<1x8x384xf32>
    %42 = vector.shape_cast %41 : vector<1x8x384xf32> to vector<8x384xf32>
    %43 = arith.truncf %35 : vector<8x128xf32> to vector<8x128xbf16>
    %cst_13 = arith.constant dense<0.000000e+00> : vector<8x384xf32>
    %44 = tpu.matmul %43, %0, %cst_13 {dimension_numbers = #tpu.dot_dimension_numbers<[1], [0], [0], [1], [0, 0, 1, 1], [], []>} : vector<8x128xbf16>, vector<128x384xbf16>, vector<8x384xf32> -> vector<8x384xf32>
    %45 = vector.broadcast %1 : vector<1x384xf32> to vector<8x384xf32>
    %46 = arith.addf %44, %45 : vector<8x384xf32>
    %47 = vector.extract_strided_slice %42 {offsets = [0, 0], sizes = [8, 128], strides = [1, 1]} : vector<8x384xf32> to vector<8x128xf32>
    %48 = vector.extract_strided_slice %46 {offsets = [0, 0], sizes = [8, 128], strides = [1, 1]} : vector<8x384xf32> to vector<8x128xf32>
    %49 = arith.addf %47, %48 : vector<8x128xf32>
    %50 = arith.negf %49 : vector<8x128xf32>
    %51 = math.exp %50 : vector<8x128xf32>
    %cst_14 = arith.constant 1.000000e+00 : f32
    %52 = vector.broadcast %cst_14 : f32 to vector<8x128xf32>
    %53 = arith.addf %52, %51 : vector<8x128xf32>
    %54 = arith.divf %52, %53 : vector<8x128xf32>
    %55 = vector.extract_strided_slice %42 {offsets = [0, 128], sizes = [8, 128], strides = [1, 1]} : vector<8x384xf32> to vector<8x128xf32>
    %56 = vector.extract_strided_slice %46 {offsets = [0, 128], sizes = [8, 128], strides = [1, 1]} : vector<8x384xf32> to vector<8x128xf32>
    %57 = arith.addf %55, %56 : vector<8x128xf32>
    %58 = arith.negf %57 : vector<8x128xf32>
    %59 = math.exp %58 : vector<8x128xf32>
    %cst_15 = arith.constant 1.000000e+00 : f32
    %60 = vector.broadcast %cst_15 : f32 to vector<8x128xf32>
    %61 = arith.addf %60, %59 : vector<8x128xf32>
    %62 = arith.divf %60, %61 : vector<8x128xf32>
    %63 = vector.extract_strided_slice %42 {offsets = [0, 256], sizes = [8, 128], strides = [1, 1]} : vector<8x384xf32> to vector<8x128xf32>
    %64 = vector.extract_strided_slice %46 {offsets = [0, 256], sizes = [8, 128], strides = [1, 1]} : vector<8x384xf32> to vector<8x128xf32>
    %65 = arith.mulf %54, %64 : vector<8x128xf32>
    %66 = arith.addf %63, %65 : vector<8x128xf32>
    %67 = math.tanh %66 : vector<8x128xf32>
    %cst_16 = arith.constant 1.000000e+00 : f32
    %68 = vector.broadcast %cst_16 : f32 to vector<8x128xf32>
    %69 = arith.subf %68, %62 : vector<8x128xf32>
    %70 = arith.mulf %69, %67 : vector<8x128xf32>
    %71 = arith.mulf %62, %35 : vector<8x128xf32>
    %72 = arith.addf %70, %71 : vector<8x128xf32>
    %73 = arith.index_cast %c1_i32 : i32 to index
    %c0_17 = arith.constant 0 : index
    %c0_18 = arith.constant 0 : index
    %74 = vector.load %arg3[%73, %c0_17, %c0_18] : memref<8x8x128xf32, #tpu.memory_space<vmem>>, vector<1x8x128xf32>
    %75 = vector.shape_cast %74 : vector<1x8x128xf32> to vector<8x128xf32>
    %76 = vector.shape_cast %72 : vector<8x128xf32> to vector<1x8x128xf32>
    tpu.vector_store %arg3[%73, %c0_17, %c0_18], %76 {strides = array<i32>} : memref<8x8x128xf32, #tpu.memory_space<vmem>>, vector<1x8x128xf32>,
    %c2_i32 = arith.constant 2 : i32
    %77 = arith.index_cast %c2_i32 : i32 to index
    %c0_19 = arith.constant 0 : index
    %c0_20 = arith.constant 0 : index
    %78 = vector.load %arg0[%77, %c0_19, %c0_20] : memref<8x8x384xf32, #tpu.memory_space<vmem>>, vector<1x8x384xf32>
    %79 = vector.shape_cast %78 : vector<1x8x384xf32> to vector<8x384xf32>
    %80 = arith.truncf %72 : vector<8x128xf32> to vector<8x128xbf16>
    %cst_21 = arith.constant dense<0.000000e+00> : vector<8x384xf32>
    %81 = tpu.matmul %80, %0, %cst_21 {dimension_numbers = #tpu.dot_dimension_numbers<[1], [0], [0], [1], [0, 0, 1, 1], [], []>} : vector<8x128xbf16>, vector<128x384xbf16>, vector<8x384xf32> -> vector<8x384xf32>
    %82 = vector.broadcast %1 : vector<1x384xf32> to vector<8x384xf32>
    %83 = arith.addf %81, %82 : vector<8x384xf32>
    %84 = vector.extract_strided_slice %79 {offsets = [0, 0], sizes = [8, 128], strides = [1, 1]} : vector<8x384xf32> to vector<8x128xf32>
    %85 = vector.extract_strided_slice %83 {offsets = [0, 0], sizes = [8, 128], strides = [1, 1]} : vector<8x384xf32> to vector<8x128xf32>
    %86 = arith.addf %84, %85 : vector<8x128xf32>
    %87 = arith.negf %86 : vector<8x128xf32>
    %88 = math.exp %87 : vector<8x128xf32>
    %cst_22 = arith.constant 1.000000e+00 : f32
    %89 = vector.broadcast %cst_22 : f32 to vector<8x128xf32>
    %90 = arith.addf %89, %88 : vector<8x128xf32>
    %91 = arith.divf %89, %90 : vector<8x128xf32>
    %92 = vector.extract_strided_slice %79 {offsets = [0, 128], sizes = [8, 128], strides = [1, 1]} : vector<8x384xf32> to vector<8x128xf32>
    %93 = vector.extract_strided_slice %83 {offsets = [0, 128], sizes = [8, 128], strides = [1, 1]} : vector<8x384xf32> to vector<8x128xf32>
    %94 = arith.addf %92, %93 : vector<8x128xf32>
    %95 = arith.negf %94 : vector<8x128xf32>
    %96 = math.exp %95 : vector<8x128xf32>
    %cst_23 = arith.constant 1.000000e+00 : f32
    %97 = vector.broadcast %cst_23 : f32 to vector<8x128xf32>
    %98 = arith.addf %97, %96 : vector<8x128xf32>
    %99 = arith.divf %97, %98 : vector<8x128xf32>
    %100 = vector.extract_strided_slice %79 {offsets = [0, 256], sizes = [8, 128], strides = [1, 1]} : vector<8x384xf32> to vector<8x128xf32>
    %101 = vector.extract_strided_slice %83 {offsets = [0, 256], sizes = [8, 128], strides = [1, 1]} : vector<8x384xf32> to vector<8x128xf32>
    %102 = arith.mulf %91, %101 : vector<8x128xf32>
    %103 = arith.addf %100, %102 : vector<8x128xf32>
    %104 = math.tanh %103 : vector<8x128xf32>
    %cst_24 = arith.constant 1.000000e+00 : f32
    %105 = vector.broadcast %cst_24 : f32 to vector<8x128xf32>
    %106 = arith.subf %105, %99 : vector<8x128xf32>
    %107 = arith.mulf %106, %104 : vector<8x128xf32>
    %108 = arith.mulf %99, %72 : vector<8x128xf32>
    %109 = arith.addf %107, %108 : vector<8x128xf32>
    %110 = arith.index_cast %c2_i32 : i32 to index
    %c0_25 = arith.constant 0 : index
    %c0_26 = arith.constant 0 : index
    %111 = vector.load %arg3[%110, %c0_25, %c0_26] : memref<8x8x128xf32, #tpu.memory_space<vmem>>, vector<1x8x128xf32>
    %112 = vector.shape_cast %111 : vector<1x8x128xf32> to vector<8x128xf32>
    %113 = vector.shape_cast %109 : vector<8x128xf32> to vector<1x8x128xf32>
    tpu.vector_store %arg3[%110, %c0_25, %c0_26], %113 {strides = array<i32>} : memref<8x8x128xf32, #tpu.memory_space<vmem>>, vector<1x8x128xf32>,
    %c3_i32 = arith.constant 3 : i32
    %114 = arith.index_cast %c3_i32 : i32 to index
    %c0_27 = arith.constant 0 : index
    %c0_28 = arith.constant 0 : index
    %115 = vector.load %arg0[%114, %c0_27, %c0_28] : memref<8x8x384xf32, #tpu.memory_space<vmem>>, vector<1x8x384xf32>
    %116 = vector.shape_cast %115 : vector<1x8x384xf32> to vector<8x384xf32>
    %117 = arith.truncf %109 : vector<8x128xf32> to vector<8x128xbf16>
    %cst_29 = arith.constant dense<0.000000e+00> : vector<8x384xf32>
    %118 = tpu.matmul %117, %0, %cst_29 {dimension_numbers = #tpu.dot_dimension_numbers<[1], [0], [0], [1], [0, 0, 1, 1], [], []>} : vector<8x128xbf16>, vector<128x384xbf16>, vector<8x384xf32> -> vector<8x384xf32>
    %119 = vector.broadcast %1 : vector<1x384xf32> to vector<8x384xf32>
    %120 = arith.addf %118, %119 : vector<8x384xf32>
    %121 = vector.extract_strided_slice %116 {offsets = [0, 0], sizes = [8, 128], strides = [1, 1]} : vector<8x384xf32> to vector<8x128xf32>
    %122 = vector.extract_strided_slice %120 {offsets = [0, 0], sizes = [8, 128], strides = [1, 1]} : vector<8x384xf32> to vector<8x128xf32>
    %123 = arith.addf %121, %122 : vector<8x128xf32>
    %124 = arith.negf %123 : vector<8x128xf32>
    %125 = math.exp %124 : vector<8x128xf32>
    %cst_30 = arith.constant 1.000000e+00 : f32
    %126 = vector.broadcast %cst_30 : f32 to vector<8x128xf32>
    %127 = arith.addf %126, %125 : vector<8x128xf32>
    %128 = arith.divf %126, %127 : vector<8x128xf32>
    %129 = vector.extract_strided_slice %116 {offsets = [0, 128], sizes = [8, 128], strides = [1, 1]} : vector<8x384xf32> to vector<8x128xf32>
    %130 = vector.extract_strided_slice %120 {offsets = [0, 128], sizes = [8, 128], strides = [1, 1]} : vector<8x384xf32> to vector<8x128xf32>
    %131 = arith.addf %129, %130 : vector<8x128xf32>
    %132 = arith.negf %131 : vector<8x128xf32>
    %133 = math.exp %132 : vector<8x128xf32>
    %cst_31 = arith.constant 1.000000e+00 : f32
    %134 = vector.broadcast %cst_31 : f32 to vector<8x128xf32>
    %135 = arith.addf %134, %133 : vector<8x128xf32>
    %136 = arith.divf %134, %135 : vector<8x128xf32>
    %137 = vector.extract_strided_slice %116 {offsets = [0, 256], sizes = [8, 128], strides = [1, 1]} : vector<8x384xf32> to vector<8x128xf32>
    %138 = vector.extract_strided_slice %120 {offsets = [0, 256], sizes = [8, 128], strides = [1, 1]} : vector<8x384xf32> to vector<8x128xf32>
    %139 = arith.mulf %128, %138 : vector<8x128xf32>
    %140 = arith.addf %137, %139 : vector<8x128xf32>
    %141 = math.tanh %140 : vector<8x128xf32>
    %cst_32 = arith.constant 1.000000e+00 : f32
    %142 = vector.broadcast %cst_32 : f32 to vector<8x128xf32>
    %143 = arith.subf %142, %136 : vector<8x128xf32>
    %144 = arith.mulf %143, %141 : vector<8x128xf32>
    %145 = arith.mulf %136, %109 : vector<8x128xf32>
    %146 = arith.addf %144, %145 : vector<8x128xf32>
    %147 = arith.index_cast %c3_i32 : i32 to index
    %c0_33 = arith.constant 0 : index
    %c0_34 = arith.constant 0 : index
    %148 = vector.load %arg3[%147, %c0_33, %c0_34] : memref<8x8x128xf32, #tpu.memory_space<vmem>>, vector<1x8x128xf32>
    %149 = vector.shape_cast %148 : vector<1x8x128xf32> to vector<8x128xf32>
    %150 = vector.shape_cast %146 : vector<8x128xf32> to vector<1x8x128xf32>
    tpu.vector_store %arg3[%147, %c0_33, %c0_34], %150 {strides = array<i32>} : memref<8x8x128xf32, #tpu.memory_space<vmem>>, vector<1x8x128xf32>,
    %c4_i32 = arith.constant 4 : i32
    %151 = arith.index_cast %c4_i32 : i32 to index
    %c0_35 = arith.constant 0 : index
    %c0_36 = arith.constant 0 : index
    %152 = vector.load %arg0[%151, %c0_35, %c0_36] : memref<8x8x384xf32, #tpu.memory_space<vmem>>, vector<1x8x384xf32>
    %153 = vector.shape_cast %152 : vector<1x8x384xf32> to vector<8x384xf32>
    %154 = arith.truncf %146 : vector<8x128xf32> to vector<8x128xbf16>
    %cst_37 = arith.constant dense<0.000000e+00> : vector<8x384xf32>
    %155 = tpu.matmul %154, %0, %cst_37 {dimension_numbers = #tpu.dot_dimension_numbers<[1], [0], [0], [1], [0, 0, 1, 1], [], []>} : vector<8x128xbf16>, vector<128x384xbf16>, vector<8x384xf32> -> vector<8x384xf32>
    %156 = vector.broadcast %1 : vector<1x384xf32> to vector<8x384xf32>
    %157 = arith.addf %155, %156 : vector<8x384xf32>
    %158 = vector.extract_strided_slice %153 {offsets = [0, 0], sizes = [8, 128], strides = [1, 1]} : vector<8x384xf32> to vector<8x128xf32>
    %159 = vector.extract_strided_slice %157 {offsets = [0, 0], sizes = [8, 128], strides = [1, 1]} : vector<8x384xf32> to vector<8x128xf32>
    %160 = arith.addf %158, %159 : vector<8x128xf32>
    %161 = arith.negf %160 : vector<8x128xf32>
    %162 = math.exp %161 : vector<8x128xf32>
    %cst_38 = arith.constant 1.000000e+00 : f32
    %163 = vector.broadcast %cst_38 : f32 to vector<8x128xf32>
    %164 = arith.addf %163, %162 : vector<8x128xf32>
    %165 = arith.divf %163, %164 : vector<8x128xf32>
    %166 = vector.extract_strided_slice %153 {offsets = [0, 128], sizes = [8, 128], strides = [1, 1]} : vector<8x384xf32> to vector<8x128xf32>
    %167 = vector.extract_strided_slice %157 {offsets = [0, 128], sizes = [8, 128], strides = [1, 1]} : vector<8x384xf32> to vector<8x128xf32>
    %168 = arith.addf %166, %167 : vector<8x128xf32>
    %169 = arith.negf %168 : vector<8x128xf32>
    %170 = math.exp %169 : vector<8x128xf32>
    %cst_39 = arith.constant 1.000000e+00 : f32
    %171 = vector.broadcast %cst_39 : f32 to vector<8x128xf32>
    %172 = arith.addf %171, %170 : vector<8x128xf32>
    %173 = arith.divf %171, %172 : vector<8x128xf32>
    %174 = vector.extract_strided_slice %153 {offsets = [0, 256], sizes = [8, 128], strides = [1, 1]} : vector<8x384xf32> to vector<8x128xf32>
    %175 = vector.extract_strided_slice %157 {offsets = [0, 256], sizes = [8, 128], strides = [1, 1]} : vector<8x384xf32> to vector<8x128xf32>
    %176 = arith.mulf %165, %175 : vector<8x128xf32>
    %177 = arith.addf %174, %176 : vector<8x128xf32>
    %178 = math.tanh %177 : vector<8x128xf32>
    %cst_40 = arith.constant 1.000000e+00 : f32
    %179 = vector.broadcast %cst_40 : f32 to vector<8x128xf32>
    %180 = arith.subf %179, %173 : vector<8x128xf32>
    %181 = arith.mulf %180, %178 : vector<8x128xf32>
    %182 = arith.mulf %173, %146 : vector<8x128xf32>
    %183 = arith.addf %181, %182 : vector<8x128xf32>
    %184 = arith.index_cast %c4_i32 : i32 to index
    %c0_41 = arith.constant 0 : index
    %c0_42 = arith.constant 0 : index
    %185 = vector.load %arg3[%184, %c0_41, %c0_42] : memref<8x8x128xf32, #tpu.memory_space<vmem>>, vector<1x8x128xf32>
    %186 = vector.shape_cast %185 : vector<1x8x128xf32> to vector<8x128xf32>
    %187 = vector.shape_cast %183 : vector<8x128xf32> to vector<1x8x128xf32>
    tpu.vector_store %arg3[%184, %c0_41, %c0_42], %187 {strides = array<i32>} : memref<8x8x128xf32, #tpu.memory_space<vmem>>, vector<1x8x128xf32>,
    %c5_i32 = arith.constant 5 : i32
    %188 = arith.index_cast %c5_i32 : i32 to index
    %c0_43 = arith.constant 0 : index
    %c0_44 = arith.constant 0 : index
    %189 = vector.load %arg0[%188, %c0_43, %c0_44] : memref<8x8x384xf32, #tpu.memory_space<vmem>>, vector<1x8x384xf32>
    %190 = vector.shape_cast %189 : vector<1x8x384xf32> to vector<8x384xf32>
    %191 = arith.truncf %183 : vector<8x128xf32> to vector<8x128xbf16>
    %cst_45 = arith.constant dense<0.000000e+00> : vector<8x384xf32>
    %192 = tpu.matmul %191, %0, %cst_45 {dimension_numbers = #tpu.dot_dimension_numbers<[1], [0], [0], [1], [0, 0, 1, 1], [], []>} : vector<8x128xbf16>, vector<128x384xbf16>, vector<8x384xf32> -> vector<8x384xf32>
    %193 = vector.broadcast %1 : vector<1x384xf32> to vector<8x384xf32>
    %194 = arith.addf %192, %193 : vector<8x384xf32>
    %195 = vector.extract_strided_slice %190 {offsets = [0, 0], sizes = [8, 128], strides = [1, 1]} : vector<8x384xf32> to vector<8x128xf32>
    %196 = vector.extract_strided_slice %194 {offsets = [0, 0], sizes = [8, 128], strides = [1, 1]} : vector<8x384xf32> to vector<8x128xf32>
    %197 = arith.addf %195, %196 : vector<8x128xf32>
    %198 = arith.negf %197 : vector<8x128xf32>
    %199 = math.exp %198 : vector<8x128xf32>
    %cst_46 = arith.constant 1.000000e+00 : f32
    %200 = vector.broadcast %cst_46 : f32 to vector<8x128xf32>
    %201 = arith.addf %200, %199 : vector<8x128xf32>
    %202 = arith.divf %200, %201 : vector<8x128xf32>
    %203 = vector.extract_strided_slice %190 {offsets = [0, 128], sizes = [8, 128], strides = [1, 1]} : vector<8x384xf32> to vector<8x128xf32>
    %204 = vector.extract_strided_slice %194 {offsets = [0, 128], sizes = [8, 128], strides = [1, 1]} : vector<8x384xf32> to vector<8x128xf32>
    %205 = arith.addf %203, %204 : vector<8x128xf32>
    %206 = arith.negf %205 : vector<8x128xf32>
    %207 = math.exp %206 : vector<8x128xf32>
    %cst_47 = arith.constant 1.000000e+00 : f32
    %208 = vector.broadcast %cst_47 : f32 to vector<8x128xf32>
    %209 = arith.addf %208, %207 : vector<8x128xf32>
    %210 = arith.divf %208, %209 : vector<8x128xf32>
    %211 = vector.extract_strided_slice %190 {offsets = [0, 256], sizes = [8, 128], strides = [1, 1]} : vector<8x384xf32> to vector<8x128xf32>
    %212 = vector.extract_strided_slice %194 {offsets = [0, 256], sizes = [8, 128], strides = [1, 1]} : vector<8x384xf32> to vector<8x128xf32>
    %213 = arith.mulf %202, %212 : vector<8x128xf32>
    %214 = arith.addf %211, %213 : vector<8x128xf32>
    %215 = math.tanh %214 : vector<8x128xf32>
    %cst_48 = arith.constant 1.000000e+00 : f32
    %216 = vector.broadcast %cst_48 : f32 to vector<8x128xf32>
    %217 = arith.subf %216, %210 : vector<8x128xf32>
    %218 = arith.mulf %217, %215 : vector<8x128xf32>
    %219 = arith.mulf %210, %183 : vector<8x128xf32>
    %220 = arith.addf %218, %219 : vector<8x128xf32>
    %221 = arith.index_cast %c5_i32 : i32 to index
    %c0_49 = arith.constant 0 : index
    %c0_50 = arith.constant 0 : index
    %222 = vector.load %arg3[%221, %c0_49, %c0_50] : memref<8x8x128xf32, #tpu.memory_space<vmem>>, vector<1x8x128xf32>
    %223 = vector.shape_cast %222 : vector<1x8x128xf32> to vector<8x128xf32>
    %224 = vector.shape_cast %220 : vector<8x128xf32> to vector<1x8x128xf32>
    tpu.vector_store %arg3[%221, %c0_49, %c0_50], %224 {strides = array<i32>} : memref<8x8x128xf32, #tpu.memory_space<vmem>>, vector<1x8x128xf32>,
    %c6_i32 = arith.constant 6 : i32
    %225 = arith.index_cast %c6_i32 : i32 to index
    %c0_51 = arith.constant 0 : index
    %c0_52 = arith.constant 0 : index
    %226 = vector.load %arg0[%225, %c0_51, %c0_52] : memref<8x8x384xf32, #tpu.memory_space<vmem>>, vector<1x8x384xf32>
    %227 = vector.shape_cast %226 : vector<1x8x384xf32> to vector<8x384xf32>
    %228 = arith.truncf %220 : vector<8x128xf32> to vector<8x128xbf16>
    %cst_53 = arith.constant dense<0.000000e+00> : vector<8x384xf32>
    %229 = tpu.matmul %228, %0, %cst_53 {dimension_numbers = #tpu.dot_dimension_numbers<[1], [0], [0], [1], [0, 0, 1, 1], [], []>} : vector<8x128xbf16>, vector<128x384xbf16>, vector<8x384xf32> -> vector<8x384xf32>
    %230 = vector.broadcast %1 : vector<1x384xf32> to vector<8x384xf32>
    %231 = arith.addf %229, %230 : vector<8x384xf32>
    %232 = vector.extract_strided_slice %227 {offsets = [0, 0], sizes = [8, 128], strides = [1, 1]} : vector<8x384xf32> to vector<8x128xf32>
    %233 = vector.extract_strided_slice %231 {offsets = [0, 0], sizes = [8, 128], strides = [1, 1]} : vector<8x384xf32> to vector<8x128xf32>
    %234 = arith.addf %232, %233 : vector<8x128xf32>
    %235 = arith.negf %234 : vector<8x128xf32>
    %236 = math.exp %235 : vector<8x128xf32>
    %cst_54 = arith.constant 1.000000e+00 : f32
    %237 = vector.broadcast %cst_54 : f32 to vector<8x128xf32>
    %238 = arith.addf %237, %236 : vector<8x128xf32>
    %239 = arith.divf %237, %238 : vector<8x128xf32>
    %240 = vector.extract_strided_slice %227 {offsets = [0, 128], sizes = [8, 128], strides = [1, 1]} : vector<8x384xf32> to vector<8x128xf32>
    %241 = vector.extract_strided_slice %231 {offsets = [0, 128], sizes = [8, 128], strides = [1, 1]} : vector<8x384xf32> to vector<8x128xf32>
    %242 = arith.addf %240, %241 : vector<8x128xf32>
    %243 = arith.negf %242 : vector<8x128xf32>
    %244 = math.exp %243 : vector<8x128xf32>
    %cst_55 = arith.constant 1.000000e+00 : f32
    %245 = vector.broadcast %cst_55 : f32 to vector<8x128xf32>
    %246 = arith.addf %245, %244 : vector<8x128xf32>
    %247 = arith.divf %245, %246 : vector<8x128xf32>
    %248 = vector.extract_strided_slice %227 {offsets = [0, 256], sizes = [8, 128], strides = [1, 1]} : vector<8x384xf32> to vector<8x128xf32>
    %249 = vector.extract_strided_slice %231 {offsets = [0, 256], sizes = [8, 128], strides = [1, 1]} : vector<8x384xf32> to vector<8x128xf32>
    %250 = arith.mulf %239, %249 : vector<8x128xf32>
    %251 = arith.addf %248, %250 : vector<8x128xf32>
    %252 = math.tanh %251 : vector<8x128xf32>
    %cst_56 = arith.constant 1.000000e+00 : f32
    %253 = vector.broadcast %cst_56 : f32 to vector<8x128xf32>
    %254 = arith.subf %253, %247 : vector<8x128xf32>
    %255 = arith.mulf %254, %252 : vector<8x128xf32>
    %256 = arith.mulf %247, %220 : vector<8x128xf32>
    %257 = arith.addf %255, %256 : vector<8x128xf32>
    %258 = arith.index_cast %c6_i32 : i32 to index
    %c0_57 = arith.constant 0 : index
    %c0_58 = arith.constant 0 : index
    %259 = vector.load %arg3[%258, %c0_57, %c0_58] : memref<8x8x128xf32, #tpu.memory_space<vmem>>, vector<1x8x128xf32>
    %260 = vector.shape_cast %259 : vector<1x8x128xf32> to vector<8x128xf32>
    %261 = vector.shape_cast %257 : vector<8x128xf32> to vector<1x8x128xf32>
    tpu.vector_store %arg3[%258, %c0_57, %c0_58], %261 {strides = array<i32>} : memref<8x8x128xf32, #tpu.memory_space<vmem>>, vector<1x8x128xf32>,
    %c7_i32 = arith.constant 7 : i32
    %262 = arith.index_cast %c7_i32 : i32 to index
    %c0_59 = arith.constant 0 : index
    %c0_60 = arith.constant 0 : index
    %263 = vector.load %arg0[%262, %c0_59, %c0_60] : memref<8x8x384xf32, #tpu.memory_space<vmem>>, vector<1x8x384xf32>
    %264 = vector.shape_cast %263 : vector<1x8x384xf32> to vector<8x384xf32>
    %265 = arith.truncf %257 : vector<8x128xf32> to vector<8x128xbf16>
    %cst_61 = arith.constant dense<0.000000e+00> : vector<8x384xf32>
    %266 = tpu.matmul %265, %0, %cst_61 {dimension_numbers = #tpu.dot_dimension_numbers<[1], [0], [0], [1], [0, 0, 1, 1], [], []>} : vector<8x128xbf16>, vector<128x384xbf16>, vector<8x384xf32> -> vector<8x384xf32>
    %267 = vector.broadcast %1 : vector<1x384xf32> to vector<8x384xf32>
    %268 = arith.addf %266, %267 : vector<8x384xf32>
    %269 = vector.extract_strided_slice %264 {offsets = [0, 0], sizes = [8, 128], strides = [1, 1]} : vector<8x384xf32> to vector<8x128xf32>
    %270 = vector.extract_strided_slice %268 {offsets = [0, 0], sizes = [8, 128], strides = [1, 1]} : vector<8x384xf32> to vector<8x128xf32>
    %271 = arith.addf %269, %270 : vector<8x128xf32>
    %272 = arith.negf %271 : vector<8x128xf32>
    %273 = math.exp %272 : vector<8x128xf32>
    %cst_62 = arith.constant 1.000000e+00 : f32
    %274 = vector.broadcast %cst_62 : f32 to vector<8x128xf32>
    %275 = arith.addf %274, %273 : vector<8x128xf32>
    %276 = arith.divf %274, %275 : vector<8x128xf32>
    %277 = vector.extract_strided_slice %264 {offsets = [0, 128], sizes = [8, 128], strides = [1, 1]} : vector<8x384xf32> to vector<8x128xf32>
    %278 = vector.extract_strided_slice %268 {offsets = [0, 128], sizes = [8, 128], strides = [1, 1]} : vector<8x384xf32> to vector<8x128xf32>
    %279 = arith.addf %277, %278 : vector<8x128xf32>
    %280 = arith.negf %279 : vector<8x128xf32>
    %281 = math.exp %280 : vector<8x128xf32>
    %cst_63 = arith.constant 1.000000e+00 : f32
    %282 = vector.broadcast %cst_63 : f32 to vector<8x128xf32>
    %283 = arith.addf %282, %281 : vector<8x128xf32>
    %284 = arith.divf %282, %283 : vector<8x128xf32>
    %285 = vector.extract_strided_slice %264 {offsets = [0, 256], sizes = [8, 128], strides = [1, 1]} : vector<8x384xf32> to vector<8x128xf32>
    %286 = vector.extract_strided_slice %268 {offsets = [0, 256], sizes = [8, 128], strides = [1, 1]} : vector<8x384xf32> to vector<8x128xf32>
    %287 = arith.mulf %276, %286 : vector<8x128xf32>
    %288 = arith.addf %285, %287 : vector<8x128xf32>
    %289 = math.tanh %288 : vector<8x128xf32>
    %cst_64 = arith.constant 1.000000e+00 : f32
    %290 = vector.broadcast %cst_64 : f32 to vector<8x128xf32>
    %291 = arith.subf %290, %284 : vector<8x128xf32>
    %292 = arith.mulf %291, %289 : vector<8x128xf32>
    %293 = arith.mulf %284, %257 : vector<8x128xf32>
    %294 = arith.addf %292, %293 : vector<8x128xf32>
    %295 = arith.index_cast %c7_i32 : i32 to index
    %c0_65 = arith.constant 0 : index
    %c0_66 = arith.constant 0 : index
    %296 = vector.load %arg3[%295, %c0_65, %c0_66] : memref<8x8x128xf32, #tpu.memory_space<vmem>>, vector<1x8x128xf32>
    %297 = vector.shape_cast %296 : vector<1x8x128xf32> to vector<8x128xf32>
    %298 = vector.shape_cast %294 : vector<8x128xf32> to vector<1x8x128xf32>
    tpu.vector_store %arg3[%295, %c0_65, %c0_66], %298 {strides = array<i32>} : memref<8x8x128xf32, #tpu.memory_space<vmem>>, vector<1x8x128xf32>,
    %c8_i32 = arith.constant 8 : i32
    return
  }
}

module attributes {stable_mosaic.version = 11 : i64} {
  func.func @_proj_bias_kernel(%arg0: memref<56x128xbf16, #tpu.memory_space<vmem>>, %arg1: memref<128x384xbf16, #tpu.memory_space<vmem>>, %arg2: memref<1x384xf32, #tpu.memory_space<vmem>>, %arg3: memref<56x384xf32, #tpu.memory_space<vmem>>) attributes {dimension_semantics = [], scalar_prefetch = 0 : i64, scratch_operands = 0 : i64, tpu.core_type = #tpu.core_type<tc>} {
    %c0 = arith.constant 0 : index
    %c0_0 = arith.constant 0 : index
    %0 = vector.load %arg0[%c0, %c0_0] : memref<56x128xbf16, #tpu.memory_space<vmem>>, vector<56x128xbf16>
    %c0_1 = arith.constant 0 : index
    %c0_2 = arith.constant 0 : index
    %1 = vector.load %arg1[%c0_1, %c0_2] : memref<128x384xbf16, #tpu.memory_space<vmem>>, vector<128x384xbf16>
    %cst = arith.constant dense<0.000000e+00> : vector<56x384xf32>
    %2 = tpu.matmul %0, %1, %cst {dimension_numbers = #tpu.dot_dimension_numbers<[1], [0], [0], [1], [0, 0, 1, 1], [], []>} : vector<56x128xbf16>, vector<128x384xbf16>, vector<56x384xf32> -> vector<56x384xf32>
    %c0_3 = arith.constant 0 : index
    %c0_4 = arith.constant 0 : index
    %3 = vector.load %arg2[%c0_3, %c0_4] : memref<1x384xf32, #tpu.memory_space<vmem>>, vector<1x384xf32>
    %4 = vector.broadcast %3 : vector<1x384xf32> to vector<56x384xf32>
    %5 = arith.addf %2, %4 : vector<56x384xf32>
    %c0_5 = arith.constant 0 : index
    %c0_6 = arith.constant 0 : index
    %6 = vector.load %arg3[%c0_5, %c0_6] : memref<56x384xf32, #tpu.memory_space<vmem>>, vector<56x384xf32>
    tpu.vector_store %arg3[%c0_5, %c0_6], %5 {strides = array<i32>} : memref<56x384xf32, #tpu.memory_space<vmem>>, vector<56x384xf32>,
    return
  }
}

module attributes {stable_mosaic.version = 11 : i64} {
  func.func @_attn_decoder_kernel(%arg0: memref<7x8x384xf32, #tpu.memory_space<vmem>>, %arg1: memref<8x8x128xf32, #tpu.memory_space<vmem>>, %arg2: memref<8x8xf32, #tpu.memory_space<vmem>>, %arg3: memref<8x128xf32, #tpu.memory_space<vmem>>, %arg4: memref<128x384xbf16, #tpu.memory_space<vmem>>, %arg5: memref<128x384xbf16, #tpu.memory_space<vmem>>, %arg6: memref<1x384xf32, #tpu.memory_space<vmem>>, %arg7: memref<56x1xi32, #tpu.memory_space<vmem>>, %arg8: memref<128x256xbf16, #tpu.memory_space<vmem>>, %arg9: memref<1x256xf32, #tpu.memory_space<vmem>>, %arg10: memref<1x1xf32, #tpu.memory_space<vmem>>, %arg11: memref<56x128xf32, #tpu.memory_space<vmem>>) attributes {dimension_semantics = [], scalar_prefetch = 0 : i64, scratch_operands = 1 : i64, tpu.core_type = #tpu.core_type<tc>} {
    %c0 = arith.constant 0 : index
    %c0_0 = arith.constant 0 : index
    %c0_1 = arith.constant 0 : index
    %0 = vector.load %arg1[%c0, %c0_0, %c0_1] : memref<8x8x128xf32, #tpu.memory_space<vmem>>, vector<8x8x128xf32>
    %c0_2 = arith.constant 0 : index
    %c0_3 = arith.constant 0 : index
    %1 = vector.load %arg2[%c0_2, %c0_3] : memref<8x8xf32, #tpu.memory_space<vmem>>, vector<8x8xf32>
    %c0_4 = arith.constant 0 : index
    %c0_5 = arith.constant 0 : index
    %2 = vector.load %arg4[%c0_4, %c0_5] : memref<128x384xbf16, #tpu.memory_space<vmem>>, vector<128x384xbf16>
    %c0_6 = arith.constant 0 : index
    %c0_7 = arith.constant 0 : index
    %3 = vector.load %arg5[%c0_6, %c0_7] : memref<128x384xbf16, #tpu.memory_space<vmem>>, vector<128x384xbf16>
    %c0_8 = arith.constant 0 : index
    %c0_9 = arith.constant 0 : index
    %4 = vector.load %arg6[%c0_8, %c0_9] : memref<1x384xf32, #tpu.memory_space<vmem>>, vector<1x384xf32>
    %c0_10 = arith.constant 0 : index
    %c0_11 = arith.constant 0 : index
    %5 = vector.load %arg3[%c0_10, %c0_11] : memref<8x128xf32, #tpu.memory_space<vmem>>, vector<8x128xf32>
    %c0_i32 = arith.constant 0 : i32
    %6 = vector.shape_cast %5 : vector<8x128xf32> to vector<8x1x128xf32>
    %7 = vector.broadcast %6 : vector<8x1x128xf32> to vector<8x8x128xf32>
    %8 = arith.mulf %0, %7 : vector<8x8x128xf32>
    %cst = arith.constant dense<0.000000e+00> : vector<8x8xf32>
    %9 = vector.multi_reduction <add>, %8, %cst [2] : vector<8x8x128xf32> to vector<8x8xf32>
    %10 = arith.addf %9, %1 : vector<8x8xf32>
    %cst_12 = arith.constant dense<0xFF800000> : vector<8xf32>
    %11 = vector.multi_reduction <maximumf>, %10, %cst_12 [1] : vector<8x8xf32> to vector<8xf32>
    %cst_13 = arith.constant 0xFF800000 : f32
    %12 = vector.broadcast %cst_13 : f32 to vector<8xf32>
    %13 = arith.maximumf %12, %11 : vector<8xf32>
    %14 = vector.shape_cast %13 : vector<8xf32> to vector<8x1xf32>
    %15 = vector.broadcast %14 : vector<8x1xf32> to vector<8x8xf32>
    %16 = arith.subf %10, %15 : vector<8x8xf32>
    %17 = math.exp %16 : vector<8x8xf32>
    %cst_14 = arith.constant dense<0.000000e+00> : vector<8xf32>
    %18 = vector.multi_reduction <add>, %17, %cst_14 [1] : vector<8x8xf32> to vector<8xf32>
    %19 = vector.shape_cast %18 : vector<8xf32> to vector<8x1xf32>
    %20 = vector.broadcast %19 : vector<8x1xf32> to vector<8x8xf32>
    %21 = arith.divf %17, %20 : vector<8x8xf32>
    %22 = vector.shape_cast %21 : vector<8x8xf32> to vector<8x8x1xf32>
    %23 = vector.broadcast %22 : vector<8x8x1xf32> to vector<8x8x128xf32>
    %24 = arith.mulf %23, %0 : vector<8x8x128xf32>
    %cst_15 = arith.constant dense<0.000000e+00> : vector<8x128xf32>
    %25 = vector.multi_reduction <add>, %24, %cst_15 [1] : vector<8x8x128xf32> to vector<8x128xf32>
    %26 = arith.index_cast %c0_i32 : i32 to index
    %c0_16 = arith.constant 0 : index
    %c0_17 = arith.constant 0 : index
    %27 = vector.load %arg0[%26, %c0_16, %c0_17] : memref<7x8x384xf32, #tpu.memory_space<vmem>>, vector<1x8x384xf32>
    %28 = vector.shape_cast %27 : vector<1x8x384xf32> to vector<8x384xf32>
    %29 = arith.truncf %25 : vector<8x128xf32> to vector<8x128xbf16>
    %cst_18 = arith.constant dense<0.000000e+00> : vector<8x384xf32>
    %30 = tpu.matmul %29, %2, %cst_18 {dimension_numbers = #tpu.dot_dimension_numbers<[1], [0], [0], [1], [0, 0, 1, 1], [], []>} : vector<8x128xbf16>, vector<128x384xbf16>, vector<8x384xf32> -> vector<8x384xf32>
    %31 = arith.addf %28, %30 : vector<8x384xf32>
    %32 = arith.truncf %5 : vector<8x128xf32> to vector<8x128xbf16>
    %cst_19 = arith.constant dense<0.000000e+00> : vector<8x384xf32>
    %33 = tpu.matmul %32, %3, %cst_19 {dimension_numbers = #tpu.dot_dimension_numbers<[1], [0], [0], [1], [0, 0, 1, 1], [], []>} : vector<8x128xbf16>, vector<128x384xbf16>, vector<8x384xf32> -> vector<8x384xf32>
    %34 = vector.broadcast %4 : vector<1x384xf32> to vector<8x384xf32>
    %35 = arith.addf %33, %34 : vector<8x384xf32>
    %36 = vector.extract_strided_slice %31 {offsets = [0, 0], sizes = [8, 128], strides = [1, 1]} : vector<8x384xf32> to vector<8x128xf32>
    %37 = vector.extract_strided_slice %35 {offsets = [0, 0], sizes = [8, 128], strides = [1, 1]} : vector<8x384xf32> to vector<8x128xf32>
    %38 = arith.addf %36, %37 : vector<8x128xf32>
    %39 = arith.negf %38 : vector<8x128xf32>
    %40 = math.exp %39 : vector<8x128xf32>
    %cst_20 = arith.constant 1.000000e+00 : f32
    %41 = vector.broadcast %cst_20 : f32 to vector<8x128xf32>
    %42 = arith.addf %41, %40 : vector<8x128xf32>
    %43 = arith.divf %41, %42 : vector<8x128xf32>
    %44 = vector.extract_strided_slice %31 {offsets = [0, 128], sizes = [8, 128], strides = [1, 1]} : vector<8x384xf32> to vector<8x128xf32>
    %45 = vector.extract_strided_slice %35 {offsets = [0, 128], sizes = [8, 128], strides = [1, 1]} : vector<8x384xf32> to vector<8x128xf32>
    %46 = arith.addf %44, %45 : vector<8x128xf32>
    %47 = arith.negf %46 : vector<8x128xf32>
    %48 = math.exp %47 : vector<8x128xf32>
    %cst_21 = arith.constant 1.000000e+00 : f32
    %49 = vector.broadcast %cst_21 : f32 to vector<8x128xf32>
    %50 = arith.addf %49, %48 : vector<8x128xf32>
    %51 = arith.divf %49, %50 : vector<8x128xf32>
    %52 = vector.extract_strided_slice %31 {offsets = [0, 256], sizes = [8, 128], strides = [1, 1]} : vector<8x384xf32> to vector<8x128xf32>
    %53 = vector.extract_strided_slice %35 {offsets = [0, 256], sizes = [8, 128], strides = [1, 1]} : vector<8x384xf32> to vector<8x128xf32>
    %54 = arith.mulf %43, %53 : vector<8x128xf32>
    %55 = arith.addf %52, %54 : vector<8x128xf32>
    %56 = math.tanh %55 : vector<8x128xf32>
    %cst_22 = arith.constant 1.000000e+00 : f32
    %57 = vector.broadcast %cst_22 : f32 to vector<8x128xf32>
    %58 = arith.subf %57, %51 : vector<8x128xf32>
    %59 = arith.mulf %58, %56 : vector<8x128xf32>
    %60 = arith.mulf %51, %5 : vector<8x128xf32>
    %61 = arith.addf %59, %60 : vector<8x128xf32>
    %c8_i32 = arith.constant 8 : i32
    %62 = arith.muli %c0_i32, %c8_i32 : i32
    %63 = arith.index_cast %62 : i32 to index
    %c0_23 = arith.constant 0 : index
    %64 = vector.load %arg11[%63, %c0_23] : memref<56x128xf32, #tpu.memory_space<vmem>>, vector<8x128xf32>
    tpu.vector_store %arg11[%63, %c0_23], %61 {strides = array<i32>} : memref<56x128xf32, #tpu.memory_space<vmem>>, vector<8x128xf32>,
    %c1_i32 = arith.constant 1 : i32
    %65 = vector.shape_cast %61 : vector<8x128xf32> to vector<8x1x128xf32>
    %66 = vector.broadcast %65 : vector<8x1x128xf32> to vector<8x8x128xf32>
    %67 = arith.mulf %0, %66 : vector<8x8x128xf32>
    %cst_24 = arith.constant dense<0.000000e+00> : vector<8x8xf32>
    %68 = vector.multi_reduction <add>, %67, %cst_24 [2] : vector<8x8x128xf32> to vector<8x8xf32>
    %69 = arith.addf %68, %1 : vector<8x8xf32>
    %cst_25 = arith.constant dense<0xFF800000> : vector<8xf32>
    %70 = vector.multi_reduction <maximumf>, %69, %cst_25 [1] : vector<8x8xf32> to vector<8xf32>
    %cst_26 = arith.constant 0xFF800000 : f32
    %71 = vector.broadcast %cst_26 : f32 to vector<8xf32>
    %72 = arith.maximumf %71, %70 : vector<8xf32>
    %73 = vector.shape_cast %72 : vector<8xf32> to vector<8x1xf32>
    %74 = vector.broadcast %73 : vector<8x1xf32> to vector<8x8xf32>
    %75 = arith.subf %69, %74 : vector<8x8xf32>
    %76 = math.exp %75 : vector<8x8xf32>
    %cst_27 = arith.constant dense<0.000000e+00> : vector<8xf32>
    %77 = vector.multi_reduction <add>, %76, %cst_27 [1] : vector<8x8xf32> to vector<8xf32>
    %78 = vector.shape_cast %77 : vector<8xf32> to vector<8x1xf32>
    %79 = vector.broadcast %78 : vector<8x1xf32> to vector<8x8xf32>
    %80 = arith.divf %76, %79 : vector<8x8xf32>
    %81 = vector.shape_cast %80 : vector<8x8xf32> to vector<8x8x1xf32>
    %82 = vector.broadcast %81 : vector<8x8x1xf32> to vector<8x8x128xf32>
    %83 = arith.mulf %82, %0 : vector<8x8x128xf32>
    %cst_28 = arith.constant dense<0.000000e+00> : vector<8x128xf32>
    %84 = vector.multi_reduction <add>, %83, %cst_28 [1] : vector<8x8x128xf32> to vector<8x128xf32>
    %85 = arith.index_cast %c1_i32 : i32 to index
    %c0_29 = arith.constant 0 : index
    %c0_30 = arith.constant 0 : index
    %86 = vector.load %arg0[%85, %c0_29, %c0_30] : memref<7x8x384xf32, #tpu.memory_space<vmem>>, vector<1x8x384xf32>
    %87 = vector.shape_cast %86 : vector<1x8x384xf32> to vector<8x384xf32>
    %88 = arith.truncf %84 : vector<8x128xf32> to vector<8x128xbf16>
    %cst_31 = arith.constant dense<0.000000e+00> : vector<8x384xf32>
    %89 = tpu.matmul %88, %2, %cst_31 {dimension_numbers = #tpu.dot_dimension_numbers<[1], [0], [0], [1], [0, 0, 1, 1], [], []>} : vector<8x128xbf16>, vector<128x384xbf16>, vector<8x384xf32> -> vector<8x384xf32>
    %90 = arith.addf %87, %89 : vector<8x384xf32>
    %91 = arith.truncf %61 : vector<8x128xf32> to vector<8x128xbf16>
    %cst_32 = arith.constant dense<0.000000e+00> : vector<8x384xf32>
    %92 = tpu.matmul %91, %3, %cst_32 {dimension_numbers = #tpu.dot_dimension_numbers<[1], [0], [0], [1], [0, 0, 1, 1], [], []>} : vector<8x128xbf16>, vector<128x384xbf16>, vector<8x384xf32> -> vector<8x384xf32>
    %93 = vector.broadcast %4 : vector<1x384xf32> to vector<8x384xf32>
    %94 = arith.addf %92, %93 : vector<8x384xf32>
    %95 = vector.extract_strided_slice %90 {offsets = [0, 0], sizes = [8, 128], strides = [1, 1]} : vector<8x384xf32> to vector<8x128xf32>
    %96 = vector.extract_strided_slice %94 {offsets = [0, 0], sizes = [8, 128], strides = [1, 1]} : vector<8x384xf32> to vector<8x128xf32>
    %97 = arith.addf %95, %96 : vector<8x128xf32>
    %98 = arith.negf %97 : vector<8x128xf32>
    %99 = math.exp %98 : vector<8x128xf32>
    %cst_33 = arith.constant 1.000000e+00 : f32
    %100 = vector.broadcast %cst_33 : f32 to vector<8x128xf32>
    %101 = arith.addf %100, %99 : vector<8x128xf32>
    %102 = arith.divf %100, %101 : vector<8x128xf32>
    %103 = vector.extract_strided_slice %90 {offsets = [0, 128], sizes = [8, 128], strides = [1, 1]} : vector<8x384xf32> to vector<8x128xf32>
    %104 = vector.extract_strided_slice %94 {offsets = [0, 128], sizes = [8, 128], strides = [1, 1]} : vector<8x384xf32> to vector<8x128xf32>
    %105 = arith.addf %103, %104 : vector<8x128xf32>
    %106 = arith.negf %105 : vector<8x128xf32>
    %107 = math.exp %106 : vector<8x128xf32>
    %cst_34 = arith.constant 1.000000e+00 : f32
    %108 = vector.broadcast %cst_34 : f32 to vector<8x128xf32>
    %109 = arith.addf %108, %107 : vector<8x128xf32>
    %110 = arith.divf %108, %109 : vector<8x128xf32>
    %111 = vector.extract_strided_slice %90 {offsets = [0, 256], sizes = [8, 128], strides = [1, 1]} : vector<8x384xf32> to vector<8x128xf32>
    %112 = vector.extract_strided_slice %94 {offsets = [0, 256], sizes = [8, 128], strides = [1, 1]} : vector<8x384xf32> to vector<8x128xf32>
    %113 = arith.mulf %102, %112 : vector<8x128xf32>
    %114 = arith.addf %111, %113 : vector<8x128xf32>
    %115 = math.tanh %114 : vector<8x128xf32>
    %cst_35 = arith.constant 1.000000e+00 : f32
    %116 = vector.broadcast %cst_35 : f32 to vector<8x128xf32>
    %117 = arith.subf %116, %110 : vector<8x128xf32>
    %118 = arith.mulf %117, %115 : vector<8x128xf32>
    %119 = arith.mulf %110, %61 : vector<8x128xf32>
    %120 = arith.addf %118, %119 : vector<8x128xf32>
    %c8_i32_36 = arith.constant 8 : i32
    %121 = arith.muli %c1_i32, %c8_i32_36 : i32
    %122 = arith.index_cast %121 : i32 to index
    %c0_37 = arith.constant 0 : index
    %123 = vector.load %arg11[%122, %c0_37] : memref<56x128xf32, #tpu.memory_space<vmem>>, vector<8x128xf32>
    tpu.vector_store %arg11[%122, %c0_37], %120 {strides = array<i32>} : memref<56x128xf32, #tpu.memory_space<vmem>>, vector<8x128xf32>,
    %c2_i32 = arith.constant 2 : i32
    %124 = vector.shape_cast %120 : vector<8x128xf32> to vector<8x1x128xf32>
    %125 = vector.broadcast %124 : vector<8x1x128xf32> to vector<8x8x128xf32>
    %126 = arith.mulf %0, %125 : vector<8x8x128xf32>
    %cst_38 = arith.constant dense<0.000000e+00> : vector<8x8xf32>
    %127 = vector.multi_reduction <add>, %126, %cst_38 [2] : vector<8x8x128xf32> to vector<8x8xf32>
    %128 = arith.addf %127, %1 : vector<8x8xf32>
    %cst_39 = arith.constant dense<0xFF800000> : vector<8xf32>
    %129 = vector.multi_reduction <maximumf>, %128, %cst_39 [1] : vector<8x8xf32> to vector<8xf32>
    %cst_40 = arith.constant 0xFF800000 : f32
    %130 = vector.broadcast %cst_40 : f32 to vector<8xf32>
    %131 = arith.maximumf %130, %129 : vector<8xf32>
    %132 = vector.shape_cast %131 : vector<8xf32> to vector<8x1xf32>
    %133 = vector.broadcast %132 : vector<8x1xf32> to vector<8x8xf32>
    %134 = arith.subf %128, %133 : vector<8x8xf32>
    %135 = math.exp %134 : vector<8x8xf32>
    %cst_41 = arith.constant dense<0.000000e+00> : vector<8xf32>
    %136 = vector.multi_reduction <add>, %135, %cst_41 [1] : vector<8x8xf32> to vector<8xf32>
    %137 = vector.shape_cast %136 : vector<8xf32> to vector<8x1xf32>
    %138 = vector.broadcast %137 : vector<8x1xf32> to vector<8x8xf32>
    %139 = arith.divf %135, %138 : vector<8x8xf32>
    %140 = vector.shape_cast %139 : vector<8x8xf32> to vector<8x8x1xf32>
    %141 = vector.broadcast %140 : vector<8x8x1xf32> to vector<8x8x128xf32>
    %142 = arith.mulf %141, %0 : vector<8x8x128xf32>
    %cst_42 = arith.constant dense<0.000000e+00> : vector<8x128xf32>
    %143 = vector.multi_reduction <add>, %142, %cst_42 [1] : vector<8x8x128xf32> to vector<8x128xf32>
    %144 = arith.index_cast %c2_i32 : i32 to index
    %c0_43 = arith.constant 0 : index
    %c0_44 = arith.constant 0 : index
    %145 = vector.load %arg0[%144, %c0_43, %c0_44] : memref<7x8x384xf32, #tpu.memory_space<vmem>>, vector<1x8x384xf32>
    %146 = vector.shape_cast %145 : vector<1x8x384xf32> to vector<8x384xf32>
    %147 = arith.truncf %143 : vector<8x128xf32> to vector<8x128xbf16>
    %cst_45 = arith.constant dense<0.000000e+00> : vector<8x384xf32>
    %148 = tpu.matmul %147, %2, %cst_45 {dimension_numbers = #tpu.dot_dimension_numbers<[1], [0], [0], [1], [0, 0, 1, 1], [], []>} : vector<8x128xbf16>, vector<128x384xbf16>, vector<8x384xf32> -> vector<8x384xf32>
    %149 = arith.addf %146, %148 : vector<8x384xf32>
    %150 = arith.truncf %120 : vector<8x128xf32> to vector<8x128xbf16>
    %cst_46 = arith.constant dense<0.000000e+00> : vector<8x384xf32>
    %151 = tpu.matmul %150, %3, %cst_46 {dimension_numbers = #tpu.dot_dimension_numbers<[1], [0], [0], [1], [0, 0, 1, 1], [], []>} : vector<8x128xbf16>, vector<128x384xbf16>, vector<8x384xf32> -> vector<8x384xf32>
    %152 = vector.broadcast %4 : vector<1x384xf32> to vector<8x384xf32>
    %153 = arith.addf %151, %152 : vector<8x384xf32>
    %154 = vector.extract_strided_slice %149 {offsets = [0, 0], sizes = [8, 128], strides = [1, 1]} : vector<8x384xf32> to vector<8x128xf32>
    %155 = vector.extract_strided_slice %153 {offsets = [0, 0], sizes = [8, 128], strides = [1, 1]} : vector<8x384xf32> to vector<8x128xf32>
    %156 = arith.addf %154, %155 : vector<8x128xf32>
    %157 = arith.negf %156 : vector<8x128xf32>
    %158 = math.exp %157 : vector<8x128xf32>
    %cst_47 = arith.constant 1.000000e+00 : f32
    %159 = vector.broadcast %cst_47 : f32 to vector<8x128xf32>
    %160 = arith.addf %159, %158 : vector<8x128xf32>
    %161 = arith.divf %159, %160 : vector<8x128xf32>
    %162 = vector.extract_strided_slice %149 {offsets = [0, 128], sizes = [8, 128], strides = [1, 1]} : vector<8x384xf32> to vector<8x128xf32>
    %163 = vector.extract_strided_slice %153 {offsets = [0, 128], sizes = [8, 128], strides = [1, 1]} : vector<8x384xf32> to vector<8x128xf32>
    %164 = arith.addf %162, %163 : vector<8x128xf32>
    %165 = arith.negf %164 : vector<8x128xf32>
    %166 = math.exp %165 : vector<8x128xf32>
    %cst_48 = arith.constant 1.000000e+00 : f32
    %167 = vector.broadcast %cst_48 : f32 to vector<8x128xf32>
    %168 = arith.addf %167, %166 : vector<8x128xf32>
    %169 = arith.divf %167, %168 : vector<8x128xf32>
    %170 = vector.extract_strided_slice %149 {offsets = [0, 256], sizes = [8, 128], strides = [1, 1]} : vector<8x384xf32> to vector<8x128xf32>
    %171 = vector.extract_strided_slice %153 {offsets = [0, 256], sizes = [8, 128], strides = [1, 1]} : vector<8x384xf32> to vector<8x128xf32>
    %172 = arith.mulf %161, %171 : vector<8x128xf32>
    %173 = arith.addf %170, %172 : vector<8x128xf32>
    %174 = math.tanh %173 : vector<8x128xf32>
    %cst_49 = arith.constant 1.000000e+00 : f32
    %175 = vector.broadcast %cst_49 : f32 to vector<8x128xf32>
    %176 = arith.subf %175, %169 : vector<8x128xf32>
    %177 = arith.mulf %176, %174 : vector<8x128xf32>
    %178 = arith.mulf %169, %120 : vector<8x128xf32>
    %179 = arith.addf %177, %178 : vector<8x128xf32>
    %c8_i32_50 = arith.constant 8 : i32
    %180 = arith.muli %c2_i32, %c8_i32_50 : i32
    %181 = arith.index_cast %180 : i32 to index
    %c0_51 = arith.constant 0 : index
    %182 = vector.load %arg11[%181, %c0_51] : memref<56x128xf32, #tpu.memory_space<vmem>>, vector<8x128xf32>
    tpu.vector_store %arg11[%181, %c0_51], %179 {strides = array<i32>} : memref<56x128xf32, #tpu.memory_space<vmem>>, vector<8x128xf32>,
    %c3_i32 = arith.constant 3 : i32
    %183 = vector.shape_cast %179 : vector<8x128xf32> to vector<8x1x128xf32>
    %184 = vector.broadcast %183 : vector<8x1x128xf32> to vector<8x8x128xf32>
    %185 = arith.mulf %0, %184 : vector<8x8x128xf32>
    %cst_52 = arith.constant dense<0.000000e+00> : vector<8x8xf32>
    %186 = vector.multi_reduction <add>, %185, %cst_52 [2] : vector<8x8x128xf32> to vector<8x8xf32>
    %187 = arith.addf %186, %1 : vector<8x8xf32>
    %cst_53 = arith.constant dense<0xFF800000> : vector<8xf32>
    %188 = vector.multi_reduction <maximumf>, %187, %cst_53 [1] : vector<8x8xf32> to vector<8xf32>
    %cst_54 = arith.constant 0xFF800000 : f32
    %189 = vector.broadcast %cst_54 : f32 to vector<8xf32>
    %190 = arith.maximumf %189, %188 : vector<8xf32>
    %191 = vector.shape_cast %190 : vector<8xf32> to vector<8x1xf32>
    %192 = vector.broadcast %191 : vector<8x1xf32> to vector<8x8xf32>
    %193 = arith.subf %187, %192 : vector<8x8xf32>
    %194 = math.exp %193 : vector<8x8xf32>
    %cst_55 = arith.constant dense<0.000000e+00> : vector<8xf32>
    %195 = vector.multi_reduction <add>, %194, %cst_55 [1] : vector<8x8xf32> to vector<8xf32>
    %196 = vector.shape_cast %195 : vector<8xf32> to vector<8x1xf32>
    %197 = vector.broadcast %196 : vector<8x1xf32> to vector<8x8xf32>
    %198 = arith.divf %194, %197 : vector<8x8xf32>
    %199 = vector.shape_cast %198 : vector<8x8xf32> to vector<8x8x1xf32>
    %200 = vector.broadcast %199 : vector<8x8x1xf32> to vector<8x8x128xf32>
    %201 = arith.mulf %200, %0 : vector<8x8x128xf32>
    %cst_56 = arith.constant dense<0.000000e+00> : vector<8x128xf32>
    %202 = vector.multi_reduction <add>, %201, %cst_56 [1] : vector<8x8x128xf32> to vector<8x128xf32>
    %203 = arith.index_cast %c3_i32 : i32 to index
    %c0_57 = arith.constant 0 : index
    %c0_58 = arith.constant 0 : index
    %204 = vector.load %arg0[%203, %c0_57, %c0_58] : memref<7x8x384xf32, #tpu.memory_space<vmem>>, vector<1x8x384xf32>
    %205 = vector.shape_cast %204 : vector<1x8x384xf32> to vector<8x384xf32>
    %206 = arith.truncf %202 : vector<8x128xf32> to vector<8x128xbf16>
    %cst_59 = arith.constant dense<0.000000e+00> : vector<8x384xf32>
    %207 = tpu.matmul %206, %2, %cst_59 {dimension_numbers = #tpu.dot_dimension_numbers<[1], [0], [0], [1], [0, 0, 1, 1], [], []>} : vector<8x128xbf16>, vector<128x384xbf16>, vector<8x384xf32> -> vector<8x384xf32>
    %208 = arith.addf %205, %207 : vector<8x384xf32>
    %209 = arith.truncf %179 : vector<8x128xf32> to vector<8x128xbf16>
    %cst_60 = arith.constant dense<0.000000e+00> : vector<8x384xf32>
    %210 = tpu.matmul %209, %3, %cst_60 {dimension_numbers = #tpu.dot_dimension_numbers<[1], [0], [0], [1], [0, 0, 1, 1], [], []>} : vector<8x128xbf16>, vector<128x384xbf16>, vector<8x384xf32> -> vector<8x384xf32>
    %211 = vector.broadcast %4 : vector<1x384xf32> to vector<8x384xf32>
    %212 = arith.addf %210, %211 : vector<8x384xf32>
    %213 = vector.extract_strided_slice %208 {offsets = [0, 0], sizes = [8, 128], strides = [1, 1]} : vector<8x384xf32> to vector<8x128xf32>
    %214 = vector.extract_strided_slice %212 {offsets = [0, 0], sizes = [8, 128], strides = [1, 1]} : vector<8x384xf32> to vector<8x128xf32>
    %215 = arith.addf %213, %214 : vector<8x128xf32>
    %216 = arith.negf %215 : vector<8x128xf32>
    %217 = math.exp %216 : vector<8x128xf32>
    %cst_61 = arith.constant 1.000000e+00 : f32
    %218 = vector.broadcast %cst_61 : f32 to vector<8x128xf32>
    %219 = arith.addf %218, %217 : vector<8x128xf32>
    %220 = arith.divf %218, %219 : vector<8x128xf32>
    %221 = vector.extract_strided_slice %208 {offsets = [0, 128], sizes = [8, 128], strides = [1, 1]} : vector<8x384xf32> to vector<8x128xf32>
    %222 = vector.extract_strided_slice %212 {offsets = [0, 128], sizes = [8, 128], strides = [1, 1]} : vector<8x384xf32> to vector<8x128xf32>
    %223 = arith.addf %221, %222 : vector<8x128xf32>
    %224 = arith.negf %223 : vector<8x128xf32>
    %225 = math.exp %224 : vector<8x128xf32>
    %cst_62 = arith.constant 1.000000e+00 : f32
    %226 = vector.broadcast %cst_62 : f32 to vector<8x128xf32>
    %227 = arith.addf %226, %225 : vector<8x128xf32>
    %228 = arith.divf %226, %227 : vector<8x128xf32>
    %229 = vector.extract_strided_slice %208 {offsets = [0, 256], sizes = [8, 128], strides = [1, 1]} : vector<8x384xf32> to vector<8x128xf32>
    %230 = vector.extract_strided_slice %212 {offsets = [0, 256], sizes = [8, 128], strides = [1, 1]} : vector<8x384xf32> to vector<8x128xf32>
    %231 = arith.mulf %220, %230 : vector<8x128xf32>
    %232 = arith.addf %229, %231 : vector<8x128xf32>
    %233 = math.tanh %232 : vector<8x128xf32>
    %cst_63 = arith.constant 1.000000e+00 : f32
    %234 = vector.broadcast %cst_63 : f32 to vector<8x128xf32>
    %235 = arith.subf %234, %228 : vector<8x128xf32>
    %236 = arith.mulf %235, %233 : vector<8x128xf32>
    %237 = arith.mulf %228, %179 : vector<8x128xf32>
    %238 = arith.addf %236, %237 : vector<8x128xf32>
    %c8_i32_64 = arith.constant 8 : i32
    %239 = arith.muli %c3_i32, %c8_i32_64 : i32
    %240 = arith.index_cast %239 : i32 to index
    %c0_65 = arith.constant 0 : index
    %241 = vector.load %arg11[%240, %c0_65] : memref<56x128xf32, #tpu.memory_space<vmem>>, vector<8x128xf32>
    tpu.vector_store %arg11[%240, %c0_65], %238 {strides = array<i32>} : memref<56x128xf32, #tpu.memory_space<vmem>>, vector<8x128xf32>,
    %c4_i32 = arith.constant 4 : i32
    %242 = vector.shape_cast %238 : vector<8x128xf32> to vector<8x1x128xf32>
    %243 = vector.broadcast %242 : vector<8x1x128xf32> to vector<8x8x128xf32>
    %244 = arith.mulf %0, %243 : vector<8x8x128xf32>
    %cst_66 = arith.constant dense<0.000000e+00> : vector<8x8xf32>
    %245 = vector.multi_reduction <add>, %244, %cst_66 [2] : vector<8x8x128xf32> to vector<8x8xf32>
    %246 = arith.addf %245, %1 : vector<8x8xf32>
    %cst_67 = arith.constant dense<0xFF800000> : vector<8xf32>
    %247 = vector.multi_reduction <maximumf>, %246, %cst_67 [1] : vector<8x8xf32> to vector<8xf32>
    %cst_68 = arith.constant 0xFF800000 : f32
    %248 = vector.broadcast %cst_68 : f32 to vector<8xf32>
    %249 = arith.maximumf %248, %247 : vector<8xf32>
    %250 = vector.shape_cast %249 : vector<8xf32> to vector<8x1xf32>
    %251 = vector.broadcast %250 : vector<8x1xf32> to vector<8x8xf32>
    %252 = arith.subf %246, %251 : vector<8x8xf32>
    %253 = math.exp %252 : vector<8x8xf32>
    %cst_69 = arith.constant dense<0.000000e+00> : vector<8xf32>
    %254 = vector.multi_reduction <add>, %253, %cst_69 [1] : vector<8x8xf32> to vector<8xf32>
    %255 = vector.shape_cast %254 : vector<8xf32> to vector<8x1xf32>
    %256 = vector.broadcast %255 : vector<8x1xf32> to vector<8x8xf32>
    %257 = arith.divf %253, %256 : vector<8x8xf32>
    %258 = vector.shape_cast %257 : vector<8x8xf32> to vector<8x8x1xf32>
    %259 = vector.broadcast %258 : vector<8x8x1xf32> to vector<8x8x128xf32>
    %260 = arith.mulf %259, %0 : vector<8x8x128xf32>
    %cst_70 = arith.constant dense<0.000000e+00> : vector<8x128xf32>
    %261 = vector.multi_reduction <add>, %260, %cst_70 [1] : vector<8x8x128xf32> to vector<8x128xf32>
    %262 = arith.index_cast %c4_i32 : i32 to index
    %c0_71 = arith.constant 0 : index
    %c0_72 = arith.constant 0 : index
    %263 = vector.load %arg0[%262, %c0_71, %c0_72] : memref<7x8x384xf32, #tpu.memory_space<vmem>>, vector<1x8x384xf32>
    %264 = vector.shape_cast %263 : vector<1x8x384xf32> to vector<8x384xf32>
    %265 = arith.truncf %261 : vector<8x128xf32> to vector<8x128xbf16>
    %cst_73 = arith.constant dense<0.000000e+00> : vector<8x384xf32>
    %266 = tpu.matmul %265, %2, %cst_73 {dimension_numbers = #tpu.dot_dimension_numbers<[1], [0], [0], [1], [0, 0, 1, 1], [], []>} : vector<8x128xbf16>, vector<128x384xbf16>, vector<8x384xf32> -> vector<8x384xf32>
    %267 = arith.addf %264, %266 : vector<8x384xf32>
    %268 = arith.truncf %238 : vector<8x128xf32> to vector<8x128xbf16>
    %cst_74 = arith.constant dense<0.000000e+00> : vector<8x384xf32>
    %269 = tpu.matmul %268, %3, %cst_74 {dimension_numbers = #tpu.dot_dimension_numbers<[1], [0], [0], [1], [0, 0, 1, 1], [], []>} : vector<8x128xbf16>, vector<128x384xbf16>, vector<8x384xf32> -> vector<8x384xf32>
    %270 = vector.broadcast %4 : vector<1x384xf32> to vector<8x384xf32>
    %271 = arith.addf %269, %270 : vector<8x384xf32>
    %272 = vector.extract_strided_slice %267 {offsets = [0, 0], sizes = [8, 128], strides = [1, 1]} : vector<8x384xf32> to vector<8x128xf32>
    %273 = vector.extract_strided_slice %271 {offsets = [0, 0], sizes = [8, 128], strides = [1, 1]} : vector<8x384xf32> to vector<8x128xf32>
    %274 = arith.addf %272, %273 : vector<8x128xf32>
    %275 = arith.negf %274 : vector<8x128xf32>
    %276 = math.exp %275 : vector<8x128xf32>
    %cst_75 = arith.constant 1.000000e+00 : f32
    %277 = vector.broadcast %cst_75 : f32 to vector<8x128xf32>
    %278 = arith.addf %277, %276 : vector<8x128xf32>
    %279 = arith.divf %277, %278 : vector<8x128xf32>
    %280 = vector.extract_strided_slice %267 {offsets = [0, 128], sizes = [8, 128], strides = [1, 1]} : vector<8x384xf32> to vector<8x128xf32>
    %281 = vector.extract_strided_slice %271 {offsets = [0, 128], sizes = [8, 128], strides = [1, 1]} : vector<8x384xf32> to vector<8x128xf32>
    %282 = arith.addf %280, %281 : vector<8x128xf32>
    %283 = arith.negf %282 : vector<8x128xf32>
    %284 = math.exp %283 : vector<8x128xf32>
    %cst_76 = arith.constant 1.000000e+00 : f32
    %285 = vector.broadcast %cst_76 : f32 to vector<8x128xf32>
    %286 = arith.addf %285, %284 : vector<8x128xf32>
    %287 = arith.divf %285, %286 : vector<8x128xf32>
    %288 = vector.extract_strided_slice %267 {offsets = [0, 256], sizes = [8, 128], strides = [1, 1]} : vector<8x384xf32> to vector<8x128xf32>
    %289 = vector.extract_strided_slice %271 {offsets = [0, 256], sizes = [8, 128], strides = [1, 1]} : vector<8x384xf32> to vector<8x128xf32>
    %290 = arith.mulf %279, %289 : vector<8x128xf32>
    %291 = arith.addf %288, %290 : vector<8x128xf32>
    %292 = math.tanh %291 : vector<8x128xf32>
    %cst_77 = arith.constant 1.000000e+00 : f32
    %293 = vector.broadcast %cst_77 : f32 to vector<8x128xf32>
    %294 = arith.subf %293, %287 : vector<8x128xf32>
    %295 = arith.mulf %294, %292 : vector<8x128xf32>
    %296 = arith.mulf %287, %238 : vector<8x128xf32>
    %297 = arith.addf %295, %296 : vector<8x128xf32>
    %c8_i32_78 = arith.constant 8 : i32
    %298 = arith.muli %c4_i32, %c8_i32_78 : i32
    %299 = arith.index_cast %298 : i32 to index
    %c0_79 = arith.constant 0 : index
    %300 = vector.load %arg11[%299, %c0_79] : memref<56x128xf32, #tpu.memory_space<vmem>>, vector<8x128xf32>
    tpu.vector_store %arg11[%299, %c0_79], %297 {strides = array<i32>} : memref<56x128xf32, #tpu.memory_space<vmem>>, vector<8x128xf32>,
    %c5_i32 = arith.constant 5 : i32
    %301 = vector.shape_cast %297 : vector<8x128xf32> to vector<8x1x128xf32>
    %302 = vector.broadcast %301 : vector<8x1x128xf32> to vector<8x8x128xf32>
    %303 = arith.mulf %0, %302 : vector<8x8x128xf32>
    %cst_80 = arith.constant dense<0.000000e+00> : vector<8x8xf32>
    %304 = vector.multi_reduction <add>, %303, %cst_80 [2] : vector<8x8x128xf32> to vector<8x8xf32>
    %305 = arith.addf %304, %1 : vector<8x8xf32>
    %cst_81 = arith.constant dense<0xFF800000> : vector<8xf32>
    %306 = vector.multi_reduction <maximumf>, %305, %cst_81 [1] : vector<8x8xf32> to vector<8xf32>
    %cst_82 = arith.constant 0xFF800000 : f32
    %307 = vector.broadcast %cst_82 : f32 to vector<8xf32>
    %308 = arith.maximumf %307, %306 : vector<8xf32>
    %309 = vector.shape_cast %308 : vector<8xf32> to vector<8x1xf32>
    %310 = vector.broadcast %309 : vector<8x1xf32> to vector<8x8xf32>
    %311 = arith.subf %305, %310 : vector<8x8xf32>
    %312 = math.exp %311 : vector<8x8xf32>
    %cst_83 = arith.constant dense<0.000000e+00> : vector<8xf32>
    %313 = vector.multi_reduction <add>, %312, %cst_83 [1] : vector<8x8xf32> to vector<8xf32>
    %314 = vector.shape_cast %313 : vector<8xf32> to vector<8x1xf32>
    %315 = vector.broadcast %314 : vector<8x1xf32> to vector<8x8xf32>
    %316 = arith.divf %312, %315 : vector<8x8xf32>
    %317 = vector.shape_cast %316 : vector<8x8xf32> to vector<8x8x1xf32>
    %318 = vector.broadcast %317 : vector<8x8x1xf32> to vector<8x8x128xf32>
    %319 = arith.mulf %318, %0 : vector<8x8x128xf32>
    %cst_84 = arith.constant dense<0.000000e+00> : vector<8x128xf32>
    %320 = vector.multi_reduction <add>, %319, %cst_84 [1] : vector<8x8x128xf32> to vector<8x128xf32>
    %321 = arith.index_cast %c5_i32 : i32 to index
    %c0_85 = arith.constant 0 : index
    %c0_86 = arith.constant 0 : index
    %322 = vector.load %arg0[%321, %c0_85, %c0_86] : memref<7x8x384xf32, #tpu.memory_space<vmem>>, vector<1x8x384xf32>
    %323 = vector.shape_cast %322 : vector<1x8x384xf32> to vector<8x384xf32>
    %324 = arith.truncf %320 : vector<8x128xf32> to vector<8x128xbf16>
    %cst_87 = arith.constant dense<0.000000e+00> : vector<8x384xf32>
    %325 = tpu.matmul %324, %2, %cst_87 {dimension_numbers = #tpu.dot_dimension_numbers<[1], [0], [0], [1], [0, 0, 1, 1], [], []>} : vector<8x128xbf16>, vector<128x384xbf16>, vector<8x384xf32> -> vector<8x384xf32>
    %326 = arith.addf %323, %325 : vector<8x384xf32>
    %327 = arith.truncf %297 : vector<8x128xf32> to vector<8x128xbf16>
    %cst_88 = arith.constant dense<0.000000e+00> : vector<8x384xf32>
    %328 = tpu.matmul %327, %3, %cst_88 {dimension_numbers = #tpu.dot_dimension_numbers<[1], [0], [0], [1], [0, 0, 1, 1], [], []>} : vector<8x128xbf16>, vector<128x384xbf16>, vector<8x384xf32> -> vector<8x384xf32>
    %329 = vector.broadcast %4 : vector<1x384xf32> to vector<8x384xf32>
    %330 = arith.addf %328, %329 : vector<8x384xf32>
    %331 = vector.extract_strided_slice %326 {offsets = [0, 0], sizes = [8, 128], strides = [1, 1]} : vector<8x384xf32> to vector<8x128xf32>
    %332 = vector.extract_strided_slice %330 {offsets = [0, 0], sizes = [8, 128], strides = [1, 1]} : vector<8x384xf32> to vector<8x128xf32>
    %333 = arith.addf %331, %332 : vector<8x128xf32>
    %334 = arith.negf %333 : vector<8x128xf32>
    %335 = math.exp %334 : vector<8x128xf32>
    %cst_89 = arith.constant 1.000000e+00 : f32
    %336 = vector.broadcast %cst_89 : f32 to vector<8x128xf32>
    %337 = arith.addf %336, %335 : vector<8x128xf32>
    %338 = arith.divf %336, %337 : vector<8x128xf32>
    %339 = vector.extract_strided_slice %326 {offsets = [0, 128], sizes = [8, 128], strides = [1, 1]} : vector<8x384xf32> to vector<8x128xf32>
    %340 = vector.extract_strided_slice %330 {offsets = [0, 128], sizes = [8, 128], strides = [1, 1]} : vector<8x384xf32> to vector<8x128xf32>
    %341 = arith.addf %339, %340 : vector<8x128xf32>
    %342 = arith.negf %341 : vector<8x128xf32>
    %343 = math.exp %342 : vector<8x128xf32>
    %cst_90 = arith.constant 1.000000e+00 : f32
    %344 = vector.broadcast %cst_90 : f32 to vector<8x128xf32>
    %345 = arith.addf %344, %343 : vector<8x128xf32>
    %346 = arith.divf %344, %345 : vector<8x128xf32>
    %347 = vector.extract_strided_slice %326 {offsets = [0, 256], sizes = [8, 128], strides = [1, 1]} : vector<8x384xf32> to vector<8x128xf32>
    %348 = vector.extract_strided_slice %330 {offsets = [0, 256], sizes = [8, 128], strides = [1, 1]} : vector<8x384xf32> to vector<8x128xf32>
    %349 = arith.mulf %338, %348 : vector<8x128xf32>
    %350 = arith.addf %347, %349 : vector<8x128xf32>
    %351 = math.tanh %350 : vector<8x128xf32>
    %cst_91 = arith.constant 1.000000e+00 : f32
    %352 = vector.broadcast %cst_91 : f32 to vector<8x128xf32>
    %353 = arith.subf %352, %346 : vector<8x128xf32>
    %354 = arith.mulf %353, %351 : vector<8x128xf32>
    %355 = arith.mulf %346, %297 : vector<8x128xf32>
    %356 = arith.addf %354, %355 : vector<8x128xf32>
    %c8_i32_92 = arith.constant 8 : i32
    %357 = arith.muli %c5_i32, %c8_i32_92 : i32
    %358 = arith.index_cast %357 : i32 to index
    %c0_93 = arith.constant 0 : index
    %359 = vector.load %arg11[%358, %c0_93] : memref<56x128xf32, #tpu.memory_space<vmem>>, vector<8x128xf32>
    tpu.vector_store %arg11[%358, %c0_93], %356 {strides = array<i32>} : memref<56x128xf32, #tpu.memory_space<vmem>>, vector<8x128xf32>,
    %c6_i32 = arith.constant 6 : i32
    %360 = vector.shape_cast %356 : vector<8x128xf32> to vector<8x1x128xf32>
    %361 = vector.broadcast %360 : vector<8x1x128xf32> to vector<8x8x128xf32>
    %362 = arith.mulf %0, %361 : vector<8x8x128xf32>
    %cst_94 = arith.constant dense<0.000000e+00> : vector<8x8xf32>
    %363 = vector.multi_reduction <add>, %362, %cst_94 [2] : vector<8x8x128xf32> to vector<8x8xf32>
    %364 = arith.addf %363, %1 : vector<8x8xf32>
    %cst_95 = arith.constant dense<0xFF800000> : vector<8xf32>
    %365 = vector.multi_reduction <maximumf>, %364, %cst_95 [1] : vector<8x8xf32> to vector<8xf32>
    %cst_96 = arith.constant 0xFF800000 : f32
    %366 = vector.broadcast %cst_96 : f32 to vector<8xf32>
    %367 = arith.maximumf %366, %365 : vector<8xf32>
    %368 = vector.shape_cast %367 : vector<8xf32> to vector<8x1xf32>
    %369 = vector.broadcast %368 : vector<8x1xf32> to vector<8x8xf32>
    %370 = arith.subf %364, %369 : vector<8x8xf32>
    %371 = math.exp %370 : vector<8x8xf32>
    %cst_97 = arith.constant dense<0.000000e+00> : vector<8xf32>
    %372 = vector.multi_reduction <add>, %371, %cst_97 [1] : vector<8x8xf32> to vector<8xf32>
    %373 = vector.shape_cast %372 : vector<8xf32> to vector<8x1xf32>
    %374 = vector.broadcast %373 : vector<8x1xf32> to vector<8x8xf32>
    %375 = arith.divf %371, %374 : vector<8x8xf32>
    %376 = vector.shape_cast %375 : vector<8x8xf32> to vector<8x8x1xf32>
    %377 = vector.broadcast %376 : vector<8x8x1xf32> to vector<8x8x128xf32>
    %378 = arith.mulf %377, %0 : vector<8x8x128xf32>
    %cst_98 = arith.constant dense<0.000000e+00> : vector<8x128xf32>
    %379 = vector.multi_reduction <add>, %378, %cst_98 [1] : vector<8x8x128xf32> to vector<8x128xf32>
    %380 = arith.index_cast %c6_i32 : i32 to index
    %c0_99 = arith.constant 0 : index
    %c0_100 = arith.constant 0 : index
    %381 = vector.load %arg0[%380, %c0_99, %c0_100] : memref<7x8x384xf32, #tpu.memory_space<vmem>>, vector<1x8x384xf32>
    %382 = vector.shape_cast %381 : vector<1x8x384xf32> to vector<8x384xf32>
    %383 = arith.truncf %379 : vector<8x128xf32> to vector<8x128xbf16>
    %cst_101 = arith.constant dense<0.000000e+00> : vector<8x384xf32>
    %384 = tpu.matmul %383, %2, %cst_101 {dimension_numbers = #tpu.dot_dimension_numbers<[1], [0], [0], [1], [0, 0, 1, 1], [], []>} : vector<8x128xbf16>, vector<128x384xbf16>, vector<8x384xf32> -> vector<8x384xf32>
    %385 = arith.addf %382, %384 : vector<8x384xf32>
    %386 = arith.truncf %356 : vector<8x128xf32> to vector<8x128xbf16>
    %cst_102 = arith.constant dense<0.000000e+00> : vector<8x384xf32>
    %387 = tpu.matmul %386, %3, %cst_102 {dimension_numbers = #tpu.dot_dimension_numbers<[1], [0], [0], [1], [0, 0, 1, 1], [], []>} : vector<8x128xbf16>, vector<128x384xbf16>, vector<8x384xf32> -> vector<8x384xf32>
    %388 = vector.broadcast %4 : vector<1x384xf32> to vector<8x384xf32>
    %389 = arith.addf %387, %388 : vector<8x384xf32>
    %390 = vector.extract_strided_slice %385 {offsets = [0, 0], sizes = [8, 128], strides = [1, 1]} : vector<8x384xf32> to vector<8x128xf32>
    %391 = vector.extract_strided_slice %389 {offsets = [0, 0], sizes = [8, 128], strides = [1, 1]} : vector<8x384xf32> to vector<8x128xf32>
    %392 = arith.addf %390, %391 : vector<8x128xf32>
    %393 = arith.negf %392 : vector<8x128xf32>
    %394 = math.exp %393 : vector<8x128xf32>
    %cst_103 = arith.constant 1.000000e+00 : f32
    %395 = vector.broadcast %cst_103 : f32 to vector<8x128xf32>
    %396 = arith.addf %395, %394 : vector<8x128xf32>
    %397 = arith.divf %395, %396 : vector<8x128xf32>
    %398 = vector.extract_strided_slice %385 {offsets = [0, 128], sizes = [8, 128], strides = [1, 1]} : vector<8x384xf32> to vector<8x128xf32>
    %399 = vector.extract_strided_slice %389 {offsets = [0, 128], sizes = [8, 128], strides = [1, 1]} : vector<8x384xf32> to vector<8x128xf32>
    %400 = arith.addf %398, %399 : vector<8x128xf32>
    %401 = arith.negf %400 : vector<8x128xf32>
    %402 = math.exp %401 : vector<8x128xf32>
    %cst_104 = arith.constant 1.000000e+00 : f32
    %403 = vector.broadcast %cst_104 : f32 to vector<8x128xf32>
    %404 = arith.addf %403, %402 : vector<8x128xf32>
    %405 = arith.divf %403, %404 : vector<8x128xf32>
    %406 = vector.extract_strided_slice %385 {offsets = [0, 256], sizes = [8, 128], strides = [1, 1]} : vector<8x384xf32> to vector<8x128xf32>
    %407 = vector.extract_strided_slice %389 {offsets = [0, 256], sizes = [8, 128], strides = [1, 1]} : vector<8x384xf32> to vector<8x128xf32>
    %408 = arith.mulf %397, %407 : vector<8x128xf32>
    %409 = arith.addf %406, %408 : vector<8x128xf32>
    %410 = math.tanh %409 : vector<8x128xf32>
    %cst_105 = arith.constant 1.000000e+00 : f32
    %411 = vector.broadcast %cst_105 : f32 to vector<8x128xf32>
    %412 = arith.subf %411, %405 : vector<8x128xf32>
    %413 = arith.mulf %412, %410 : vector<8x128xf32>
    %414 = arith.mulf %405, %356 : vector<8x128xf32>
    %415 = arith.addf %413, %414 : vector<8x128xf32>
    %c8_i32_106 = arith.constant 8 : i32
    %416 = arith.muli %c6_i32, %c8_i32_106 : i32
    %417 = arith.index_cast %416 : i32 to index
    %c0_107 = arith.constant 0 : index
    %418 = vector.load %arg11[%417, %c0_107] : memref<56x128xf32, #tpu.memory_space<vmem>>, vector<8x128xf32>
    tpu.vector_store %arg11[%417, %c0_107], %415 {strides = array<i32>} : memref<56x128xf32, #tpu.memory_space<vmem>>, vector<8x128xf32>,
    %c7_i32 = arith.constant 7 : i32
    %c0_108 = arith.constant 0 : index
    %c0_109 = arith.constant 0 : index
    %419 = vector.load %arg11[%c0_108, %c0_109] : memref<56x128xf32, #tpu.memory_space<vmem>>, vector<56x128xf32>
    %420 = arith.truncf %419 : vector<56x128xf32> to vector<56x128xbf16>
    %c0_110 = arith.constant 0 : index
    %c0_111 = arith.constant 0 : index
    %421 = vector.load %arg8[%c0_110, %c0_111] : memref<128x256xbf16, #tpu.memory_space<vmem>>, vector<128x256xbf16>
    %cst_112 = arith.constant dense<0.000000e+00> : vector<56x256xf32>
    %422 = tpu.matmul %420, %421, %cst_112 {dimension_numbers = #tpu.dot_dimension_numbers<[1], [0], [0], [1], [0, 0, 1, 1], [], []>} : vector<56x128xbf16>, vector<128x256xbf16>, vector<56x256xf32> -> vector<56x256xf32>
    %c0_113 = arith.constant 0 : index
    %c0_114 = arith.constant 0 : index
    %423 = vector.load %arg9[%c0_113, %c0_114] : memref<1x256xf32, #tpu.memory_space<vmem>>, vector<1x256xf32>
    %424 = vector.broadcast %423 : vector<1x256xf32> to vector<56x256xf32>
    %425 = arith.addf %422, %424 : vector<56x256xf32>
    %cst_115 = arith.constant dense<0xFF800000> : vector<56xf32>
    %426 = vector.multi_reduction <maximumf>, %425, %cst_115 [1] : vector<56x256xf32> to vector<56xf32>
    %427 = vector.shape_cast %426 : vector<56xf32> to vector<56x1xf32>
    %428 = vector.broadcast %427 : vector<56x1xf32> to vector<56x256xf32>
    %429 = arith.subf %425, %428 : vector<56x256xf32>
    %430 = math.exp %429 : vector<56x256xf32>
    %cst_116 = arith.constant dense<0.000000e+00> : vector<56xf32>
    %431 = vector.multi_reduction <add>, %430, %cst_116 [1] : vector<56x256xf32> to vector<56xf32>
    %432 = vector.shape_cast %431 : vector<56xf32> to vector<56x1xf32>
    %433 = math.log %432 : vector<56x1xf32>
    %434 = arith.addf %427, %433 : vector<56x1xf32>
    %c0_117 = arith.constant 0 : index
    %c0_118 = arith.constant 0 : index
    %435 = vector.load %arg7[%c0_117, %c0_118] : memref<56x1xi32, #tpu.memory_space<vmem>>, vector<56x1xi32>
    %436 = tpu.iota {dimensions = array<i32: 1>} : vector<56x256xi32>
    %437 = vector.broadcast %435 : vector<56x1xi32> to vector<56x256xi32>
    %438 = arith.cmpi eq, %436, %437 : vector<56x256xi32>
    %cst_119 = arith.constant 0.000000e+00 : f32
    %439 = vector.broadcast %cst_119 : f32 to vector<56x256xf32>
    %440 = arith.select %438, %425, %439 : vector<56x256xi1>, vector<56x256xf32>
    %cst_120 = arith.constant dense<0.000000e+00> : vector<56xf32>
    %441 = vector.multi_reduction <add>, %440, %cst_120 [1] : vector<56x256xf32> to vector<56xf32>
    %442 = vector.shape_cast %441 : vector<56xf32> to vector<56x1xf32>
    %c0_i32_121 = arith.constant 0 : i32
    %443 = vector.broadcast %c0_i32_121 : i32 to vector<56x1xi32>
    %444 = arith.cmpi ne, %435, %443 : vector<56x1xi32>
    %445 = arith.extui %444 : vector<56x1xi1> to vector<56x1xi32>
    %446 = arith.sitofp %445 : vector<56x1xi32> to vector<56x1xf32>
    %447 = arith.subf %434, %442 : vector<56x1xf32>
    %448 = arith.mulf %447, %446 : vector<56x1xf32>
    %449 = vector.shape_cast %448 : vector<56x1xf32> to vector<1x56x1xf32>
    %cst_122 = arith.constant dense<0.000000e+00> : vector<1xf32>
    %450 = vector.multi_reduction <add>, %449, %cst_122 [1, 2] : vector<1x56x1xf32> to vector<1xf32>
    %451 = vector.shape_cast %450 : vector<1xf32> to vector<1x1x1xf32>
    %452 = vector.extract %451[0, 0, 0] : f32 from vector<1x1x1xf32>
    %453 = vector.broadcast %452 : f32 to vector<1x1xf32>
    %c0_123 = arith.constant 0 : index
    %c0_124 = arith.constant 0 : index
    %454 = vector.load %arg10[%c0_123, %c0_124] : memref<1x1xf32, #tpu.memory_space<vmem>>, vector<1x1xf32>
    tpu.vector_store %arg10[%c0_123, %c0_124], %453 {strides = array<i32>} : memref<1x1xf32, #tpu.memory_space<vmem>>, vector<1x1xf32>,
    return
  }
}

</mosaic_0001>

<bundles_post_ra>
// kernel: sumrnn_forward.4
= control target key start
LH: loop header
LB: loop body
LE: loop exit
PB: predicated region body
PF: predicated region fallthrough
CT: control target
= control target key end

     0   :  { %s748_s1 = inlined_call_operand.vmem [shape: bf16[128,384], index: 1, kind: input, shape index: {}]   ;;  %s749_s0 = inlined_call_operand.vmem [shape: bf16[64,128], index: 0, kind: input, shape index: {}]   ;;  %s750_s2 = inlined_call_operand.vmem [shape: f32[1,384], index: 2, kind: input, shape index: {}]   ;;  %s751_s3 = inlined_call_operand.vmem [shape: f32[64,384], index: 3, kind: output, shape index: {}]  }
   0x1   :  { %v466_v0 = vld [vmem:[%s748_s1 + $0xac] sm:$0xf]  ;;  %v433_v1 = vld [vmem:[%s748_s1 + $0xb4] sm:$0xf0]  ;;  %v439_v2 = vld [vmem:[%s748_s1 + $0xb0] sm:$0xf] }
   0x2   :  { %v436_v3 = vor.u32 %v466_v0, %v433_v1  ;;  %v468_v4 = vld [vmem:[%s748_s1 + $0xb8] sm:$0xf0]  ;;  %v463_v5 = vld [vmem:[%s748_s1 + $0x94] sm:$0xf]  ;;  %v421_v6 = vld [vmem:[%s748_s1 + $0x9c] sm:$0xf0] }
   0x3   :  { %v440_v7 = vor.u32 %v468_v4, %v439_v2  ;;  %v427_v8 = vld [vmem:[%s748_s1 + $0x98] sm:$0xf]  ;;  %v465_v9 = vld [vmem:[%s748_s1 + $0xa0] sm:$0xf0]  ;;  %v431_v10 = vld [vmem:[%s748_s1 + $0xa8] sm:$0xf]  ;;  %v424_v11 = vor.u32 %v463_v5, %v421_v6 }
   0x4   :  { %243 = vmatpush.bf16.msra.mxu1 %v436_v3  ;;  %v467_v12 = vld [vmem:[%s748_s1 + $0xb0] sm:$0xf0]  ;;  %v428_v13 = vor.u32 %v465_v9, %v427_v8  ;;  %v460_v15 = vld [vmem:[%s748_s1 + $0x7c] sm:$0xf]  ;;  %v409_v16 = vld [vmem:[%s748_s1 + $0x84] sm:$0xf0] }
   0x5   :  { %272 = vmatpush.bf16.msra.mxu2 %v440_v7  ;;  %v432_v14 = vor.u32 %v467_v12, %v431_v10  ;;  %v419_v17 = vld [vmem:[%s748_s1 + $0x90] sm:$0xf]  ;;  %v415_v18 = vld [vmem:[%s748_s1 + $0x80] sm:$0xf]  ;;  %v462_v19 = vld [vmem:[%s748_s1 + $0x88] sm:$0xf0]  ;;  %v412_v22 = vor.u32 %v460_v15, %v409_v16 }
   0x6   :  { %v464_v20 = vld [vmem:[%s748_s1 + $0x98] sm:$0xf0]  ;;  %v407_v23 = vld [vmem:[%s748_s1 + $0x78] sm:$0xf]  ;;  %v461_v24 = vld [vmem:[%s748_s1 + $0x80] sm:$0xf0]  ;;  %v416_v25 = vor.u32 %v462_v19, %v415_v18 }
   0x7   :  { %469 = vmatpush.bf16.msra.mxu3 %v432_v14  ;;  %v420_v21 = vor.u32 %v464_v20, %v419_v17  ;;  %214 = vmatpush.bf16.msra.mxu0 %v432_v14  ;;  %v457_v26 = vld [vmem:[%s748_s1 + $0x64] sm:$0xf]  ;;  %v397_v27 = vld [vmem:[%s748_s1 + $0x6c] sm:$0xf0]  ;;  %v403_v28 = vld [vmem:[%s748_s1 + $0x68] sm:$0xf]  ;;  %v408_v30 = vor.u32 %v461_v24, %v407_v23 }
   0x8   :  { %244 = vmatpush.bf16.msra.mxu1 %v424_v11  ;;  %v459_v29 = vld [vmem:[%s748_s1 + $0x70] sm:$0xf0]  ;;  %v400_v31 = vor.u32 %v457_v26, %v397_v27  ;;  %v395_v32 = vld [vmem:[%s748_s1 + $0x60] sm:$0xf]  ;;  %v458_v33 = vld [vmem:[%s748_s1 + $0x68] sm:$0xf0] }
   0x9   :  { %273 = vmatpush.bf16.msra.mxu2 %v428_v13  ;;  %v404_v34 = vor.u32 %v459_v29, %v403_v28  ;;  %v454_v35 = vld [vmem:[%s748_s1 + $0x4c] sm:$0xf]  ;;  %v385_v36 = vld [vmem:[%s748_s1 + $0x54] sm:$0xf0]  ;;  %v391_v37 = vld [vmem:[%s748_s1 + $0x50] sm:$0xf]  ;;  %v396_v39 = vor.u32 %v458_v33, %v395_v32 }
   0xa   :  { %v456_v38 = vld [vmem:[%s748_s1 + $0x58] sm:$0xf0]  ;;  %v388_v40 = vor.u32 %v454_v35, %v385_v36  ;;  %v383_v41 = vld [vmem:[%s748_s1 + $0x48] sm:$0xf]  ;;  %v455_v42 = vld [vmem:[%s748_s1 + $0x50] sm:$0xf0] }
   0xb   :  { %470 = vmatpush.bf16.msra.mxu3 %v420_v21  ;;  %215 = vmatpush.bf16.msra.mxu0 %v420_v21  ;;  %v392_v43 = vor.u32 %v456_v38, %v391_v37  ;;  %v451_v44 = vld [vmem:[%s748_s1 + $0x34] sm:$0xf]  ;;  %v373_v45 = vld [vmem:[%s748_s1 + $0x3c] sm:$0xf0]  ;;  %v379_v46 = vld [vmem:[%s748_s1 + $0x38] sm:$0xf]  ;;  %v384_v48 = vor.u32 %v455_v42, %v383_v41 }
   0xc   :  { %245 = vmatpush.bf16.msra.mxu1 %v412_v22  ;;  %v453_v47 = vld [vmem:[%s748_s1 + $0x40] sm:$0xf0]  ;;  %v376_v49 = vor.u32 %v451_v44, %v373_v45  ;;  %v371_v50 = vld [vmem:[%s748_s1 + $0x30] sm:$0xf]  ;;  %v452_v51 = vld [vmem:[%s748_s1 + $0x38] sm:$0xf0] }
   0xd   :  { %274 = vmatpush.bf16.msra.mxu2 %v416_v25  ;;  %v380_v52 = vor.u32 %v453_v47, %v379_v46  ;;  %v448_v53 = vld [vmem:[%s748_s1 + $0x1c] sm:$0xf]  ;;  %v361_v54 = vld [vmem:[%s748_s1 + $0x24] sm:$0xf0]  ;;  %v367_v55 = vld [vmem:[%s748_s1 + $0x20] sm:$0xf]  ;;  %v372_v57 = vor.u32 %v452_v51, %v371_v50 }
   0xe   :  { %v450_v56 = vld [vmem:[%s748_s1 + $0x28] sm:$0xf0]  ;;  %v364_v58 = vor.u32 %v448_v53, %v361_v54  ;;  %v359_v59 = vld [vmem:[%s748_s1 + $0x18] sm:$0xf]  ;;  %v449_v60 = vld [vmem:[%s748_s1 + $0x20] sm:$0xf0] }
   0xf   :  { %471 = vmatpush.bf16.msra.mxu3 %v408_v30  ;;  %216 = vmatpush.bf16.msra.mxu0 %v408_v30  ;;  %v368_v61 = vor.u32 %v450_v56, %v367_v55  ;;  %v445_v62 = vld [vmem:[%s748_s1 + $0x4] sm:$0xf]  ;;  %v349_v63 = vld [vmem:[%s748_s1 + $0xc] sm:$0xf0]  ;;  %v355_v0 = vld [vmem:[%s748_s1 + $0x8] sm:$0xf]  ;;  %v360_v2 = vor.u32 %v449_v60, %v359_v59 }
  0x10   :  { %246 = vmatpush.bf16.msra.mxu1 %v400_v31  ;;  %v447_v1 = vld [vmem:[%s748_s1 + $0x10] sm:$0xf0]  ;;  %v352_v3 = vor.u32 %v445_v62, %v349_v63  ;;  %v347_v4 = vld [vmem:[%s748_s1] sm:$0xf]  ;;  %v446_v5 = vld [vmem:[%s748_s1 + $0x8] sm:$0xf0] }
  0x11   :  { %275 = vmatpush.bf16.msra.mxu2 %v404_v34  ;;  %v356_v6 = vor.u32 %v447_v1, %v355_v0  ;;  %v441_v7 = vld [vmem:[%s749_s0] sm:$0xff]  ;;  %v348_v8 = vor.u32 %v446_v5, %v347_v4  ;;  %v442_v9 = vld [vmem:[%s749_s0 + $0x8] sm:$0xff]  ;;  %v443_v10 = vld [vmem:[%s749_s0 + $0x10] sm:$0xff] }
  0x12   :  { %v444_v11 = vld [vmem:[%s749_s0 + $0x18] sm:$0xff]  ;;  %v54_v12 = vld [vmem:[%s750_s2] sm:$0x7] }
  0x13   :  { %472 = vmatpush.bf16.msra.mxu3 %v396_v39  ;;  %217 = vmatpush.bf16.msra.mxu0 %v396_v39  ;;  %v656_v13 = vperm.slane %v54_v12, 1  ;;  %v662_v16 = vperm.slane %v54_v12, 2  ;;  %v56_v17 = vperm.slane %v54_v12, 0 }
  0x14   :  { %247 = vmatpush.bf16.msra.mxu1 %v388_v40 }
  0x15   :  { %276 = vmatpush.bf16.msra.mxu2 %v392_v43 }
  0x17   :  { %473 = vmatpush.bf16.msra.mxu3 %v384_v48  ;;  %218 = vmatpush.bf16.msra.mxu0 %v384_v48 }
  0x18   :  { %248 = vmatpush.bf16.msra.mxu1 %v376_v49 }
  0x19   :  { %277 = vmatpush.bf16.msra.mxu2 %v380_v52 }
  0x1b   :  { %474 = vmatpush.bf16.msra.mxu3 %v372_v57  ;;  %219 = vmatpush.bf16.msra.mxu0 %v372_v57 }
  0x1c   :  { %249 = vmatpush.bf16.msra.mxu1 %v364_v58 }
  0x1d   :  { %278 = vmatpush.bf16.msra.mxu2 %v368_v61 }
  0x1f   :  { %475 = vmatpush.bf16.msra.mxu3 %v360_v2  ;;  %220 = vmatpush.bf16.msra.mxu0 %v360_v2 }
  0x20   :  { %250 = vmatpush.bf16.msra.mxu1 %v352_v3 }
  0x21   :  { %279 = vmatpush.bf16.msra.mxu2 %v356_v6 }
  0x23   :  { %251 = vmatmul.bf16.vlgmr.msra.gmra.mxu1 %v441_v7  ;;  %476 = vmatpush.bf16.msra.mxu3 %v348_v8 }
  0x24   :  { %280 = vmatmul.bf16.vlgmr.msra.gmra.mxu2 %v441_v7  ;;  %221 = vmatpush.bf16.msra.mxu0 %v348_v8 }
  0x26   :  { %227 = vmatmul.bf16.vlgmr.msra.gmra.mxu3 %v442_v9 }
  0x27   :  { %222 = vmatmul.bf16.vlgmr.msra.gmra.mxu0 %v441_v7 }
  0x33   :  { %256 = vmatmul.bf16.gmra.mxu1 %v442_v9 }
  0x34   :  { %285 = vmatmul.bf16.gmra.mxu2 %v442_v9 }
  0x36   :  { %232 = vmatmul.bf16.gmra.mxu3 %v443_v10 }
  0x43   :  { %261 = vmatmul.bf16.gmra.mxu1 %v443_v10 }
  0x44   :  { %290 = vmatmul.bf16.gmra.mxu2 %v443_v10 }
  0x46   :  { %237 = vmatmul.bf16.gmra.mxu3 %v444_v11 }
  0x53   :  { %266 = vmatmul.bf16.gmra.mxu1 %v444_v11 }
  0x54   :  { %295 = vmatmul.bf16.gmra.mxu2 %v444_v11 }
  0xa0   :  { %v252_v14 = vpop.f32.mrf.mxu1 }
  0xa1   :  { %v253_v15 = vadd.f32 %v252_v14, %v656_v13 }
  0xa3   :  { %302 = vst [vmem:[%s751_s3 + $0x8] sm:$0xff] %v253_v15 }
  0xa4   :  { %v223_v24 = vpop.f32.mrf.mxu0 }
  0xa5   :  { %v224_v25 = vadd.f32 %v223_v24, %v56_v17 }
  0xa7   :  { %v281_v18 = vpop.f32.mrf.mxu2  ;;  %301 = vst [vmem:[%s751_s3] sm:$0xff] %v224_v25 }
  0xa8   :  { %v282_v19 = vadd.f32 %v281_v18, %v662_v16  ;;  %v254_v20 = vpop.f32.mrf.mxu1 }
  0xa9   :  { %v255_v21 = vadd.f32 %v254_v20, %v656_v13  ;;  %v228_v22 = vpop.f32.mrf.mxu3 }
  0xaa   :  { %303 = vst [vmem:[%s751_s3 + $0x10] sm:$0xff] %v282_v19  ;;  %v229_v23 = vadd.f32 %v228_v22, %v56_v17 }
  0xab   :  { %305 = vst [vmem:[%s751_s3 + $0x20] sm:$0xff] %v255_v21 }
  0xac   :  { %307 = vst [vmem:[%s751_s3 + $0x30] sm:$0xff] %v229_v23  ;;  %v225_v32 = vpop.f32.mrf.mxu0 }
  0xad   :  { %v226_v33 = vadd.f32 %v225_v32, %v56_v17 }
  0xaf   :  { %v283_v26 = vpop.f32.mrf.mxu2  ;;  %304 = vst [vmem:[%s751_s3 + $0x18] sm:$0xff] %v226_v33 }
  0xb0   :  { %v284_v27 = vadd.f32 %v283_v26, %v662_v16  ;;  %v257_v28 = vpop.f32.mrf.mxu1 }
  0xb1   :  { %v258_v29 = vadd.f32 %v257_v28, %v656_v13  ;;  %v230_v30 = vpop.f32.mrf.mxu3 }
  0xb2   :  { %306 = vst [vmem:[%s751_s3 + $0x28] sm:$0xff] %v284_v27  ;;  %v231_v31 = vadd.f32 %v230_v30, %v56_v17 }
  0xb3   :  { %308 = vst [vmem:[%s751_s3 + $0x38] sm:$0xff] %v258_v29 }
  0xb4   :  { %310 = vst [vmem:[%s751_s3 + $0x48] sm:$0xff] %v231_v31 }
  0xb7   :  { %v286_v34 = vpop.f32.mrf.mxu2 }
  0xb8   :  { %v287_v35 = vadd.f32 %v286_v34, %v662_v16  ;;  %v259_v36 = vpop.f32.mrf.mxu1 }
  0xb9   :  { %v260_v37 = vadd.f32 %v259_v36, %v656_v13  ;;  %v233_v38 = vpop.f32.mrf.mxu3 }
  0xba   :  { %309 = vst [vmem:[%s751_s3 + $0x40] sm:$0xff] %v287_v35  ;;  %v234_v39 = vadd.f32 %v233_v38, %v56_v17 }
  0xbb   :  { %311 = vst [vmem:[%s751_s3 + $0x50] sm:$0xff] %v260_v37 }
  0xbc   :  { %313 = vst [vmem:[%s751_s3 + $0x60] sm:$0xff] %v234_v39 }
  0xbf   :  { %v288_v40 = vpop.f32.mrf.mxu2 }
  0xc0   :  { %v289_v41 = vadd.f32 %v288_v40, %v662_v16  ;;  %v262_v42 = vpop.f32.mrf.mxu1 }
  0xc1   :  { %v263_v43 = vadd.f32 %v262_v42, %v656_v13  ;;  %v235_v44 = vpop.f32.mrf.mxu3 }
  0xc2   :  { %312 = vst [vmem:[%s751_s3 + $0x58] sm:$0xff] %v289_v41  ;;  %v236_v45 = vadd.f32 %v235_v44, %v56_v17 }
  0xc3   :  { %314 = vst [vmem:[%s751_s3 + $0x68] sm:$0xff] %v263_v43 }
  0xc4   :  { %316 = vst [vmem:[%s751_s3 + $0x78] sm:$0xff] %v236_v45 }
  0xc7   :  { %v291_v46 = vpop.f32.mrf.mxu2 }
  0xc8   :  { %v292_v47 = vadd.f32 %v291_v46, %v662_v16  ;;  %v264_v48 = vpop.f32.mrf.mxu1 }
  0xc9   :  { %v265_v49 = vadd.f32 %v264_v48, %v656_v13  ;;  %v238_v50 = vpop.f32.mrf.mxu3 }
  0xca   :  { %315 = vst [vmem:[%s751_s3 + $0x70] sm:$0xff] %v292_v47  ;;  %v239_v51 = vadd.f32 %v238_v50, %v56_v17 }
  0xcb   :  { %317 = vst [vmem:[%s751_s3 + $0x80] sm:$0xff] %v265_v49 }
  0xcc   :  { %319 = vst [vmem:[%s751_s3 + $0x90] sm:$0xff] %v239_v51 }
  0xcf   :  { %v293_v52 = vpop.f32.mrf.mxu2 }
  0xd0   :  { %v294_v53 = vadd.f32 %v293_v52, %v662_v16  ;;  %v267_v54 = vpop.f32.mrf.mxu1 }
  0xd1   :  { %v268_v55 = vadd.f32 %v267_v54, %v656_v13  ;;  %v240_v56 = vpop.f32.mrf.mxu3 }
  0xd2   :  { %318 = vst [vmem:[%s751_s3 + $0x88] sm:$0xff] %v294_v53  ;;  %v241_v57 = vadd.f32 %v240_v56, %v56_v17 }
  0xd3   :  { %320 = vst [vmem:[%s751_s3 + $0x98] sm:$0xff] %v268_v55 }
  0xd4   :  { %322 = vst [vmem:[%s751_s3 + $0xa8] sm:$0xff] %v241_v57 }
  0xd7   :  { %v296_v58 = vpop.f32.mrf.mxu2 }
  0xd8   :  { %v297_v59 = vadd.f32 %v296_v58, %v662_v16  ;;  %v269_v60 = vpop.f32.mrf.mxu1 }
  0xd9   :  { %v270_v61 = vadd.f32 %v269_v60, %v656_v13 }
  0xda   :  { %321 = vst [vmem:[%s751_s3 + $0xa0] sm:$0xff] %v297_v59 }
  0xdb   :  { %323 = vst [vmem:[%s751_s3 + $0xb0] sm:$0xff] %v270_v61 }
  0xdf   :  { %v298_v62 = vpop.f32.mrf.mxu2 }
  0xe0   :  { %v299_v63 = vadd.f32 %v298_v62, %v662_v16 }
  0xe2   :  { %324 = vst [vmem:[%s751_s3 + $0xb8] sm:$0xff] %v299_v63 }

// kernel: sumrnn_forward.6
= control target key start
LH: loop header
LB: loop body
LE: loop exit
PB: predicated region body
PF: predicated region fallthrough
CT: control target
= control target key end

     0   :  { %s705_s1 = inlined_call_operand.vmem [shape: bf16[128,384], index: 1, kind: input, shape index: {}]   ;;  %s706_s0 = inlined_call_operand.vmem [shape: bf16[56,128], index: 0, kind: input, shape index: {}]   ;;  %s707_s2 = inlined_call_operand.vmem [shape: f32[1,384], index: 2, kind: input, shape index: {}]   ;;  %s708_s3 = inlined_call_operand.vmem [shape: f32[56,384], index: 3, kind: output, shape index: {}]  }
   0x1   :  { %v452_v0 = vld [vmem:[%s705_s1 + $0xac] sm:$0xf]  ;;  %v420_v1 = vld [vmem:[%s705_s1 + $0xb4] sm:$0xf0]  ;;  %v426_v2 = vld [vmem:[%s705_s1 + $0xb0] sm:$0xf] }
   0x2   :  { %v423_v3 = vor.u32 %v452_v0, %v420_v1  ;;  %v454_v4 = vld [vmem:[%s705_s1 + $0xb8] sm:$0xf0]  ;;  %v449_v5 = vld [vmem:[%s705_s1 + $0x94] sm:$0xf]  ;;  %v408_v6 = vld [vmem:[%s705_s1 + $0x9c] sm:$0xf0] }
   0x3   :  { %v427_v7 = vor.u32 %v454_v4, %v426_v2  ;;  %v414_v8 = vld [vmem:[%s705_s1 + $0x98] sm:$0xf]  ;;  %v451_v9 = vld [vmem:[%s705_s1 + $0xa0] sm:$0xf0]  ;;  %v418_v10 = vld [vmem:[%s705_s1 + $0xa8] sm:$0xf]  ;;  %v411_v11 = vor.u32 %v449_v5, %v408_v6 }
   0x4   :  { %239 = vmatpush.bf16.msra.mxu1 %v423_v3  ;;  %v453_v12 = vld [vmem:[%s705_s1 + $0xb0] sm:$0xf0]  ;;  %v415_v13 = vor.u32 %v451_v9, %v414_v8  ;;  %v446_v15 = vld [vmem:[%s705_s1 + $0x7c] sm:$0xf]  ;;  %v396_v16 = vld [vmem:[%s705_s1 + $0x84] sm:$0xf0] }
   0x5   :  { %267 = vmatpush.bf16.msra.mxu2 %v427_v7  ;;  %v419_v14 = vor.u32 %v453_v12, %v418_v10  ;;  %v406_v17 = vld [vmem:[%s705_s1 + $0x90] sm:$0xf]  ;;  %v402_v18 = vld [vmem:[%s705_s1 + $0x80] sm:$0xf]  ;;  %v448_v19 = vld [vmem:[%s705_s1 + $0x88] sm:$0xf0]  ;;  %v399_v22 = vor.u32 %v446_v15, %v396_v16 }
   0x6   :  { %v450_v20 = vld [vmem:[%s705_s1 + $0x98] sm:$0xf0]  ;;  %v394_v23 = vld [vmem:[%s705_s1 + $0x78] sm:$0xf]  ;;  %v447_v24 = vld [vmem:[%s705_s1 + $0x80] sm:$0xf0]  ;;  %v403_v25 = vor.u32 %v448_v19, %v402_v18 }
   0x7   :  { %455 = vmatpush.bf16.msra.mxu3 %v419_v14  ;;  %v407_v21 = vor.u32 %v450_v20, %v406_v17  ;;  %211 = vmatpush.bf16.msra.mxu0 %v419_v14  ;;  %v443_v26 = vld [vmem:[%s705_s1 + $0x64] sm:$0xf]  ;;  %v384_v27 = vld [vmem:[%s705_s1 + $0x6c] sm:$0xf0]  ;;  %v390_v28 = vld [vmem:[%s705_s1 + $0x68] sm:$0xf]  ;;  %v395_v30 = vor.u32 %v447_v24, %v394_v23 }
   0x8   :  { %240 = vmatpush.bf16.msra.mxu1 %v411_v11  ;;  %v445_v29 = vld [vmem:[%s705_s1 + $0x70] sm:$0xf0]  ;;  %v387_v31 = vor.u32 %v443_v26, %v384_v27  ;;  %v382_v32 = vld [vmem:[%s705_s1 + $0x60] sm:$0xf]  ;;  %v444_v33 = vld [vmem:[%s705_s1 + $0x68] sm:$0xf0] }
   0x9   :  { %268 = vmatpush.bf16.msra.mxu2 %v415_v13  ;;  %v391_v34 = vor.u32 %v445_v29, %v390_v28  ;;  %v440_v35 = vld [vmem:[%s705_s1 + $0x4c] sm:$0xf]  ;;  %v372_v36 = vld [vmem:[%s705_s1 + $0x54] sm:$0xf0]  ;;  %v378_v37 = vld [vmem:[%s705_s1 + $0x50] sm:$0xf]  ;;  %v383_v39 = vor.u32 %v444_v33, %v382_v32 }
   0xa   :  { %v442_v38 = vld [vmem:[%s705_s1 + $0x58] sm:$0xf0]  ;;  %v375_v40 = vor.u32 %v440_v35, %v372_v36  ;;  %v370_v41 = vld [vmem:[%s705_s1 + $0x48] sm:$0xf]  ;;  %v441_v42 = vld [vmem:[%s705_s1 + $0x50] sm:$0xf0] }
   0xb   :  { %456 = vmatpush.bf16.msra.mxu3 %v407_v21  ;;  %212 = vmatpush.bf16.msra.mxu0 %v407_v21  ;;  %v379_v43 = vor.u32 %v442_v38, %v378_v37  ;;  %v437_v44 = vld [vmem:[%s705_s1 + $0x34] sm:$0xf]  ;;  %v360_v45 = vld [vmem:[%s705_s1 + $0x3c] sm:$0xf0]  ;;  %v366_v46 = vld [vmem:[%s705_s1 + $0x38] sm:$0xf]  ;;  %v371_v48 = vor.u32 %v441_v42, %v370_v41 }
   0xc   :  { %241 = vmatpush.bf16.msra.mxu1 %v399_v22  ;;  %v439_v47 = vld [vmem:[%s705_s1 + $0x40] sm:$0xf0]  ;;  %v363_v49 = vor.u32 %v437_v44, %v360_v45  ;;  %v358_v50 = vld [vmem:[%s705_s1 + $0x30] sm:$0xf]  ;;  %v438_v51 = vld [vmem:[%s705_s1 + $0x38] sm:$0xf0] }
   0xd   :  { %269 = vmatpush.bf16.msra.mxu2 %v403_v25  ;;  %v367_v52 = vor.u32 %v439_v47, %v366_v46  ;;  %v434_v53 = vld [vmem:[%s705_s1 + $0x1c] sm:$0xf]  ;;  %v348_v54 = vld [vmem:[%s705_s1 + $0x24] sm:$0xf0]  ;;  %v354_v55 = vld [vmem:[%s705_s1 + $0x20] sm:$0xf]  ;;  %v359_v57 = vor.u32 %v438_v51, %v358_v50 }
   0xe   :  { %v436_v56 = vld [vmem:[%s705_s1 + $0x28] sm:$0xf0]  ;;  %v351_v58 = vor.u32 %v434_v53, %v348_v54  ;;  %v346_v59 = vld [vmem:[%s705_s1 + $0x18] sm:$0xf]  ;;  %v435_v60 = vld [vmem:[%s705_s1 + $0x20] sm:$0xf0] }
   0xf   :  { %457 = vmatpush.bf16.msra.mxu3 %v395_v30  ;;  %213 = vmatpush.bf16.msra.mxu0 %v395_v30  ;;  %v355_v61 = vor.u32 %v436_v56, %v354_v55  ;;  %v431_v62 = vld [vmem:[%s705_s1 + $0x4] sm:$0xf]  ;;  %v336_v63 = vld [vmem:[%s705_s1 + $0xc] sm:$0xf0]  ;;  %v342_v0 = vld [vmem:[%s705_s1 + $0x8] sm:$0xf]  ;;  %v347_v2 = vor.u32 %v435_v60, %v346_v59 }
  0x10   :  { %242 = vmatpush.bf16.msra.mxu1 %v387_v31  ;;  %v433_v1 = vld [vmem:[%s705_s1 + $0x10] sm:$0xf0]  ;;  %v339_v3 = vor.u32 %v431_v62, %v336_v63  ;;  %v334_v4 = vld [vmem:[%s705_s1] sm:$0xf]  ;;  %v432_v5 = vld [vmem:[%s705_s1 + $0x8] sm:$0xf0] }
  0x11   :  { %270 = vmatpush.bf16.msra.mxu2 %v391_v34  ;;  %v343_v6 = vor.u32 %v433_v1, %v342_v0  ;;  %v428_v7 = vld [vmem:[%s706_s0] sm:$0xff]  ;;  %v335_v8 = vor.u32 %v432_v5, %v334_v4  ;;  %v429_v9 = vld [vmem:[%s706_s0 + $0x8] sm:$0xff]  ;;  %v430_v10 = vld [vmem:[%s706_s0 + $0x10] sm:$0xff] }
  0x12   :  { %v20_v11 = vld [vmem:[%s706_s0 + $0x18] sm:$0xf]  ;;  %v53_v14 = vld [vmem:[%s707_s2] sm:$0x7] }
  0x13   :  { %458 = vmatpush.bf16.msra.mxu3 %v383_v39  ;;  %214 = vmatpush.bf16.msra.mxu0 %v383_v39  ;;  %v74_v12 = vunpack.c.l.b16 %v20_v11  ;;  %v56_v15 = vperm.slane %v53_v14, 1  ;;  %v57_v18 = vperm.slane %v53_v14, 2  ;;  %v55_v19 = vperm.slane %v53_v14, 0 }
  0x14   :  { %243 = vmatpush.bf16.msra.mxu1 %v375_v40 }
  0x15   :  { %271 = vmatpush.bf16.msra.mxu2 %v379_v43  ;;  %v78_v13 = vpack.c.b16 %v74_v12, %v74_v12 }
  0x17   :  { %459 = vmatpush.bf16.msra.mxu3 %v371_v48  ;;  %215 = vmatpush.bf16.msra.mxu0 %v371_v48 }
  0x18   :  { %244 = vmatpush.bf16.msra.mxu1 %v363_v49 }
  0x19   :  { %272 = vmatpush.bf16.msra.mxu2 %v367_v52 }
  0x1b   :  { %460 = vmatpush.bf16.msra.mxu3 %v359_v57  ;;  %216 = vmatpush.bf16.msra.mxu0 %v359_v57 }
  0x1c   :  { %245 = vmatpush.bf16.msra.mxu1 %v351_v58 }
  0x1d   :  { %273 = vmatpush.bf16.msra.mxu2 %v355_v61 }
  0x1f   :  { %461 = vmatpush.bf16.msra.mxu3 %v347_v2  ;;  %217 = vmatpush.bf16.msra.mxu0 %v347_v2 }
  0x20   :  { %246 = vmatpush.bf16.msra.mxu1 %v339_v3 }
  0x21   :  { %274 = vmatpush.bf16.msra.mxu2 %v343_v6 }
  0x23   :  { %247 = vmatmul.bf16.vlgmr.msra.gmra.mxu1 %v428_v7  ;;  %462 = vmatpush.bf16.msra.mxu3 %v335_v8 }
  0x24   :  { %275 = vmatmul.bf16.vlgmr.msra.gmra.mxu2 %v428_v7  ;;  %218 = vmatpush.bf16.msra.mxu0 %v335_v8 }
  0x26   :  { %224 = vmatmul.bf16.vlgmr.msra.gmra.mxu3 %v429_v9 }
  0x27   :  { %219 = vmatmul.bf16.vlgmr.msra.gmra.mxu0 %v428_v7 }
  0x33   :  { %252 = vmatmul.bf16.gmra.mxu1 %v429_v9 }
  0x34   :  { %280 = vmatmul.bf16.gmra.mxu2 %v429_v9 }
  0x36   :  { %229 = vmatmul.bf16.gmra.mxu3 %v430_v10 }
  0x43   :  { %257 = vmatmul.bf16.gmra.mxu1 %v430_v10 }
  0x44   :  { %285 = vmatmul.bf16.gmra.mxu2 %v430_v10 }
  0x46   :  { %234 = vmatmul.bf16.gmra.mxu3 %v78_v13 }
  0x53   :  { %262 = vmatmul.bf16.gmra.mxu1 %v78_v13 }
  0x54   :  { %290 = vmatmul.bf16.gmra.mxu2 %v78_v13 }
  0xa0   :  { %v248_v16 = vpop.f32.mrf.mxu1 }
  0xa1   :  { %v249_v17 = vadd.f32 %v248_v16, %v56_v15 }
  0xa3   :  { %296 = vst [vmem:[%s708_s3 + $0x8] sm:$0xff] %v249_v17 }
  0xa4   :  { %v220_v26 = vpop.f32.mrf.mxu0 }
  0xa5   :  { %v221_v27 = vadd.f32 %v220_v26, %v55_v19 }
  0xa7   :  { %v276_v20 = vpop.f32.mrf.mxu2  ;;  %295 = vst [vmem:[%s708_s3] sm:$0xff] %v221_v27 }
  0xa8   :  { %v277_v21 = vadd.f32 %v276_v20, %v57_v18  ;;  %v250_v22 = vpop.f32.mrf.mxu1 }
  0xa9   :  { %v251_v23 = vadd.f32 %v250_v22, %v56_v15  ;;  %v225_v24 = vpop.f32.mrf.mxu3 }
  0xaa   :  { %297 = vst [vmem:[%s708_s3 + $0x10] sm:$0xff] %v277_v21  ;;  %v226_v25 = vadd.f32 %v225_v24, %v55_v19 }
  0xab   :  { %299 = vst [vmem:[%s708_s3 + $0x20] sm:$0xff] %v251_v23 }
  0xac   :  { %301 = vst [vmem:[%s708_s3 + $0x30] sm:$0xff] %v226_v25  ;;  %v222_v34 = vpop.f32.mrf.mxu0 }
  0xad   :  { %v223_v35 = vadd.f32 %v222_v34, %v55_v19 }
  0xaf   :  { %v278_v28 = vpop.f32.mrf.mxu2  ;;  %298 = vst [vmem:[%s708_s3 + $0x18] sm:$0xff] %v223_v35 }
  0xb0   :  { %v279_v29 = vadd.f32 %v278_v28, %v57_v18  ;;  %v253_v30 = vpop.f32.mrf.mxu1 }
  0xb1   :  { %v254_v31 = vadd.f32 %v253_v30, %v56_v15  ;;  %v227_v32 = vpop.f32.mrf.mxu3 }
  0xb2   :  { %300 = vst [vmem:[%s708_s3 + $0x28] sm:$0xff] %v279_v29  ;;  %v228_v33 = vadd.f32 %v227_v32, %v55_v19 }
  0xb3   :  { %302 = vst [vmem:[%s708_s3 + $0x38] sm:$0xff] %v254_v31 }
  0xb4   :  { %304 = vst [vmem:[%s708_s3 + $0x48] sm:$0xff] %v228_v33 }
  0xb7   :  { %v281_v36 = vpop.f32.mrf.mxu2 }
  0xb8   :  { %v282_v37 = vadd.f32 %v281_v36, %v57_v18  ;;  %v255_v38 = vpop.f32.mrf.mxu1 }
  0xb9   :  { %v256_v39 = vadd.f32 %v255_v38, %v56_v15  ;;  %v230_v40 = vpop.f32.mrf.mxu3 }
  0xba   :  { %303 = vst [vmem:[%s708_s3 + $0x40] sm:$0xff] %v282_v37  ;;  %v231_v41 = vadd.f32 %v230_v40, %v55_v19 }
  0xbb   :  { %305 = vst [vmem:[%s708_s3 + $0x50] sm:$0xff] %v256_v39 }
  0xbc   :  { %307 = vst [vmem:[%s708_s3 + $0x60] sm:$0xff] %v231_v41 }
  0xbf   :  { %v283_v42 = vpop.f32.mrf.mxu2 }
  0xc0   :  { %v284_v43 = vadd.f32 %v283_v42, %v57_v18  ;;  %v258_v44 = vpop.f32.mrf.mxu1 }
  0xc1   :  { %v259_v45 = vadd.f32 %v258_v44, %v56_v15  ;;  %v232_v46 = vpop.f32.mrf.mxu3 }
  0xc2   :  { %306 = vst [vmem:[%s708_s3 + $0x58] sm:$0xff] %v284_v43  ;;  %v233_v47 = vadd.f32 %v232_v46, %v55_v19 }
  0xc3   :  { %308 = vst [vmem:[%s708_s3 + $0x68] sm:$0xff] %v259_v45 }
  0xc4   :  { %310 = vst [vmem:[%s708_s3 + $0x78] sm:$0xff] %v233_v47 }
  0xc7   :  { %v286_v48 = vpop.f32.mrf.mxu2 }
  0xc8   :  { %v287_v49 = vadd.f32 %v286_v48, %v57_v18  ;;  %v260_v50 = vpop.f32.mrf.mxu1 }
  0xc9   :  { %v261_v51 = vadd.f32 %v260_v50, %v56_v15  ;;  %v235_v52 = vpop.f32.mrf.mxu3 }
  0xca   :  { %309 = vst [vmem:[%s708_s3 + $0x70] sm:$0xff] %v287_v49  ;;  %v236_v53 = vadd.f32 %v235_v52, %v55_v19 }
  0xcb   :  { %311 = vst [vmem:[%s708_s3 + $0x80] sm:$0xff] %v261_v51 }
  0xcc   :  { %313 = vst [vmem:[%s708_s3 + $0x90] sm:$0xff] %v236_v53 }
  0xcf   :  { %v288_v54 = vpop.f32.mrf.mxu2 }
  0xd0   :  { %v289_v55 = vadd.f32 %v288_v54, %v57_v18  ;;  %v263_v56 = vpop.f32.mrf.mxu1 }
  0xd1   :  { %v264_v57 = vadd.f32 %v263_v56, %v56_v15  ;;  %v237_v58 = vpop.f32.mrf.mxu3 }
  0xd2   :  { %312 = vst [vmem:[%s708_s3 + $0x88] sm:$0xff] %v289_v55 }
  0xd3   :  { %314 = vst [vmem:[%s708_s3 + $0x98] sm:$0xff] %v264_v57 }
  0xd7   :  { %v291_v59 = vpop.f32.mrf.mxu2 }
  0xd8   :  { %v292_v60 = vadd.f32 %v291_v59, %v57_v18  ;;  %v265_v61 = vpop.f32.mrf.mxu1 }
  0xda   :  { %315 = vst [vmem:[%s708_s3 + $0xa0] sm:$0xff] %v292_v60 }
  0xdf   :  { %v293_v62 = vpop.f32.mrf.mxu2 }

// kernel: sumrnn_forward.5
= control target key start
LH: loop header
LB: loop body
LE: loop exit
PB: predicated region body
PF: predicated region fallthrough
CT: control target
= control target key end

     0   :  { %8 = vsyncpa [#allocation3], 0  ;;  %s1219_s15 = smov [#allocation2]   ;;  %s1220_s17 = smov 192   ;;  %s1657_s0 = inlined_call_operand.vmem [shape: f32[8,8,384], index: 0, kind: input, shape index: {}]   ;;  %s1658_s1 = inlined_call_operand.hbm [shape: bf16[128,384], index: 1, kind: input, shape index: {}]   ;;  %s1659_s2 = inlined_call_operand.vmem [shape: f32[1,384], index: 2, kind: input, shape index: {}]   ;;  %s1660_s3 = inlined_call_operand.vmem [shape: f32[8,8,128], index: 3, kind: output, shape index: {}]  }
   0x1   :  { %s15_s14 = sshll.u32 %s1658_s1, 4  ;;  %s17_s16 = sshll.u32 %s1219_s15, 4  ;;  %s16_s14 = int_to_ptr.hbm [resolvable:$true] %s15_s14  ;;  %s18_s16 = int_to_ptr.vmem [resolvable:$true] %s17_s16 }
   0x2   :  { %s1221_s18 = smov 12  }
   0x3   :  { %23 = dma.hbm_to_vmem [thread:$0]  %s16_s14, 3072, %s18_s16, [#allocation3], %s1220_s17, %s1220_s17, %s1221_s18  }
   0x4   :  { %1217 = dma.done.wait [#allocation3], 3072  }
   0x5   :  { %1218 = vsyncadd [#allocation3], 4294964224  ;;  %v1031_v0 = vld [vmem:[#allocation2 + $0xa8] sm:$0xf]  ;;  %v1107_v1 = vld [vmem:[#allocation2 + $0xb0] sm:$0xf0] }
   0x6   :  { %v1106_v2 = vld [vmem:[#allocation2 + $0xac] sm:$0xf]  ;;  %v1246_v3 = vor.u32 %v1107_v1, %v1031_v0  ;;  %v1033_v4 = vld [vmem:[#allocation2 + $0xb4] sm:$0xf0]  ;;  %v1019_v5 = vld [vmem:[#allocation2 + $0x90] sm:$0xf] }
   0x7   :  { %v1104_v6 = vld [vmem:[#allocation2 + $0x98] sm:$0xf0]  ;;  %v1248_v7 = vor.u32 %v1106_v2, %v1033_v4  ;;  %v1103_v8 = vld [vmem:[#allocation2 + $0x94] sm:$0xf]  ;;  %v1021_v9 = vld [vmem:[#allocation2 + $0x9c] sm:$0xf0] }
   0x8   :  { %202 = vmatpush.bf16.msra.mxu0 %v1246_v3  ;;  %v1251_v10 = vor.u32 %v1104_v6, %v1019_v5  ;;  %294 = vmatpush.bf16.msra.mxu3 %v1246_v3  ;;  %v1255_v11 = vor.u32 %v1103_v8, %v1021_v9  ;;  %v1007_v12 = vld [vmem:[#allocation2 + $0x78] sm:$0xf]  ;;  %v1101_v13 = vld [vmem:[#allocation2 + $0x80] sm:$0xf0]  ;;  %v1100_v14 = vld [vmem:[#allocation2 + $0x7c] sm:$0xf] }
   0x9   :  { %215 = vmatpush.bf16.msra.mxu1 %v1248_v7  ;;  %v1009_v15 = vld [vmem:[#allocation2 + $0x84] sm:$0xf0]  ;;  %v1039_v16 = vld [vmem:[#allocation2 + $0xb0] sm:$0xf]  ;;  %v1258_v17 = vor.u32 %v1101_v13, %v1007_v12  ;;  %v1108_v18 = vld [vmem:[#allocation2 + $0xb8] sm:$0xf0] }
   0xa   :  { %v1262_v19 = vor.u32 %v1100_v14, %v1009_v15  ;;  %v995_v20 = vld [vmem:[#allocation2 + $0x60] sm:$0xf]  ;;  %v1098_v21 = vld [vmem:[#allocation2 + $0x68] sm:$0xf0]  ;;  %v1264_v22 = vor.u32 %v1108_v18, %v1039_v16  ;;  %v1027_v23 = vld [vmem:[#allocation2 + $0x98] sm:$0xf] }
   0xb   :  { %v1097_v24 = vld [vmem:[#allocation2 + $0x64] sm:$0xf]  ;;  %v997_v25 = vld [vmem:[#allocation2 + $0x6c] sm:$0xf0]  ;;  %v1270_v28 = vor.u32 %v1098_v21, %v995_v20  ;;  %v1015_v29 = vld [vmem:[#allocation2 + $0x80] sm:$0xf] }
   0xc   :  { %203 = vmatpush.bf16.msra.mxu0 %v1251_v10  ;;  %295 = vmatpush.bf16.msra.mxu3 %v1251_v10  ;;  %v1105_v26 = vld [vmem:[#allocation2 + $0xa0] sm:$0xf0]  ;;  %v1102_v30 = vld [vmem:[#allocation2 + $0x88] sm:$0xf0]  ;;  %v1274_v31 = vor.u32 %v1097_v24, %v997_v25  ;;  %v983_v32 = vld [vmem:[#allocation2 + $0x48] sm:$0xf] }
   0xd   :  { %216 = vmatpush.bf16.msra.mxu1 %v1255_v11  ;;  %228 = vmatpush.bf16.msra.mxu2 %v1264_v22  ;;  %v1267_v27 = vor.u32 %v1105_v26, %v1027_v23  ;;  %v1095_v33 = vld [vmem:[#allocation2 + $0x50] sm:$0xf0]  ;;  %v1094_v34 = vld [vmem:[#allocation2 + $0x4c] sm:$0xf]  ;;  %v985_v35 = vld [vmem:[#allocation2 + $0x54] sm:$0xf0]  ;;  %v1277_v36 = vor.u32 %v1102_v30, %v1015_v29 }
   0xe   :  { %v1280_v37 = vor.u32 %v1095_v33, %v983_v32  ;;  %v1003_v38 = vld [vmem:[#allocation2 + $0x68] sm:$0xf]  ;;  %v1099_v39 = vld [vmem:[#allocation2 + $0x70] sm:$0xf0]  ;;  %v1284_v40 = vor.u32 %v1094_v34, %v985_v35  ;;  %v971_v41 = vld [vmem:[#allocation2 + $0x30] sm:$0xf] }
   0xf   :  { %v1092_v42 = vld [vmem:[#allocation2 + $0x38] sm:$0xf0]  ;;  %v1091_v43 = vld [vmem:[#allocation2 + $0x34] sm:$0xf]  ;;  %v973_v44 = vld [vmem:[#allocation2 + $0x3c] sm:$0xf0]  ;;  %v1287_v45 = vor.u32 %v1099_v39, %v1003_v38 }
  0x10   :  { %204 = vmatpush.bf16.msra.mxu0 %v1258_v17  ;;  %296 = vmatpush.bf16.msra.mxu3 %v1258_v17  ;;  %v1290_v46 = vor.u32 %v1092_v42, %v971_v41  ;;  %v991_v47 = vld [vmem:[#allocation2 + $0x50] sm:$0xf]  ;;  %v1096_v48 = vld [vmem:[#allocation2 + $0x58] sm:$0xf0]  ;;  %v1294_v49 = vor.u32 %v1091_v43, %v973_v44  ;;  %v959_v50 = vld [vmem:[#allocation2 + $0x18] sm:$0xf] }
  0x11   :  { %217 = vmatpush.bf16.msra.mxu1 %v1262_v19  ;;  %229 = vmatpush.bf16.msra.mxu2 %v1267_v27  ;;  %v1089_v51 = vld [vmem:[#allocation2 + $0x20] sm:$0xf0]  ;;  %v1088_v52 = vld [vmem:[#allocation2 + $0x1c] sm:$0xf]  ;;  %v961_v53 = vld [vmem:[#allocation2 + $0x24] sm:$0xf0]  ;;  %v1297_v54 = vor.u32 %v1096_v48, %v991_v47 }
  0x12   :  { %v1300_v55 = vor.u32 %v1089_v51, %v959_v50  ;;  %v979_v56 = vld [vmem:[#allocation2 + $0x38] sm:$0xf]  ;;  %v1093_v57 = vld [vmem:[#allocation2 + $0x40] sm:$0xf0]  ;;  %v1304_v58 = vor.u32 %v1088_v52, %v961_v53  ;;  %v947_v59 = vld [vmem:[#allocation2] sm:$0xf] }
  0x13   :  { %v1086_v60 = vld [vmem:[#allocation2 + $0x8] sm:$0xf0]  ;;  %v1085_v61 = vld [vmem:[#allocation2 + $0x4] sm:$0xf]  ;;  %v949_v62 = vld [vmem:[#allocation2 + $0xc] sm:$0xf0]  ;;  %v1307_v63 = vor.u32 %v1093_v57, %v979_v56 }
  0x14   :  { %205 = vmatpush.bf16.msra.mxu0 %v1270_v28  ;;  %297 = vmatpush.bf16.msra.mxu3 %v1270_v28  ;;  %v1310_v0 = vor.u32 %v1086_v60, %v947_v59  ;;  %v967_v1 = vld [vmem:[#allocation2 + $0x20] sm:$0xf]  ;;  %v1090_v2 = vld [vmem:[#allocation2 + $0x28] sm:$0xf0]  ;;  %v1314_v4 = vor.u32 %v1085_v61, %v949_v62  ;;  %v955_v6 = vld [vmem:[#allocation2 + $0x8] sm:$0xf] }
  0x15   :  { %218 = vmatpush.bf16.msra.mxu1 %v1274_v31  ;;  %230 = vmatpush.bf16.msra.mxu2 %v1277_v36  ;;  %v1317_v5 = vor.u32 %v1090_v2, %v967_v1  ;;  %v1087_v8 = vld [vmem:[#allocation2 + $0x10] sm:$0xf0]  ;;  %v1222_v9 = vmov 0   ;;  %v63_v13 = vld [vmem:[%s1659_s2] sm:$0x7]  ;;  %v65_v21 = vld [vmem:[%s1657_s0 + $0x8] sm:$0xff] }
  0x16   :  { %v1326_v12 = vor.u32 %v1087_v8, %v955_v6  ;;  %v1385_v14 = vperm.slane %v63_v13, 0  ;;  %v1387_v15 = vperm.slane %v63_v13, 1  ;;  %v64_v16 = vld [vmem:[%s1657_s0] sm:$0xff]  ;;  %v1397_v50 = vperm.slane %v63_v13, 2  ;;  %v66_v2 = vld [vmem:[%s1657_s0 + $0x10] sm:$0xff] }
  0x18   :  { %206 = vmatpush.bf16.msra.mxu0 %v1280_v37  ;;  %298 = vmatpush.bf16.msra.mxu3 %v1280_v37 }
  0x19   :  { %219 = vmatpush.bf16.msra.mxu1 %v1284_v40  ;;  %231 = vmatpush.bf16.msra.mxu2 %v1287_v45 }
  0x1c   :  { %207 = vmatpush.bf16.msra.mxu0 %v1290_v46  ;;  %299 = vmatpush.bf16.msra.mxu3 %v1290_v46 }
  0x1d   :  { %220 = vmatpush.bf16.msra.mxu1 %v1294_v49  ;;  %232 = vmatpush.bf16.msra.mxu2 %v1297_v54 }
  0x20   :  { %208 = vmatpush.bf16.msra.mxu0 %v1300_v55  ;;  %300 = vmatpush.bf16.msra.mxu3 %v1300_v55 }
  0x21   :  { %221 = vmatpush.bf16.msra.mxu1 %v1304_v58  ;;  %233 = vmatpush.bf16.msra.mxu2 %v1307_v63 }
  0x24   :  { %209 = vmatpush.bf16.msra.mxu0 %v1310_v0  ;;  %301 = vmatpush.bf16.msra.mxu3 %v1310_v0 }
  0x25   :  { %222 = vmatpush.bf16.msra.mxu1 %v1314_v4  ;;  %234 = vmatpush.bf16.msra.mxu2 %v1317_v5 }
  0x27   :  { %210 = vmatmul.bf16.vlgmr.msra.gmra.mxu0 %v1222_v9 }
  0x28   :  { %307 = vmatpush.bf16.msrb.mxu0 %v1248_v7  ;;  %400 = vmatpush.bf16.msrb.mxu3 %v1248_v7 }
  0x29   :  { %320 = vmatpush.bf16.msrb.mxu1 %v1264_v22  ;;  %235 = vmatpush.bf16.msra.mxu2 %v1326_v12 }
  0x2a   :  { %223 = vmatmul.bf16.vlgmr.msra.gmra.mxu1 %v1222_v9 }
  0x2c   :  { %308 = vmatpush.bf16.msrb.mxu0 %v1255_v11  ;;  %401 = vmatpush.bf16.msrb.mxu3 %v1255_v11 }
  0x2d   :  { %321 = vmatpush.bf16.msrb.mxu1 %v1267_v27  ;;  %387 = vmatpush.bf16.msrb.mxu2 %v1246_v3 }
  0x2e   :  { %236 = vmatmul.bf16.vlgmr.msra.gmra.mxu2 %v1222_v9 }
  0x30   :  { %309 = vmatpush.bf16.msrb.mxu0 %v1262_v19  ;;  %402 = vmatpush.bf16.msrb.mxu3 %v1262_v19 }
  0x31   :  { %322 = vmatpush.bf16.msrb.mxu1 %v1277_v36  ;;  %388 = vmatpush.bf16.msrb.mxu2 %v1251_v10 }
  0x34   :  { %310 = vmatpush.bf16.msrb.mxu0 %v1274_v31  ;;  %403 = vmatpush.bf16.msrb.mxu3 %v1274_v31 }
  0x35   :  { %323 = vmatpush.bf16.msrb.mxu1 %v1287_v45  ;;  %389 = vmatpush.bf16.msrb.mxu2 %v1258_v17 }
  0x38   :  { %311 = vmatpush.bf16.msrb.mxu0 %v1284_v40  ;;  %404 = vmatpush.bf16.msrb.mxu3 %v1284_v40 }
  0x39   :  { %324 = vmatpush.bf16.msrb.mxu1 %v1297_v54  ;;  %390 = vmatpush.bf16.msrb.mxu2 %v1270_v28 }
  0x3c   :  { %312 = vmatpush.bf16.msrb.mxu0 %v1294_v49  ;;  %405 = vmatpush.bf16.msrb.mxu3 %v1294_v49 }
  0x3d   :  { %325 = vmatpush.bf16.msrb.mxu1 %v1307_v63  ;;  %391 = vmatpush.bf16.msrb.mxu2 %v1280_v37 }
  0x40   :  { %313 = vmatpush.bf16.msrb.mxu0 %v1304_v58  ;;  %406 = vmatpush.bf16.msrb.mxu3 %v1304_v58 }
  0x41   :  { %326 = vmatpush.bf16.msrb.mxu1 %v1317_v5  ;;  %392 = vmatpush.bf16.msrb.mxu2 %v1290_v46 }
  0x44   :  { %314 = vmatpush.bf16.msrb.mxu0 %v1314_v4  ;;  %407 = vmatpush.bf16.msrb.mxu3 %v1314_v4 }
  0x45   :  { %327 = vmatpush.bf16.msrb.mxu1 %v1326_v12  ;;  %393 = vmatpush.bf16.msrb.mxu2 %v1300_v55 }
  0x48   :  { %413 = vmatpush.bf16.msra.mxu0 %v1264_v22 }
  0x49   :  { %480 = vmatpush.bf16.msra.mxu1 %v1246_v3  ;;  %394 = vmatpush.bf16.msrb.mxu2 %v1310_v0 }
  0x4c   :  { %414 = vmatpush.bf16.msra.mxu0 %v1267_v27 }
  0x4d   :  { %481 = vmatpush.bf16.msra.mxu1 %v1251_v10  ;;  %493 = vmatpush.bf16.msra.mxu2 %v1248_v7 }
  0x50   :  { %415 = vmatpush.bf16.msra.mxu0 %v1277_v36 }
  0x51   :  { %482 = vmatpush.bf16.msra.mxu1 %v1258_v17  ;;  %494 = vmatpush.bf16.msra.mxu2 %v1255_v11 }
  0x54   :  { %416 = vmatpush.bf16.msra.mxu0 %v1287_v45 }
  0x55   :  { %483 = vmatpush.bf16.msra.mxu1 %v1270_v28  ;;  %495 = vmatpush.bf16.msra.mxu2 %v1262_v19 }
  0x58   :  { %417 = vmatpush.bf16.msra.mxu0 %v1297_v54 }
  0x59   :  { %484 = vmatpush.bf16.msra.mxu1 %v1280_v37  ;;  %496 = vmatpush.bf16.msra.mxu2 %v1274_v31 }
  0x5c   :  { %418 = vmatpush.bf16.msra.mxu0 %v1307_v63 }
  0x5d   :  { %485 = vmatpush.bf16.msra.mxu1 %v1290_v46  ;;  %497 = vmatpush.bf16.msra.mxu2 %v1284_v40 }
  0x60   :  { %419 = vmatpush.bf16.msra.mxu0 %v1317_v5 }
  0x61   :  { %486 = vmatpush.bf16.msra.mxu1 %v1300_v55  ;;  %498 = vmatpush.bf16.msra.mxu2 %v1294_v49 }
  0x64   :  { %420 = vmatpush.bf16.msra.mxu0 %v1326_v12 }
  0x65   :  { %487 = vmatpush.bf16.msra.mxu1 %v1310_v0  ;;  %499 = vmatpush.bf16.msra.mxu2 %v1304_v58 }
  0x69   :  { %500 = vmatpush.bf16.msra.mxu2 %v1314_v4 }
  0xa4   :  { %v211_v18 = vpop.f32.mrf.mxu0 }
  0xa5   :  { %v212_v20 = vadd.f32 %v211_v18, %v1385_v14 }
  0xa7   :  { %v224_v23 = vpop.f32.mrf.mxu1  ;;  %v241_v25 = vadd.f32 %v212_v20, %v64_v16 }
  0xa8   :  { %v225_v24 = vadd.f32 %v224_v23, %v1387_v15 }
  0xa9   :  { %v1041_v29 = vmul.f32 -1.442695, %v241_v25 }
  0xaa   :  { %v261_v26 = vadd.f32 %v225_v24, %v65_v21 }
  0xab   :  { %1113 = vpow2.f32 %v1041_v29 }
  0xac   :  { %v1042_v30 = vmul.f32 -1.442695, %v261_v26  ;;  %v213_v32 = vpop.f32.mrf.mxu0 }
  0xae   :  { %1115 = vpow2.f32 %v1042_v30 }
  0xaf   :  { %v226_v33 = vpop.f32.mrf.mxu1 }
  0xb0   :  { %v1044_v33 = vld [vmem:[%s1657_s0 + $0x20] sm:$0xff] }
  0xb1   :  { %v1114_v34 = vpop.eup %1113  ;;  %v237_v35 = vpop.f32.mrf.mxu2 }
  0xb2   :  { %v245_v39 = vadd.f32 1.0, %v1114_v34  ;;  %v238_v60 = vadd.f32 %v237_v35, %v1397_v50 }
  0xb4   :  { %v1116_v38 = vpop.eup %1115  ;;  %1117 = vrcp.f32 %v245_v39  ;;  %v257_v53 = vand.u32 2147483648, %v245_v39  ;;  %v255_v57 = vand.u32 2147483647, %v245_v39  ;;  %vm251_vm1 = vweird.f32 %v245_v39 }
  0xb5   :  { %v265_v41 = vadd.f32 1.0, %v1116_v38 }
  0xb6   :  { %v258_v62 = vor.u32 1.1754944e-38, %v257_v53  ;;  %vm256_vm3 = vcmp.eq.f32.partialorder %v255_v57, 8.507059e+37 }
  0xb7   :  { %1119 = vrcp.f32 %v265_v41  ;;  %vm271_vm4 = vweird.f32 %v265_v41  ;;  %v277_v13 = vand.u32 2147483648, %v265_v41  ;;  %v275_v16 = vand.u32 2147483647, %v265_v41 }
  0xb9   :  { %v239_v42 = vpop.f32.mrf.mxu2  ;;  %v278_v21 = vor.u32 1.1754944e-38, %v277_v13  ;;  %vm276_vm7 = vcmp.eq.f32.partialorder %v275_v16, 8.507059e+37 }
  0xba   :  { %v1118_v43 = vpop.eup %1117  ;;  %v1043_v42 = vld [vmem:[%s1657_s0 + $0x18] sm:$0xff] }
  0xbb   :  { %v247_v47 = vmul.f32 %v1118_v43, %v245_v39  ;;  %vm252_vm0 = vweird.f32 %v1118_v43 }
  0xbc   :  { %vm253_vm2 = vmor %vm251_vm1, %vm252_vm0 }
  0xbd   :  { %v1120_v44 = vpop.eup %1119  ;;  %v248_v51 = vsub.f32 1.0, %v247_v47 }
  0xbe   :  { %v267_v48 = vmul.f32 %v1120_v44, %v265_v41  ;;  %vm272_vm5 = vweird.f32 %v1120_v44 }
  0xbf   :  { %v249_v56 = vmul.f32 %v1118_v43, %v248_v51  ;;  %vm273_vm6 = vmor %vm271_vm4, %vm272_vm5 }
  0xc0   :  { %v268_v52 = vsub.f32 1.0, %v267_v48 }
  0xc1   :  { %v250_v61 = vadd.f32 %v1118_v43, %v249_v56 }
  0xc2   :  { %v269_v59 = vmul.f32 %v1120_v44, %v268_v52 }
  0xc3   :  { %v254_v1 = vsel %vm253_vm2, %v1118_v43, %v250_v61 }
  0xc4   :  { %v259_v6 = vsel %vm256_vm3, %v258_v62, %v254_v1  ;;  %v270_v8 = vadd.f32 %v1120_v44, %v269_v59 }
  0xc5   :  { %v281_v9 = vmul.f32 %v259_v6, %v238_v60 }
  0xc6   :  { %v274_v20 = vsel %vm273_vm6, %v1120_v44, %v270_v8 }
  0xc7   :  { %v282_v18 = vadd.f32 %v281_v9, %v66_v2  ;;  %v279_v23 = vsel %vm276_vm7, %v278_v21, %v274_v20 }
  0xc8   :  { %v284_v24 = vsub.f32 1.0, %v279_v23  ;;  %v286_v29 = vmul.f32 0.0, %v279_v23 }
  0xc9   :  { %1121 = vtanh.f32 %v282_v18 }
  0xcf   :  { %v1122_v25 = vpop.eup %1121 }
  0xd0   :  { %v285_v26 = vmul.f32 %v1122_v25, %v284_v24 }
  0xd2   :  { %v1403_v30 = vadd.f32 %v286_v29, %v285_v26  ;;  %v1045_v26 = vld [vmem:[%s1657_s0 + $0x28] sm:$0xff] }
  0xd4   :  { %288 = vst [vmem:[%s1660_s3] sm:$0xff] %v1403_v30  ;;  %v293_v32 = vpack.c.bf16 %v1403_v30, %v1403_v30 }
  0xd6   :  { %302 = vmatmul.bf16.vlgmr.msra.gmra.mxu3 %v293_v32  ;;  %315 = vmatmul.bf16.vlgmr.msrb.gmra.mxu0 %v293_v32 }
  0xd7   :  { %328 = vmatmul.bf16.vlgmr.msrb.gmra.mxu1 %v293_v32  ;;  %506 = vmatpush.bf16.msra.mxu3 %v1264_v22 }
  0xd8   :  { %573 = vmatpush.bf16.msrb.mxu0 %v1246_v3  ;;  %586 = vmatpush.bf16.msrb.mxu1 %v1248_v7 }
  0xdb   :  { %507 = vmatpush.bf16.msra.mxu3 %v1267_v27 }
  0xdc   :  { %574 = vmatpush.bf16.msrb.mxu0 %v1251_v10  ;;  %587 = vmatpush.bf16.msrb.mxu1 %v1255_v11 }
  0xdf   :  { %508 = vmatpush.bf16.msra.mxu3 %v1277_v36 }
  0xe0   :  { %575 = vmatpush.bf16.msrb.mxu0 %v1258_v17  ;;  %588 = vmatpush.bf16.msrb.mxu1 %v1262_v19 }
  0xe3   :  { %509 = vmatpush.bf16.msra.mxu3 %v1287_v45 }
  0xe4   :  { %576 = vmatpush.bf16.msrb.mxu0 %v1270_v28  ;;  %589 = vmatpush.bf16.msrb.mxu1 %v1274_v31 }
  0xe7   :  { %510 = vmatpush.bf16.msra.mxu3 %v1297_v54 }
  0xe8   :  { %577 = vmatpush.bf16.msrb.mxu0 %v1280_v37  ;;  %590 = vmatpush.bf16.msrb.mxu1 %v1284_v40 }
  0xeb   :  { %511 = vmatpush.bf16.msra.mxu3 %v1307_v63 }
  0xec   :  { %578 = vmatpush.bf16.msrb.mxu0 %v1290_v46  ;;  %591 = vmatpush.bf16.msrb.mxu1 %v1294_v49 }
  0xef   :  { %512 = vmatpush.bf16.msra.mxu3 %v1317_v5 }
  0xf0   :  { %579 = vmatpush.bf16.msrb.mxu0 %v1300_v55  ;;  %592 = vmatpush.bf16.msrb.mxu1 %v1304_v58 }
  0xf3   :  { %513 = vmatpush.bf16.msra.mxu3 %v1326_v12 }
  0xf4   :  { %580 = vmatpush.bf16.msrb.mxu0 %v1310_v0  ;;  %593 = vmatpush.bf16.msrb.mxu1 %v1314_v4 }
 0x153   :  { %v316_v34 = vpop.f32.mrf.mxu0 }
 0x154   :  { %v317_v35 = vadd.f32 %v316_v34, %v1387_v15  ;;  %v329_v38 = vpop.f32.mrf.mxu1 }
 0x155   :  { %v330_v23 = vadd.f32 %v329_v38, %v1397_v50 }
 0x156   :  { %v353_v39 = vadd.f32 %v1044_v33, %v317_v35 }
 0x158   :  { %v1047_v41 = vmul.f32 -1.442695, %v353_v39 }
 0x159   :  { %v303_v43 = vpop.f32.mrf.mxu3 }
 0x15a   :  { %1123 = vpow2.f32 %v1047_v41  ;;  %v304_v44 = vadd.f32 %v303_v43, %v1385_v14 }
 0x15b   :  { %v318_v47 = vpop.f32.mrf.mxu0 }
 0x15c   :  { %v333_v48 = vadd.f32 %v1043_v42, %v304_v44  ;;  %v331_v51 = vpop.f32.mrf.mxu1 }
 0x15e   :  { %v1046_v52 = vmul.f32 -1.442695, %v333_v48 }
 0x160   :  { %v1124_v53 = vpop.eup %1123  ;;  %1125 = vpow2.f32 %v1046_v52  ;;  %v1049_v52 = vld [vmem:[%s1657_s0 + $0x30] sm:$0xff] }
 0x161   :  { %v357_v56 = vadd.f32 1.0, %v1124_v53  ;;  %v305_v57 = vpop.f32.mrf.mxu3 }
 0x163   :  { %1127 = vrcp.f32 %v357_v56  ;;  %v369_v32 = vand.u32 2147483648, %v357_v56  ;;  %vm363_vm13 = vweird.f32 %v357_v56  ;;  %v367_v34 = vand.u32 2147483647, %v357_v56 }
 0x165   :  { %v370_v41 = vor.u32 1.1754944e-38, %v369_v32  ;;  %vm368_vm15 = vcmp.eq.f32.partialorder %v367_v34, 8.507059e+37 }
 0x166   :  { %v1126_v59 = vpop.eup %1125 }
 0x167   :  { %v337_v60 = vadd.f32 1.0, %v1126_v59 }
 0x169   :  { %1129 = vrcp.f32 %v337_v60  ;;  %v1128_v61 = vpop.eup %1127  ;;  %v349_v9 = vand.u32 2147483648, %v337_v60  ;;  %v347_v16 = vand.u32 2147483647, %v337_v60  ;;  %vm343_vm9 = vweird.f32 %v337_v60 }
 0x16a   :  { %v359_v62 = vmul.f32 %v1128_v61, %v357_v56  ;;  %vm364_vm12 = vweird.f32 %v1128_v61  ;;  %v1050_v56 = vld [vmem:[%s1657_s0 + $0x38] sm:$0xff] }
 0x16b   :  { %v350_v21 = vor.u32 1.1754944e-38, %v349_v9  ;;  %vm348_vm11 = vcmp.eq.f32.partialorder %v347_v16, 8.507059e+37  ;;  %vm365_vm14 = vmor %vm363_vm13, %vm364_vm12 }
 0x16c   :  { %v360_v6 = vsub.f32 1.0, %v359_v62 }
 0x16e   :  { %v361_v18 = vmul.f32 %v1128_v61, %v360_v6 }
 0x16f   :  { %v1130_v1 = vpop.eup %1129 }
 0x170   :  { %v339_v2 = vmul.f32 %v1130_v1, %v337_v60  ;;  %vm344_vm8 = vweird.f32 %v1130_v1  ;;  %v362_v29 = vadd.f32 %v1128_v61, %v361_v18 }
 0x171   :  { %vm345_vm10 = vmor %vm343_vm9, %vm344_vm8 }
 0x172   :  { %v340_v8 = vsub.f32 1.0, %v339_v2  ;;  %v366_v39 = vsel %vm365_vm14, %v1128_v61, %v362_v29 }
 0x173   :  { %v371_v38 = vsel %vm368_vm15, %v370_v41, %v366_v39 }
 0x174   :  { %v341_v13 = vmul.f32 %v1130_v1, %v340_v8  ;;  %v376_v42 = vsub.f32 1.0, %v371_v38  ;;  %v378_v47 = vmul.f32 %v371_v38, %v1403_v30 }
 0x176   :  { %v342_v20 = vadd.f32 %v1130_v1, %v341_v13 }
 0x178   :  { %v346_v24 = vsel %vm345_vm10, %v1130_v1, %v342_v20 }
 0x179   :  { %v351_v25 = vsel %vm348_vm11, %v350_v21, %v346_v24 }
 0x17a   :  { %v373_v33 = vmul.f32 %v351_v25, %v330_v23 }
 0x17c   :  { %v374_v35 = vadd.f32 %v1045_v26, %v373_v33 }
 0x17e   :  { %1131 = vtanh.f32 %v374_v35 }
 0x184   :  { %v1132_v43 = vpop.eup %1131 }
 0x185   :  { %v377_v44 = vmul.f32 %v1132_v43, %v376_v42 }
 0x187   :  { %v1448_v48 = vadd.f32 %v378_v47, %v377_v44  ;;  %v1051_v44 = vld [vmem:[%s1657_s0 + $0x40] sm:$0xff] }
 0x189   :  { %1048 = vst [vmem:[%s1660_s3 + $0x8] sm:$0xff] %v1448_v48  ;;  %v386_v51 = vpack.c.bf16 %v1448_v48, %v1448_v48 }
 0x18b   :  { %395 = vmatmul.bf16.vlgmr.msrb.gmra.mxu2 %v386_v51  ;;  %408 = vmatmul.bf16.vlgmr.msrb.gmra.mxu3 %v386_v51 }
 0x18c   :  { %421 = vmatmul.bf16.vlgmr.msra.gmra.mxu0 %v386_v51  ;;  %599 = vmatpush.bf16.msrb.mxu2 %v1264_v22 }
 0x18d   :  { %666 = vmatpush.bf16.msrb.mxu3 %v1246_v3  ;;  %679 = vmatpush.bf16.msra.mxu0 %v1248_v7 }
 0x190   :  { %600 = vmatpush.bf16.msrb.mxu2 %v1267_v27 }
 0x191   :  { %667 = vmatpush.bf16.msrb.mxu3 %v1251_v10  ;;  %680 = vmatpush.bf16.msra.mxu0 %v1255_v11 }
 0x194   :  { %601 = vmatpush.bf16.msrb.mxu2 %v1277_v36 }
 0x195   :  { %668 = vmatpush.bf16.msrb.mxu3 %v1258_v17  ;;  %681 = vmatpush.bf16.msra.mxu0 %v1262_v19 }
 0x198   :  { %602 = vmatpush.bf16.msrb.mxu2 %v1287_v45 }
 0x199   :  { %669 = vmatpush.bf16.msrb.mxu3 %v1270_v28  ;;  %682 = vmatpush.bf16.msra.mxu0 %v1274_v31 }
 0x19c   :  { %603 = vmatpush.bf16.msrb.mxu2 %v1297_v54 }
 0x19d   :  { %670 = vmatpush.bf16.msrb.mxu3 %v1280_v37  ;;  %683 = vmatpush.bf16.msra.mxu0 %v1284_v40 }
 0x1a0   :  { %604 = vmatpush.bf16.msrb.mxu2 %v1307_v63 }
 0x1a1   :  { %671 = vmatpush.bf16.msrb.mxu3 %v1290_v46  ;;  %684 = vmatpush.bf16.msra.mxu0 %v1294_v49 }
 0x1a4   :  { %605 = vmatpush.bf16.msrb.mxu2 %v1317_v5 }
 0x1a5   :  { %672 = vmatpush.bf16.msrb.mxu3 %v1300_v55  ;;  %685 = vmatpush.bf16.msra.mxu0 %v1304_v58 }
 0x1a8   :  { %606 = vmatpush.bf16.msrb.mxu2 %v1326_v12 }
 0x1a9   :  { %673 = vmatpush.bf16.msrb.mxu3 %v1310_v0  ;;  %686 = vmatpush.bf16.msra.mxu0 %v1314_v4 }
 0x209   :  { %v422_v30 = vpop.f32.mrf.mxu0 }
 0x20a   :  { %v423_v38 = vadd.f32 %v422_v30, %v1397_v50 }
 0x20e   :  { %v396_v53 = vpop.f32.mrf.mxu2  ;;  %v409_v57 = vpop.f32.mrf.mxu3 }
 0x20f   :  { %v397_v59 = vadd.f32 %v396_v53, %v1385_v14  ;;  %v410_v60 = vadd.f32 %v409_v57, %v1387_v15 }
 0x211   :  { %v426_v61 = vadd.f32 %v1049_v52, %v397_v59  ;;  %v446_v62 = vadd.f32 %v1050_v56, %v410_v60  ;;  %v424_v1 = vpop.f32.mrf.mxu0 }
 0x213   :  { %v1052_v2 = vmul.f32 -1.442695, %v426_v61  ;;  %v1053_v6 = vmul.f32 -1.442695, %v446_v62 }
 0x215   :  { %1133 = vpow2.f32 %v1052_v2 }
 0x216   :  { %1135 = vpow2.f32 %v1053_v6  ;;  %v398_v8 = vpop.f32.mrf.mxu2  ;;  %v411_v9 = vpop.f32.mrf.mxu3 }
 0x21b   :  { %v1134_v13 = vpop.eup %1133 }
 0x21c   :  { %v1136_v16 = vpop.eup %1135  ;;  %v430_v18 = vadd.f32 1.0, %v1134_v13 }
 0x21d   :  { %v450_v20 = vadd.f32 1.0, %v1136_v16 }
 0x21e   :  { %1137 = vrcp.f32 %v430_v18  ;;  %v442_v29 = vand.u32 2147483648, %v430_v18  ;;  %v440_v34 = vand.u32 2147483647, %v430_v18  ;;  %vm436_vm1 = vweird.f32 %v430_v18 }
 0x21f   :  { %1139 = vrcp.f32 %v450_v20  ;;  %v462_v52 = vand.u32 2147483648, %v450_v20  ;;  %vm456_vm5 = vweird.f32 %v450_v20  ;;  %v460_v53 = vand.u32 2147483647, %v450_v20 }
 0x220   :  { %v443_v41 = vor.u32 1.1754944e-38, %v442_v29  ;;  %vm441_vm3 = vcmp.eq.f32.partialorder %v440_v34, 8.507059e+37 }
 0x221   :  { %v463_v59 = vor.u32 1.1754944e-38, %v462_v52  ;;  %vm461_vm7 = vcmp.eq.f32.partialorder %v460_v53, 8.507059e+37 }
 0x224   :  { %v1138_v21 = vpop.eup %1137 }
 0x225   :  { %v1140_v23 = vpop.eup %1139  ;;  %v432_v24 = vmul.f32 %v1138_v21, %v430_v18  ;;  %vm437_vm0 = vweird.f32 %v1138_v21  ;;  %v1056_v18 = vld [vmem:[%s1657_s0 + $0x50] sm:$0xff] }
 0x226   :  { %v452_v25 = vmul.f32 %v1140_v23, %v450_v20  ;;  %vm438_vm2 = vmor %vm436_vm1, %vm437_vm0  ;;  %vm457_vm4 = vweird.f32 %v1140_v23 }
 0x227   :  { %v433_v26 = vsub.f32 1.0, %v432_v24  ;;  %vm458_vm6 = vmor %vm456_vm5, %vm457_vm4 }
 0x228   :  { %v453_v32 = vsub.f32 1.0, %v452_v25 }
 0x229   :  { %v434_v33 = vmul.f32 %v1138_v21, %v433_v26 }
 0x22a   :  { %v454_v35 = vmul.f32 %v1140_v23, %v453_v32 }
 0x22b   :  { %v435_v39 = vadd.f32 %v1138_v21, %v434_v33 }
 0x22c   :  { %v455_v47 = vadd.f32 %v1140_v23, %v454_v35 }
 0x22d   :  { %v439_v42 = vsel %vm438_vm2, %v1138_v21, %v435_v39 }
 0x22e   :  { %v444_v43 = vsel %vm441_vm3, %v443_v41, %v439_v42  ;;  %v459_v57 = vsel %vm458_vm6, %v1140_v23, %v455_v47 }
 0x22f   :  { %v466_v51 = vmul.f32 %v444_v43, %v423_v38  ;;  %v464_v30 = vsel %vm461_vm7, %v463_v59, %v459_v57 }
 0x230   :  { %v469_v60 = vsub.f32 1.0, %v464_v30  ;;  %v471_v1 = vmul.f32 %v464_v30, %v1448_v48  ;;  %v1055_v48 = vld [vmem:[%s1657_s0 + $0x48] sm:$0xff] }
 0x231   :  { %v467_v56 = vadd.f32 %v1051_v44, %v466_v51 }
 0x233   :  { %1141 = vtanh.f32 %v467_v56 }
 0x239   :  { %v1142_v61 = vpop.eup %1141 }
 0x23a   :  { %v470_v62 = vmul.f32 %v1142_v61, %v469_v60  ;;  %v1057_v60 = vld [vmem:[%s1657_s0 + $0x58] sm:$0xff] }
 0x23c   :  { %v1493_v2 = vadd.f32 %v471_v1, %v470_v62 }
 0x23e   :  { %1054 = vst [vmem:[%s1660_s3 + $0x10] sm:$0xff] %v1493_v2  ;;  %v479_v6 = vpack.c.bf16 %v1493_v2, %v1493_v2 }
 0x240   :  { %488 = vmatmul.bf16.vlgmr.msra.gmra.mxu1 %v479_v6  ;;  %501 = vmatmul.bf16.vlgmr.msra.gmra.mxu2 %v479_v6 }
 0x241   :  { %514 = vmatmul.bf16.vlgmr.msra.gmra.mxu3 %v479_v6  ;;  %692 = vmatpush.bf16.msra.mxu1 %v1264_v22 }
 0x242   :  { %759 = vmatpush.bf16.msra.mxu2 %v1246_v3  ;;  %772 = vmatpush.bf16.msra.mxu3 %v1248_v7 }
 0x245   :  { %693 = vmatpush.bf16.msra.mxu1 %v1267_v27 }
 0x246   :  { %760 = vmatpush.bf16.msra.mxu2 %v1251_v10  ;;  %773 = vmatpush.bf16.msra.mxu3 %v1255_v11 }
 0x249   :  { %694 = vmatpush.bf16.msra.mxu1 %v1277_v36 }
 0x24a   :  { %761 = vmatpush.bf16.msra.mxu2 %v1258_v17  ;;  %774 = vmatpush.bf16.msra.mxu3 %v1262_v19 }
 0x24d   :  { %695 = vmatpush.bf16.msra.mxu1 %v1287_v45 }
 0x24e   :  { %762 = vmatpush.bf16.msra.mxu2 %v1270_v28  ;;  %775 = vmatpush.bf16.msra.mxu3 %v1274_v31 }
 0x251   :  { %696 = vmatpush.bf16.msra.mxu1 %v1297_v54 }
 0x252   :  { %763 = vmatpush.bf16.msra.mxu2 %v1280_v37  ;;  %776 = vmatpush.bf16.msra.mxu3 %v1284_v40 }
 0x255   :  { %697 = vmatpush.bf16.msra.mxu1 %v1307_v63 }
 0x256   :  { %764 = vmatpush.bf16.msra.mxu2 %v1290_v46  ;;  %777 = vmatpush.bf16.msra.mxu3 %v1294_v49 }
 0x259   :  { %698 = vmatpush.bf16.msra.mxu1 %v1317_v5 }
 0x25a   :  { %765 = vmatpush.bf16.msra.mxu2 %v1300_v55  ;;  %778 = vmatpush.bf16.msra.mxu3 %v1304_v58 }
 0x25d   :  { %699 = vmatpush.bf16.msra.mxu1 %v1326_v12 }
 0x25e   :  { %766 = vmatpush.bf16.msra.mxu2 %v1310_v0  ;;  %779 = vmatpush.bf16.msra.mxu3 %v1314_v4 }
 0x2bd   :  { %v489_v8 = vpop.f32.mrf.mxu1 }
 0x2be   :  { %v490_v9 = vadd.f32 %v489_v8, %v1385_v14 }
 0x2c0   :  { %v519_v13 = vadd.f32 %v1055_v48, %v490_v9 }
 0x2c2   :  { %v1058_v16 = vmul.f32 -1.442695, %v519_v13 }
 0x2c3   :  { %v502_v20 = vpop.f32.mrf.mxu2 }
 0x2c4   :  { %1143 = vpow2.f32 %v1058_v16  ;;  %v503_v21 = vadd.f32 %v502_v20, %v1387_v15  ;;  %v515_v23 = vpop.f32.mrf.mxu3 }
 0x2c5   :  { %v491_v24 = vpop.f32.mrf.mxu1  ;;  %v516_v59 = vadd.f32 %v515_v23, %v1397_v50 }
 0x2c6   :  { %v539_v25 = vadd.f32 %v1056_v18, %v503_v21 }
 0x2c8   :  { %v1059_v26 = vmul.f32 -1.442695, %v539_v25 }
 0x2ca   :  { %v1144_v29 = vpop.eup %1143  ;;  %1145 = vpow2.f32 %v1059_v26 }
 0x2cb   :  { %v523_v32 = vadd.f32 1.0, %v1144_v29  ;;  %v504_v33 = vpop.f32.mrf.mxu2 }
 0x2cc   :  { %v517_v34 = vpop.f32.mrf.mxu3 }
 0x2cd   :  { %1147 = vrcp.f32 %v523_v32  ;;  %v535_v43 = vand.u32 2147483648, %v523_v32  ;;  %v533_v47 = vand.u32 2147483647, %v523_v32  ;;  %vm529_vm9 = vweird.f32 %v523_v32 }
 0x2cf   :  { %v536_v56 = vor.u32 1.1754944e-38, %v535_v43  ;;  %vm534_vm11 = vcmp.eq.f32.partialorder %v533_v47, 8.507059e+37 }
 0x2d0   :  { %v1146_v35 = vpop.eup %1145 }
 0x2d1   :  { %v543_v39 = vadd.f32 1.0, %v1146_v35 }
 0x2d3   :  { %v1148_v41 = vpop.eup %1147  ;;  %1149 = vrcp.f32 %v543_v39  ;;  %v555_v1 = vand.u32 2147483648, %v543_v39  ;;  %v553_v48 = vand.u32 2147483647, %v543_v39  ;;  %vm549_vm13 = vweird.f32 %v543_v39 }
 0x2d4   :  { %v525_v38 = vmul.f32 %v1148_v41, %v523_v32  ;;  %vm530_vm8 = vweird.f32 %v1148_v41 }
 0x2d5   :  { %vm531_vm10 = vmor %vm529_vm9, %vm530_vm8  ;;  %v556_v13 = vor.u32 1.1754944e-38, %v555_v1  ;;  %vm554_vm15 = vcmp.eq.f32.partialorder %v553_v48, 8.507059e+37 }
 0x2d6   :  { %v526_v42 = vsub.f32 1.0, %v525_v38 }
 0x2d8   :  { %v527_v44 = vmul.f32 %v1148_v41, %v526_v42 }
 0x2d9   :  { %v1150_v51 = vpop.eup %1149 }
 0x2da   :  { %v545_v52 = vmul.f32 %v1150_v51, %v543_v39  ;;  %v528_v53 = vadd.f32 %v1148_v41, %v527_v44  ;;  %vm550_vm12 = vweird.f32 %v1150_v51 }
 0x2db   :  { %vm551_vm14 = vmor %vm549_vm13, %vm550_vm12 }
 0x2dc   :  { %v546_v57 = vsub.f32 1.0, %v545_v52  ;;  %v532_v30 = vsel %vm531_vm10, %v1148_v41, %v528_v53 }
 0x2dd   :  { %v537_v61 = vsel %vm534_vm11, %v536_v56, %v532_v30  ;;  %v1063_v56 = vld [vmem:[%s1657_s0 + $0x70] sm:$0xff] }
 0x2de   :  { %v547_v62 = vmul.f32 %v1150_v51, %v546_v57  ;;  %v559_v6 = vmul.f32 %v537_v61, %v516_v59 }
 0x2e0   :  { %v548_v8 = vadd.f32 %v1150_v51, %v547_v62  ;;  %v560_v9 = vadd.f32 %v1057_v60, %v559_v6 }
 0x2e2   :  { %v552_v16 = vsel %vm551_vm14, %v1150_v51, %v548_v8  ;;  %1151 = vtanh.f32 %v560_v9 }
 0x2e3   :  { %v557_v18 = vsel %vm554_vm15, %v556_v13, %v552_v16 }
 0x2e4   :  { %v562_v20 = vsub.f32 1.0, %v557_v18  ;;  %v564_v24 = vmul.f32 %v557_v18, %v1493_v2 }
 0x2e8   :  { %v1152_v21 = vpop.eup %1151 }
 0x2e9   :  { %v563_v23 = vmul.f32 %v1152_v21, %v562_v20  ;;  %v1068_v21 = vld [vmem:[%s1657_s0 + $0x80] sm:$0xff] }
 0x2eb   :  { %v1538_v25 = vadd.f32 %v564_v24, %v563_v23 }
 0x2ed   :  { %1060 = vst [vmem:[%s1660_s3 + $0x18] sm:$0xff] %v1538_v25  ;;  %v572_v26 = vpack.c.bf16 %v1538_v25, %v1538_v25 }
 0x2ef   :  { %581 = vmatmul.bf16.vlgmr.msrb.gmra.mxu0 %v572_v26  ;;  %594 = vmatmul.bf16.vlgmr.msrb.gmra.mxu1 %v572_v26 }
 0x2f0   :  { %607 = vmatmul.bf16.vlgmr.msrb.gmra.mxu2 %v572_v26  ;;  %785 = vmatpush.bf16.msrb.mxu0 %v1264_v22 }
 0x2f1   :  { %852 = vmatpush.bf16.msrb.mxu1 %v1246_v3  ;;  %865 = vmatpush.bf16.msrb.mxu2 %v1248_v7  ;;  %v1061_v3 = vld [vmem:[%s1657_s0 + $0x60] sm:$0xff] }
 0x2f4   :  { %786 = vmatpush.bf16.msrb.mxu0 %v1267_v27 }
 0x2f5   :  { %853 = vmatpush.bf16.msrb.mxu1 %v1251_v10  ;;  %866 = vmatpush.bf16.msrb.mxu2 %v1255_v11  ;;  %v1062_v10 = vld [vmem:[%s1657_s0 + $0x68] sm:$0xff] }
 0x2f8   :  { %787 = vmatpush.bf16.msrb.mxu0 %v1277_v36 }
 0x2f9   :  { %854 = vmatpush.bf16.msrb.mxu1 %v1258_v17  ;;  %867 = vmatpush.bf16.msrb.mxu2 %v1262_v19 }
 0x2fc   :  { %788 = vmatpush.bf16.msrb.mxu0 %v1287_v45 }
 0x2fd   :  { %855 = vmatpush.bf16.msrb.mxu1 %v1270_v28  ;;  %868 = vmatpush.bf16.msrb.mxu2 %v1274_v31 }
 0x300   :  { %789 = vmatpush.bf16.msrb.mxu0 %v1297_v54 }
 0x301   :  { %856 = vmatpush.bf16.msrb.mxu1 %v1280_v37  ;;  %869 = vmatpush.bf16.msrb.mxu2 %v1284_v40 }
 0x304   :  { %790 = vmatpush.bf16.msrb.mxu0 %v1307_v63 }
 0x305   :  { %857 = vmatpush.bf16.msrb.mxu1 %v1290_v46  ;;  %870 = vmatpush.bf16.msrb.mxu2 %v1294_v49 }
 0x308   :  { %791 = vmatpush.bf16.msrb.mxu0 %v1317_v5 }
 0x309   :  { %858 = vmatpush.bf16.msrb.mxu1 %v1300_v55  ;;  %871 = vmatpush.bf16.msrb.mxu2 %v1304_v58 }
 0x30c   :  { %792 = vmatpush.bf16.msrb.mxu0 %v1326_v12 }
 0x30d   :  { %859 = vmatpush.bf16.msrb.mxu1 %v1310_v0  ;;  %872 = vmatpush.bf16.msrb.mxu2 %v1314_v4 }
 0x36c   :  { %v582_v7 = vpop.f32.mrf.mxu0  ;;  %v595_v11 = vpop.f32.mrf.mxu1 }
 0x36d   :  { %v583_v17 = vadd.f32 %v582_v7, %v1385_v14  ;;  %v596_v19 = vadd.f32 %v595_v11, %v1387_v15 }
 0x36f   :  { %v612_v28 = vadd.f32 %v1061_v3, %v583_v17  ;;  %v632_v31 = vadd.f32 %v1062_v10, %v596_v19 }
 0x371   :  { %v1064_v37 = vmul.f32 -1.442695, %v612_v28  ;;  %v1065_v40 = vmul.f32 -1.442695, %v632_v31 }
 0x373   :  { %1153 = vpow2.f32 %v1064_v37  ;;  %v608_v46 = vpop.f32.mrf.mxu2 }
 0x374   :  { %1155 = vpow2.f32 %v1065_v40  ;;  %v584_v49 = vpop.f32.mrf.mxu0  ;;  %v597_v55 = vpop.f32.mrf.mxu1  ;;  %v609_v52 = vadd.f32 %v608_v46, %v1397_v50 }
 0x379   :  { %v1154_v58 = vpop.eup %1153 }
 0x37a   :  { %v1156_v0 = vpop.eup %1155  ;;  %v616_v4 = vadd.f32 1.0, %v1154_v58 }
 0x37b   :  { %v636_v2 = vadd.f32 1.0, %v1156_v0  ;;  %v610_v29 = vpop.f32.mrf.mxu2 }
 0x37c   :  { %1157 = vrcp.f32 %v616_v4  ;;  %v628_v38 = vand.u32 2147483648, %v616_v4  ;;  %v626_v43 = vand.u32 2147483647, %v616_v4  ;;  %vm622_vm1 = vweird.f32 %v616_v4 }
 0x37d   :  { %1159 = vrcp.f32 %v636_v2  ;;  %v648_v30 = vand.u32 2147483648, %v636_v2  ;;  %vm642_vm5 = vweird.f32 %v636_v2  ;;  %v646_v61 = vand.u32 2147483647, %v636_v2 }
 0x37e   :  { %v629_v51 = vor.u32 1.1754944e-38, %v628_v38  ;;  %vm627_vm3 = vcmp.eq.f32.partialorder %v626_v43, 8.507059e+37 }
 0x37f   :  { %v649_v6 = vor.u32 1.1754944e-38, %v648_v30  ;;  %vm647_vm7 = vcmp.eq.f32.partialorder %v646_v61, 8.507059e+37 }
 0x382   :  { %v1158_v32 = vpop.eup %1157 }
 0x383   :  { %v1160_v33 = vpop.eup %1159  ;;  %v618_v34 = vmul.f32 %v1158_v32, %v616_v4  ;;  %vm623_vm0 = vweird.f32 %v1158_v32 }
 0x384   :  { %v638_v35 = vmul.f32 %v1160_v33, %v636_v2  ;;  %vm624_vm2 = vmor %vm622_vm1, %vm623_vm0  ;;  %vm643_vm4 = vweird.f32 %v1160_v33 }
 0x385   :  { %v619_v39 = vsub.f32 1.0, %v618_v34  ;;  %vm644_vm6 = vmor %vm642_vm5, %vm643_vm4  ;;  %v1069_v34 = vld [vmem:[%s1657_s0 + $0x88] sm:$0xff] }
 0x386   :  { %v639_v41 = vsub.f32 1.0, %v638_v35 }
 0x387   :  { %v620_v42 = vmul.f32 %v1158_v32, %v619_v39 }
 0x388   :  { %v640_v44 = vmul.f32 %v1160_v33, %v639_v41 }
 0x389   :  { %v621_v47 = vadd.f32 %v1158_v32, %v620_v42 }
 0x38a   :  { %v641_v59 = vadd.f32 %v1160_v33, %v640_v44 }
 0x38b   :  { %v625_v53 = vsel %vm624_vm2, %v1158_v32, %v621_v47 }
 0x38c   :  { %v630_v57 = vsel %vm627_vm3, %v629_v51, %v625_v53  ;;  %v645_v1 = vsel %vm644_vm6, %v1160_v33, %v641_v59 }
 0x38d   :  { %v652_v60 = vmul.f32 %v630_v57, %v609_v52  ;;  %v650_v48 = vsel %vm647_vm7, %v649_v6, %v645_v1 }
 0x38e   :  { %v655_v8 = vsub.f32 1.0, %v650_v48  ;;  %v657_v16 = vmul.f32 %v650_v48, %v1538_v25 }
 0x38f   :  { %v653_v62 = vadd.f32 %v1063_v56, %v652_v60  ;;  %v1073_v60 = vld [vmem:[%s1657_s0 + $0x90] sm:$0xff] }
 0x391   :  { %1161 = vtanh.f32 %v653_v62  ;;  %v1074_v62 = vld [vmem:[%s1657_s0 + $0x98] sm:$0xff] }
 0x397   :  { %v1162_v9 = vpop.eup %1161 }
 0x398   :  { %v656_v13 = vmul.f32 %v1162_v9, %v655_v8 }
 0x39a   :  { %v1583_v18 = vadd.f32 %v657_v16, %v656_v13 }
 0x39c   :  { %1066 = vst [vmem:[%s1660_s3 + $0x20] sm:$0xff] %v1583_v18  ;;  %v665_v20 = vpack.c.bf16 %v1583_v18, %v1583_v18 }
 0x39e   :  { %674 = vmatmul.bf16.vlgmr.msrb.gmra.mxu3 %v665_v20  ;;  %687 = vmatmul.bf16.vlgmr.msra.gmra.mxu0 %v665_v20 }
 0x39f   :  { %700 = vmatmul.bf16.vlgmr.msra.gmra.mxu1 %v665_v20  ;;  %878 = vmatpush.bf16.msrb.mxu3 %v1264_v22 }
 0x3a3   :  { %879 = vmatpush.bf16.msrb.mxu3 %v1267_v27 }
 0x3a7   :  { %880 = vmatpush.bf16.msrb.mxu3 %v1277_v36 }
 0x3ab   :  { %881 = vmatpush.bf16.msrb.mxu3 %v1287_v45  ;;  %v1067_v45 = vld [vmem:[%s1657_s0 + $0x78] sm:$0xff] }
 0x3af   :  { %882 = vmatpush.bf16.msrb.mxu3 %v1297_v54 }
 0x3b3   :  { %883 = vmatpush.bf16.msrb.mxu3 %v1307_v63 }
 0x3b7   :  { %884 = vmatpush.bf16.msrb.mxu3 %v1317_v5 }
 0x3bb   :  { %885 = vmatpush.bf16.msrb.mxu3 %v1326_v12 }
 0x41b   :  { %v688_v23 = vpop.f32.mrf.mxu0 }
 0x41c   :  { %v689_v22 = vadd.f32 %v688_v23, %v1387_v15  ;;  %v701_v27 = vpop.f32.mrf.mxu1 }
 0x41d   :  { %v702_v29 = vadd.f32 %v701_v27, %v1397_v50 }
 0x41e   :  { %v725_v24 = vadd.f32 %v1068_v21, %v689_v22 }
 0x420   :  { %v1071_v36 = vmul.f32 -1.442695, %v725_v24 }
 0x421   :  { %v675_v54 = vpop.f32.mrf.mxu3 }
 0x422   :  { %1163 = vpow2.f32 %v1071_v36  ;;  %v676_v63 = vadd.f32 %v675_v54, %v1385_v14 }
 0x423   :  { %v690_v5 = vpop.f32.mrf.mxu0 }
 0x424   :  { %v705_v12 = vadd.f32 %v1067_v45, %v676_v63  ;;  %v703_v25 = vpop.f32.mrf.mxu1 }
 0x426   :  { %v1070_v26 = vmul.f32 -1.442695, %v705_v12 }
 0x428   :  { %v1164_v3 = vpop.eup %1163  ;;  %1165 = vpow2.f32 %v1070_v26 }
 0x429   :  { %v729_v7 = vadd.f32 1.0, %v1164_v3  ;;  %v677_v10 = vpop.f32.mrf.mxu3 }
 0x42b   :  { %1167 = vrcp.f32 %v729_v7  ;;  %v741_v39 = vand.u32 2147483648, %v729_v7  ;;  %vm735_vm13 = vweird.f32 %v729_v7  ;;  %v739_v38 = vand.u32 2147483647, %v729_v7 }
 0x42d   :  { %v742_v44 = vor.u32 1.1754944e-38, %v741_v39  ;;  %vm740_vm15 = vcmp.eq.f32.partialorder %v739_v38, 8.507059e+37  ;;  %v1079_v39 = vld [vmem:[%s1657_s0 + $0xa8] sm:$0xff] }
 0x42e   :  { %v1166_v11 = vpop.eup %1165 }
 0x42f   :  { %v709_v17 = vadd.f32 1.0, %v1166_v11 }
 0x431   :  { %1169 = vrcp.f32 %v709_v17  ;;  %v1168_v19 = vpop.eup %1167  ;;  %v721_v49 = vand.u32 2147483648, %v709_v17  ;;  %v719_v58 = vand.u32 2147483647, %v709_v17  ;;  %vm715_vm9 = vweird.f32 %v709_v17 }
 0x432   :  { %v731_v28 = vmul.f32 %v1168_v19, %v729_v7  ;;  %vm736_vm12 = vweird.f32 %v1168_v19 }
 0x433   :  { %v722_v2 = vor.u32 1.1754944e-38, %v721_v49  ;;  %vm720_vm11 = vcmp.eq.f32.partialorder %v719_v58, 8.507059e+37  ;;  %vm737_vm14 = vmor %vm735_vm13, %vm736_vm12 }
 0x434   :  { %v732_v40 = vsub.f32 1.0, %v731_v28 }
 0x436   :  { %v733_v0 = vmul.f32 %v1168_v19, %v732_v40 }
 0x437   :  { %v1170_v31 = vpop.eup %1169 }
 0x438   :  { %v711_v37 = vmul.f32 %v1170_v31, %v709_v17  ;;  %vm716_vm8 = vweird.f32 %v1170_v31  ;;  %v734_v35 = vadd.f32 %v1168_v19, %v733_v0 }
 0x439   :  { %vm717_vm10 = vmor %vm715_vm9, %vm716_vm8 }
 0x43a   :  { %v712_v46 = vsub.f32 1.0, %v711_v37  ;;  %v738_v43 = vsel %vm737_vm14, %v1168_v19, %v734_v35 }
 0x43b   :  { %v743_v47 = vsel %vm740_vm15, %v742_v44, %v738_v43  ;;  %v1080_v44 = vld [vmem:[%s1657_s0 + $0xb0] sm:$0xff] }
 0x43c   :  { %v713_v55 = vmul.f32 %v1170_v31, %v712_v46  ;;  %v748_v51 = vsub.f32 1.0, %v743_v47  ;;  %v750_v56 = vmul.f32 %v743_v47, %v1583_v18 }
 0x43e   :  { %v714_v4 = vadd.f32 %v1170_v31, %v713_v55 }
 0x440   :  { %v718_v32 = vsel %vm717_vm10, %v1170_v31, %v714_v4  ;;  %v1075_v31 = vld [vmem:[%s1657_s0 + $0xa0] sm:$0xff] }
 0x441   :  { %v723_v33 = vsel %vm720_vm11, %v722_v2, %v718_v32 }
 0x442   :  { %v745_v41 = vmul.f32 %v723_v33, %v702_v29 }
 0x444   :  { %v746_v42 = vadd.f32 %v1069_v34, %v745_v41 }
 0x446   :  { %1171 = vtanh.f32 %v746_v42 }
 0x44c   :  { %v1172_v52 = vpop.eup %1171 }
 0x44d   :  { %v749_v53 = vmul.f32 %v1172_v52, %v748_v51 }
 0x44f   :  { %v1612_v57 = vadd.f32 %v750_v56, %v749_v53 }
 0x451   :  { %1072 = vst [vmem:[%s1660_s3 + $0x28] sm:$0xff] %v1612_v57  ;;  %v758_v59 = vpack.c.bf16 %v1612_v57, %v1612_v57 }
 0x453   :  { %767 = vmatmul.bf16.vlgmr.msra.gmra.mxu2 %v758_v59  ;;  %780 = vmatmul.bf16.vlgmr.msra.gmra.mxu3 %v758_v59 }
 0x454   :  { %793 = vmatmul.bf16.vlgmr.msrb.gmra.mxu0 %v758_v59 }
 0x4d1   :  { %v794_v30 = vpop.f32.mrf.mxu0 }
 0x4d2   :  { %v795_v17 = vadd.f32 %v794_v30, %v1397_v50 }
 0x4d6   :  { %v768_v61 = vpop.f32.mrf.mxu2  ;;  %v781_v1 = vpop.f32.mrf.mxu3 }
 0x4d7   :  { %v769_v6 = vadd.f32 %v768_v61, %v1385_v14  ;;  %v782_v48 = vadd.f32 %v781_v1, %v1387_v15 }
 0x4d9   :  { %v798_v8 = vadd.f32 %v1073_v60, %v769_v6  ;;  %v818_v9 = vadd.f32 %v1074_v62, %v782_v48  ;;  %v796_v13 = vpop.f32.mrf.mxu0 }
 0x4db   :  { %v1076_v16 = vmul.f32 -1.442695, %v798_v8  ;;  %v1077_v18 = vmul.f32 -1.442695, %v818_v9 }
 0x4dd   :  { %1173 = vpow2.f32 %v1076_v16 }
 0x4de   :  { %1175 = vpow2.f32 %v1077_v18  ;;  %v770_v20 = vpop.f32.mrf.mxu2  ;;  %v783_v21 = vpop.f32.mrf.mxu3 }
 0x4e3   :  { %v1174_v23 = vpop.eup %1173 }
 0x4e4   :  { %v1176_v22 = vpop.eup %1175  ;;  %v802_v27 = vadd.f32 1.0, %v1174_v23 }
 0x4e5   :  { %v822_v24 = vadd.f32 1.0, %v1176_v22 }
 0x4e6   :  { %1177 = vrcp.f32 %v802_v27  ;;  %v814_v12 = vand.u32 2147483648, %v802_v27  ;;  %v812_v3 = vand.u32 2147483647, %v802_v27  ;;  %vm808_vm1 = vweird.f32 %v802_v27 }
 0x4e7   :  { %1179 = vrcp.f32 %v822_v24  ;;  %v834_v46 = vand.u32 2147483648, %v822_v24  ;;  %vm828_vm5 = vweird.f32 %v822_v24  ;;  %v832_v49 = vand.u32 2147483647, %v822_v24 }
 0x4e8   :  { %v815_v11 = vor.u32 1.1754944e-38, %v814_v12  ;;  %vm813_vm3 = vcmp.eq.f32.partialorder %v812_v3, 8.507059e+37 }
 0x4e9   :  { %v835_v0 = vor.u32 1.1754944e-38, %v834_v46  ;;  %vm833_vm7 = vcmp.eq.f32.partialorder %v832_v49, 8.507059e+37 }
 0x4ec   :  { %v1178_v36 = vpop.eup %1177 }
 0x4ed   :  { %v1180_v45 = vpop.eup %1179  ;;  %v804_v54 = vmul.f32 %v1178_v36, %v802_v27  ;;  %vm809_vm0 = vweird.f32 %v1178_v36  ;;  %v1081_v27 = vld [vmem:[%s1657_s0 + $0xb8] sm:$0xff] }
 0x4ee   :  { %v824_v63 = vmul.f32 %v1180_v45, %v822_v24  ;;  %vm810_vm2 = vmor %vm808_vm1, %vm809_vm0  ;;  %vm829_vm4 = vweird.f32 %v1180_v45 }
 0x4ef   :  { %v805_v5 = vsub.f32 1.0, %v804_v54  ;;  %vm830_vm6 = vmor %vm828_vm5, %vm829_vm4 }
 0x4f0   :  { %v825_v25 = vsub.f32 1.0, %v824_v63 }
 0x4f1   :  { %v806_v26 = vmul.f32 %v1178_v36, %v805_v5 }
 0x4f2   :  { %v826_v7 = vmul.f32 %v1180_v45, %v825_v25 }
 0x4f3   :  { %v807_v10 = vadd.f32 %v1178_v36, %v806_v26 }
 0x4f4   :  { %v827_v37 = vadd.f32 %v1180_v45, %v826_v7 }
 0x4f5   :  { %v811_v19 = vsel %vm810_vm2, %v1178_v36, %v807_v10 }
 0x4f6   :  { %v816_v28 = vsel %vm813_vm3, %v815_v11, %v811_v19  ;;  %v831_v58 = vsel %vm830_vm6, %v1180_v45, %v827_v37 }
 0x4f7   :  { %v838_v40 = vmul.f32 %v816_v28, %v795_v17  ;;  %v836_v4 = vsel %vm833_vm7, %v835_v0, %v831_v58 }
 0x4f8   :  { %v841_v2 = vsub.f32 1.0, %v836_v4  ;;  %v843_v33 = vmul.f32 %v836_v4, %v1612_v57 }
 0x4f9   :  { %v839_v55 = vadd.f32 %v1075_v31, %v838_v40 }
 0x4fb   :  { %1181 = vtanh.f32 %v839_v55 }
 0x501   :  { %v1182_v29 = vpop.eup %1181 }
 0x502   :  { %v842_v32 = vmul.f32 %v1182_v29, %v841_v2 }
 0x504   :  { %v1633_v34 = vadd.f32 %v843_v33, %v842_v32 }
 0x506   :  { %1078 = vst [vmem:[%s1660_s3 + $0x30] sm:$0xff] %v1633_v34  ;;  %v851_v35 = vpack.c.bf16 %v1633_v34, %v1633_v34 }
 0x508   :  { %860 = vmatmul.bf16.vlgmr.msrb.gmra.mxu1 %v851_v35  ;;  %873 = vmatmul.bf16.vlgmr.msrb.gmra.mxu2 %v851_v35 }
 0x509   :  { %886 = vmatmul.bf16.vlgmr.msrb.gmra.mxu3 %v851_v35 }
 0x585   :  { %v861_v41 = vpop.f32.mrf.mxu1 }
 0x586   :  { %v862_v38 = vadd.f32 %v861_v41, %v1385_v14 }
 0x588   :  { %v891_v42 = vadd.f32 %v1079_v39, %v862_v38 }
 0x58a   :  { %v1082_v43 = vmul.f32 -1.442695, %v891_v42 }
 0x58b   :  { %v874_v47 = vpop.f32.mrf.mxu2 }
 0x58c   :  { %1183 = vpow2.f32 %v1082_v43  ;;  %v875_v51 = vadd.f32 %v874_v47, %v1387_v15  ;;  %v887_v52 = vpop.f32.mrf.mxu3 }
 0x58d   :  { %v863_v53 = vpop.f32.mrf.mxu1  ;;  %v888_v23 = vadd.f32 %v887_v52, %v1397_v50 }
 0x58e   :  { %v911_v56 = vadd.f32 %v1080_v44, %v875_v51 }
 0x590   :  { %v1083_v57 = vmul.f32 -1.442695, %v911_v56 }
 0x592   :  { %v1184_v59 = vpop.eup %1183  ;;  %1185 = vpow2.f32 %v1083_v57 }
 0x593   :  { %v895_v30 = vadd.f32 1.0, %v1184_v59  ;;  %v876_v60 = vpop.f32.mrf.mxu2 }
 0x594   :  { %v889_v61 = vpop.f32.mrf.mxu3 }
 0x595   :  { %1187 = vrcp.f32 %v895_v30  ;;  %v907_v8 = vand.u32 2147483648, %v895_v30  ;;  %v905_v15 = vand.u32 2147483647, %v895_v30  ;;  %vm901_vm9 = vweird.f32 %v895_v30 }
 0x597   :  { %v908_v20 = vor.u32 1.1754944e-38, %v907_v8  ;;  %vm906_vm11 = vcmp.eq.f32.partialorder %v905_v15, 8.507059e+37 }
 0x598   :  { %v1186_v14 = vpop.eup %1185 }
 0x599   :  { %v915_v62 = vadd.f32 1.0, %v1186_v14 }
 0x59b   :  { %v1188_v1 = vpop.eup %1187  ;;  %1189 = vrcp.f32 %v915_v62  ;;  %v927_v45 = vand.u32 2147483648, %v915_v62  ;;  %v925_v63 = vand.u32 2147483647, %v915_v62  ;;  %vm921_vm13 = vweird.f32 %v915_v62 }
 0x59c   :  { %v897_v6 = vmul.f32 %v1188_v1, %v895_v30  ;;  %vm902_vm8 = vweird.f32 %v1188_v1 }
 0x59d   :  { %vm903_vm10 = vmor %vm901_vm9, %vm902_vm8  ;;  %v928_v25 = vor.u32 1.1754944e-38, %v927_v45  ;;  %vm926_vm15 = vcmp.eq.f32.partialorder %v925_v63, 8.507059e+37 }
 0x59e   :  { %v898_v48 = vsub.f32 1.0, %v897_v6 }
 0x5a0   :  { %v899_v9 = vmul.f32 %v1188_v1, %v898_v48 }
 0x5a1   :  { %v1190_v13 = vpop.eup %1189 }
 0x5a2   :  { %v917_v16 = vmul.f32 %v1190_v13, %v915_v62  ;;  %v900_v18 = vadd.f32 %v1188_v1, %v899_v9  ;;  %vm922_vm12 = vweird.f32 %v1190_v13 }
 0x5a3   :  { %vm923_vm14 = vmor %vm921_vm13, %vm922_vm12 }
 0x5a4   :  { %v918_v21 = vsub.f32 1.0, %v917_v16  ;;  %v904_v22 = vsel %vm903_vm10, %v1188_v1, %v900_v18 }
 0x5a5   :  { %v909_v24 = vsel %vm906_vm11, %v908_v20, %v904_v22 }
 0x5a6   :  { %v919_v36 = vmul.f32 %v1190_v13, %v918_v21  ;;  %v931_v54 = vmul.f32 %v909_v24, %v888_v23 }
 0x5a8   :  { %v920_v5 = vadd.f32 %v1190_v13, %v919_v36  ;;  %v932_v12 = vadd.f32 %v1081_v27, %v931_v54 }
 0x5aa   :  { %v924_v26 = vsel %vm923_vm14, %v1190_v13, %v920_v5  ;;  %1191 = vtanh.f32 %v932_v12 }
 0x5ab   :  { %v929_v50 = vsel %vm926_vm15, %v928_v25, %v924_v26 }
 0x5ac   :  { %v934_v3 = vsub.f32 1.0, %v929_v50  ;;  %v936_v11 = vmul.f32 %v929_v50, %v1633_v34 }
 0x5b0   :  { %v1192_v7 = vpop.eup %1191 }
 0x5b1   :  { %v935_v10 = vmul.f32 %v1192_v7, %v934_v3 }
 0x5b3   :  { %v937_v17 = vadd.f32 %v936_v11, %v935_v10 }
 0x5b5   :  { %1084 = vst [vmem:[%s1660_s3 + $0x38] sm:$0xff] %v937_v17 }
 0x5b6   :  { %944 = vsyncpa [#allocation3], 1 }

// kernel: sumrnn_forward.7
= control target key start
LH: loop header
LB: loop body
LE: loop exit
PB: predicated region body
PF: predicated region fallthrough
CT: control target
= control target key end

     0   :  { %15 = vsyncpa [#allocation4], 0  ;;  %s8755_s0 = inlined_call_operand.vmem [shape: f32[7,8,384], index: 0, kind: input, shape index: {}]   ;;  %s8756_s1 = inlined_call_operand.vmem [shape: f32[8,8,128], index: 1, kind: input, shape index: {}]   ;;  %s8757_s2 = inlined_call_operand.vmem [shape: f32[8,8], index: 2, kind: input, shape index: {}]   ;;  %s8758_s3 = inlined_call_operand.vmem [shape: f32[8,128], index: 3, kind: input, shape index: {}]   ;;  %s8759_s4 = inlined_call_operand.vmem [shape: bf16[128,384], index: 4, kind: input, shape index: {}]   ;;  %s8760_s5 = inlined_call_operand.vmem [shape: bf16[128,384], index: 5, kind: input, shape index: {}]   ;;  %s8761_s6 = inlined_call_operand.vmem [shape: f32[1,384], index: 6, kind: input, shape index: {}]   ;;  %s8762_s7 = inlined_call_operand.vmem [shape: s32[56,1], index: 7, kind: input, shape index: {}]   ;;  %s8763_s8 = inlined_call_operand.hbm [shape: bf16[128,256], index: 8, kind: input, shape index: {}]   ;;  %s8764_s9 = inlined_call_operand.vmem [shape: f32[1,256], index: 9, kind: input, shape index: {}]   ;;  %s8765_s10 = inlined_call_operand.hbm [shape: f32[1,1], index: 10, kind: output, shape index: {}]  }
   0x1   :  { %16 = vsyncpa [#allocation5], 0  ;;  %s37_s15 = sshll.u32 %s8763_s8, 4  ;;  %s5890_s16 = smov [#allocation3]   ;;  %s38_s15 = int_to_ptr.hbm [resolvable:$true] %s37_s15 }
   0x2   :  { %s39_s17 = sshll.u32 %s5890_s16, 4  ;;  %s5891_s18 = smov 128   ;;  %s40_s17 = int_to_ptr.vmem [resolvable:$true] %s39_s17 }
   0x3   :  { %s5892_s19 = smov 8  }
   0x4   :  { %45 = dma.hbm_to_vmem [thread:$0]  %s38_s15, 2048, %s40_s17, [#allocation4], %s5891_s18, %s5891_s18, %s5892_s19  }
   0x5   :  { %5886 = dma.done.wait [#allocation4], 2048  }
   0x6   :  { %5887 = vsyncadd [#allocation4], 4294965248  ;;  %v177_v0 = vlaneseq  ;;  %v5958_v2 = vld [vmem:[%s8756_s1] sm:$0xff]  ;;  %v5966_v8 = vld [vmem:[%s8756_s1 + $0x18] sm:$0xff]  ;;  %v5893_v43 = vmov 0   ;;  %vm290_vm0 = vcmask 1041409  }
   0x7   :  { %v126_v3 = vld [vmem:[%s8758_s3] sm:$0xff]  ;;  %v5971_v9 = vld [vmem:[%s8756_s1 + $0x10] sm:$0xff]  ;;  %v5979_v17 = vld [vmem:[%s8756_s1 + $0x8] sm:$0xff]  ;;  %vm8873_vm1 = vcmask 1042434   ;;  %vm8872_vm2 = vcmask 1043459   ;;  %vm8867_vm3 = vcmask 1044484  }
   0x8   :  { %v178_v1 = vshrl.u32 %v177_v0, 7  ;;  %v135_v4 = vperm.slane %v126_v3, 0  ;;  %v130_v5 = vrot.slane %v126_v3, 3  ;;  %v129_v6 = vrot.slane %v126_v3, 2  ;;  %v5984_v19 = vld [vmem:[%s8756_s1 + $0x20] sm:$0xff]  ;;  %v5991_v24 = vld [vmem:[%s8756_s1 + $0x30] sm:$0xff] }
   0x9   :  { %v128_v7 = vrot.slane %v126_v3, 1  ;;  %v131_v13 = vrot.slane %v126_v3, 4  ;;  %v133_v22 = vrot.slane %v126_v3, 6  ;;  %v134_v26 = vrot.slane %v126_v3, 7  ;;  %v60_v28 = vld [vmem:[%s8757_s2] sm:$0xff]  ;;  %v6000_v29 = vld [vmem:[%s8756_s1 + $0x38] sm:$0xff] }
   0xa   :  { %5454 = vset.pattern.permute.xlu2 %v178_v1  ;;  %5455 = vset.pattern.permute.xlu0 %v178_v1  ;;  %v151_v10 = vmul.f32 %v135_v4, %v5958_v2  ;;  %v138_v11 = vperm.slane %v130_v5, 0  ;;  %v137_v12 = vperm.slane %v129_v6, 0  ;;  %v183_v30 = vperm.slane %v60_v28, 1  ;;  %v6006_v41 = vld [vmem:[%s8756_s1 + $0x28] sm:$0xff]  ;;  %s5895_s18 = smov [#allocation6]  }
   0xb   :  { %5456 = vset.pattern.permute.xlu1 %v178_v1  ;;  %v136_v16 = vperm.slane %v128_v7, 0  ;;  %v139_v18 = vperm.slane %v131_v13, 0  ;;  %v141_v23 = vperm.slane %v133_v22, 0  ;;  %v142_v27 = vperm.slane %v134_v26, 0  ;;  %s5075_s19 = sshll.u32 %s5895_s18, 4  ;;  %s5076_s19 = int_to_ptr.vmem [resolvable:$true] %s5075_s19 }
   0xc   :  { %159 = vadd.xlane.f32.xlu0 %v151_v10  ;;  %v154_v14 = vmul.f32 %v138_v11, %v5966_v8  ;;  %v153_v15 = vmul.f32 %v137_v12, %v5971_v9  ;;  %v190_v32 = vperm.slane %v60_v28, 2  ;;  %v197_v33 = vperm.slane %v60_v28, 3 }
   0xd   :  { %v152_v20 = vmul.f32 %v136_v16, %v5979_v17  ;;  %v155_v21 = vmul.f32 %v139_v18, %v5984_v19  ;;  %v157_v25 = vmul.f32 %v141_v23, %v5991_v24  ;;  %v158_v31 = vmul.f32 %v142_v27, %v6000_v29 }
   0xe   :  { %165 = vadd.xlane.f32.xlu2 %v154_v14  ;;  %163 = vadd.xlane.f32.xlu1 %v153_v15  ;;  %v204_v34 = vperm.slane %v60_v28, 4  ;;  %v211_v35 = vperm.slane %v60_v28, 5  ;;  %v176_v36 = vperm.slane %v60_v28, 0  ;;  %v218_v37 = vperm.slane %v60_v28, 6 }
   0xf   :  { %v225_v38 = vperm.slane %v60_v28, 7  ;;  %v132_v39 = vrot.slane %v126_v3, 5  ;;  %v6046_v11 = vand.u32 127, %v177_v0  ;;  %vm8866_vm4 = vcmask 1045509  }
  0x10   :  { %vm8863_vm5 = vcmask 1046534   ;;  %vm8767_vm6 = vcmask 1047559   ;;  %vm8766_vm7 = vcmask 64512  }
  0x11   :  { %v140_v40 = vperm.slane %v132_v39, 0  ;;  %8898 = vst [vmem:[#allocation17_spill] sm:$0xff] %v6046_v11 }
  0x13   :  { %v156_v42 = vmul.f32 %v140_v40, %v6006_v41 }
  0x14   :  { %161 = vadd.xlane.f32.xlu0 %v152_v20 }
  0x16   :  { %167 = vadd.xlane.f32.xlu1 %v155_v21 }
  0x1e   :  { %171 = vadd.xlane.f32.xlu1 %v157_v25 }
  0x26   :  { %188 = vperm.xlu2 %5454, %v183_v30   ;;  %173 = vadd.xlane.f32.xlu1 %v158_v31 }
  0x28   :  { %195 = vperm.xlu0 %5455, %v190_v32  }
  0x2e   :  { %202 = vperm.xlu2 %5454, %v197_v33  }
  0x30   :  { %5458 = vset.pattern.permute.xlu0 %v5893_v43 }
  0x36   :  { %209 = vperm.xlu2 %5454, %v204_v34  }
  0x3e   :  { %216 = vperm.xlu2 %5454, %v211_v35  }
  0x3f   :  { %181 = vperm.xlu1 %5456, %v176_v36  }
  0x46   :  { %223 = vperm.xlu2 %5454, %v218_v37  }
  0x47   :  { %230 = vperm.xlu1 %5456, %v225_v38  }
  0x4e   :  { %5457 = vset.pattern.permute.xlu2 %v5893_v43 }
  0x4f   :  { %5459 = vset.pattern.permute.xlu1 %v5893_v43 }
  0x52   :  { %169 = vadd.xlane.f32.xlu0 %v156_v42 }
  0x7f   :  { %v160_v44 = vpop.xlane.xlu0 %159 }
  0x81   :  { %v166_v45 = vpop.xlane.xlu2 %165  ;;  %v164_v49 = vpop.xlane.xlu1 %163 }
  0x87   :  { %v162_v46 = vpop.xlane.xlu0 %161 }
  0x89   :  { %v6009_v47 = vpop.permute.xlu2 %188  ;;  %v168_v51 = vpop.xlane.xlu1 %167 }
  0x8a   :  { %8890 = vst [vmem:[#allocation9_spill] sm:$0xff] %v6009_v47  ;;  %v6012_v48 = vadd.f32 %v6009_v47, %v162_v46 }
  0x8c   :  { %260 = vperm.xlu0 %5458, %v6012_v48  }
  0x91   :  { %v6015_v50 = vpop.permute.xlu2 %202  ;;  %v172_v54 = vpop.xlane.xlu1 %171 }
  0x92   :  { %8891 = vst [vmem:[#allocation10_spill] sm:$0xff] %v6015_v50  ;;  %v243_v63 = vadd.f32 %v6015_v50, %v166_v45 }
  0x99   :  { %v6017_v52 = vpop.permute.xlu2 %209  ;;  %v174_v56 = vpop.xlane.xlu1 %173 }
  0x9a   :  { %8892 = vst [vmem:[#allocation11_spill] sm:$0xff] %v6017_v52  ;;  %v6020_v53 = vadd.f32 %v6017_v52, %v168_v51  ;;  %v6034_v61 = vpop.permute.xlu0 %195 }
  0x9b   :  { %8896 = vst [vmem:[#allocation15_spill] sm:$0xff] %v6034_v61  ;;  %v242_v62 = vadd.f32 %v6034_v61, %v164_v49 }
  0x9c   :  { %269 = vperm.xlu1 %5459, %v6020_v53  }
  0xa1   :  { %v6023_v55 = vpop.permute.xlu2 %216 }
  0xa2   :  { %8893 = vst [vmem:[#allocation12_spill] sm:$0xff] %v6023_v55 }
  0xa9   :  { %v6025_v57 = vpop.permute.xlu2 %223 }
  0xaa   :  { %8894 = vst [vmem:[#allocation13_spill] sm:$0xff] %v6025_v57  ;;  %v6028_v58 = vadd.f32 %v6025_v57, %v172_v54 }
  0xac   :  { %275 = vperm.xlu1 %5459, %v6028_v58  }
  0xb1   :  { %v6031_v59 = vpop.permute.xlu1 %181 }
  0xb2   :  { %8895 = vst [vmem:[#allocation14_spill] sm:$0xff] %v6031_v59  ;;  %v240_v60 = vadd.f32 %v6031_v59, %v160_v44 }
  0xb4   :  { %257 = vperm.xlu2 %5457, %v240_v60  }
  0xb9   :  { %v6039_v4 = vpop.permute.xlu1 %230 }
  0xba   :  { %8897 = vst [vmem:[#allocation16_spill] sm:$0xff] %v6039_v4  ;;  %v6042_v5 = vadd.f32 %v6039_v4, %v174_v56 }
  0xbc   :  { %263 = vperm.xlu2 %5457, %v242_v62  }
  0xc4   :  { %266 = vperm.xlu2 %5457, %v243_v63  }
  0xc5   :  { %v170_v1 = vpop.xlane.xlu0 %169 }
  0xc6   :  { %v245_v3 = vadd.f32 %v6023_v55, %v170_v1 }
  0xcc   :  { %272 = vperm.xlu2 %5457, %v245_v3  }
  0xd4   :  { %278 = vperm.xlu2 %5457, %v6042_v5  }
  0xfe   :  { %v261_v12 = vpop.permute.xlu0 %260 }
  0xff   :  { %v283_v16 = vperm.slane %v261_v12, %v6046_v11 }
 0x10e   :  { %v258_v6 = vpop.permute.xlu2 %257  ;;  %v270_v13 = vpop.permute.xlu1 %269 }
 0x10f   :  { %v282_v14 = vperm.slane %v258_v6, %v6046_v11  ;;  %v286_v25 = vperm.slane %v270_v13, %v6046_v11 }
 0x111   :  { %v291_v21 = vsel %vm290_vm0, %v283_v16, %v282_v14 }
 0x116   :  { %v264_v7 = vpop.permute.xlu2 %263 }
 0x117   :  { %v284_v15 = vperm.slane %v264_v7, %v6046_v11 }
 0x119   :  { %v293_v22 = vsel %vm8873_vm1, %v284_v15, %v291_v21 }
 0x11e   :  { %v267_v10 = vpop.permute.xlu2 %266  ;;  %v276_v26 = vpop.permute.xlu1 %275 }
 0x11f   :  { %v285_v18 = vperm.slane %v267_v10, %v6046_v11  ;;  %v288_v30 = vperm.slane %v276_v26, %v6046_v11 }
 0x121   :  { %v295_v0 = vsel %vm8872_vm2, %v285_v18, %v293_v22 }
 0x122   :  { %v297_v27 = vsel %vm8867_vm3, %v286_v25, %v295_v0 }
 0x126   :  { %v273_v20 = vpop.permute.xlu2 %272 }
 0x127   :  { %v287_v23 = vperm.slane %v273_v20, %v6046_v11 }
 0x129   :  { %v299_v28 = vsel %vm8866_vm4, %v287_v23, %v297_v27 }
 0x12a   :  { %v301_v33 = vsel %vm8863_vm5, %v288_v30, %v299_v28 }
 0x12e   :  { %v279_v31 = vpop.permute.xlu2 %278 }
 0x12f   :  { %v289_v32 = vperm.slane %v279_v31, %v6046_v11 }
 0x131   :  { %v303_v34 = vsel %vm8767_vm6, %v289_v32, %v301_v33 }
 0x132   :  { %v306_v35 = vsel %vm8766_vm7, %v303_v34, -inf }
 0x133   :  { %307 = vmax.xlane.f32.xlu1 %v306_v35 }
 0x1a6   :  { %v308_v36 = vpop.xlane.xlu1 %307 }
 0x1a7   :  { %v311_v37 = vperm.slane %v308_v36, 1  ;;  %v310_v38 = vperm.slane %v308_v36, 0  ;;  %v313_v42 = vperm.slane %v308_v36, 3  ;;  %v312_v43 = vperm.slane %v308_v36, 2 }
 0x1a8   :  { %v315_v54 = vperm.slane %v308_v36, 5  ;;  %v314_v1 = vperm.slane %v308_v36, 4  ;;  %v317_v10 = vperm.slane %v308_v36, 7  ;;  %v316_v12 = vperm.slane %v308_v36, 6 }
 0x1a9   :  { %v327_v39 = vsub.f32 %v6012_v48, %v311_v37  ;;  %v326_v40 = vsub.f32 %v240_v60, %v310_v38  ;;  %v329_v46 = vsub.f32 %v243_v63, %v313_v42  ;;  %v328_v49 = vsub.f32 %v242_v62, %v312_v43 }
 0x1aa   :  { %v331_v48 = vsub.f32 %v245_v3, %v315_v54  ;;  %v330_v60 = vsub.f32 %v6020_v53, %v314_v1  ;;  %v333_v15 = vsub.f32 %v6042_v5, %v317_v10  ;;  %v332_v3 = vsub.f32 %v6028_v58, %v316_v12 }
 0x1ab   :  { %v336_v44 = vmul.f32 1.442695, %v327_v39  ;;  %v334_v45 = vmul.f32 1.442695, %v326_v40  ;;  %v340_v51 = vmul.f32 1.442695, %v329_v46 }
 0x1ac   :  { %v338_v56 = vmul.f32 1.442695, %v328_v49  ;;  %v344_v63 = vmul.f32 1.442695, %v331_v48  ;;  %v342_v62 = vmul.f32 1.442695, %v330_v60 }
 0x1ad   :  { %5460 = vpow2.f32 %v336_v44  ;;  %v348_v16 = vmul.f32 1.442695, %v333_v15  ;;  %v346_v53 = vmul.f32 1.442695, %v332_v3 }
 0x1ae   :  { %5462 = vpow2.f32 %v334_v45 }
 0x1af   :  { %5464 = vpow2.f32 %v340_v51 }
 0x1b0   :  { %5466 = vpow2.f32 %v338_v56 }
 0x1b1   :  { %5468 = vpow2.f32 %v344_v63 }
 0x1b2   :  { %5470 = vpow2.f32 %v342_v62 }
 0x1b3   :  { %v6065_v6 = vpop.eup %5460  ;;  %5472 = vpow2.f32 %v348_v16 }
 0x1b4   :  { %v6067_v7 = vpop.eup %5462  ;;  %362 = vperm.xlu0 %5458, %v6065_v6   ;;  %5474 = vpow2.f32 %v346_v53 }
 0x1b5   :  { %359 = vperm.xlu2 %5457, %v6067_v7   ;;  %v6072_v13 = vpop.eup %5464 }
 0x1b6   :  { %v6074_v14 = vpop.eup %5466 }
 0x1b7   :  { %v6080_v18 = vpop.eup %5468 }
 0x1b8   :  { %v6082_v20 = vpop.eup %5470 }
 0x1b9   :  { %v6086_v21 = vpop.eup %5472 }
 0x1ba   :  { %v6088_v22 = vpop.eup %5474 }
 0x1bc   :  { %368 = vperm.xlu0 %5458, %v6072_v13  }
 0x1bd   :  { %365 = vperm.xlu2 %5457, %v6074_v14  }
 0x1c4   :  { %374 = vperm.xlu0 %5458, %v6080_v18  }
 0x1c5   :  { %371 = vperm.xlu2 %5457, %v6082_v20  }
 0x1cc   :  { %380 = vperm.xlu0 %5458, %v6086_v21  }
 0x1cd   :  { %377 = vperm.xlu2 %5457, %v6088_v22  }
 0x20f   :  { %v360_v58 = vpop.permute.xlu2 %359 }
 0x210   :  { %v382_v27 = vperm.slane %v360_v58, %v6046_v11 }
 0x217   :  { %v366_v0 = vpop.permute.xlu2 %365 }
 0x218   :  { %v384_v31 = vperm.slane %v366_v0, %v6046_v11 }
 0x21f   :  { %v372_v25 = vpop.permute.xlu2 %371 }
 0x220   :  { %v386_v36 = vperm.slane %v372_v25, %v6046_v11 }
 0x226   :  { %v363_v5 = vpop.permute.xlu0 %362 }
 0x227   :  { %v383_v26 = vperm.slane %v363_v5, %v6046_v11  ;;  %v378_v37 = vpop.permute.xlu2 %377 }
 0x228   :  { %v388_v40 = vperm.slane %v378_v37, %v6046_v11 }
 0x229   :  { %v390_v28 = vsel %vm290_vm0, %v383_v26, %v382_v27 }
 0x22a   :  { %v391_v33 = vsel %vm8873_vm1, %v384_v31, %v390_v28 }
 0x22e   :  { %v369_v23 = vpop.permute.xlu0 %368 }
 0x22f   :  { %v385_v30 = vperm.slane %v369_v23, %v6046_v11 }
 0x231   :  { %v392_v34 = vsel %vm8872_vm2, %v385_v30, %v391_v33 }
 0x232   :  { %v393_v38 = vsel %vm8867_vm3, %v386_v36, %v392_v34 }
 0x236   :  { %v375_v32 = vpop.permute.xlu0 %374 }
 0x237   :  { %v387_v35 = vperm.slane %v375_v32, %v6046_v11 }
 0x239   :  { %v394_v39 = vsel %vm8866_vm4, %v387_v35, %v393_v38 }
 0x23a   :  { %v395_v44 = vsel %vm8863_vm5, %v388_v40, %v394_v39 }
 0x23e   :  { %v381_v42 = vpop.permute.xlu0 %380 }
 0x23f   :  { %v389_v43 = vperm.slane %v381_v42, %v6046_v11 }
 0x241   :  { %v396_v45 = vsel %vm8767_vm6, %v389_v43, %v395_v44 }
 0x242   :  { %v398_v46 = vsel %vm8766_vm7, %v396_v45, 0.0 }
 0x243   :  { %399 = vadd.xlane.f32.xlu2 %v398_v46 }
 0x2b6   :  { %v6108_v49 = vpop.xlane.xlu2 %399 }
 0x2b7   :  { %v403_v51 = vperm.slane %v6108_v49, 1  ;;  %v402_v54 = vperm.slane %v6108_v49, 0  ;;  %v6113_v56 = vperm.slane %v6108_v49, 5  ;;  %v6116_v1 = vperm.slane %v6108_v49, 2 }
 0x2b8   :  { %v6119_v48 = vperm.slane %v6108_v49, 7  ;;  %v6123_v60 = vperm.slane %v6108_v49, 3  ;;  %v6129_v16 = vperm.slane %v6108_v49, 4  ;;  %v6182_v23 = vperm.slane %v6108_v49, 6  ;;  %v5173_v49 = vld [vmem:[%s8759_s4 + $0xa8] sm:$0xf] }
 0x2b9   :  { %5476 = vrcp.f32 %v403_v51  ;;  %v442_v63 = vand.u32 2147483647, %v403_v51  ;;  %v444_v10 = vand.u32 2147483648, %v403_v51  ;;  %v427_v12 = vand.u32 2147483647, %v402_v54 }
 0x2ba   :  { %5478 = vrcp.f32 %v402_v54  ;;  %vm438_vm8 = vweird.f32 %v403_v51  ;;  %vm423_vm9 = vweird.f32 %v402_v54  ;;  %v429_v5 = vand.u32 2147483648, %v402_v54 }
 0x2bb   :  { %5480 = vrcp.f32 %v6113_v56  ;;  %vm6133_vm10 = vcmp.eq.f32.partialorder %v442_v63, 8.507059e+37  ;;  %v445_v25 = vor.u32 1.1754944e-38, %v444_v10  ;;  %vm6139_vm12 = vcmp.eq.f32.partialorder %v427_v12, 8.507059e+37 }
 0x2bc   :  { %5482 = vrcp.f32 %v6116_v1  ;;  %vm498_vm13 = vweird.f32 %v6113_v56  ;;  %v430_v36 = vor.u32 1.1754944e-38, %v429_v5  ;;  %v502_v42 = vand.u32 2147483647, %v6113_v56 }
 0x2bd   :  { %5484 = vrcp.f32 %v6119_v48  ;;  %v504_v45 = vand.u32 2147483648, %v6113_v56 }
 0x2be   :  { %5486 = vrcp.f32 %v6123_v60 }
 0x2bf   :  { %v5477_v62 = vpop.eup %5476  ;;  %5488 = vrcp.f32 %v6129_v16 }
 0x2c0   :  { %v5479_v15 = vpop.eup %5478  ;;  %v434_v3 = vmul.f32 %v5477_v62, %v403_v51  ;;  %vm439_vm11 = vweird.f32 %v5477_v62  ;;  %5490 = vrcp.f32 %v6182_v23 }
 0x2c1   :  { %v6131_v53 = vpop.eup %5480  ;;  %v419_v58 = vmul.f32 %v5479_v15, %v402_v54  ;;  %vm424_vm14 = vweird.f32 %v5479_v15  ;;  %vm440_vm15 = vmor %vm438_vm8, %vm439_vm11  ;;  %v459_v54 = vand.u32 2147483648, %v6116_v1 }
 0x2c2   :  { %v435_v0 = vsub.f32 1.0, %v434_v3  ;;  %v494_v26 = vmul.f32 %v6131_v53, %v6113_v56  ;;  %v5483_v27 = vpop.eup %5482  ;;  %vm499_vm7 = vweird.f32 %v6131_v53  ;;  %vm425_vm6 = vmor %vm423_vm9, %vm424_vm14  ;;  %v505_v56 = vor.u32 1.1754944e-38, %v504_v45 }
 0x2c3   :  { %v420_v28 = vsub.f32 1.0, %v419_v58  ;;  %v6144_v31 = vpop.eup %5484  ;;  %v449_v34 = vmul.f32 %v5483_v27, %v6116_v1  ;;  %vm454_vm8 = vweird.f32 %v5483_v27  ;;  %vm6175_vm9 = vmor %vm498_vm13, %vm499_vm7  ;;  %vm503_vm7 = vcmp.eq.f32.partialorder %v502_v42, 8.507059e+37 }
 0x2c4   :  { %v436_v32 = vmul.f32 %v5477_v62, %v435_v0  ;;  %v495_v33 = vsub.f32 1.0, %v494_v26  ;;  %v524_v37 = vmul.f32 %v6144_v31, %v6119_v48  ;;  %v6150_v38 = vpop.eup %5486  ;;  %vm528_vm14 = vweird.f32 %v6119_v48 }
 0x2c5   :  { %v421_v35 = vmul.f32 %v5479_v15, %v420_v28  ;;  %v450_v43 = vsub.f32 1.0, %v449_v34  ;;  %v464_v46 = vmul.f32 %v6150_v38, %v6123_v60  ;;  %v6164_v0 = vpop.eup %5488  ;;  %vm469_vm13 = vweird.f32 %v6150_v38 }
 0x2c6   :  { %v437_v39 = vadd.f32 %v5477_v62, %v436_v32  ;;  %v496_v40 = vmul.f32 %v6131_v53, %v495_v33  ;;  %v525_v3 = vsub.f32 1.0, %v524_v37  ;;  %v479_v34 = vmul.f32 %v6164_v0, %v6129_v16 }
 0x2c7   :  { %v422_v44 = vadd.f32 %v5479_v15, %v421_v35  ;;  %v451_v12 = vmul.f32 %v5483_v27, %v450_v43  ;;  %v465_v5 = vsub.f32 1.0, %v464_v46  ;;  %v534_v37 = vand.u32 2147483648, %v6119_v48 }
 0x2c8   :  { %v441_v63 = vsel %vm440_vm15, %v5477_v62, %v437_v39  ;;  %v497_v10 = vadd.f32 %v6131_v53, %v496_v40  ;;  %v480_v40 = vsub.f32 1.0, %v479_v34  ;;  %v474_v45 = vand.u32 2147483648, %v6123_v60  ;;  %v5161_v34 = vld [vmem:[%s8759_s4 + $0x90] sm:$0xf] }
 0x2c9   :  { %v446_v58 = vsel %vm6133_vm10, %v445_v25, %v441_v63  ;;  %v426_v51 = vsel %vm425_vm6, %v5479_v15, %v422_v44  ;;  %v452_v62 = vadd.f32 %v5483_v27, %v451_v12  ;;  %vm453_vm6 = vweird.f32 %v6116_v1 }
 0x2ca   :  { %v447_v26 = vmul.f32 %v6065_v6, %v446_v58  ;;  %v431_v28 = vsel %vm6139_vm12, %v430_v36, %v426_v51  ;;  %v457_v6 = vand.u32 2147483647, %v6116_v1  ;;  %vm455_vm10 = vmor %vm453_vm6, %vm454_vm8  ;;  %v526_v25 = vmul.f32 %v6144_v31, %v525_v3 }
 0x2cb   :  { %v432_v32 = vmul.f32 %v6067_v7, %v431_v28  ;;  %v501_v7 = vsel %vm6175_vm9, %v6131_v53, %v497_v10  ;;  %v456_v30 = vsel %vm455_vm10, %v5483_v27, %v452_v62  ;;  %v466_v33 = vmul.f32 %v6150_v38, %v465_v5  ;;  %v5404_v53 = vld [vmem:[%s8759_s4 + $0xb0] sm:$0xf0] }
 0x2cc   :  { %545 = vperm.xlu1 %5459, %v447_v26   ;;  %v460_v1 = vor.u32 1.1754944e-38, %v459_v54  ;;  %v506_v35 = vsel %vm503_vm7, %v505_v56, %v501_v7  ;;  %vm458_vm11 = vcmp.eq.f32.partialorder %v457_v6, 8.507059e+37  ;;  %v527_v36 = vadd.f32 %v6144_v31, %v526_v25 }
 0x2cd   :  { %540 = vperm.xlu0 %5458, %v432_v32   ;;  %vm529_vm12 = vweird.f32 %v6144_v31  ;;  %v467_v39 = vadd.f32 %v6150_v38, %v466_v33  ;;  %v6203_v42 = vor.u32 %v5404_v53, %v5173_v49  ;;  %v507_v43 = vmul.f32 %v6080_v18, %v506_v35  ;;  %v5398_v49 = vld [vmem:[%s8759_s4 + $0x80] sm:$0xf0]  ;;  %v5137_v53 = vld [vmem:[%s8759_s4 + $0x60] sm:$0xf]  ;;  %v5395_v35 = vld [vmem:[%s8759_s4 + $0x68] sm:$0xf0] }
 0x2ce   :  { %v461_v27 = vsel %vm458_vm11, %v460_v1, %v456_v30  ;;  %v532_v44 = vand.u32 2147483647, %v6119_v48  ;;  %vm6210_vm15 = vmor %vm528_vm14, %vm529_vm12  ;;  %vm468_vm8 = vweird.f32 %v6123_v60  ;;  %v472_v10 = vand.u32 2147483647, %v6123_v60 }
 0x2cf   :  { %8905 = vst [vmem:[#allocation18_spill] sm:$0xff] %v6203_v42  ;;  %v462_v46 = vmul.f32 %v6074_v14, %v461_v27  ;;  %798 = vmatpush.bf16.msra.mxu0 %v6203_v42  ;;  %1532 = vmatpush.bf16.msra.mxu2 %v6203_v42  ;;  %v531_v18 = vsel %vm6210_vm15, %v6144_v31, %v527_v36  ;;  %vm470_vm9 = vmor %vm468_vm8, %vm469_vm13  ;;  %v5491_v14 = vpop.eup %5490  ;;  %v535_v48 = vor.u32 1.1754944e-38, %v534_v37  ;;  %v475_v60 = vor.u32 1.1754944e-38, %v474_v45  ;;  %v5403_v27 = vld [vmem:[%s8759_s4 + $0xac] sm:$0xf] }
 0x2d0   :  { %v471_v12 = vsel %vm470_vm9, %v6150_v38, %v467_v39  ;;  %v481_v3 = vmul.f32 %v6164_v0, %v480_v40  ;;  %vm533_vm6 = vcmp.eq.f32.partialorder %v532_v44, 8.507059e+37  ;;  %v509_v58 = vmul.f32 %v5491_v14, %v6182_v23  ;;  %v5175_v37 = vld [vmem:[%s8759_s4 + $0xb4] sm:$0xf0]  ;;  %v5125_v39 = vld [vmem:[%s8759_s4 + $0x48] sm:$0xf] }
 0x2d1   :  { %v536_v51 = vsel %vm533_vm6, %v535_v48, %v531_v18  ;;  %vm473_vm10 = vcmp.eq.f32.partialorder %v472_v10, 8.507059e+37  ;;  %vm484_vm7 = vweird.f32 %v6164_v0  ;;  %v489_v62 = vand.u32 2147483648, %v6129_v16  ;;  %v5392_v40 = vld [vmem:[%s8759_s4 + $0x50] sm:$0xf0]  ;;  %v5163_v45 = vld [vmem:[%s8759_s4 + $0x9c] sm:$0xf0] }
 0x2d2   :  { %v476_v5 = vsel %vm473_vm10, %v475_v60, %v471_v12  ;;  %v482_v26 = vadd.f32 %v6164_v0, %v481_v3  ;;  %v510_v31 = vsub.f32 1.0, %v509_v58  ;;  %v537_v28 = vmul.f32 %v6086_v21, %v536_v51  ;;  %v5400_v44 = vld [vmem:[%s8759_s4 + $0x94] sm:$0xf]  ;;  %v5389_v48 = vld [vmem:[%s8759_s4 + $0x38] sm:$0xf0] }
 0x2d3   :  { %v477_v38 = vmul.f32 %v6072_v13, %v476_v5  ;;  %vm483_vm11 = vweird.f32 %v6129_v16  ;;  %v487_v54 = vand.u32 2147483647, %v6129_v16  ;;  %v490_v6 = vor.u32 1.1754944e-38, %v489_v62  ;;  %v5397_v12 = vld [vmem:[%s8759_s4 + $0x7c] sm:$0xf] }
 0x2d4   :  { %565 = vperm.xlu1 %5459, %v507_v43   ;;  %vm485_vm12 = vmor %vm483_vm11, %vm484_vm7  ;;  %v511_v15 = vmul.f32 %v5491_v14, %v510_v31  ;;  %vm514_vm14 = vweird.f32 %v5491_v14  ;;  %v519_v21 = vand.u32 2147483648, %v6182_v23  ;;  %vm513_vm15 = vweird.f32 %v6182_v23  ;;  %v5151_v60 = vld [vmem:[%s8759_s4 + $0x84] sm:$0xf0]  ;;  %v5101_v51 = vld [vmem:[%s8759_s4 + $0x18] sm:$0xf] }
 0x2d5   :  { %550 = vperm.xlu0 %5458, %v462_v46   ;;  %v486_v32 = vsel %vm485_vm12, %v6164_v0, %v482_v26  ;;  %vm488_vm13 = vcmp.eq.f32.partialorder %v487_v54, 8.507059e+37  ;;  %v517_v13 = vand.u32 2147483647, %v6182_v23  ;;  %vm515_vm8 = vmor %vm513_vm15, %vm514_vm14  ;;  %v5149_v23 = vld [vmem:[%s8759_s4 + $0x78] sm:$0xf]  ;;  %v6268_v36 = vor.u32 %v5395_v35, %v5137_v53 }
 0x2d6   :  { %v491_v7 = vsel %vm488_vm13, %v490_v6, %v486_v32  ;;  %v512_v25 = vadd.f32 %v5491_v14, %v511_v15  ;;  %v520_v30 = vor.u32 1.1754944e-38, %v519_v21  ;;  %v6279_v43 = vor.u32 %v5403_v27, %v5175_v37  ;;  %v5386_v5 = vld [vmem:[%s8759_s4 + $0x20] sm:$0xf0]  ;;  %v5139_v31 = vld [vmem:[%s8759_s4 + $0x6c] sm:$0xf0] }
 0x2d7   :  { %v492_v56 = vmul.f32 %v6082_v20, %v491_v7  ;;  %vm518_vm9 = vcmp.eq.f32.partialorder %v517_v13, 8.507059e+37  ;;  %v5401_v20 = vld [vmem:[%s8759_s4 + $0x98] sm:$0xf0]  ;;  %8910 = vst [vmem:[#allocation21_spill] sm:$0xff] %v6268_v36  ;;  %v6288_v46 = vor.u32 %v5392_v40, %v5125_v39  ;;  %v6292_v10 = vor.u32 %v5400_v44, %v5163_v45  ;;  %v5394_v26 = vld [vmem:[%s8759_s4 + $0x64] sm:$0xf] }
 0x2d8   :  { %v516_v16 = vsel %vm515_vm8, %v5491_v14, %v512_v25  ;;  %v6248_v1 = vor.u32 %v5401_v20, %v5161_v34  ;;  %8911 = vst [vmem:[#allocation22_spill] sm:$0xff] %v6279_v43  ;;  %811 = vmatpush.bf16.msra.mxu1 %v6279_v43  ;;  %1545 = vmatpush.bf16.msra.mxu3 %v6279_v43  ;;  %v5113_v14 = vld [vmem:[%s8759_s4 + $0x30] sm:$0xf]  ;;  %v5383_v7 = vld [vmem:[%s8759_s4 + $0x8] sm:$0xf0]  ;;  %vm8936_vm6 = vcmask 1047559  }
 0x2d9   :  { %v521_v0 = vsel %vm518_vm9, %v520_v30, %v516_v16  ;;  %8912 = vst [vmem:[#allocation23_spill] sm:$0xff] %v6288_v46  ;;  %v6305_v3 = vor.u32 %v5389_v48, %v5113_v14  ;;  %v6312_v58 = vor.u32 %v5397_v12, %v5151_v60  ;;  %v6329_v62 = vor.u32 %v5386_v5, %v5101_v51  ;;  %v5405_v30 = vld [vmem:[%s8759_s4 + $0xb8] sm:$0xf0]  ;;  %v5115_v34 = vld [vmem:[%s8759_s4 + $0x3c] sm:$0xf0]  ;;  %vm8953_vm9 = vmmov %vm8936_vm6 }
 0x2da   :  { %v522_v33 = vmul.f32 %v6088_v22, %v521_v0  ;;  %8908 = vst [vmem:[#allocation19_spill] sm:$0xff] %v6248_v1  ;;  %799 = vmatpush.bf16.msra.mxu0 %v6248_v1  ;;  %v6254_v22 = vor.u32 %v5398_v49, %v5149_v23  ;;  %1533 = vmatpush.bf16.msra.mxu2 %v6248_v1  ;;  %v5388_v0 = vld [vmem:[%s8759_s4 + $0x34] sm:$0xf]  ;;  %v5169_v20 = vld [vmem:[%s8759_s4 + $0x98] sm:$0xf] }
 0x2db   :  { %8913 = vst [vmem:[#allocation24_spill] sm:$0xff] %v6292_v10  ;;  %v6334_v32 = vor.u32 %v5394_v26, %v5139_v31  ;;  %v5402_v23 = vld [vmem:[%s8759_s4 + $0xa0] sm:$0xf0]  ;;  %v6383_v39 = vor.u32 %v5388_v0, %v5115_v34  ;;  %v5157_v14 = vld [vmem:[%s8759_s4 + $0x80] sm:$0xf] }
 0x2dc   :  { %575 = vperm.xlu1 %5459, %v537_v28   ;;  %8909 = vst [vmem:[#allocation20_spill] sm:$0xff] %v6254_v22  ;;  %812 = vmatpush.bf16.msra.mxu1 %v6292_v10  ;;  %v6385_v40 = vor.u32 %v5402_v23, %v5169_v20  ;;  %v5133_v23 = vld [vmem:[%s8759_s4 + $0x50] sm:$0xf] }
 0x2dd   :  { %555 = vperm.xlu0 %5458, %v477_v38   ;;  %8914 = vst [vmem:[#allocation25_spill] sm:$0xff] %v6305_v3  ;;  %1546 = vmatpush.bf16.msra.mxu3 %v6292_v10 }
 0x2de   :  { %800 = vmatpush.bf16.msra.mxu0 %v6254_v22  ;;  %1534 = vmatpush.bf16.msra.mxu2 %v6254_v22  ;;  %8915 = vst [vmem:[#allocation26_spill] sm:$0xff] %v6312_v58 }
 0x2df   :  { %8916 = vst [vmem:[#allocation27_spill] sm:$0xff] %v6329_v62 }
 0x2e0   :  { %813 = vmatpush.bf16.msra.mxu1 %v6312_v58  ;;  %8917 = vst [vmem:[#allocation28_spill] sm:$0xff] %v6334_v32 }
 0x2e1   :  { %1547 = vmatpush.bf16.msra.mxu3 %v6312_v58  ;;  %8920 = vst [vmem:[#allocation31_spill] sm:$0xff] %v6383_v39 }
 0x2e2   :  { %801 = vmatpush.bf16.msra.mxu0 %v6268_v36  ;;  %1535 = vmatpush.bf16.msra.mxu2 %v6268_v36 }
 0x2e4   :  { %814 = vmatpush.bf16.msra.mxu1 %v6334_v32 }
 0x2e5   :  { %560 = vperm.xlu0 %5458, %v492_v56   ;;  %v5181_v56 = vld [vmem:[%s8759_s4 + $0xb0] sm:$0xf]  ;;  %1548 = vmatpush.bf16.msra.mxu3 %v6334_v32 }
 0x2e6   :  { %802 = vmatpush.bf16.msra.mxu0 %v6288_v46  ;;  %1536 = vmatpush.bf16.msra.mxu2 %v6288_v46 }
 0x2ea   :  { %803 = vmatpush.bf16.msra.mxu0 %v6305_v3  ;;  %1537 = vmatpush.bf16.msra.mxu2 %v6305_v3 }
 0x2ed   :  { %570 = vperm.xlu0 %5458, %v522_v33   ;;  %v6367_v33 = vor.u32 %v5405_v30, %v5181_v56 }
 0x2ee   :  { %804 = vmatpush.bf16.msra.mxu0 %v6329_v62  ;;  %1538 = vmatpush.bf16.msra.mxu2 %v6329_v62 }
 0x33e   :  { %v546_v63 = vpop.permute.xlu1 %545 }
 0x33f   :  { %v541_v18 = vpop.permute.xlu0 %540  ;;  %v579_v28 = vmul.f32 %v546_v63, %v5979_v17  ;;  %v5089_v17 = vld [vmem:[%s8759_s4] sm:$0xf]  ;;  %v5385_v63 = vld [vmem:[%s8759_s4 + $0x1c] sm:$0xf] }
 0x340   :  { %v578_v38 = vmul.f32 %v541_v18, %v5958_v2  ;;  %v5391_v2 = vld [vmem:[%s8759_s4 + $0x4c] sm:$0xf]  ;;  %v6348_v21 = vor.u32 %v5383_v7, %v5089_v17  ;;  %v5103_v18 = vld [vmem:[%s8759_s4 + $0x24] sm:$0xf0]  ;;  %v5428_v7 = vld [vmem:[%s8760_s5 + $0xb0] sm:$0xf0] }
 0x341   :  { %v592_v25 = vrot.slane %v579_v28, 4  ;;  %v6404_v26 = vor.u32 %v5385_v63, %v5103_v18  ;;  %v5269_v17 = vld [vmem:[%s8760_s5 + $0xa8] sm:$0xf] }
 0x342   :  { %8918 = vst [vmem:[#allocation29_spill] sm:$0xff] %v6348_v21  ;;  %v586_v13 = vrot.slane %v578_v38, 4  ;;  %805 = vmatpush.bf16.msra.mxu0 %v6348_v21  ;;  %1539 = vmatpush.bf16.msra.mxu2 %v6348_v21  ;;  %v6433_v20 = vor.u32 %v5428_v7, %v5269_v17  ;;  %v5424_v7 = vld [vmem:[%s8760_s5 + $0x94] sm:$0xf] }
 0x343   :  { %v593_v53 = vadd.f32 %v592_v25, %v579_v28  ;;  %8921 = vst [vmem:[#allocation32_spill] sm:$0xff] %v6404_v26  ;;  %v5382_v28 = vld [vmem:[%s8759_s4 + $0x4] sm:$0xf] }
 0x344   :  { %v587_v27 = vadd.f32 %v586_v13, %v578_v38  ;;  %v5145_v38 = vld [vmem:[%s8759_s4 + $0x68] sm:$0xf] }
 0x345   :  { %v594_v48 = vrot.slane %v593_v53, 2 }
 0x346   :  { %v566_v54 = vpop.permute.xlu1 %565  ;;  %824 = vmatpush.bf16.msrb.mxu0 %v6367_v33  ;;  %v588_v51 = vrot.slane %v587_v27, 2 }
 0x347   :  { %v551_v15 = vpop.permute.xlu0 %550  ;;  %v583_v35 = vmul.f32 %v566_v54, %v6006_v41  ;;  %v5396_v54 = vld [vmem:[%s8759_s4 + $0x70] sm:$0xf0] }
 0x348   :  { %v580_v6 = vmul.f32 %v551_v15, %v5971_v9  ;;  %v5127_v9 = vld [vmem:[%s8759_s4 + $0x54] sm:$0xf0]  ;;  %v589_v56 = vadd.f32 %v588_v51, %v587_v27  ;;  %v6431_v0 = vor.u32 %v5396_v54, %v5145_v38  ;;  %v5257_v27 = vld [vmem:[%s8760_s5 + $0x90] sm:$0xf]  ;;  %v5422_v38 = vld [vmem:[%s8760_s5 + $0x80] sm:$0xf0] }
 0x349   :  { %v6358_v16 = vor.u32 %v5391_v2, %v5127_v9  ;;  %v616_v12 = vrot.slane %v583_v35, 4  ;;  %v595_v2 = vadd.f32 %v594_v48, %v593_v53  ;;  %v5271_v51 = vld [vmem:[%s8760_s5 + $0xb4] sm:$0xf0] }
 0x34a   :  { %v598_v49 = vrot.slane %v580_v6, 4  ;;  %825 = vmatpush.bf16.msrb.mxu0 %v6385_v40 }
 0x34b   :  { %8919 = vst [vmem:[#allocation30_spill] sm:$0xff] %v6358_v16  ;;  %815 = vmatpush.bf16.msra.mxu1 %v6358_v16  ;;  %1549 = vmatpush.bf16.msra.mxu3 %v6358_v16  ;;  %v617_v25 = vadd.f32 %v616_v12, %v583_v35  ;;  %v596_v18 = vrot.slane %v595_v2, 1 }
 0x34c   :  { %v599_v45 = vadd.f32 %v598_v49, %v580_v6  ;;  %v5393_v49 = vld [vmem:[%s8759_s4 + $0x58] sm:$0xf0] }
 0x34e   :  { %v576_v37 = vpop.permute.xlu1 %575  ;;  %v600_v15 = vrot.slane %v599_v45, 2 }
 0x34f   :  { %v556_v44 = vpop.permute.xlu0 %555  ;;  %v585_v60 = vmul.f32 %v576_v37, %v6000_v29  ;;  %816 = vmatpush.bf16.msra.mxu1 %v6383_v39  ;;  %v5091_v29 = vld [vmem:[%s8759_s4 + $0xc] sm:$0xf0]  ;;  %1550 = vmatpush.bf16.msra.mxu3 %v6383_v39  ;;  %v5425_v37 = vld [vmem:[%s8760_s5 + $0x98] sm:$0xf0] }
 0x350   :  { %v581_v41 = vmul.f32 %v556_v44, %v5966_v8  ;;  %v5399_v8 = vld [vmem:[%s8759_s4 + $0x88] sm:$0xf0]  ;;  %v6429_v30 = vor.u32 %v5382_v28, %v5091_v29  ;;  %v601_v53 = vadd.f32 %v600_v15, %v599_v45  ;;  %v618_v44 = vrot.slane %v617_v25, 2  ;;  %v5245_v29 = vld [vmem:[%s8760_s5 + $0x78] sm:$0xf] }
 0x351   :  { %v6406_v31 = vor.u32 %v5399_v8, %v5157_v14  ;;  %v628_v9 = vrot.slane %v585_v60, 4  ;;  %v590_v14 = vrot.slane %v589_v56, 1  ;;  %v6451_v45 = vor.u32 %v5393_v49, %v5133_v23  ;;  %v5390_v8 = vld [vmem:[%s8759_s4 + $0x40] sm:$0xf0] }
 0x352   :  { %v604_v5 = vrot.slane %v581_v41, 4  ;;  %8922 = vst [vmem:[#allocation33_spill] sm:$0xff] %v6429_v30  ;;  %v6457_v12 = vor.u32 %v5425_v37, %v5257_v27  ;;  %v619_v15 = vadd.f32 %v618_v44, %v617_v25  ;;  %v597_v23 = vadd.f32 %v596_v18, %v595_v2  ;;  %v5109_v27 = vld [vmem:[%s8759_s4 + $0x20] sm:$0xf]  ;;  %v5387_v37 = vld [vmem:[%s8759_s4 + $0x28] sm:$0xf0] }
 0x353   :  { %817 = vmatpush.bf16.msra.mxu1 %v6404_v26  ;;  %826 = vmatpush.bf16.msrb.mxu0 %v6406_v31  ;;  %8923 = vst [vmem:[#allocation34_spill] sm:$0xff] %v6451_v45  ;;  %v591_v49 = vadd.f32 %v590_v14, %v589_v56  ;;  %v5233_v2 = vld [vmem:[%s8760_s5 + $0x60] sm:$0xf]  ;;  %v5419_v56 = vld [vmem:[%s8760_s5 + $0x68] sm:$0xf0] }
 0x354   :  { %v605_v6 = vadd.f32 %v604_v5, %v581_v41  ;;  %1551 = vmatpush.bf16.msra.mxu3 %v6404_v26  ;;  %v629_v41 = vadd.f32 %v628_v9, %v585_v60  ;;  %v5121_v60 = vld [vmem:[%s8759_s4 + $0x38] sm:$0xf]  ;;  %v602_v5 = vrot.slane %v601_v53, 1  ;;  %v5259_v9 = vld [vmem:[%s8760_s5 + $0x9c] sm:$0xf0]  ;;  %v620_v14 = vrot.slane %v619_v15, 1 }
 0x355   :  { %v6503_v18 = vor.u32 %v5424_v7, %v5259_v9  ;;  %v5429_v7 = vld [vmem:[%s8760_s5 + $0xb8] sm:$0xf0] }
 0x356   :  { %v606_v13 = vrot.slane %v605_v6, 2  ;;  %v603_v44 = vadd.f32 %v602_v5, %v601_v53  ;;  %v5097_v53 = vld [vmem:[%s8759_s4 + $0x8] sm:$0xf] }
 0x357   :  { %v561_v34 = vpop.permute.xlu0 %560  ;;  %818 = vmatpush.bf16.msra.mxu1 %v6429_v30  ;;  %827 = vmatpush.bf16.msrb.mxu0 %v6431_v0 }
 0x358   :  { %v582_v35 = vmul.f32 %v561_v34, %v5984_v19  ;;  %v607_v63 = vadd.f32 %v606_v13, %v605_v6  ;;  %v5427_v19 = vld [vmem:[%s8760_s5 + $0xac] sm:$0xf]  ;;  %1552 = vmatpush.bf16.msra.mxu3 %v6429_v30  ;;  %v630_v6 = vrot.slane %v629_v41, 2  ;;  %v6484_v34 = vor.u32 %v5390_v8, %v5121_v60 }
 0x359   :  { %v6475_v54 = vor.u32 %v5427_v19, %v5271_v51  ;;  %v639_v9 = vpack.c.bf16 %v603_v44, %v603_v44 }
 0x35a   :  { %v610_v48 = vrot.slane %v582_v35, 4  ;;  %v608_v17 = vrot.slane %v607_v63, 1  ;;  %8924 = vst [vmem:[#allocation35_spill] sm:$0xff] %v6484_v34  ;;  %v631_v60 = vadd.f32 %v630_v6, %v629_v41  ;;  %v638_v41 = vpack.c.bf16 %v597_v23, %v597_v23  ;;  %v5384_v6 = vld [vmem:[%s8759_s4 + $0x10] sm:$0xf0]  ;;  %s5077_s4 = sshll.u32 %s8765_s10, 4  ;;  %s5078_s4 = int_to_ptr.hbm [resolvable:$true] %s5077_s4 }
 0x35b   :  { %976 = vmatpush.bf16.msrb.mxu1 %v6433_v20  ;;  %828 = vmatpush.bf16.msrb.mxu0 %v6451_v45  ;;  %v6541_v44 = vor.u32 %v5384_v6, %v5097_v53  ;;  %v5265_v53 = vld [vmem:[%s8760_s5 + $0x98] sm:$0xf]  ;;  %v655_v6 = vunpack.c.l.b16 %v639_v9 }
 0x35c   :  { %v611_v28 = vadd.f32 %v610_v48, %v582_v35  ;;  %1588 = vmatpush.bf16.msrb.mxu2 %v6475_v54  ;;  %v6488_v35 = vor.u32 %v5422_v38, %v5245_v29  ;;  %v609_v8 = vadd.f32 %v608_v17, %v607_v63  ;;  %v5247_v29 = vld [vmem:[%s8760_s5 + $0x84] sm:$0xf0]  ;;  %v637_v63 = vpack.c.bf16 %v591_v49, %v591_v49  ;;  %v5277_v17 = vld [vmem:[%s8760_s5 + $0xb0] sm:$0xf]  ;;  %v5223_v9 = vld [vmem:[%s8760_s5 + $0x54] sm:$0xf0] }
 0x35d   :  { %v6519_v38 = vor.u32 %v5419_v56, %v5233_v2  ;;  %v5221_v49 = vld [vmem:[%s8760_s5 + $0x48] sm:$0xf]  ;;  %8927 = vst [vmem:[#allocation38_spill] sm:$0xff] %v6541_v44 }
 0x35e   :  { %v612_v13 = vrot.slane %v611_v28, 2  ;;  %v640_v2 = vpack.c.bf16 %v609_v8, %v609_v8  ;;  %v653_v8 = vunpack.c.l.b16 %v637_v63 }
 0x35f   :  { %v571_v25 = vpop.permute.xlu0 %570  ;;  %977 = vmatpush.bf16.msrb.mxu1 %v6457_v12  ;;  %829 = vmatpush.bf16.msrb.mxu0 %v6484_v34 }
 0x360   :  { %v613_v48 = vadd.f32 %v612_v13, %v611_v28  ;;  %v584_v19 = vmul.f32 %v571_v25, %v5991_v24  ;;  %v6509_v24 = vor.u32 %v5387_v37, %v5109_v27  ;;  %v5421_v28 = vld [vmem:[%s8760_s5 + $0x7c] sm:$0xf]  ;;  %1589 = vmatpush.bf16.msrb.mxu2 %v6503_v18  ;;  %v5416_v25 = vld [vmem:[%s8760_s5 + $0x50] sm:$0xf0]  ;;  %v6536_v27 = vor.u32 %v5429_v7, %v5277_v17 }
 0x361   :  { %v632_v37 = vrot.slane %v631_v60, 1  ;;  %v6538_v56 = vor.u32 %v5421_v28, %v5247_v29  ;;  %v6551_v28 = vor.u32 %v5416_v25, %v5221_v49  ;;  %v5426_v29 = vld [vmem:[%s8760_s5 + $0xa0] sm:$0xf0]  ;;  %v656_v7 = vunpack.c.l.b16 %v640_v2  ;;  %v5423_v2 = vld [vmem:[%s8760_s5 + $0x88] sm:$0xf0] }
 0x362   :  { %v614_v51 = vrot.slane %v613_v48, 1  ;;  %v622_v5 = vrot.slane %v584_v19, 4  ;;  %8925 = vst [vmem:[#allocation36_spill] sm:$0xff] %v6509_v24  ;;  %1601 = vmatpush.bf16.msrb.mxu3 %v6536_v27 }
 0x363   :  { %978 = vmatpush.bf16.msrb.mxu1 %v6488_v35  ;;  %8926 = vst [vmem:[#allocation37_spill] sm:$0xff] %v6536_v27  ;;  %830 = vmatpush.bf16.msrb.mxu0 %v6509_v24  ;;  %v633_v63 = vadd.f32 %v632_v37, %v631_v60 }
 0x364   :  { %v615_v13 = vadd.f32 %v614_v51, %v613_v48  ;;  %v623_v23 = vadd.f32 %v622_v5, %v584_v19  ;;  %v5418_v48 = vld [vmem:[%s8760_s5 + $0x64] sm:$0xf]  ;;  %v5235_v19 = vld [vmem:[%s8760_s5 + $0x6c] sm:$0xf0]  ;;  %v654_v51 = vunpack.c.l.b16 %v638_v41  ;;  %v621_v5 = vadd.f32 %v620_v14, %v619_v15  ;;  %8928 = vst [vmem:[#allocation39_spill] sm:$0xff] %v6551_v28  ;;  %1590 = vmatpush.bf16.msrb.mxu2 %v6538_v56 }
 0x365   :  { %v5209_v15 = vld [vmem:[%s8760_s5 + $0x30] sm:$0xf]  ;;  %v5413_v14 = vld [vmem:[%s8760_s5 + $0x38] sm:$0xf0]  ;;  %v6566_v41 = vor.u32 %v5426_v29, %v5265_v53  ;;  %v644_v53 = vpack.c.bf16 %v633_v63, %v633_v63 }
 0x366   :  { %v641_v11 = vpack.c.bf16 %v615_v13, %v615_v13  ;;  %v624_v4 = vrot.slane %v623_v23, 2  ;;  %v6568_v13 = vor.u32 %v5418_v48, %v5235_v19  ;;  %v642_v60 = vpack.c.bf16 %v621_v5, %v621_v5 }
 0x367   :  { %979 = vmatpush.bf16.msrb.mxu1 %v6519_v38  ;;  %8929 = vst [vmem:[#allocation40_spill] sm:$0xff] %v6566_v41  ;;  %831 = vmatpush.bf16.msrb.mxu0 %v6541_v44  ;;  %v6580_v37 = vor.u32 %v5413_v14, %v5209_v15 }
 0x368   :  { %v625_v17 = vadd.f32 %v624_v4, %v623_v23  ;;  %v657_v49 = vunpack.c.l.b16 %v641_v11  ;;  %v5415_v4 = vld [vmem:[%s8760_s5 + $0x4c] sm:$0xf]  ;;  %1602 = vmatpush.bf16.msrb.mxu3 %v6566_v41  ;;  %v661_v23 = vsel %vm290_vm0, %v654_v51, %v653_v8  ;;  %v5253_v11 = vld [vmem:[%s8760_s5 + $0x80] sm:$0xf]  ;;  %1591 = vmatpush.bf16.msrb.mxu2 %v6568_v13  ;;  %v5197_v51 = vld [vmem:[%s8760_s5 + $0x18] sm:$0xf] }
 0x369   :  { %8930 = vst [vmem:[#allocation41_spill] sm:$0xff] %v6580_v37  ;;  %v662_v48 = vsel %vm8873_vm1, %v655_v6, %v661_v23  ;;  %v5410_v8 = vld [vmem:[%s8760_s5 + $0x20] sm:$0xf0]  ;;  %v6596_v5 = vor.u32 %v5423_v2, %v5253_v11  ;;  %v6599_v15 = vor.u32 %v5415_v4, %v5223_v9  ;;  %v5412_v6 = vld [vmem:[%s8760_s5 + $0x34] sm:$0xf]  ;;  %v660_v11 = vunpack.c.l.b16 %v644_v53 }
 0x36a   :  { %v626_v25 = vrot.slane %v625_v17, 1  ;;  %v663_v29 = vsel %vm8872_vm2, %v656_v7, %v662_v48  ;;  %v6610_v63 = vor.u32 %v5410_v8, %v5197_v51  ;;  %v5241_v7 = vld [vmem:[%s8760_s5 + $0x68] sm:$0xf]  ;;  %v5185_v9 = vld [vmem:[%s8760_s5] sm:$0xf] }
 0x36b   :  { %980 = vmatpush.bf16.msrb.mxu1 %v6551_v28  ;;  %8931 = vst [vmem:[#allocation42_spill] sm:$0xff] %v6596_v5  ;;  %v664_v57 = vsel %vm8867_vm3, %v657_v49, %v663_v29  ;;  %v5420_v49 = vld [vmem:[%s8760_s5 + $0x70] sm:$0xf0]  ;;  %v5407_v23 = vld [vmem:[%s8760_s5 + $0x8] sm:$0xf0] }
 0x36c   :  { %v627_v19 = vadd.f32 %v626_v25, %v625_v17  ;;  %8932 = vst [vmem:[#allocation43_spill] sm:$0xff] %v6599_v15  ;;  %v5211_v17 = vld [vmem:[%s8760_s5 + $0x3c] sm:$0xf0]  ;;  %1603 = vmatpush.bf16.msrb.mxu3 %v6596_v5  ;;  %v658_v25 = vunpack.c.l.b16 %v642_v60  ;;  %1592 = vmatpush.bf16.msrb.mxu2 %v6599_v15  ;;  %v6625_v60 = vor.u32 %v5420_v49, %v5241_v7  ;;  %v5229_v29 = vld [vmem:[%s8760_s5 + $0x50] sm:$0xf] }
 0x36d   :  { %8933 = vst [vmem:[#allocation44_spill] sm:$0xff] %v6610_v63  ;;  %v6628_v48 = vor.u32 %v5412_v6, %v5211_v17  ;;  %v6634_v8 = vor.u32 %v5407_v23, %v5185_v9  ;;  %v5199_v6 = vld [vmem:[%s8760_s5 + $0x24] sm:$0xf0]  ;;  %v5217_v7 = vld [vmem:[%s8760_s5 + $0x38] sm:$0xf] }
 0x36e   :  { %v643_v14 = vpack.c.bf16 %v627_v19, %v627_v19  ;;  %8934 = vst [vmem:[#allocation45_spill] sm:$0xff] %v6625_v60  ;;  %v665_v2 = vsel %vm8866_vm4, %v658_v25, %v664_v57  ;;  %v5417_v57 = vld [vmem:[%s8760_s5 + $0x58] sm:$0xf0]  ;;  %v5414_v49 = vld [vmem:[%s8760_s5 + $0x40] sm:$0xf0] }
 0x36f   :  { %981 = vmatpush.bf16.msrb.mxu1 %v6580_v37  ;;  %8935 = vst [vmem:[#allocation46_spill] sm:$0xff] %v6628_v48  ;;  %v6649_v17 = vor.u32 %v5417_v57, %v5229_v29  ;;  %v5187_v9 = vld [vmem:[%s8760_s5 + $0xc] sm:$0xf0]  ;;  %v6670_v23 = vor.u32 %v5414_v49, %v5217_v7  ;;  %v5193_v29 = vld [vmem:[%s8760_s5 + $0x8] sm:$0xf] }
 0x370   :  { %v659_v4 = vunpack.c.l.b16 %v643_v14  ;;  %1604 = vmatpush.bf16.msrb.mxu3 %v6625_v60  ;;  %8937 = vst [vmem:[#allocation47_spill] sm:$0xff] %v6634_v8  ;;  %1593 = vmatpush.bf16.msrb.mxu2 %v6628_v48  ;;  %v5409_v14 = vld [vmem:[%s8760_s5 + $0x1c] sm:$0xf]  ;;  %v5408_v57 = vld [vmem:[%s8760_s5 + $0x10] sm:$0xf0] }
 0x371   :  { %8938 = vst [vmem:[#allocation48_spill] sm:$0xff] %v6649_v17  ;;  %v6653_v25 = vor.u32 %v5409_v14, %v5199_v6  ;;  %v6698_v14 = vld [vmem:[%s8758_s3] sm:$0xff]  ;;  %v6702_v7 = vor.u32 %v5408_v57, %v5193_v29 }
 0x372   :  { %v666_v19 = vsel %vm8863_vm5, %v659_v4, %v665_v2  ;;  %v5406_v4 = vld [vmem:[%s8760_s5 + $0x4] sm:$0xf]  ;;  %8940 = vst [vmem:[#allocation50_spill] sm:$0xff] %v6670_v23  ;;  %v5205_v2 = vld [vmem:[%s8760_s5 + $0x20] sm:$0xf]  ;;  %v840_v6 = vpack.c.bf16 %v6698_v14, %v6698_v14 }
 0x373   :  { %v667_v51 = vsel %vm8936_vm6, %v660_v11, %v666_v19  ;;  %982 = vmatpush.bf16.msrb.mxu1 %v6610_v63  ;;  %8939 = vst [vmem:[#allocation49_spill] sm:$0xff] %v6653_v25  ;;  %v6673_v11 = vor.u32 %v5406_v4, %v5187_v9  ;;  %v5411_v19 = vld [vmem:[%s8760_s5 + $0x28] sm:$0xf0]  ;;  %v634_v29 = vld [vmem:[%s8755_s0] sm:$0xff]  ;;  %vm8954_vm6 = vcmask 64512  }
 0x374   :  { %v668_v53 = vpack.c.b16 %v667_v51, %v667_v51  ;;  %1605 = vmatpush.bf16.msrb.mxu3 %v6649_v17  ;;  %1594 = vmatpush.bf16.msrb.mxu2 %v6653_v25  ;;  %v6684_v51 = vor.u32 %v5411_v19, %v5205_v2  ;;  %8943 = vst [vmem:[#allocation53_spill] sm:$0xff] %v6702_v7  ;;  %v125_v2 = vld [vmem:[%s8761_s6] sm:$0x7] }
 0x375   :  { %8941 = vst [vmem:[#allocation51_spill] sm:$0xff] %v6673_v11  ;;  %v6750_v19 = vperm.slane %v125_v2, 0 }
 0x376   :  { %806 = vmatmul.bf16.vlgmr.msra.gmra.mxu0 %v668_v53  ;;  %819 = vmatmul.bf16.vlgmr.msra.gmra.mxu1 %v668_v53  ;;  %8942 = vst [vmem:[#allocation52_spill] sm:$0xff] %v6684_v51 }
 0x377   :  { %989 = vmatpush.bf16.msra.mxu0 %v6475_v54  ;;  %983 = vmatpush.bf16.msrb.mxu1 %v6634_v8  ;;  %8944 = vst [vmem:[#allocation54_spill] sm:$0xff] %v6750_v19 }
 0x378   :  { %1606 = vmatpush.bf16.msrb.mxu3 %v6670_v23  ;;  %1595 = vmatpush.bf16.msrb.mxu2 %v6673_v11 }
 0x37b   :  { %1002 = vmatpush.bf16.msra.mxu1 %v6536_v27  ;;  %990 = vmatpush.bf16.msra.mxu0 %v6503_v18 }
 0x37c   :  { %1607 = vmatpush.bf16.msrb.mxu3 %v6684_v51 }
 0x37f   :  { %1003 = vmatpush.bf16.msra.mxu1 %v6566_v41  ;;  %991 = vmatpush.bf16.msra.mxu0 %v6538_v56 }
 0x380   :  { %1608 = vmatpush.bf16.msrb.mxu3 %v6702_v7 }
 0x383   :  { %1004 = vmatpush.bf16.msra.mxu1 %v6596_v5  ;;  %992 = vmatpush.bf16.msra.mxu0 %v6568_v13 }
 0x386   :  { %832 = vmatmul.bf16.vlgmr.msrb.gmra.mxu0 %v668_v53  ;;  %984 = vmatmul.bf16.vlgmr.msrb.gmra.mxu1 %v840_v6 }
 0x387   :  { %1005 = vmatpush.bf16.msra.mxu1 %v6625_v60  ;;  %993 = vmatpush.bf16.msra.mxu0 %v6599_v15 }
 0x38b   :  { %1006 = vmatpush.bf16.msra.mxu1 %v6649_v17  ;;  %994 = vmatpush.bf16.msra.mxu0 %v6628_v48 }
 0x38f   :  { %1007 = vmatpush.bf16.msra.mxu1 %v6670_v23  ;;  %995 = vmatpush.bf16.msra.mxu0 %v6653_v25 }
 0x393   :  { %1008 = vmatpush.bf16.msra.mxu1 %v6684_v51  ;;  %996 = vmatpush.bf16.msra.mxu0 %v6673_v11 }
 0x396   :  { %997 = vmatmul.bf16.vlgmr.msra.gmra.mxu0 %v840_v6 }
 0x397   :  { %1009 = vmatpush.bf16.msra.mxu1 %v6702_v7  ;;  %1558 = vmatpush.bf16.msrb.mxu0 %v6367_v33 }
 0x39a   :  { %1010 = vmatmul.bf16.vlgmr.msra.gmra.mxu1 %v840_v6 }
 0x39b   :  { %1575 = vmatpush.bf16.msrb.mxu1 %v6433_v20  ;;  %1559 = vmatpush.bf16.msrb.mxu0 %v6385_v40 }
 0x39f   :  { %1576 = vmatpush.bf16.msrb.mxu1 %v6457_v12  ;;  %1560 = vmatpush.bf16.msrb.mxu0 %v6406_v31 }
 0x3a3   :  { %1577 = vmatpush.bf16.msrb.mxu1 %v6488_v35  ;;  %1561 = vmatpush.bf16.msrb.mxu0 %v6431_v0 }
 0x3a7   :  { %1578 = vmatpush.bf16.msrb.mxu1 %v6519_v38  ;;  %1562 = vmatpush.bf16.msrb.mxu0 %v6451_v45 }
 0x3ab   :  { %1579 = vmatpush.bf16.msrb.mxu1 %v6551_v28  ;;  %1563 = vmatpush.bf16.msrb.mxu0 %v6484_v34 }
 0x3af   :  { %1580 = vmatpush.bf16.msrb.mxu1 %v6580_v37  ;;  %1564 = vmatpush.bf16.msrb.mxu0 %v6509_v24 }
 0x3b3   :  { %1581 = vmatpush.bf16.msrb.mxu1 %v6610_v63  ;;  %1565 = vmatpush.bf16.msrb.mxu0 %v6541_v44 }
 0x3b7   :  { %1582 = vmatpush.bf16.msrb.mxu1 %v6634_v8  ;;  %2131 = vmatpush.bf16.msra.mxu0 %v6203_v42 }
 0x3bb   :  { %2144 = vmatpush.bf16.msra.mxu1 %v6279_v43  ;;  %2132 = vmatpush.bf16.msra.mxu0 %v6248_v1 }
 0x3bf   :  { %2145 = vmatpush.bf16.msra.mxu1 %v6292_v10  ;;  %2133 = vmatpush.bf16.msra.mxu0 %v6254_v22  ;;  %v6762_v22 = vperm.slane %v125_v2, 2 }
 0x3c1   :  { %8946 = vst [vmem:[#allocation56_spill] sm:$0xff] %v6762_v22 }
 0x3c3   :  { %2146 = vmatpush.bf16.msra.mxu1 %v6312_v58  ;;  %2134 = vmatpush.bf16.msra.mxu0 %v6268_v36 }
 0x3c7   :  { %2147 = vmatpush.bf16.msra.mxu1 %v6334_v32  ;;  %2135 = vmatpush.bf16.msra.mxu0 %v6288_v46 }
 0x3cb   :  { %2148 = vmatpush.bf16.msra.mxu1 %v6358_v16  ;;  %2136 = vmatpush.bf16.msra.mxu0 %v6305_v3  ;;  %v6756_v3 = vperm.slane %v125_v2, 1  ;;  %v635_v16 = vld [vmem:[%s8755_s0 + $0x8] sm:$0xff] }
 0x3cd   :  { %8945 = vst [vmem:[#allocation55_spill] sm:$0xff] %v6756_v3 }
 0x3cf   :  { %2149 = vmatpush.bf16.msra.mxu1 %v6383_v39  ;;  %2137 = vmatpush.bf16.msra.mxu0 %v6329_v62 }
 0x3d3   :  { %2150 = vmatpush.bf16.msra.mxu1 %v6404_v26  ;;  %2138 = vmatpush.bf16.msra.mxu0 %v6348_v21 }
 0x3d7   :  { %2151 = vmatpush.bf16.msra.mxu1 %v6429_v30 }
 0x3f3   :  { %v807_v53 = vpop.f32.mrf.mxu0  ;;  %v820_v49 = vpop.f32.mrf.mxu1 }
 0x3f4   :  { %v837_v26 = vadd.f32 %v807_v53, %v634_v29  ;;  %v838_v36 = vadd.f32 %v820_v49, %v635_v16 }
 0x3fb   :  { %v809_v4 = vpop.f32.mrf.mxu0  ;;  %v822_v9 = vpop.f32.mrf.mxu1 }
 0x403   :  { %v833_v57 = vpop.f32.mrf.mxu0  ;;  %v985_v6 = vpop.f32.mrf.mxu1 }
 0x404   :  { %v986_v21 = vadd.f32 %v985_v6, %v6750_v19 }
 0x406   :  { %v1015_v30 = vadd.f32 %v986_v21, %v837_v26 }
 0x408   :  { %v5279_v62 = vmul.f32 -1.442695, %v1015_v30 }
 0x40a   :  { %5492 = vpow2.f32 %v5279_v62 }
 0x40b   :  { %v835_v4 = vpop.f32.mrf.mxu0  ;;  %v987_v9 = vpop.f32.mrf.mxu1 }
 0x410   :  { %v5493_v39 = vpop.eup %5492 }
 0x411   :  { %v1019_v46 = vadd.f32 1.0, %v5493_v39 }
 0x413   :  { %5494 = vrcp.f32 %v1019_v46  ;;  %v998_v32 = vpop.f32.mrf.mxu0  ;;  %v1031_v58 = vand.u32 2147483648, %v1019_v46  ;;  %v1029_v39 = vand.u32 2147483647, %v1019_v46  ;;  %vm1025_vm7 = vweird.f32 %v1019_v46 }
 0x414   :  { %v999_v53 = vadd.f32 %v998_v32, %v6756_v3 }
 0x415   :  { %vm1030_vm12 = vcmp.eq.f32.partialorder %v1029_v39, 8.507059e+37 }
 0x416   :  { %v1035_v6 = vadd.f32 %v999_v53, %v838_v36  ;;  %v1032_v36 = vor.u32 1.1754944e-38, %v1031_v58 }
 0x417   :  { %v1011_v29 = vpop.f32.mrf.mxu1 }
 0x418   :  { %v5280_v21 = vmul.f32 -1.442695, %v1035_v6  ;;  %v1012_v49 = vadd.f32 %v1011_v29, %v6762_v22  ;;  %v636_v6 = vld [vmem:[%s8755_s0 + $0x10] sm:$0xff] }
 0x419   :  { %v5495_v26 = vpop.eup %5494 }
 0x41a   :  { %5496 = vpow2.f32 %v5280_v21  ;;  %v1021_v62 = vmul.f32 %v5495_v26, %v1019_v46  ;;  %vm1026_vm10 = vweird.f32 %v5495_v26 }
 0x41b   :  { %v1000_v30 = vpop.f32.mrf.mxu0  ;;  %vm1027_vm11 = vmor %vm1025_vm7, %vm1026_vm10 }
 0x41c   :  { %v1022_v4 = vsub.f32 1.0, %v1021_v62  ;;  %v839_v62 = vadd.f32 %v833_v57, %v636_v6  ;;  %vm8955_vm10 = vmmov %vm8953_vm9 }
 0x41d   :  { %vm8956_vm7 = vmmov %vm8954_vm6 }
 0x41e   :  { %v1023_v19 = vmul.f32 %v5495_v26, %v1022_v4 }
 0x41f   :  { %v1013_v9 = vpop.f32.mrf.mxu1 }
 0x420   :  { %v5497_v10 = vpop.eup %5496  ;;  %v1024_v1 = vadd.f32 %v5495_v26, %v1023_v19 }
 0x421   :  { %v1039_v16 = vadd.f32 1.0, %v5497_v10 }
 0x422   :  { %v1028_v32 = vsel %vm1027_vm11, %v5495_v26, %v1024_v1 }
 0x423   :  { %5498 = vrcp.f32 %v1039_v16  ;;  %v1033_v53 = vsel %vm1030_vm12, %v1032_v36, %v1028_v32  ;;  %v1051_v46 = vand.u32 2147483648, %v1039_v16  ;;  %v1049_v1 = vand.u32 2147483647, %v1039_v16 }
 0x424   :  { %v1055_v21 = vmul.f32 %v1033_v53, %v1012_v49  ;;  %vm1045_vm14 = vweird.f32 %v1039_v16 }
 0x425   :  { %v1052_v29 = vor.u32 1.1754944e-38, %v1051_v46  ;;  %vm1050_vm8 = vcmp.eq.f32.partialorder %v1049_v1, 8.507059e+37  ;;  %v6795_v46 = vld [vmem:[%s8756_s1 + $0x8] sm:$0xff] }
 0x426   :  { %v1056_v4 = vadd.f32 %v1055_v21, %v839_v62 }
 0x428   :  { %5500 = vtanh.f32 %v1056_v4  ;;  %v6789_v4 = vld [vmem:[%s8756_s1 + $0x10] sm:$0xff] }
 0x429   :  { %v5499_v2 = vpop.eup %5498 }
 0x42a   :  { %v1041_v30 = vmul.f32 %v5499_v2, %v1039_v16  ;;  %vm1046_vm13 = vweird.f32 %v5499_v2 }
 0x42b   :  { %vm1047_vm15 = vmor %vm1045_vm14, %vm1046_vm13 }
 0x42c   :  { %v1042_v19 = vsub.f32 1.0, %v1041_v30 }
 0x42e   :  { %v1043_v10 = vmul.f32 %v5499_v2, %v1042_v19  ;;  %v5501_v32 = vpop.eup %5500 }
 0x430   :  { %v1044_v58 = vadd.f32 %v5499_v2, %v1043_v10 }
 0x432   :  { %v1048_v26 = vsel %vm1047_vm15, %v5499_v2, %v1044_v58  ;;  %v6782_v2 = vld [vmem:[%s8756_s1] sm:$0xff] }
 0x433   :  { %v1053_v9 = vsel %vm1050_vm8, %v1052_v29, %v1048_v26  ;;  %v6804_v29 = vld [vmem:[%s8756_s1 + $0x18] sm:$0xff] }
 0x434   :  { %v1058_v39 = vsub.f32 1.0, %v1053_v9  ;;  %v1060_v57 = vmul.f32 %v6698_v14, %v1053_v9 }
 0x436   :  { %v1059_v36 = vmul.f32 %v5501_v32, %v1058_v39  ;;  %v6813_v32 = vld [vmem:[%s8756_s1 + $0x20] sm:$0xff] }
 0x438   :  { %v6769_v49 = vadd.f32 %v1060_v57, %v1059_v36 }
 0x43a   :  { %8947 = vst [vmem:[#allocation57_spill] sm:$0xff] %v6769_v49  ;;  %v6773_v53 = vpack.c.bf16 %v6769_v49, %v6769_v49  ;;  %v1071_v6 = vperm.slane %v6769_v49, 0  ;;  %v1065_v16 = vrot.slane %v6769_v49, 2  ;;  %v1064_v21 = vrot.slane %v6769_v49, 1 }
 0x43b   :  { %v1066_v1 = vrot.slane %v6769_v49, 3  ;;  %v1067_v9 = vrot.slane %v6769_v49, 4  ;;  %v1068_v57 = vrot.slane %v6769_v49, 5 }
 0x43c   :  { %8948 = vst [vmem:[#allocation58_spill] sm:$0xff] %v6773_v53  ;;  %1583 = vmatmul.bf16.vlgmr.msrb.gmra.mxu1 %v6773_v53  ;;  %v1087_v14 = vmul.f32 %v6782_v2, %v1071_v6  ;;  %v1073_v62 = vperm.slane %v1065_v16, 0  ;;  %v1072_v30 = vperm.slane %v1064_v21, 0  ;;  %v6822_v16 = vld [vmem:[%s8756_s1 + $0x28] sm:$0xff] }
 0x43d   :  { %2200 = vmatpush.bf16.msrb.mxu1 %v6536_v27  ;;  %v1074_v58 = vperm.slane %v1066_v1, 0  ;;  %v1075_v39 = vperm.slane %v1067_v9, 0  ;;  %v1076_v6 = vperm.slane %v1068_v57, 0 }
 0x43e   :  { %1095 = vadd.xlane.f32.xlu0 %v1087_v14  ;;  %v1089_v19 = vmul.f32 %v6789_v4, %v1073_v62  ;;  %v1088_v10 = vmul.f32 %v6795_v46, %v1072_v30  ;;  %v1069_v14 = vrot.slane %v6769_v49, 6  ;;  %v6830_v30 = vld [vmem:[%s8756_s1 + $0x30] sm:$0xff] }
 0x43f   :  { %v1090_v26 = vmul.f32 %v6804_v29, %v1074_v58  ;;  %v1091_v36 = vmul.f32 %v6813_v32, %v1075_v39  ;;  %v1092_v21 = vmul.f32 %v6822_v16, %v1076_v6  ;;  %v6837_v58 = vld [vmem:[%s8756_s1 + $0x38] sm:$0xff] }
 0x440   :  { %1099 = vadd.xlane.f32.xlu1 %v1089_v19  ;;  %1097 = vadd.xlane.f32.xlu2 %v1088_v10  ;;  %v1077_v62 = vperm.slane %v1069_v14, 0  ;;  %v1070_v10 = vrot.slane %v6769_v49, 7 }
 0x441   :  { %2201 = vmatpush.bf16.msrb.mxu1 %v6566_v41 }
 0x442   :  { %v1093_v19 = vmul.f32 %v6830_v30, %v1077_v62  ;;  %v1078_v1 = vperm.slane %v1070_v10, 0 }
 0x445   :  { %2202 = vmatpush.bf16.msrb.mxu1 %v6596_v5 }
 0x448   :  { %1101 = vadd.xlane.f32.xlu2 %v1090_v26  ;;  %v1094_v26 = vmul.f32 %v6837_v58, %v1078_v1 }
 0x449   :  { %2203 = vmatpush.bf16.msrb.mxu1 %v6625_v60 }
 0x44d   :  { %2204 = vmatpush.bf16.msrb.mxu1 %v6649_v17 }
 0x450   :  { %1103 = vadd.xlane.f32.xlu2 %v1091_v36 }
 0x451   :  { %2205 = vmatpush.bf16.msrb.mxu1 %v6670_v23 }
 0x455   :  { %2206 = vmatpush.bf16.msrb.mxu1 %v6684_v51 }
 0x458   :  { %1105 = vadd.xlane.f32.xlu2 %v1092_v21 }
 0x459   :  { %2207 = vmatpush.bf16.msrb.mxu1 %v6702_v7  ;;  %v8951_v7 = vld [vmem:[#allocation16_spill] sm:$0xff] }
 0x460   :  { %1107 = vadd.xlane.f32.xlu2 %v1093_v19 }
 0x468   :  { %1109 = vadd.xlane.f32.xlu2 %v1094_v26 }
 0x4b1   :  { %v1096_v9 = vpop.xlane.xlu0 %1095 }
 0x4b2   :  { %v1111_v39 = vadd.f32 %v1096_v9, %v6031_v59 }
 0x4b3   :  { %v1100_v36 = vpop.xlane.xlu1 %1099  ;;  %v1098_v57 = vpop.xlane.xlu2 %1097 }
 0x4b4   :  { %v1113_v6 = vadd.f32 %v1100_v36, %v6034_v61  ;;  %v1112_v21 = vadd.f32 %v1098_v57, %v6009_v47  ;;  %1128 = vperm.xlu0 %5458, %v1111_v39   ;;  %v8950_v57 = vld [vmem:[#allocation13_spill] sm:$0xff] }
 0x4b6   :  { %1134 = vperm.xlu2 %5457, %v1113_v6   ;;  %1131 = vperm.xlu1 %5459, %v1112_v21  }
 0x4b9   :  { %v6843_v14 = vpop.f32.mrf.mxu1 }
 0x4ba   :  { %8949 = vst [vmem:[#allocation59_spill] sm:$0xff] %v6843_v14 }
 0x4bb   :  { %v1102_v62 = vpop.xlane.xlu2 %1101 }
 0x4bc   :  { %v1114_v19 = vadd.f32 %v1102_v62, %v6015_v50 }
 0x4be   :  { %1137 = vperm.xlu0 %5458, %v1114_v19  }
 0x4c1   :  { %v1586_v10 = vpop.f32.mrf.mxu1 }
 0x4c3   :  { %v1104_v1 = vpop.xlane.xlu2 %1103 }
 0x4c4   :  { %v1115_v26 = vadd.f32 %v1104_v1, %v6017_v52  ;;  %v8952_v1 = vld [vmem:[#allocation17_spill] sm:$0xff] }
 0x4c6   :  { %1140 = vperm.xlu0 %5458, %v1115_v26  }
 0x4cb   :  { %v1106_v9 = vpop.xlane.xlu2 %1105 }
 0x4cc   :  { %v1116_v59 = vadd.f32 %v1106_v9, %v6023_v55 }
 0x4ce   :  { %1143 = vperm.xlu1 %5459, %v1116_v59  }
 0x4d3   :  { %v1108_v36 = vpop.xlane.xlu2 %1107 }
 0x4d4   :  { %v6849_v47 = vadd.f32 %v1108_v36, %v8950_v57 }
 0x4d6   :  { %1146 = vperm.xlu2 %5457, %v6849_v47  }
 0x4db   :  { %v1110_v61 = vpop.xlane.xlu2 %1109 }
 0x4dc   :  { %v1118_v51 = vadd.f32 %v1110_v61, %v8951_v7 }
 0x4de   :  { %1149 = vperm.xlu0 %5458, %v1118_v51  }
 0x510   :  { %v1135_v23 = vpop.permute.xlu2 %1134 }
 0x511   :  { %v1153_v57 = vperm.slane %v1135_v23, %v8952_v1 }
 0x526   :  { %v1129_v62 = vpop.permute.xlu0 %1128 }
 0x527   :  { %v1151_v17 = vperm.slane %v1129_v62, %v8952_v1 }
 0x528   :  { %v1132_v50 = vpop.permute.xlu1 %1131 }
 0x529   :  { %v1152_v52 = vperm.slane %v1132_v50, %v8952_v1 }
 0x52b   :  { %v1159_v60 = vsel %vm290_vm0, %v1152_v52, %v1151_v17 }
 0x52c   :  { %v1160_v7 = vsel %vm8873_vm1, %v1153_v57, %v1159_v60 }
 0x530   :  { %v1138_v10 = vpop.permute.xlu0 %1137  ;;  %v1147_v27 = vpop.permute.xlu2 %1146 }
 0x531   :  { %v1154_v36 = vperm.slane %v1138_v10, %v8952_v1  ;;  %v1157_v49 = vperm.slane %v1147_v27, %v8952_v1 }
 0x533   :  { %v1161_v41 = vsel %vm8872_vm2, %v1154_v36, %v1160_v7 }
 0x538   :  { %v1141_v9 = vpop.permute.xlu0 %1140 }
 0x539   :  { %v1155_v5 = vperm.slane %v1141_v9, %v8952_v1 }
 0x53b   :  { %v1162_v50 = vsel %vm8867_vm3, %v1155_v5, %v1161_v41 }
 0x540   :  { %v1144_v55 = vpop.permute.xlu1 %1143 }
 0x541   :  { %v1156_v61 = vperm.slane %v1144_v55, %v8952_v1 }
 0x543   :  { %v1163_v62 = vsel %vm8866_vm4, %v1156_v61, %v1162_v50 }
 0x544   :  { %v1164_v23 = vsel %vm8863_vm5, %v1157_v49, %v1163_v62 }
 0x550   :  { %v1150_v52 = vpop.permute.xlu0 %1149 }
 0x551   :  { %v1158_v17 = vperm.slane %v1150_v52, %v8952_v1 }
 0x553   :  { %v1165_v10 = vsel %vm8953_vm9, %v1158_v17, %v1164_v23 }
 0x554   :  { %v1167_v55 = vsel %vm8954_vm6, %v1165_v10, -inf }
 0x555   :  { %1168 = vmax.xlane.f32.xlu1 %v1167_v55 }
 0x5c8   :  { %v1169_v60 = vpop.xlane.xlu1 %1168 }
 0x5c9   :  { %v1172_v57 = vperm.slane %v1169_v60, 1  ;;  %v1171_v7 = vperm.slane %v1169_v60, 0  ;;  %v1174_v41 = vperm.slane %v1169_v60, 3  ;;  %v1173_v5 = vperm.slane %v1169_v60, 2 }
 0x5ca   :  { %v1176_v49 = vperm.slane %v1169_v60, 5  ;;  %v1175_v17 = vperm.slane %v1169_v60, 4 }
 0x5cb   :  { %v1188_v9 = vsub.f32 %v1112_v21, %v1172_v57  ;;  %v1187_v36 = vsub.f32 %v1111_v39, %v1171_v7  ;;  %v1190_v27 = vsub.f32 %v1114_v19, %v1174_v41  ;;  %v1189_v52 = vsub.f32 %v1113_v6, %v1173_v5 }
 0x5cc   :  { %v1192_v39 = vsub.f32 %v1116_v59, %v1176_v49  ;;  %v1191_v21 = vsub.f32 %v1115_v26, %v1175_v17  ;;  %v1178_v19 = vperm.slane %v1169_v60, 7  ;;  %v1177_v6 = vperm.slane %v1169_v60, 6 }
 0x5cd   :  { %v1197_v61 = vmul.f32 1.442695, %v1188_v9  ;;  %v1195_v50 = vmul.f32 1.442695, %v1187_v36  ;;  %v1201_v22 = vmul.f32 1.442695, %v1190_v27 }
 0x5ce   :  { %v1199_v62 = vmul.f32 1.442695, %v1189_v52  ;;  %v1205_v55 = vmul.f32 1.442695, %v1192_v39  ;;  %v1203_v57 = vmul.f32 1.442695, %v1191_v21  ;;  %v1194_v36 = vsub.f32 %v1118_v51, %v1178_v19 }
 0x5cf   :  { %5502 = vpow2.f32 %v1197_v61 }
 0x5d0   :  { %5504 = vpow2.f32 %v1195_v50  ;;  %v1209_v59 = vmul.f32 1.442695, %v1194_v36 }
 0x5d1   :  { %5506 = vpow2.f32 %v1201_v22  ;;  %v1193_v22 = vsub.f32 %v6849_v47, %v1177_v6 }
 0x5d2   :  { %5508 = vpow2.f32 %v1199_v62 }
 0x5d3   :  { %5510 = vpow2.f32 %v1205_v55  ;;  %v1207_v41 = vmul.f32 1.442695, %v1193_v22 }
 0x5d4   :  { %5512 = vpow2.f32 %v1203_v57 }
 0x5d5   :  { %v6869_v23 = vpop.eup %5502  ;;  %5514 = vpow2.f32 %v1209_v59 }
 0x5d6   :  { %v6871_v10 = vpop.eup %5504  ;;  %1223 = vperm.xlu0 %5458, %v6869_v23   ;;  %5516 = vpow2.f32 %v1207_v41 }
 0x5d7   :  { %1220 = vperm.xlu2 %5457, %v6871_v10   ;;  %v6875_v7 = vpop.eup %5506 }
 0x5d8   :  { %v6877_v9 = vpop.eup %5508 }
 0x5d9   :  { %v6882_v26 = vpop.eup %5510 }
 0x5da   :  { %v6884_v5 = vpop.eup %5512 }
 0x5db   :  { %v6888_v60 = vpop.eup %5514 }
 0x5dc   :  { %v6890_v61 = vpop.eup %5516 }
 0x5de   :  { %1229 = vperm.xlu0 %5458, %v6875_v7  }
 0x5df   :  { %1226 = vperm.xlu2 %5457, %v6877_v9  }
 0x5e6   :  { %1235 = vperm.xlu0 %5458, %v6882_v26  }
 0x5e7   :  { %1232 = vperm.xlu2 %5457, %v6884_v5  }
 0x5ee   :  { %1241 = vperm.xlu0 %5458, %v6888_v60  }
 0x5ef   :  { %1238 = vperm.xlu2 %5457, %v6890_v61  }
 0x631   :  { %v1221_v47 = vpop.permute.xlu2 %1220 }
 0x632   :  { %v1243_v62 = vperm.slane %v1221_v47, %v8952_v1 }
 0x639   :  { %v1227_v50 = vpop.permute.xlu2 %1226 }
 0x63a   :  { %v1245_v21 = vperm.slane %v1227_v50, %v8952_v1 }
 0x641   :  { %v1233_v52 = vpop.permute.xlu2 %1232 }
 0x642   :  { %v1247_v36 = vperm.slane %v1233_v52, %v8952_v1 }
 0x648   :  { %v1224_v51 = vpop.permute.xlu0 %1223 }
 0x649   :  { %v1244_v49 = vperm.slane %v1224_v51, %v8952_v1  ;;  %v1239_v22 = vpop.permute.xlu2 %1238 }
 0x64a   :  { %v1249_v47 = vperm.slane %v1239_v22, %v8952_v1 }
 0x64b   :  { %v1251_v17 = vsel %vm290_vm0, %v1244_v49, %v1243_v62 }
 0x64c   :  { %v1252_v19 = vsel %vm8873_vm1, %v1245_v21, %v1251_v17 }
 0x650   :  { %v1230_v27 = vpop.permute.xlu0 %1229 }
 0x651   :  { %v1246_v39 = vperm.slane %v1230_v27, %v8952_v1 }
 0x653   :  { %v1253_v57 = vsel %vm8872_vm2, %v1246_v39, %v1252_v19 }
 0x654   :  { %v1254_v59 = vsel %vm8867_vm3, %v1247_v36, %v1253_v57 }
 0x658   :  { %v1236_v55 = vpop.permute.xlu0 %1235 }
 0x659   :  { %v1248_v6 = vperm.slane %v1236_v55, %v8952_v1 }
 0x65b   :  { %v1255_v41 = vsel %vm8866_vm4, %v1248_v6, %v1254_v59 }
 0x65c   :  { %v1256_v50 = vsel %vm8863_vm5, %v1249_v47, %v1255_v41 }
 0x660   :  { %v1242_v51 = vpop.permute.xlu0 %1241 }
 0x661   :  { %v1250_v27 = vperm.slane %v1242_v51, %v8952_v1 }
 0x663   :  { %v1257_v49 = vsel %vm8955_vm10, %v1250_v27, %v1256_v50 }
 0x664   :  { %v1259_v62 = vsel %vm8956_vm7, %v1257_v49, 0.0 }
 0x665   :  { %1260 = vadd.xlane.f32.xlu2 %v1259_v62 }
 0x6d8   :  { %v1261_v17 = vpop.xlane.xlu2 %1260 }
 0x6d9   :  { %v1270_v39 = vperm.slane %v1261_v17, 7  ;;  %v1264_v52 = vperm.slane %v1261_v17, 1  ;;  %v6910_v21 = vperm.slane %v1261_v17, 0  ;;  %v6912_v55 = vperm.slane %v1261_v17, 5 }
 0x6da   :  { %v6914_v19 = vperm.slane %v1261_v17, 2  ;;  %v6917_v6 = vperm.slane %v1261_v17, 3  ;;  %v6921_v41 = vperm.slane %v1261_v17, 4  ;;  %v6925_v50 = vperm.slane %v1261_v17, 6 }
 0x6db   :  { %5518 = vrcp.f32 %v1270_v39  ;;  %v1393_v57 = vand.u32 2147483647, %v1270_v39  ;;  %v1395_v36 = vand.u32 2147483648, %v1270_v39  ;;  %v1303_v22 = vand.u32 2147483647, %v1264_v52 }
 0x6dc   :  { %5520 = vrcp.f32 %v1264_v52  ;;  %v1305_v59 = vand.u32 2147483648, %v1264_v52  ;;  %vm1389_vm11 = vweird.f32 %v1270_v39  ;;  %v1288_v51 = vand.u32 2147483647, %v6910_v21 }
 0x6dd   :  { %5522 = vrcp.f32 %v6910_v21  ;;  %v1290_v27 = vand.u32 2147483648, %v6910_v21  ;;  %vm6927_vm12 = vcmp.eq.f32.partialorder %v1393_v57, 8.507059e+37  ;;  %vm1299_vm13 = vweird.f32 %v1264_v52 }
 0x6de   :  { %5524 = vrcp.f32 %v6912_v55  ;;  %v1396_v14 = vor.u32 1.1754944e-38, %v1395_v36  ;;  %vm6932_vm14 = vcmp.eq.f32.partialorder %v1303_v22, 8.507059e+37  ;;  %vm1284_vm15 = vweird.f32 %v6910_v21 }
 0x6df   :  { %5526 = vrcp.f32 %v6914_v19  ;;  %v1306_v11 = vor.u32 1.1754944e-38, %v1305_v59  ;;  %v1363_v57 = vand.u32 2147483647, %v6912_v55  ;;  %vm6939_vm8 = vcmp.eq.f32.partialorder %v1288_v51, 8.507059e+37 }
 0x6e0   :  { %5528 = vrcp.f32 %v6917_v6  ;;  %v1291_v36 = vor.u32 1.1754944e-38, %v1290_v27  ;;  %vm1359_vm9 = vweird.f32 %v6912_v55  ;;  %v1365_v22 = vand.u32 2147483648, %v6912_v55 }
 0x6e1   :  { %v5519_v47 = vpop.eup %5518  ;;  %5530 = vrcp.f32 %v6921_v41  ;;  %v1318_v42 = vand.u32 2147483647, %v6914_v19 }
 0x6e2   :  { %v5521_v49 = vpop.eup %5520  ;;  %v1385_v62 = vmul.f32 %v5519_v47, %v1270_v39  ;;  %vm1390_vm6 = vweird.f32 %v5519_v47  ;;  %v1366_v24 = vor.u32 1.1754944e-38, %v1365_v22  ;;  %5532 = vrcp.f32 %v6925_v50 }
 0x6e3   :  { %v5523_v3 = vpop.eup %5522  ;;  %v1295_v43 = vmul.f32 %v5521_v49, %v1264_v52  ;;  %vm1300_vm10 = vweird.f32 %v5521_v49  ;;  %vm1391_vm5 = vmor %vm1389_vm11, %vm1390_vm6  ;;  %vm1364_vm11 = vcmp.eq.f32.partialorder %v1363_v57, 8.507059e+37  ;;  %v1333_v57 = vand.u32 2147483647, %v6917_v6 }
 0x6e4   :  { %v1386_v17 = vsub.f32 1.0, %v1385_v62  ;;  %v1280_v44 = vmul.f32 %v5523_v3, %v6910_v21  ;;  %v5525_v8 = vpop.eup %5524  ;;  %vm1285_vm7 = vweird.f32 %v5523_v3  ;;  %vm1301_vm3 = vmor %vm1299_vm13, %vm1300_vm10 }
 0x6e5   :  { %v1296_v25 = vsub.f32 1.0, %v1295_v43  ;;  %v5527_v63 = vpop.eup %5526  ;;  %v1355_v59 = vmul.f32 %v5525_v8, %v6912_v55  ;;  %vm1360_vm4 = vweird.f32 %v5525_v8  ;;  %vm1286_vm1 = vmor %vm1284_vm15, %vm1285_vm7  ;;  %vm1374_vm7 = vweird.f32 %v6925_v50 }
 0x6e6   :  { %v1387_v48 = vmul.f32 %v5519_v47, %v1386_v17  ;;  %v1281_v62 = vsub.f32 1.0, %v1280_v44  ;;  %v1310_v37 = vmul.f32 %v5527_v63, %v6914_v19  ;;  %v6948_v43 = vpop.eup %5528  ;;  %vm1315_vm2 = vweird.f32 %v5527_v63 }
 0x6e7   :  { %v1297_v34 = vmul.f32 %v5521_v49, %v1296_v25  ;;  %v1356_v15 = vsub.f32 1.0, %v1355_v59  ;;  %v1325_v44 = vmul.f32 %v6948_v43, %v6917_v6 }
 0x6e8   :  { %v1388_v51 = vadd.f32 %v5519_v47, %v1387_v48  ;;  %v1282_v27 = vmul.f32 %v5523_v3, %v1281_v62  ;;  %v1311_v17 = vsub.f32 1.0, %v1310_v37 }
 0x6e9   :  { %v1298_v45 = vadd.f32 %v5521_v49, %v1297_v34  ;;  %v1357_v53 = vmul.f32 %v5525_v8, %v1356_v15  ;;  %v1326_v34 = vsub.f32 1.0, %v1325_v44 }
 0x6ea   :  { %v1392_v25 = vsel %vm1391_vm5, %v5519_v47, %v1388_v51  ;;  %v1283_v28 = vadd.f32 %v5523_v3, %v1282_v27  ;;  %v1312_v39 = vmul.f32 %v5527_v63, %v1311_v17  ;;  %v5531_v51 = vpop.eup %5530  ;;  %vm1314_vm5 = vweird.f32 %v6914_v19 }
 0x6eb   :  { %v1397_v48 = vsel %vm6927_vm12, %v1396_v14, %v1392_v25  ;;  %v1302_v62 = vsel %vm1301_vm3, %v5521_v49, %v1298_v45  ;;  %v1358_v52 = vadd.f32 %v5525_v8, %v1357_v53  ;;  %v1320_v45 = vand.u32 2147483648, %v6914_v19  ;;  %vm1361_vm3 = vmor %vm1359_vm9, %vm1360_vm4 }
 0x6ec   :  { %v1398_v37 = vmul.f32 %v6888_v60, %v1397_v48  ;;  %v1307_v59 = vsel %vm6932_vm14, %v1306_v11, %v1302_v62  ;;  %v1287_v47 = vsel %vm1286_vm1, %v5523_v3, %v1283_v28  ;;  %v1313_v14 = vadd.f32 %v5527_v63, %v1312_v39  ;;  %vm1316_vm1 = vmor %vm1314_vm5, %vm1315_vm2 }
 0x6ed   :  { %v1308_v15 = vmul.f32 %v6869_v23, %v1307_v59  ;;  %v1292_v1 = vsel %vm6939_vm8, %v1291_v36, %v1287_v47  ;;  %v1362_v3 = vsel %vm1361_vm3, %v5525_v8, %v1358_v52  ;;  %v1327_v11 = vmul.f32 %v6948_v43, %v1326_v34  ;;  %v5533_v36 = vpop.eup %5532 }
 0x6ee   :  { %1436 = vperm.xlu2 %5457, %v1398_v37   ;;  %v1293_v21 = vmul.f32 %v6871_v10, %v1292_v1  ;;  %v1317_v28 = vsel %vm1316_vm1, %v5527_v63, %v1313_v14  ;;  %v1340_v53 = vmul.f32 %v5531_v51, %v6921_v41  ;;  %v1321_v23 = vor.u32 1.1754944e-38, %v1320_v45 }
 0x6ef   :  { %1406 = vperm.xlu1 %5459, %v1308_v15   ;;  %v1367_v10 = vsel %vm1364_vm11, %v1366_v24, %v1362_v3  ;;  %vm1319_vm4 = vcmp.eq.f32.partialorder %v1318_v42, 8.507059e+37  ;;  %v1328_v55 = vadd.f32 %v6948_v43, %v1327_v11  ;;  %vm1330_vm12 = vweird.f32 %v6948_v43 }
 0x6f0   :  { %1401 = vperm.xlu0 %5458, %v1293_v21   ;;  %v1322_v60 = vsel %vm1319_vm4, %v1321_v23, %v1317_v28  ;;  %v1341_v8 = vsub.f32 1.0, %v1340_v53  ;;  %v1368_v19 = vmul.f32 %v6882_v26, %v1367_v10  ;;  %v1335_v63 = vand.u32 2147483648, %v6917_v6 }
 0x6f1   :  { %v1323_v49 = vmul.f32 %v6877_v9, %v1322_v60  ;;  %vm1329_vm2 = vweird.f32 %v6917_v6  ;;  %v1370_v17 = vmul.f32 %v5533_v36, %v6925_v50  ;;  %vm1334_vm14 = vcmp.eq.f32.partialorder %v1333_v57, 8.507059e+37 }
 0x6f2   :  { %vm1331_vm13 = vmor %vm1329_vm2, %vm1330_vm12  ;;  %v1342_v27 = vmul.f32 %v5531_v51, %v1341_v8  ;;  %v1336_v44 = vor.u32 1.1754944e-38, %v1335_v63  ;;  %vm1345_vm15 = vweird.f32 %v5531_v51  ;;  %v1350_v9 = vand.u32 2147483648, %v6921_v41 }
 0x6f3   :  { %v1332_v22 = vsel %vm1331_vm13, %v6948_v43, %v1328_v55  ;;  %v1371_v48 = vsub.f32 1.0, %v1370_v17  ;;  %vm1344_vm8 = vweird.f32 %v6921_v41  ;;  %v1348_v6 = vand.u32 2147483647, %v6921_v41 }
 0x6f4   :  { %v1337_v26 = vsel %vm1334_vm14, %v1336_v44, %v1332_v22  ;;  %v1343_v25 = vadd.f32 %v5531_v51, %v1342_v27  ;;  %vm1346_vm9 = vmor %vm1344_vm8, %vm1345_vm15  ;;  %v1351_v34 = vor.u32 1.1754944e-38, %v1350_v9  ;;  %vm1375_vm10 = vweird.f32 %v5533_v36 }
 0x6f5   :  { %v1338_v62 = vmul.f32 %v6875_v7, %v1337_v26  ;;  %v1372_v39 = vmul.f32 %v5533_v36, %v1371_v48  ;;  %vm1349_vm6 = vcmp.eq.f32.partialorder %v1348_v6, 8.507059e+37  ;;  %v1380_v47 = vand.u32 2147483648, %v6925_v50  ;;  %vm1376_vm3 = vmor %vm1374_vm7, %vm1375_vm10 }
 0x6f6   :  { %v1347_v43 = vsel %vm1346_vm9, %v5531_v51, %v1343_v25  ;;  %v1378_v7 = vand.u32 2147483647, %v6925_v50  ;;  %vm8963_vm1 = vcmask 1042434   ;;  %vm8964_vm11 = vcmask 1043459  }
 0x6f7   :  { %1426 = vperm.xlu1 %5459, %v1368_v19   ;;  %v1352_v37 = vsel %vm1349_vm6, %v1351_v34, %v1347_v43  ;;  %v1373_v59 = vadd.f32 %v5533_v36, %v1372_v39  ;;  %v1381_v15 = vor.u32 1.1754944e-38, %v1380_v47  ;;  %vm8965_vm4 = vcmask 1044484  }
 0x6f8   :  { %1411 = vperm.xlu0 %5458, %v1323_v49   ;;  %v1353_v52 = vmul.f32 %v6884_v5, %v1352_v37  ;;  %vm1379_vm5 = vcmp.eq.f32.partialorder %v1378_v7, 8.507059e+37  ;;  %vm8966_vm12 = vcmask 1045509   ;;  %vm8967_vm2 = vcmask 1046534  }
 0x6f9   :  { %v1377_v41 = vsel %vm1376_vm3, %v5533_v36, %v1373_v59  ;;  %vm8968_vm13 = vcmask 1047559  }
 0x6fa   :  { %v1382_v51 = vsel %vm1379_vm5, %v1381_v15, %v1377_v41  ;;  %vm9022_vm5 = vmmov %vm8963_vm1 }
 0x6fb   :  { %v1383_v1 = vmul.f32 %v6890_v61, %v1382_v51 }
 0x700   :  { %1416 = vperm.xlu0 %5458, %v1338_v62  }
 0x708   :  { %1421 = vperm.xlu0 %5458, %v1353_v52  }
 0x710   :  { %1431 = vperm.xlu0 %5458, %v1383_v1  }
 0x748   :  { %v1437_v53 = vpop.permute.xlu2 %1436 }
 0x761   :  { %v1407_v45 = vpop.permute.xlu1 %1406 }
 0x762   :  { %v1402_v14 = vpop.permute.xlu0 %1401  ;;  %v1440_v21 = vmul.f32 %v6795_v46, %v1407_v45  ;;  %v1446_v46 = vmul.f32 %v6837_v58, %v1437_v53 }
 0x763   :  { %v1439_v42 = vmul.f32 %v6782_v2, %v1402_v14 }
 0x764   :  { %v1453_v24 = vrot.slane %v1440_v21, 4  ;;  %v1489_v22 = vrot.slane %v1446_v46, 4 }
 0x765   :  { %v1447_v50 = vrot.slane %v1439_v42, 4 }
 0x766   :  { %v1454_v23 = vadd.f32 %v1453_v24, %v1440_v21  ;;  %v1490_v62 = vadd.f32 %v1489_v22, %v1446_v46 }
 0x767   :  { %v1448_v10 = vadd.f32 %v1447_v50, %v1439_v42 }
 0x768   :  { %v1455_v63 = vrot.slane %v1454_v23, 2  ;;  %v1491_v47 = vrot.slane %v1490_v62, 2 }
 0x769   :  { %v1427_v28 = vpop.permute.xlu1 %1426  ;;  %v1449_v49 = vrot.slane %v1448_v10, 2 }
 0x76a   :  { %v1412_v5 = vpop.permute.xlu0 %1411  ;;  %v1444_v60 = vmul.f32 %v6822_v16, %v1427_v28  ;;  %v1456_v17 = vadd.f32 %v1455_v63, %v1454_v23  ;;  %v1492_v42 = vadd.f32 %v1491_v47, %v1490_v62 }
 0x76b   :  { %v1441_v3 = vmul.f32 %v6789_v4, %v1412_v5  ;;  %v1450_v44 = vadd.f32 %v1449_v49, %v1448_v10 }
 0x76c   :  { %v1477_v57 = vrot.slane %v1444_v60, 4  ;;  %v1457_v43 = vrot.slane %v1456_v17, 1 }
 0x76d   :  { %v1459_v11 = vrot.slane %v1441_v3, 4  ;;  %v1451_v39 = vrot.slane %v1450_v44, 1 }
 0x76e   :  { %v1478_v26 = vadd.f32 %v1477_v57, %v1444_v60  ;;  %v1458_v41 = vadd.f32 %v1457_v43, %v1456_v17  ;;  %v1493_v60 = vrot.slane %v1492_v42, 1 }
 0x76f   :  { %v1460_v55 = vadd.f32 %v1459_v11, %v1441_v3  ;;  %v1452_v15 = vadd.f32 %v1451_v39, %v1450_v44 }
 0x770   :  { %v1479_v34 = vrot.slane %v1478_v26, 2  ;;  %v1500_v50 = vpack.c.bf16 %v1458_v41, %v1458_v41  ;;  %v8971_v41 = vld [vmem:[#allocation34_spill] sm:$0xff] }
 0x771   :  { %v1461_v4 = vrot.slane %v1460_v55, 2  ;;  %v1499_v28 = vpack.c.bf16 %v1452_v15, %v1452_v15  ;;  %v8972_v15 = vld [vmem:[#allocation43_spill] sm:$0xff] }
 0x772   :  { %v1417_v61 = vpop.permute.xlu0 %1416  ;;  %v1480_v51 = vadd.f32 %v1479_v34, %v1478_v26  ;;  %v1516_v46 = vunpack.c.l.b16 %v1500_v50  ;;  %v8982_v50 = vld [vmem:[#allocation18_spill] sm:$0xff] }
 0x773   :  { %v1442_v8 = vmul.f32 %v6804_v29, %v1417_v61  ;;  %v1462_v48 = vadd.f32 %v1461_v4, %v1460_v55  ;;  %v1494_v4 = vadd.f32 %v1493_v60, %v1492_v42  ;;  %v8978_v42 = vld [vmem:[#allocation49_spill] sm:$0xff] }
 0x774   :  { %v1481_v11 = vrot.slane %v1480_v51, 1  ;;  %v8988_v60 = vld [vmem:[#allocation21_spill] sm:$0xff] }
 0x775   :  { %v1465_v19 = vrot.slane %v1442_v8, 4  ;;  %v1463_v37 = vrot.slane %v1462_v48, 1 }
 0x776   :  { %v1482_v63 = vadd.f32 %v1481_v11, %v1480_v51  ;;  %v8973_v51 = vld [vmem:[#allocation41_spill] sm:$0xff]  ;;  %v8984_v11 = vld [vmem:[#allocation19_spill] sm:$0xff] }
 0x777   :  { %v1466_v36 = vadd.f32 %v1465_v19, %v1442_v8  ;;  %v1464_v14 = vadd.f32 %v1463_v37, %v1462_v48  ;;  %v1515_v19 = vunpack.c.l.b16 %v1499_v28  ;;  %v1506_v48 = vpack.c.bf16 %v1494_v4, %v1494_v4  ;;  %v8983_v28 = vld [vmem:[#allocation22_spill] sm:$0xff]  ;;  %v8997_v4 = vld [vmem:[#allocation33_spill] sm:$0xff] }
 0x778   :  { %v1504_v44 = vpack.c.bf16 %v1482_v63, %v1482_v63  ;;  %v8994_v63 = vld [vmem:[#allocation27_spill] sm:$0xff] }
 0x779   :  { %v1467_v27 = vrot.slane %v1466_v36, 2  ;;  %v1501_v53 = vpack.c.bf16 %v1464_v14, %v1464_v14  ;;  %v1523_v17 = vsel %vm290_vm0, %v1516_v46, %v1515_v19  ;;  %v1522_v39 = vunpack.c.l.b16 %v1506_v48  ;;  %v8975_v14 = vld [vmem:[#allocation46_spill] sm:$0xff]  ;;  %v8992_v46 = vld [vmem:[#allocation25_spill] sm:$0xff]  ;;  %v8993_v19 = vld [vmem:[#allocation31_spill] sm:$0xff] }
 0x77a   :  { %v1422_v25 = vpop.permute.xlu0 %1421 }
 0x77b   :  { %v1443_v9 = vmul.f32 %v6813_v32, %v1422_v25  ;;  %v1468_v6 = vadd.f32 %v1467_v27, %v1466_v36  ;;  %v1517_v49 = vunpack.c.l.b16 %v1501_v53  ;;  %v8985_v53 = vld [vmem:[#allocation24_spill] sm:$0xff] }
 0x77d   :  { %v1471_v29 = vrot.slane %v1443_v9, 4  ;;  %v1469_v52 = vrot.slane %v1468_v6, 1  ;;  %v1524_v26 = vsel %vm8963_vm1, %v1517_v49, %v1523_v17  ;;  %v8995_v49 = vld [vmem:[#allocation32_spill] sm:$0xff]  ;;  %vm9023_vm1 = vmmov %vm8964_vm11 }
 0x77f   :  { %v1472_v59 = vadd.f32 %v1471_v29, %v1443_v9  ;;  %v1470_v5 = vadd.f32 %v1469_v52, %v1468_v6  ;;  %v1520_v29 = vunpack.c.l.b16 %v1504_v44  ;;  %v8969_v52 = vld [vmem:[#allocation58_spill] sm:$0xff] }
 0x780   :  { %v8998_v44 = vld [vmem:[#allocation54_spill] sm:$0xff] }
 0x781   :  { %v1473_v7 = vrot.slane %v1472_v59, 2  ;;  %v1502_v61 = vpack.c.bf16 %v1470_v5, %v1470_v5  ;;  %v8979_v5 = vld [vmem:[#allocation47_spill] sm:$0xff] }
 0x782   :  { %v1432_v1 = vpop.permute.xlu0 %1431 }
 0x783   :  { %v1474_v45 = vadd.f32 %v1473_v7, %v1472_v59  ;;  %v1445_v21 = vmul.f32 %v6830_v30, %v1432_v1  ;;  %v1518_v36 = vunpack.c.l.b16 %v1502_v61  ;;  %v8970_v7 = vld [vmem:[#allocation39_spill] sm:$0xff]  ;;  %v8989_v61 = vld [vmem:[#allocation28_spill] sm:$0xff] }
 0x784   :  { %v8974_v1 = vld [vmem:[#allocation35_spill] sm:$0xff] }
 0x785   :  { %v1475_v3 = vrot.slane %v1474_v45, 1  ;;  %v1483_v24 = vrot.slane %v1445_v21, 4  ;;  %v1525_v9 = vsel %vm8964_vm11, %v1518_v36, %v1524_v26  ;;  %v8999_v26 = vld [vmem:[#allocation59_spill] sm:$0xff]  ;;  %vm9024_vm11 = vmmov %vm8965_vm4 }
 0x787   :  { %v1476_v23 = vadd.f32 %v1475_v3, %v1474_v45  ;;  %v1484_v10 = vadd.f32 %v1483_v24, %v1445_v21  ;;  %v8976_v45 = vld [vmem:[#allocation44_spill] sm:$0xff]  ;;  %v8980_v3 = vld [vmem:[#allocation38_spill] sm:$0xff]  ;;  %v8981_v24 = vld [vmem:[#allocation51_spill] sm:$0xff] }
 0x788   :  { %v8977_v21 = vld [vmem:[#allocation36_spill] sm:$0xff] }
 0x789   :  { %v1503_v55 = vpack.c.bf16 %v1476_v23, %v1476_v23  ;;  %v1485_v8 = vrot.slane %v1484_v10, 2  ;;  %v8986_v23 = vld [vmem:[#allocation20_spill] sm:$0xff] }
 0x78b   :  { %v1486_v57 = vadd.f32 %v1485_v8, %v1484_v10  ;;  %v1519_v22 = vunpack.c.l.b16 %v1503_v55  ;;  %v8987_v10 = vld [vmem:[#allocation26_spill] sm:$0xff]  ;;  %v8990_v55 = vld [vmem:[#allocation23_spill] sm:$0xff] }
 0x78c   :  { %v8991_v8 = vld [vmem:[#allocation30_spill] sm:$0xff] }
 0x78d   :  { %v1487_v27 = vrot.slane %v1486_v57, 1  ;;  %v1526_v6 = vsel %vm8965_vm4, %v1519_v22, %v1525_v9  ;;  %v5281_v22 = vld [vmem:[%s8755_s0 + $0x18] sm:$0xff]  ;;  %vm9025_vm4 = vmmov %vm8966_vm12 }
 0x78e   :  { %v1527_v34 = vsel %vm8966_vm12, %v1520_v29, %v1526_v6  ;;  %vm9026_vm12 = vmmov %vm8967_vm2 }
 0x78f   :  { %v1488_v25 = vadd.f32 %v1487_v27, %v1486_v57  ;;  %v8996_v57 = vld [vmem:[#allocation29_spill] sm:$0xff] }
 0x791   :  { %v1505_v62 = vpack.c.bf16 %v1488_v25, %v1488_v25  ;;  %v1585_v25 = vadd.f32 %v8999_v26, %v8998_v44 }
 0x793   :  { %v1521_v43 = vunpack.c.l.b16 %v1505_v62 }
 0x795   :  { %v1528_v37 = vsel %vm8967_vm2, %v1521_v43, %v1527_v34  ;;  %vm9027_vm2 = vmmov %vm8968_vm13 }
 0x796   :  { %v1529_v59 = vsel %vm8968_vm13, %v1522_v39, %v1528_v37  ;;  %v5282_v37 = vld [vmem:[%s8755_s0 + $0x20] sm:$0xff]  ;;  %vm9028_vm13 = vcmask 64512  }
 0x797   :  { %v1530_v47 = vpack.c.b16 %v1529_v59, %v1529_v59 }
 0x799   :  { %1540 = vmatmul.bf16.vlgmr.msra.gmra.mxu2 %v1530_v47  ;;  %1553 = vmatmul.bf16.vlgmr.msra.gmra.mxu3 %v1530_v47 }
 0x79a   :  { %1566 = vmatmul.bf16.vlgmr.msrb.gmra.mxu0 %v1530_v47  ;;  %2174 = vmatpush.bf16.msra.mxu3 %v6433_v20 }
 0x79b   :  { %2157 = vmatpush.bf16.msra.mxu2 %v6367_v33  ;;  %2187 = vmatpush.bf16.msrb.mxu0 %v6475_v54 }
 0x79e   :  { %2175 = vmatpush.bf16.msra.mxu3 %v6457_v12 }
 0x79f   :  { %2158 = vmatpush.bf16.msra.mxu2 %v6385_v40  ;;  %2188 = vmatpush.bf16.msrb.mxu0 %v6503_v18 }
 0x7a2   :  { %2176 = vmatpush.bf16.msra.mxu3 %v6488_v35 }
 0x7a3   :  { %2159 = vmatpush.bf16.msra.mxu2 %v6406_v31  ;;  %2189 = vmatpush.bf16.msrb.mxu0 %v6538_v56 }
 0x7a6   :  { %2177 = vmatpush.bf16.msra.mxu3 %v6519_v38 }
 0x7a7   :  { %2160 = vmatpush.bf16.msra.mxu2 %v6431_v0  ;;  %2190 = vmatpush.bf16.msrb.mxu0 %v6568_v13 }
 0x7a9   :  { %1596 = vmatmul.bf16.vlgmr.msrb.gmra.mxu2 %v8969_v52  ;;  %1609 = vmatmul.bf16.vlgmr.msrb.gmra.mxu3 %v8969_v52 }
 0x7aa   :  { %2178 = vmatpush.bf16.msra.mxu3 %v8970_v7 }
 0x7ab   :  { %2161 = vmatpush.bf16.msra.mxu2 %v8971_v41  ;;  %2191 = vmatpush.bf16.msrb.mxu0 %v8972_v15 }
 0x7ae   :  { %2179 = vmatpush.bf16.msra.mxu3 %v8973_v51 }
 0x7af   :  { %2162 = vmatpush.bf16.msra.mxu2 %v8974_v1  ;;  %2192 = vmatpush.bf16.msrb.mxu0 %v8975_v14 }
 0x7b2   :  { %2180 = vmatpush.bf16.msra.mxu3 %v8976_v45 }
 0x7b3   :  { %2163 = vmatpush.bf16.msra.mxu2 %v8977_v21  ;;  %2193 = vmatpush.bf16.msrb.mxu0 %v8978_v42 }
 0x7b6   :  { %2181 = vmatpush.bf16.msra.mxu3 %v8979_v5 }
 0x7b7   :  { %2164 = vmatpush.bf16.msra.mxu2 %v8980_v3  ;;  %2194 = vmatpush.bf16.msrb.mxu0 %v8981_v24 }
 0x7ba   :  { %2743 = vmatpush.bf16.msrb.mxu3 %v8983_v28 }
 0x7bb   :  { %2730 = vmatpush.bf16.msrb.mxu2 %v8982_v50 }
 0x7be   :  { %2744 = vmatpush.bf16.msrb.mxu3 %v8985_v53 }
 0x7bf   :  { %2731 = vmatpush.bf16.msrb.mxu2 %v8984_v11 }
 0x7c2   :  { %2745 = vmatpush.bf16.msrb.mxu3 %v8987_v10 }
 0x7c3   :  { %2732 = vmatpush.bf16.msrb.mxu2 %v8986_v23 }
 0x7c6   :  { %2746 = vmatpush.bf16.msrb.mxu3 %v8989_v61 }
 0x7c7   :  { %2733 = vmatpush.bf16.msrb.mxu2 %v8988_v60 }
 0x7ca   :  { %2747 = vmatpush.bf16.msrb.mxu3 %v8991_v8 }
 0x7cb   :  { %2734 = vmatpush.bf16.msrb.mxu2 %v8990_v55 }
 0x7ce   :  { %2748 = vmatpush.bf16.msrb.mxu3 %v8993_v19 }
 0x7cf   :  { %2735 = vmatpush.bf16.msrb.mxu2 %v8992_v46 }
 0x7d2   :  { %2749 = vmatpush.bf16.msrb.mxu3 %v8995_v49 }
 0x7d3   :  { %2736 = vmatpush.bf16.msrb.mxu2 %v8994_v63 }
 0x7d6   :  { %2750 = vmatpush.bf16.msrb.mxu3 %v8997_v4  ;;  %v9000_v4 = vld [vmem:[#allocation55_spill] sm:$0xff] }
 0x7d7   :  { %2737 = vmatpush.bf16.msrb.mxu2 %v8996_v57 }
 0x817   :  { %v1567_v36 = vpop.f32.mrf.mxu0 }
 0x81c   :  { %v1541_v27 = vpop.f32.mrf.mxu2  ;;  %v1554_v17 = vpop.f32.mrf.mxu3 }
 0x81d   :  { %v1571_v48 = vadd.f32 %v5281_v22, %v1541_v27  ;;  %v1572_v52 = vadd.f32 %v5282_v37, %v1554_v17 }
 0x81f   :  { %v1614_v9 = vadd.f32 %v1585_v25, %v1571_v48  ;;  %v1569_v62 = vpop.f32.mrf.mxu0 }
 0x821   :  { %v5284_v6 = vmul.f32 -1.442695, %v1614_v9 }
 0x823   :  { %5534 = vpow2.f32 %v5284_v6 }
 0x824   :  { %v1543_v29 = vpop.f32.mrf.mxu2  ;;  %v1556_v43 = vpop.f32.mrf.mxu3 }
 0x829   :  { %v5535_v39 = vpop.eup %5534 }
 0x82a   :  { %v1618_v34 = vadd.f32 1.0, %v5535_v39 }
 0x82c   :  { %5536 = vrcp.f32 %v1618_v34  ;;  %v1597_v59 = vpop.f32.mrf.mxu2  ;;  %v1610_v47 = vpop.f32.mrf.mxu3  ;;  %v1630_v29 = vand.u32 2147483648, %v1618_v34  ;;  %v1628_v43 = vand.u32 2147483647, %v1618_v34  ;;  %vm1624_vm15 = vweird.f32 %v1618_v34 }
 0x82d   :  { %v1598_v57 = vadd.f32 %v1597_v59, %v9000_v4  ;;  %v9001_v59 = vld [vmem:[#allocation56_spill] sm:$0xff] }
 0x82e   :  { %v1631_v37 = vor.u32 1.1754944e-38, %v1630_v29  ;;  %vm1629_vm9 = vcmp.eq.f32.partialorder %v1628_v43, 8.507059e+37 }
 0x82f   :  { %v1634_v26 = vadd.f32 %v1598_v57, %v1572_v52  ;;  %v1611_v52 = vadd.f32 %v1610_v47, %v9001_v59 }
 0x831   :  { %v5285_v22 = vmul.f32 -1.442695, %v1634_v26  ;;  %v5283_v26 = vld [vmem:[%s8755_s0 + $0x28] sm:$0xff] }
 0x832   :  { %v5537_v27 = vpop.eup %5536 }
 0x833   :  { %5538 = vpow2.f32 %v5285_v22  ;;  %v1620_v25 = vmul.f32 %v5537_v27, %v1618_v34  ;;  %vm1625_vm14 = vweird.f32 %v5537_v27 }
 0x834   :  { %v1599_v48 = vpop.f32.mrf.mxu2  ;;  %v1612_v9 = vpop.f32.mrf.mxu3  ;;  %vm1626_vm8 = vmor %vm1624_vm15, %vm1625_vm14 }
 0x835   :  { %v1621_v62 = vsub.f32 1.0, %v1620_v25  ;;  %v1573_v48 = vadd.f32 %v5283_v26, %v1567_v36  ;;  %vm9029_vm14 = vmmov %vm9022_vm5 }
 0x836   :  { %vm9030_vm15 = vmmov %vm9023_vm1 }
 0x837   :  { %v1622_v6 = vmul.f32 %v5537_v27, %v1621_v62 }
 0x839   :  { %v5539_v39 = vpop.eup %5538  ;;  %v1623_v44 = vadd.f32 %v5537_v27, %v1622_v6 }
 0x83a   :  { %v1638_v49 = vadd.f32 1.0, %v5539_v39 }
 0x83b   :  { %v1627_v17 = vsel %vm1626_vm8, %v5537_v27, %v1623_v44  ;;  %vm9031_vm8 = vmmov %vm9024_vm11 }
 0x83c   :  { %5540 = vrcp.f32 %v1638_v49  ;;  %v1632_v57 = vsel %vm1629_vm9, %v1631_v37, %v1627_v17  ;;  %v1650_v34 = vand.u32 2147483648, %v1638_v49  ;;  %v1648_v44 = vand.u32 2147483647, %v1638_v49  ;;  %vm9032_vm9 = vmmov %vm9025_vm4 }
 0x83d   :  { %v1654_v22 = vmul.f32 %v1632_v57, %v1611_v52  ;;  %vm1644_vm10 = vweird.f32 %v1638_v49  ;;  %v9002_v52 = vld [vmem:[#allocation57_spill] sm:$0xff] }
 0x83e   :  { %v1651_v29 = vor.u32 1.1754944e-38, %v1650_v34  ;;  %vm1649_vm3 = vcmp.eq.f32.partialorder %v1648_v44, 8.507059e+37  ;;  %v7080_v44 = vld [vmem:[%s8756_s1 + $0x10] sm:$0xff] }
 0x83f   :  { %v1655_v62 = vadd.f32 %v1654_v22, %v1573_v48 }
 0x841   :  { %5542 = vtanh.f32 %v1655_v62 }
 0x842   :  { %v5541_v25 = vpop.eup %5540 }
 0x843   :  { %v1640_v9 = vmul.f32 %v5541_v25, %v1638_v49  ;;  %vm1645_vm6 = vweird.f32 %v5541_v25 }
 0x844   :  { %vm1646_vm7 = vmor %vm1644_vm10, %vm1645_vm6 }
 0x845   :  { %v1641_v6 = vsub.f32 1.0, %v1640_v9  ;;  %vm9033_vm6 = vmmov %vm9026_vm12 }
 0x846   :  { %vm9034_vm10 = vmmov %vm9027_vm2 }
 0x847   :  { %v1642_v39 = vmul.f32 %v5541_v25, %v1641_v6  ;;  %v5543_v37 = vpop.eup %5542 }
 0x849   :  { %v1643_v27 = vadd.f32 %v5541_v25, %v1642_v39  ;;  %v9004_v39 = vld [vmem:[#allocation37_spill] sm:$0xff] }
 0x84b   :  { %v1647_v47 = vsel %vm1646_vm7, %v5541_v25, %v1643_v27  ;;  %vm9035_vm7 = vmmov %vm9028_vm13 }
 0x84c   :  { %v1652_v43 = vsel %vm1649_vm3, %v1651_v29, %v1647_v47  ;;  %v7086_v29 = vld [vmem:[%s8756_s1 + $0x8] sm:$0xff] }
 0x84d   :  { %v1657_v17 = vsub.f32 1.0, %v1652_v43  ;;  %v1659_v36 = vmul.f32 %v1652_v43, %v9002_v52  ;;  %v9009_v52 = vld [vmem:[#allocation50_spill] sm:$0xff] }
 0x84f   :  { %v1658_v57 = vmul.f32 %v5543_v37, %v1657_v17  ;;  %v9005_v17 = vld [vmem:[#allocation40_spill] sm:$0xff] }
 0x851   :  { %v7064_v26 = vadd.f32 %v1659_v36, %v1658_v57  ;;  %v7094_v57 = vld [vmem:[%s8756_s1 + $0x18] sm:$0xff] }
 0x853   :  { %9003 = vst [vmem:[#allocation58_spill] sm:$0xff] %v7064_v26  ;;  %v7068_v22 = vpack.c.bf16 %v7064_v26, %v7064_v26  ;;  %v1670_v48 = vperm.slane %v7064_v26, 0  ;;  %v1664_v49 = vrot.slane %v7064_v26, 2  ;;  %v1663_v9 = vrot.slane %v7064_v26, 1 }
 0x854   :  { %v1665_v34 = vrot.slane %v7064_v26, 3  ;;  %v1666_v47 = vrot.slane %v7064_v26, 4 }
 0x855   :  { %2182 = vmatmul.bf16.vlgmr.msra.gmra.mxu3 %v7068_v22  ;;  %v1686_v25 = vmul.f32 %v6782_v2, %v1670_v48  ;;  %v1672_v62 = vperm.slane %v1664_v49, 0  ;;  %v1671_v6 = vperm.slane %v1663_v9, 0  ;;  %v1667_v48 = vrot.slane %v7064_v26, 5  ;;  %v9006_v49 = vld [vmem:[#allocation42_spill] sm:$0xff] }
 0x856   :  { %2799 = vmatpush.bf16.msra.mxu3 %v9004_v39  ;;  %v1673_v43 = vperm.slane %v1665_v34, 0  ;;  %v1674_v37 = vperm.slane %v1666_v47, 0  ;;  %v9008_v47 = vld [vmem:[#allocation48_spill] sm:$0xff] }
 0x857   :  { %1694 = vadd.xlane.f32.xlu1 %v1686_v25  ;;  %v1688_v27 = vmul.f32 %v7080_v44, %v1672_v62  ;;  %v1687_v2 = vmul.f32 %v7086_v29, %v1671_v6  ;;  %v1668_v25 = vrot.slane %v7064_v26, 6  ;;  %v1675_v62 = vperm.slane %v1667_v48, 0  ;;  %v9007_v6 = vld [vmem:[#allocation45_spill] sm:$0xff] }
 0x858   :  { %v1689_v36 = vmul.f32 %v7094_v57, %v1673_v43  ;;  %v1690_v9 = vmul.f32 %v6813_v32, %v1674_v37  ;;  %v9010_v37 = vld [vmem:[#allocation52_spill] sm:$0xff]  ;;  %v9011_v48 = vld [vmem:[#allocation53_spill] sm:$0xff] }
 0x859   :  { %1698 = vadd.xlane.f32.xlu2 %v1688_v27  ;;  %1696 = vadd.xlane.f32.xlu0 %v1687_v2  ;;  %v1676_v34 = vperm.slane %v1668_v25, 0  ;;  %v1691_v27 = vmul.f32 %v6822_v16, %v1675_v62  ;;  %v1669_v2 = vrot.slane %v7064_v26, 7  ;;  %v9012_v16 = vld [vmem:[#allocation14_spill] sm:$0xff] }
 0x85a   :  { %2800 = vmatpush.bf16.msra.mxu3 %v9005_v17  ;;  %v9021_v17 = vld [vmem:[#allocation17_spill] sm:$0xff] }
 0x85b   :  { %v1692_v43 = vmul.f32 %v6830_v30, %v1676_v34 }
 0x85e   :  { %2801 = vmatpush.bf16.msra.mxu3 %v9006_v49  ;;  %v9014_v49 = vld [vmem:[#allocation9_spill] sm:$0xff] }
 0x85f   :  { %1700 = vadd.xlane.f32.xlu1 %v1689_v36  ;;  %v1677_v36 = vperm.slane %v1669_v2, 0  ;;  %v9015_v2 = vld [vmem:[#allocation10_spill] sm:$0xff] }
 0x861   :  { %1702 = vadd.xlane.f32.xlu0 %v1690_v9  ;;  %v1693_v32 = vmul.f32 %v6837_v58, %v1677_v36  ;;  %v9016_v36 = vld [vmem:[#allocation11_spill] sm:$0xff] }
 0x862   :  { %2802 = vmatpush.bf16.msra.mxu3 %v9007_v6 }
 0x866   :  { %2803 = vmatpush.bf16.msra.mxu3 %v9008_v47  ;;  %v9013_v47 = vld [vmem:[#allocation15_spill] sm:$0xff] }
 0x867   :  { %1704 = vadd.xlane.f32.xlu1 %v1691_v27 }
 0x869   :  { %1706 = vadd.xlane.f32.xlu0 %v1692_v43 }
 0x86a   :  { %2804 = vmatpush.bf16.msra.mxu3 %v9009_v52 }
 0x86e   :  { %2805 = vmatpush.bf16.msra.mxu3 %v9010_v37  ;;  %v9020_v37 = vld [vmem:[#allocation16_spill] sm:$0xff] }
 0x86f   :  { %1708 = vadd.xlane.f32.xlu1 %v1693_v32 }
 0x872   :  { %2806 = vmatpush.bf16.msra.mxu3 %v9011_v48  ;;  %v9018_v48 = vld [vmem:[#allocation12_spill] sm:$0xff] }
 0x8ca   :  { %v1695_v9 = vpop.xlane.xlu1 %1694 }
 0x8cb   :  { %v1710_v25 = vadd.f32 %v1695_v9, %v9012_v16 }
 0x8cc   :  { %v1699_v62 = vpop.xlane.xlu2 %1698  ;;  %v1697_v6 = vpop.xlane.xlu0 %1696 }
 0x8cd   :  { %v1712_v27 = vadd.f32 %v1699_v62, %v9013_v47  ;;  %v1711_v30 = vadd.f32 %v1697_v6, %v9014_v49  ;;  %1727 = vperm.xlu0 %5458, %v1710_v25   ;;  %v9019_v6 = vld [vmem:[#allocation13_spill] sm:$0xff] }
 0x8cf   :  { %1733 = vperm.xlu1 %5459, %v1712_v27   ;;  %1730 = vperm.xlu2 %5457, %v1711_v30  }
 0x8d2   :  { %v1701_v34 = vpop.xlane.xlu1 %1700 }
 0x8d3   :  { %v1713_v58 = vadd.f32 %v1701_v34, %v9015_v2 }
 0x8d4   :  { %v1703_v43 = vpop.xlane.xlu0 %1702 }
 0x8d5   :  { %v7115_v32 = vadd.f32 %v1703_v43, %v9016_v36  ;;  %1736 = vperm.xlu0 %5458, %v1713_v58  }
 0x8d7   :  { %1739 = vperm.xlu2 %5457, %v7115_v32  }
 0x8d8   :  { %v7118_v9 = vpop.f32.mrf.mxu3 }
 0x8d9   :  { %9017 = vst [vmem:[#allocation39_spill] sm:$0xff] %v7118_v9 }
 0x8da   :  { %v1705_v16 = vpop.xlane.xlu1 %1704 }
 0x8db   :  { %v1715_v62 = vadd.f32 %v1705_v16, %v9018_v48 }
 0x8dc   :  { %v1707_v47 = vpop.xlane.xlu0 %1706 }
 0x8dd   :  { %v7122_v49 = vadd.f32 %v1707_v47, %v9019_v6  ;;  %1742 = vperm.xlu0 %5458, %v1715_v62  }
 0x8df   :  { %1745 = vperm.xlu1 %5459, %v7122_v49  }
 0x8e0   :  { %v2185_v34 = vpop.f32.mrf.mxu3 }
 0x8e2   :  { %v1709_v2 = vpop.xlane.xlu1 %1708 }
 0x8e3   :  { %v1717_v43 = vadd.f32 %v1709_v2, %v9020_v37 }
 0x8e5   :  { %1748 = vperm.xlu2 %5457, %v1717_v43  }
 0x929   :  { %v1731_v36 = vpop.permute.xlu2 %1730 }
 0x92a   :  { %v1751_v16 = vperm.slane %v1731_v36, %v9021_v17 }
 0x931   :  { %v1740_v48 = vpop.permute.xlu2 %1739 }
 0x932   :  { %v1754_v37 = vperm.slane %v1740_v48, %v9021_v17 }
 0x93f   :  { %v1728_v52 = vpop.permute.xlu0 %1727  ;;  %v1749_v63 = vpop.permute.xlu2 %1748 }
 0x940   :  { %v1750_v39 = vperm.slane %v1728_v52, %v9021_v17 }
 0x941   :  { %v1734_v26 = vpop.permute.xlu1 %1733 }
 0x942   :  { %v1752_v47 = vperm.slane %v1734_v26, %v9021_v17  ;;  %v1758_v6 = vsel %vm290_vm0, %v1751_v16, %v1750_v39  ;;  %v1757_v39 = vperm.slane %v1749_v63, %v9021_v17 }
 0x944   :  { %v1759_v34 = vsel %vm9022_vm5, %v1752_v47, %v1758_v6 }
 0x947   :  { %v1737_v59 = vpop.permute.xlu0 %1736 }
 0x948   :  { %v1753_v4 = vperm.slane %v1737_v59, %v9021_v17 }
 0x94a   :  { %v1760_v2 = vsel %vm9023_vm1, %v1753_v4, %v1759_v34 }
 0x94b   :  { %v1761_v36 = vsel %vm9024_vm11, %v1754_v37, %v1760_v2 }
 0x94f   :  { %v1743_v9 = vpop.permute.xlu0 %1742 }
 0x950   :  { %v1755_v52 = vperm.slane %v1743_v9, %v9021_v17 }
 0x951   :  { %v1746_v19 = vpop.permute.xlu1 %1745 }
 0x952   :  { %v1756_v46 = vperm.slane %v1746_v19, %v9021_v17  ;;  %v1762_v26 = vsel %vm9025_vm4, %v1755_v52, %v1761_v36 }
 0x954   :  { %v1763_v59 = vsel %vm9026_vm12, %v1756_v46, %v1762_v26 }
 0x955   :  { %v1764_v6 = vsel %vm9027_vm2, %v1757_v39, %v1763_v59 }
 0x956   :  { %v1766_v4 = vsel %vm9028_vm13, %v1764_v6, -inf }
 0x957   :  { %1767 = vmax.xlane.f32.xlu0 %v1766_v4 }
 0x9ca   :  { %v1768_v48 = vpop.xlane.xlu0 %1767 }
 0x9cb   :  { %v1771_v16 = vperm.slane %v1768_v48, 1  ;;  %v1770_v47 = vperm.slane %v1768_v48, 0  ;;  %v1773_v8 = vperm.slane %v1768_v48, 3  ;;  %v1772_v37 = vperm.slane %v1768_v48, 2 }
 0x9cc   :  { %v1775_v46 = vperm.slane %v1768_v48, 5  ;;  %v1774_v39 = vperm.slane %v1768_v48, 4  ;;  %v1776_v4 = vperm.slane %v1768_v48, 6 }
 0x9cd   :  { %v1787_v9 = vsub.f32 %v1711_v30, %v1771_v16  ;;  %v1786_v34 = vsub.f32 %v1710_v25, %v1770_v47  ;;  %v1789_v52 = vsub.f32 %v1713_v58, %v1773_v8  ;;  %v1788_v63 = vsub.f32 %v1712_v27, %v1772_v37 }
 0x9ce   :  { %v1791_v25 = vsub.f32 %v1715_v62, %v1775_v46  ;;  %v1790_v30 = vsub.f32 %v7115_v32, %v1774_v39  ;;  %v1777_v58 = vperm.slane %v1768_v48, 7  ;;  %v1792_v62 = vsub.f32 %v7122_v49, %v1776_v4 }
 0x9cf   :  { %v1796_v2 = vmul.f32 1.442695, %v1787_v9  ;;  %v1794_v19 = vmul.f32 1.442695, %v1786_v34  ;;  %v1800_v36 = vmul.f32 1.442695, %v1789_v52 }
 0x9d0   :  { %v1798_v26 = vmul.f32 1.442695, %v1788_v63  ;;  %v1804_v8 = vmul.f32 1.442695, %v1791_v25  ;;  %v1802_v27 = vmul.f32 1.442695, %v1790_v30  ;;  %v1793_v9 = vsub.f32 %v1717_v43, %v1777_v58 }
 0x9d1   :  { %5544 = vpow2.f32 %v1796_v2  ;;  %v1806_v37 = vmul.f32 1.442695, %v1792_v62 }
 0x9d2   :  { %5546 = vpow2.f32 %v1794_v19  ;;  %v1808_v34 = vmul.f32 1.442695, %v1793_v9 }
 0x9d3   :  { %5548 = vpow2.f32 %v1800_v36 }
 0x9d4   :  { %5550 = vpow2.f32 %v1798_v26 }
 0x9d5   :  { %5552 = vpow2.f32 %v1804_v8 }
 0x9d6   :  { %5554 = vpow2.f32 %v1802_v27 }
 0x9d7   :  { %v7142_v59 = vpop.eup %5544  ;;  %5556 = vpow2.f32 %v1808_v34 }
 0x9d8   :  { %v7144_v6 = vpop.eup %5546  ;;  %1822 = vperm.xlu2 %5457, %v7142_v59   ;;  %5558 = vpow2.f32 %v1806_v37 }
 0x9d9   :  { %1819 = vperm.xlu1 %5459, %v7144_v6   ;;  %v7149_v16 = vpop.eup %5548 }
 0x9da   :  { %v7151_v47 = vpop.eup %5550 }
 0x9db   :  { %v7156_v32 = vpop.eup %5552 }
 0x9dc   :  { %v7158_v2 = vpop.eup %5554 }
 0x9dd   :  { %v7162_v48 = vpop.eup %5556 }
 0x9de   :  { %v7164_v19 = vpop.eup %5558 }
 0x9e0   :  { %1828 = vperm.xlu2 %5457, %v7149_v16  }
 0x9e1   :  { %1825 = vperm.xlu1 %5459, %v7151_v47  }
 0x9e8   :  { %1834 = vperm.xlu2 %5457, %v7156_v32  }
 0x9e9   :  { %1831 = vperm.xlu1 %5459, %v7158_v2  }
 0x9f0   :  { %1840 = vperm.xlu2 %5457, %v7162_v48  }
 0x9f1   :  { %1837 = vperm.xlu1 %5459, %v7164_v19  }
 0xa32   :  { %v1823_v49 = vpop.permute.xlu2 %1822 }
 0xa33   :  { %v1843_v39 = vperm.slane %v1823_v49, %v9021_v17 }
 0xa3a   :  { %v1829_v52 = vpop.permute.xlu2 %1828 }
 0xa3b   :  { %v1845_v27 = vperm.slane %v1829_v52, %v9021_v17 }
 0xa42   :  { %v1835_v36 = vpop.permute.xlu2 %1834 }
 0xa43   :  { %v1847_v34 = vperm.slane %v1835_v36, %v9021_v17 }
 0xa4a   :  { %v1841_v9 = vpop.permute.xlu2 %1840 }
 0xa4b   :  { %v1820_v43 = vpop.permute.xlu1 %1819  ;;  %v1849_v49 = vperm.slane %v1841_v9, %v9021_v17 }
 0xa4c   :  { %v1842_v46 = vperm.slane %v1820_v43, %v9021_v17 }
 0xa4e   :  { %v1850_v30 = vsel %vm290_vm0, %v1843_v39, %v1842_v46 }
 0xa53   :  { %v1826_v63 = vpop.permute.xlu1 %1825 }
 0xa54   :  { %v1844_v26 = vperm.slane %v1826_v63, %v9021_v17 }
 0xa56   :  { %v1851_v8 = vsel %vm9029_vm14, %v1844_v26, %v1850_v30 }
 0xa57   :  { %v1852_v4 = vsel %vm9030_vm15, %v1845_v27, %v1851_v8 }
 0xa5b   :  { %v1832_v25 = vpop.permute.xlu1 %1831 }
 0xa5c   :  { %v1846_v58 = vperm.slane %v1832_v25, %v9021_v17 }
 0xa5e   :  { %v1853_v62 = vsel %vm9031_vm8, %v1846_v58, %v1852_v4 }
 0xa5f   :  { %v1854_v63 = vsel %vm9032_vm9, %v1847_v34, %v1853_v62 }
 0xa63   :  { %v1838_v37 = vpop.permute.xlu1 %1837 }
 0xa64   :  { %v1848_v43 = vperm.slane %v1838_v37, %v9021_v17 }
 0xa66   :  { %v1855_v46 = vsel %vm9033_vm6, %v1848_v43, %v1854_v63 }
 0xa67   :  { %v1856_v26 = vsel %vm9034_vm10, %v1849_v49, %v1855_v46 }
 0xa68   :  { %v1858_v52 = vsel %vm9035_vm7, %v1856_v26, 0.0 }
 0xa69   :  { %1859 = vadd.xlane.f32.xlu1 %v1858_v52 }
 0xadc   :  { %v7184_v39 = vpop.xlane.xlu1 %1859 }
 0xadd   :  { %v1863_v25 = vperm.slane %v7184_v39, 1  ;;  %v1862_v36 = vperm.slane %v7184_v39, 0  ;;  %v7189_v30 = vperm.slane %v7184_v39, 4  ;;  %v7192_v8 = vperm.slane %v7184_v39, 2 }
 0xade   :  { %v7195_v58 = vperm.slane %v7184_v39, 6  ;;  %v7199_v27 = vperm.slane %v7184_v39, 3  ;;  %v7205_v49 = vperm.slane %v7184_v39, 5  ;;  %v7258_v23 = vperm.slane %v7184_v39, 7 }
 0xadf   :  { %5560 = vrcp.f32 %v1863_v25  ;;  %v1902_v4 = vand.u32 2147483647, %v1863_v25  ;;  %v1904_v9 = vand.u32 2147483648, %v1863_v25  ;;  %v1887_v34 = vand.u32 2147483647, %v1862_v36 }
 0xae0   :  { %5562 = vrcp.f32 %v1862_v36  ;;  %vm1898_vm3 = vweird.f32 %v1863_v25  ;;  %vm1883_vm5 = vweird.f32 %v1862_v36  ;;  %v1889_v26 = vand.u32 2147483648, %v1862_v36 }
 0xae1   :  { %5564 = vrcp.f32 %v7189_v30  ;;  %vm7209_vm1 = vcmp.eq.f32.partialorder %v1902_v4, 8.507059e+37  ;;  %v1905_v55 = vor.u32 1.1754944e-38, %v1904_v9  ;;  %vm7215_vm4 = vcmp.eq.f32.partialorder %v1887_v34, 8.507059e+37 }
 0xae2   :  { %5566 = vrcp.f32 %v7192_v8  ;;  %vm1943_vm12 = vweird.f32 %v7189_v30  ;;  %v1890_v28 = vor.u32 1.1754944e-38, %v1889_v26  ;;  %v1947_v3 = vand.u32 2147483647, %v7189_v30 }
 0xae3   :  { %5568 = vrcp.f32 %v7195_v58  ;;  %vm1913_vm6 = vweird.f32 %v7192_v8 }
 0xae4   :  { %5570 = vrcp.f32 %v7199_v27  ;;  %vm1948_vm7 = vcmp.eq.f32.partialorder %v1947_v3, 8.507059e+37  ;;  %v1977_v3 = vand.u32 2147483647, %v7195_v58 }
 0xae5   :  { %v5561_v62 = vpop.eup %5560  ;;  %5572 = vrcp.f32 %v7205_v49 }
 0xae6   :  { %v5563_v37 = vpop.eup %5562  ;;  %v1894_v43 = vmul.f32 %v5561_v62, %v1863_v25  ;;  %vm1899_vm11 = vweird.f32 %v5561_v62  ;;  %5574 = vrcp.f32 %v7258_v23 }
 0xae7   :  { %v7207_v63 = vpop.eup %5564  ;;  %v1879_v46 = vmul.f32 %v5563_v37, %v1862_v36  ;;  %vm1884_vm2 = vweird.f32 %v5563_v37  ;;  %vm1900_vm13 = vmor %vm1898_vm3, %vm1899_vm11  ;;  %v1919_v36 = vand.u32 2147483648, %v7192_v8  ;;  %vm1973_vm11 = vweird.f32 %v7195_v58 }
 0xae8   :  { %v1895_v52 = vsub.f32 1.0, %v1894_v43  ;;  %v1939_v61 = vmul.f32 %v7207_v63, %v7189_v30  ;;  %v5567_v60 = vpop.eup %5566  ;;  %vm1944_vm14 = vweird.f32 %v7207_v63  ;;  %vm1885_vm15 = vmor %vm1883_vm5, %vm1884_vm2 }
 0xae9   :  { %v1880_v10 = vsub.f32 1.0, %v1879_v46  ;;  %v7220_v53 = vpop.eup %5568  ;;  %v1909_v11 = vmul.f32 %v5567_v60, %v7192_v8  ;;  %vm1914_vm8 = vweird.f32 %v5567_v60  ;;  %vm7251_vm9 = vmor %vm1943_vm12, %vm1944_vm14  ;;  %vm1928_vm12 = vweird.f32 %v7199_v27 }
 0xaea   :  { %v1896_v43 = vmul.f32 %v5561_v62, %v1895_v52  ;;  %v1940_v4 = vsub.f32 1.0, %v1939_v61  ;;  %v1969_v46 = vmul.f32 %v7220_v53, %v7195_v58  ;;  %v7226_v34 = vpop.eup %5570  ;;  %vm1915_vm10 = vmor %vm1913_vm6, %vm1914_vm8  ;;  %vm1974_vm5 = vweird.f32 %v7220_v53 }
 0xaeb   :  { %v1881_v9 = vmul.f32 %v5563_v37, %v1880_v10  ;;  %v1910_v5 = vsub.f32 1.0, %v1909_v11  ;;  %v1949_v10 = vand.u32 2147483648, %v7189_v30  ;;  %v1924_v26 = vmul.f32 %v7226_v34, %v7199_v27  ;;  %v7240_v21 = vpop.eup %5572 }
 0xaec   :  { %v1897_v50 = vadd.f32 %v5561_v62, %v1896_v43  ;;  %v1941_v24 = vmul.f32 %v7207_v63, %v1940_v4  ;;  %v1970_v42 = vsub.f32 1.0, %v1969_v46  ;;  %v1954_v30 = vmul.f32 %v7240_v21, %v7205_v49 }
 0xaed   :  { %v1882_v61 = vadd.f32 %v5563_v37, %v1881_v9  ;;  %v1911_v4 = vmul.f32 %v5567_v60, %v1910_v5  ;;  %v1925_v9 = vsub.f32 1.0, %v1924_v26  ;;  %v1950_v17 = vor.u32 1.1754944e-38, %v1949_v10 }
 0xaee   :  { %v1901_v52 = vsel %vm1900_vm13, %v5561_v62, %v1897_v50  ;;  %v1942_v43 = vadd.f32 %v7207_v63, %v1941_v24  ;;  %v1934_v46 = vand.u32 2147483648, %v7199_v27  ;;  %v1932_v10 = vand.u32 2147483647, %v7199_v27 }
 0xaef   :  { %v1906_v11 = vsel %vm7209_vm1, %v1905_v55, %v1901_v52  ;;  %v1886_v25 = vsel %vm1885_vm15, %v5563_v37, %v1882_v61  ;;  %v1912_v50 = vadd.f32 %v5567_v60, %v1911_v4  ;;  %v1917_v55 = vand.u32 2147483647, %v7192_v8  ;;  %v5575_v52 = vpop.eup %5574 }
 0xaf0   :  { %v1907_v45 = vmul.f32 %v7142_v59, %v1906_v11  ;;  %v1891_v14 = vsel %vm7215_vm4, %v1890_v28, %v1886_v25  ;;  %v1971_v28 = vmul.f32 %v7220_v53, %v1970_v42  ;;  %v1920_v8 = vor.u32 1.1754944e-38, %v1919_v36  ;;  %vm1975_vm4 = vmor %vm1973_vm11, %vm1974_vm5 }
 0xaf1   :  { %v1892_v24 = vmul.f32 %v7144_v6, %v1891_v14  ;;  %v1946_v14 = vsel %vm7251_vm9, %v7207_v63, %v1942_v43  ;;  %v1916_v59 = vsel %vm1915_vm10, %v5567_v60, %v1912_v50  ;;  %v1926_v6 = vmul.f32 %v7226_v34, %v1925_v9 }
 0xaf2   :  { %2005 = vperm.xlu0 %5458, %v1907_v45   ;;  %v1951_v39 = vsel %vm1948_vm7, %v1950_v17, %v1946_v14  ;;  %vm1918_vm3 = vcmp.eq.f32.partialorder %v1917_v55, 8.507059e+37  ;;  %v1972_v62 = vadd.f32 %v7220_v53, %v1971_v28  ;;  %v1979_v42 = vand.u32 2147483648, %v7195_v58 }
 0xaf3   :  { %2000 = vperm.xlu2 %5457, %v1892_v24   ;;  %v1921_v45 = vsel %vm1918_vm3, %v1920_v8, %v1916_v59  ;;  %v1927_v60 = vadd.f32 %v7226_v34, %v1926_v6  ;;  %vm1929_vm1 = vweird.f32 %v7226_v34  ;;  %v1955_v37 = vsub.f32 1.0, %v1954_v30 }
 0xaf4   :  { %v1952_v63 = vmul.f32 %v7158_v2, %v1951_v39  ;;  %v1922_v61 = vmul.f32 %v7151_v47, %v1921_v45  ;;  %v1976_v26 = vsel %vm1975_vm4, %v7220_v53, %v1972_v62  ;;  %vm1930_vm2 = vmor %vm1928_vm12, %vm1929_vm1  ;;  %v1980_v2 = vor.u32 1.1754944e-38, %v1979_v42  ;;  %v7300_v39 = vld [vmem:[%s8756_s1] sm:$0xff] }
 0xaf5   :  { %v1931_v43 = vsel %vm1930_vm2, %v7226_v34, %v1927_v60  ;;  %v1956_v58 = vmul.f32 %v7240_v21, %v1955_v37  ;;  %vm1978_vm13 = vcmp.eq.f32.partialorder %v1977_v3, 8.507059e+37  ;;  %v1935_v4 = vor.u32 1.1754944e-38, %v1934_v46 }
 0xaf6   :  { %v1984_v47 = vmul.f32 %v5575_v52, %v7258_v23  ;;  %v1981_v11 = vsel %vm1978_vm13, %v1980_v2, %v1976_v26  ;;  %vm1933_vm14 = vcmp.eq.f32.partialorder %v1932_v10, 8.507059e+37  ;;  %vm1959_vm15 = vweird.f32 %v7240_v21  ;;  %v7309_v26 = vld [vmem:[%s8756_s1 + $0x28] sm:$0xff] }
 0xaf7   :  { %v1936_v25 = vsel %vm1933_vm14, %v1935_v4, %v1931_v43  ;;  %v1957_v27 = vadd.f32 %v7240_v21, %v1956_v58  ;;  %v1982_v9 = vmul.f32 %v7164_v19, %v1981_v11  ;;  %v1964_v50 = vand.u32 2147483648, %v7205_v49 }
 0xaf8   :  { %v1985_v53 = vsub.f32 1.0, %v1984_v47  ;;  %v1937_v34 = vmul.f32 %v7149_v16, %v1936_v25  ;;  %vm1958_vm8 = vweird.f32 %v7205_v49  ;;  %v1962_v36 = vand.u32 2147483647, %v7205_v49 }
 0xaf9   :  { %vm1960_vm9 = vmor %vm1958_vm8, %vm1959_vm15  ;;  %v1965_v55 = vor.u32 1.1754944e-38, %v1964_v50  ;;  %vm1989_vm10 = vweird.f32 %v5575_v52  ;;  %v1994_v19 = vand.u32 2147483648, %v7258_v23  ;;  %vm1988_vm7 = vweird.f32 %v7258_v23 }
 0xafa   :  { %2020 = vperm.xlu0 %5458, %v1952_v63   ;;  %v1961_v24 = vsel %vm1960_vm9, %v7240_v21, %v1957_v27  ;;  %v1986_v5 = vmul.f32 %v5575_v52, %v1985_v53  ;;  %vm1963_vm6 = vcmp.eq.f32.partialorder %v1962_v36, 8.507059e+37  ;;  %v1992_v16 = vand.u32 2147483647, %v7258_v23  ;;  %vm1990_vm3 = vmor %vm1988_vm7, %vm1989_vm10  ;;  %v7315_v36 = vld [vmem:[%s8756_s1 + $0x20] sm:$0xff] }
 0xafb   :  { %2010 = vperm.xlu2 %5457, %v1922_v61   ;;  %v1966_v14 = vsel %vm1963_vm6, %v1965_v55, %v1961_v24  ;;  %v1995_v59 = vor.u32 1.1754944e-38, %v1994_v19  ;;  %vm9042_vm1 = vcmask 1042434   ;;  %vm9043_vm11 = vcmask 1043459  }
 0xafc   :  { %v1987_v28 = vadd.f32 %v5575_v52, %v1986_v5  ;;  %v1967_v17 = vmul.f32 %v7156_v32, %v1966_v14  ;;  %vm1993_vm5 = vcmp.eq.f32.partialorder %v1992_v16, 8.507059e+37  ;;  %v7321_v14 = vld [vmem:[%s8756_s1 + $0x38] sm:$0xff]  ;;  %vm9044_vm4 = vcmask 1044484  }
 0xafd   :  { %vm9045_vm12 = vcmask 1045509   ;;  %vm9046_vm2 = vcmask 1046534   ;;  %vm9047_vm13 = vcmask 1047559  }
 0xafe   :  { %v1991_v49 = vsel %vm1990_vm3, %v5575_v52, %v1987_v28 }
 0xaff   :  { %v1996_v21 = vsel %vm1993_vm5, %v1995_v59, %v1991_v49  ;;  %vm9095_vm5 = vmmov %vm9042_vm1 }
 0xb00   :  { %v1997_v6 = vmul.f32 %v7162_v48, %v1996_v21 }
 0xb02   :  { %2030 = vperm.xlu0 %5458, %v1982_v9  }
 0xb03   :  { %2015 = vperm.xlu2 %5457, %v1937_v34  }
 0xb0b   :  { %2025 = vperm.xlu2 %5457, %v1967_v17  }
 0xb13   :  { %2035 = vperm.xlu2 %5457, %v1997_v6  }
 0xb4d   :  { %v2001_v30 = vpop.permute.xlu2 %2000 }
 0xb4e   :  { %v2038_v32 = vmul.f32 %v7300_v39, %v2001_v30 }
 0xb50   :  { %v2046_v62 = vrot.slane %v2038_v32, 4 }
 0xb52   :  { %v2047_v37 = vadd.f32 %v2046_v62, %v2038_v32 }
 0xb54   :  { %v2048_v10 = vrot.slane %v2047_v37, 2 }
 0xb55   :  { %v2011_v8 = vpop.permute.xlu2 %2010 }
 0xb56   :  { %v2040_v23 = vmul.f32 %v7080_v44, %v2011_v8  ;;  %v2049_v11 = vadd.f32 %v2048_v10, %v2047_v37 }
 0xb58   :  { %v2058_v60 = vrot.slane %v2040_v23, 4  ;;  %v2050_v55 = vrot.slane %v2049_v11, 1 }
 0xb5a   :  { %v2059_v3 = vadd.f32 %v2058_v60, %v2040_v23  ;;  %v2051_v8 = vadd.f32 %v2050_v55, %v2049_v11 }
 0xb5c   :  { %v2060_v4 = vrot.slane %v2059_v3, 2 }
 0xb5d   :  { %v2016_v45 = vpop.permute.xlu2 %2015 }
 0xb5e   :  { %v2041_v42 = vmul.f32 %v7094_v57, %v2016_v45  ;;  %v2061_v50 = vadd.f32 %v2060_v4, %v2059_v3  ;;  %v7327_v3 = vld [vmem:[%s8756_s1 + $0x30] sm:$0xff] }
 0xb60   :  { %v2064_v63 = vrot.slane %v2041_v42, 4  ;;  %v2062_v21 = vrot.slane %v2061_v50, 1 }
 0xb62   :  { %v2065_v43 = vadd.f32 %v2064_v63, %v2041_v42  ;;  %v2063_v63 = vadd.f32 %v2062_v21, %v2061_v50 }
 0xb64   :  { %v2006_v48 = vpop.permute.xlu0 %2005  ;;  %v2066_v27 = vrot.slane %v2065_v43, 2 }
 0xb65   :  { %v2039_v46 = vmul.f32 %v7086_v29, %v2006_v48  ;;  %v2026_v61 = vpop.permute.xlu2 %2025 }
 0xb66   :  { %v2043_v52 = vmul.f32 %v7309_v26, %v2026_v61  ;;  %v2067_v16 = vadd.f32 %v2066_v27, %v2065_v43  ;;  %v2098_v61 = vpack.c.bf16 %v2051_v8, %v2051_v8 }
 0xb67   :  { %v2052_v2 = vrot.slane %v2039_v46, 4 }
 0xb68   :  { %v2076_v58 = vrot.slane %v2043_v52, 4  ;;  %v2068_v45 = vrot.slane %v2067_v16, 1  ;;  %v2114_v27 = vunpack.c.l.b16 %v2098_v61  ;;  %v9049_v61 = vld [vmem:[#allocation44_spill] sm:$0xff] }
 0xb69   :  { %v2053_v47 = vadd.f32 %v2052_v2, %v2039_v46 }
 0xb6a   :  { %v2077_v53 = vadd.f32 %v2076_v58, %v2043_v52  ;;  %v2069_v43 = vadd.f32 %v2068_v45, %v2067_v16 }
 0xb6b   :  { %v2054_v25 = vrot.slane %v2053_v47, 2 }
 0xb6c   :  { %v2021_v9 = vpop.permute.xlu0 %2020  ;;  %v2078_v49 = vrot.slane %v2077_v53, 2 }
 0xb6d   :  { %v2055_v34 = vadd.f32 %v2054_v25, %v2053_v47  ;;  %v2042_v24 = vmul.f32 %v7315_v36, %v2021_v9  ;;  %v2036_v5 = vpop.permute.xlu2 %2035  ;;  %v2100_v47 = vpack.c.bf16 %v2063_v63, %v2063_v63 }
 0xb6e   :  { %v2045_v28 = vmul.f32 %v7321_v14, %v2036_v5  ;;  %v2079_v42 = vadd.f32 %v2078_v49, %v2077_v53 }
 0xb6f   :  { %v2056_v19 = vrot.slane %v2055_v34, 1  ;;  %v2070_v17 = vrot.slane %v2042_v24, 4  ;;  %v2116_v55 = vunpack.c.l.b16 %v2100_v47  ;;  %v9057_v47 = vld [vmem:[#allocation19_spill] sm:$0xff] }
 0xb70   :  { %v2088_v59 = vrot.slane %v2045_v28, 4  ;;  %v2080_v4 = vrot.slane %v2079_v42, 1 }
 0xb71   :  { %v2057_v6 = vadd.f32 %v2056_v19, %v2055_v34  ;;  %v2071_v30 = vadd.f32 %v2070_v17, %v2042_v24  ;;  %v2101_v34 = vpack.c.bf16 %v2069_v43, %v2069_v43  ;;  %v9054_v43 = vld [vmem:[#allocation51_spill] sm:$0xff] }
 0xb72   :  { %v2089_v32 = vadd.f32 %v2088_v59, %v2045_v28  ;;  %v2081_v5 = vadd.f32 %v2080_v4, %v2079_v42  ;;  %v9056_v4 = vld [vmem:[#allocation22_spill] sm:$0xff] }
 0xb73   :  { %v2072_v23 = vrot.slane %v2071_v30, 2  ;;  %v2099_v62 = vpack.c.bf16 %v2057_v6, %v2057_v6  ;;  %v2117_v59 = vunpack.c.l.b16 %v2101_v34  ;;  %v9064_v34 = vld [vmem:[#allocation30_spill] sm:$0xff] }
 0xb74   :  { %v2090_v60 = vrot.slane %v2089_v32, 2  ;;  %v2031_v37 = vpop.permute.xlu0 %2030  ;;  %v2103_v21 = vpack.c.bf16 %v2081_v5, %v2081_v5  ;;  %v9066_v5 = vld [vmem:[#allocation31_spill] sm:$0xff] }
 0xb75   :  { %v2073_v48 = vadd.f32 %v2072_v23, %v2071_v30  ;;  %v2044_v46 = vmul.f32 %v7327_v3, %v2031_v37  ;;  %v2115_v58 = vunpack.c.l.b16 %v2099_v62 }
 0xb76   :  { %v2091_v10 = vadd.f32 %v2090_v60, %v2089_v32  ;;  %v2119_v45 = vunpack.c.l.b16 %v2103_v21  ;;  %v9071_v21 = vld [vmem:[#allocation54_spill] sm:$0xff] }
 0xb77   :  { %v2074_v52 = vrot.slane %v2073_v48, 1  ;;  %v2082_v2 = vrot.slane %v2044_v46, 4  ;;  %v2122_v24 = vsel %vm290_vm0, %v2115_v58, %v2114_v27  ;;  %v9055_v58 = vld [vmem:[#allocation18_spill] sm:$0xff] }
 0xb78   :  { %v2092_v53 = vrot.slane %v2091_v10, 1  ;;  %v2123_v17 = vsel %vm9042_vm1, %v2116_v55, %v2122_v24  ;;  %v9060_v27 = vld [vmem:[#allocation26_spill] sm:$0xff]  ;;  %v9065_v24 = vld [vmem:[#allocation25_spill] sm:$0xff]  ;;  %v9067_v55 = vld [vmem:[#allocation27_spill] sm:$0xff] }
 0xb79   :  { %v2075_v11 = vadd.f32 %v2074_v52, %v2073_v48  ;;  %v2083_v25 = vadd.f32 %v2082_v2, %v2044_v46  ;;  %v2124_v30 = vsel %vm9043_vm11, %v2117_v59, %v2123_v17  ;;  %v9048_v46 = vld [vmem:[#allocation46_spill] sm:$0xff]  ;;  %v9051_v52 = vld [vmem:[#allocation49_spill] sm:$0xff]  ;;  %v9052_v2 = vld [vmem:[#allocation47_spill] sm:$0xff] }
 0xb7a   :  { %v2093_v19 = vadd.f32 %v2092_v53, %v2091_v10  ;;  %v9050_v10 = vld [vmem:[#allocation36_spill] sm:$0xff]  ;;  %v9061_v53 = vld [vmem:[#allocation21_spill] sm:$0xff]  ;;  %vm9096_vm1 = vmmov %vm9043_vm11 }
 0xb7b   :  { %v2102_v9 = vpack.c.bf16 %v2075_v11, %v2075_v11  ;;  %v2084_v50 = vrot.slane %v2083_v25, 2  ;;  %v9058_v11 = vld [vmem:[#allocation24_spill] sm:$0xff]  ;;  %v9070_v17 = vld [vmem:[#allocation33_spill] sm:$0xff]  ;;  %vm9097_vm11 = vmmov %vm9044_vm4 }
 0xb7c   :  { %v2105_v8 = vpack.c.bf16 %v2093_v19, %v2093_v19  ;;  %v9069_v19 = vld [vmem:[#allocation29_spill] sm:$0xff] }
 0xb7d   :  { %v2085_v28 = vadd.f32 %v2084_v50, %v2083_v25  ;;  %v2118_v49 = vunpack.c.l.b16 %v2102_v9  ;;  %v9059_v25 = vld [vmem:[#allocation20_spill] sm:$0xff]  ;;  %v9063_v50 = vld [vmem:[#allocation23_spill] sm:$0xff] }
 0xb7e   :  { %v2121_v60 = vunpack.c.l.b16 %v2105_v8  ;;  %v9062_v9 = vld [vmem:[#allocation28_spill] sm:$0xff] }
 0xb7f   :  { %v2086_v16 = vrot.slane %v2085_v28, 1  ;;  %v2125_v32 = vsel %vm9044_vm4, %v2118_v49, %v2124_v30  ;;  %v5286_v49 = vld [vmem:[%s8755_s0 + $0x30] sm:$0xff]  ;;  %vm9098_vm4 = vmmov %vm9045_vm12 }
 0xb80   :  { %v2126_v42 = vsel %vm9045_vm12, %v2119_v45, %v2125_v32  ;;  %vm9099_vm12 = vmmov %vm9046_vm2 }
 0xb81   :  { %v2087_v6 = vadd.f32 %v2086_v16, %v2085_v28  ;;  %v9068_v28 = vld [vmem:[#allocation32_spill] sm:$0xff] }
 0xb83   :  { %v2104_v23 = vpack.c.bf16 %v2087_v6, %v2087_v6  ;;  %v9072_v6 = vld [vmem:[#allocation39_spill] sm:$0xff] }
 0xb84   :  { %v2184_v30 = vadd.f32 %v9072_v6, %v9071_v21 }
 0xb85   :  { %v2120_v62 = vunpack.c.l.b16 %v2104_v23 }
 0xb87   :  { %v2127_v37 = vsel %vm9046_vm2, %v2120_v62, %v2126_v42  ;;  %vm9100_vm2 = vmmov %vm9047_vm13 }
 0xb88   :  { %v2128_v63 = vsel %vm9047_vm13, %v2121_v60, %v2127_v37  ;;  %vm9101_vm13 = vcmask 64512  }
 0xb89   :  { %v2129_v48 = vpack.c.b16 %v2128_v63, %v2128_v63  ;;  %v5287_v63 = vld [vmem:[%s8755_s0 + $0x38] sm:$0xff] }
 0xb8b   :  { %2139 = vmatmul.bf16.vlgmr.msra.gmra.mxu0 %v2129_v48  ;;  %2152 = vmatmul.bf16.vlgmr.msra.gmra.mxu1 %v2129_v48 }
 0xb8c   :  { %2165 = vmatmul.bf16.vlgmr.msra.gmra.mxu2 %v2129_v48  ;;  %2773 = vmatpush.bf16.msra.mxu1 %v6433_v20 }
 0xb8d   :  { %2756 = vmatpush.bf16.msra.mxu0 %v6367_v33  ;;  %2786 = vmatpush.bf16.msra.mxu2 %v6475_v54 }
 0xb90   :  { %2774 = vmatpush.bf16.msra.mxu1 %v6457_v12 }
 0xb91   :  { %2757 = vmatpush.bf16.msra.mxu0 %v6385_v40  ;;  %2787 = vmatpush.bf16.msra.mxu2 %v6503_v18 }
 0xb94   :  { %2775 = vmatpush.bf16.msra.mxu1 %v6488_v35 }
 0xb95   :  { %2758 = vmatpush.bf16.msra.mxu0 %v6406_v31  ;;  %2788 = vmatpush.bf16.msra.mxu2 %v6538_v56 }
 0xb98   :  { %2776 = vmatpush.bf16.msra.mxu1 %v6519_v38 }
 0xb99   :  { %2759 = vmatpush.bf16.msra.mxu0 %v6431_v0  ;;  %2789 = vmatpush.bf16.msra.mxu2 %v6568_v13 }
 0xb9b   :  { %2195 = vmatmul.bf16.vlgmr.msrb.gmra.mxu0 %v7068_v22  ;;  %2208 = vmatmul.bf16.vlgmr.msrb.gmra.mxu1 %v7068_v22  ;;  %v9053_v22 = vld [vmem:[#allocation38_spill] sm:$0xff] }
 0xb9c   :  { %2777 = vmatpush.bf16.msra.mxu1 %v8970_v7 }
 0xb9d   :  { %2760 = vmatpush.bf16.msra.mxu0 %v8971_v41  ;;  %2790 = vmatpush.bf16.msra.mxu2 %v8972_v15 }
 0xba0   :  { %2778 = vmatpush.bf16.msra.mxu1 %v8973_v51 }
 0xba1   :  { %2761 = vmatpush.bf16.msra.mxu0 %v8974_v1  ;;  %2791 = vmatpush.bf16.msra.mxu2 %v9048_v46 }
 0xba4   :  { %2779 = vmatpush.bf16.msra.mxu1 %v9049_v61 }
 0xba5   :  { %2762 = vmatpush.bf16.msra.mxu0 %v9050_v10  ;;  %2792 = vmatpush.bf16.msra.mxu2 %v9051_v52 }
 0xba8   :  { %2780 = vmatpush.bf16.msra.mxu1 %v9052_v2 }
 0xba9   :  { %2763 = vmatpush.bf16.msra.mxu0 %v9053_v22  ;;  %2793 = vmatpush.bf16.msra.mxu2 %v9054_v43 }
 0xbac   :  { %3342 = vmatpush.bf16.msrb.mxu1 %v9056_v4 }
 0xbad   :  { %3329 = vmatpush.bf16.msrb.mxu0 %v9055_v58 }
 0xbb0   :  { %3343 = vmatpush.bf16.msrb.mxu1 %v9058_v11 }
 0xbb1   :  { %3330 = vmatpush.bf16.msrb.mxu0 %v9057_v47 }
 0xbb4   :  { %3344 = vmatpush.bf16.msrb.mxu1 %v9060_v27 }
 0xbb5   :  { %3331 = vmatpush.bf16.msrb.mxu0 %v9059_v25 }
 0xbb8   :  { %3345 = vmatpush.bf16.msrb.mxu1 %v9062_v9 }
 0xbb9   :  { %3332 = vmatpush.bf16.msrb.mxu0 %v9061_v53 }
 0xbbc   :  { %3346 = vmatpush.bf16.msrb.mxu1 %v9064_v34 }
 0xbbd   :  { %3333 = vmatpush.bf16.msrb.mxu0 %v9063_v50 }
 0xbc0   :  { %3347 = vmatpush.bf16.msrb.mxu1 %v9066_v5 }
 0xbc1   :  { %3334 = vmatpush.bf16.msrb.mxu0 %v9065_v24 }
 0xbc4   :  { %3348 = vmatpush.bf16.msrb.mxu1 %v9068_v28 }
 0xbc5   :  { %3335 = vmatpush.bf16.msrb.mxu0 %v9067_v55  ;;  %v9073_v55 = vld [vmem:[#allocation55_spill] sm:$0xff] }
 0xbc8   :  { %3349 = vmatpush.bf16.msrb.mxu1 %v9070_v17 }
 0xbc9   :  { %3336 = vmatpush.bf16.msrb.mxu0 %v9069_v19 }
 0xc08   :  { %v2140_v16 = vpop.f32.mrf.mxu0  ;;  %v2153_v59 = vpop.f32.mrf.mxu1 }
 0xc09   :  { %v2170_v8 = vadd.f32 %v5286_v49, %v2140_v16  ;;  %v2171_v28 = vadd.f32 %v5287_v63, %v2153_v59 }
 0xc0b   :  { %v2213_v32 = vadd.f32 %v2184_v30, %v2170_v8 }
 0xc0d   :  { %v5289_v23 = vmul.f32 -1.442695, %v2213_v32 }
 0xc0f   :  { %5576 = vpow2.f32 %v5289_v23  ;;  %v2166_v45 = vpop.f32.mrf.mxu2 }
 0xc10   :  { %v2142_v62 = vpop.f32.mrf.mxu0  ;;  %v2155_v60 = vpop.f32.mrf.mxu1 }
 0xc15   :  { %v5577_v42 = vpop.eup %5576 }
 0xc16   :  { %v2217_v37 = vadd.f32 1.0, %v5577_v42 }
 0xc17   :  { %v2168_v48 = vpop.f32.mrf.mxu2 }
 0xc18   :  { %5578 = vrcp.f32 %v2217_v37  ;;  %v2196_v17 = vpop.f32.mrf.mxu0  ;;  %v2209_v19 = vpop.f32.mrf.mxu1  ;;  %v2229_v42 = vand.u32 2147483648, %v2217_v37  ;;  %v2227_v21 = vand.u32 2147483647, %v2217_v37  ;;  %vm2223_vm15 = vweird.f32 %v2217_v37 }
 0xc19   :  { %v2197_v6 = vadd.f32 %v2196_v17, %v9073_v55  ;;  %v9074_v17 = vld [vmem:[#allocation56_spill] sm:$0xff] }
 0xc1a   :  { %v2230_v63 = vor.u32 1.1754944e-38, %v2229_v42  ;;  %vm2228_vm9 = vcmp.eq.f32.partialorder %v2227_v21, 8.507059e+37 }
 0xc1b   :  { %v2233_v49 = vadd.f32 %v2197_v6, %v2171_v28  ;;  %v2210_v6 = vadd.f32 %v2209_v19, %v9074_v17 }
 0xc1d   :  { %v5290_v16 = vmul.f32 -1.442695, %v2233_v49  ;;  %v5288_v49 = vld [vmem:[%s8755_s0 + $0x40] sm:$0xff] }
 0xc1e   :  { %v5579_v30 = vpop.eup %5578 }
 0xc1f   :  { %5580 = vpow2.f32 %v5290_v16  ;;  %v2219_v8 = vmul.f32 %v5579_v30, %v2217_v37  ;;  %vm2224_vm14 = vweird.f32 %v5579_v30 }
 0xc20   :  { %v2198_v32 = vpop.f32.mrf.mxu0  ;;  %v2211_v23 = vpop.f32.mrf.mxu1  ;;  %vm2225_vm8 = vmor %vm2223_vm15, %vm2224_vm14 }
 0xc21   :  { %v2220_v62 = vsub.f32 1.0, %v2219_v8  ;;  %v2172_v32 = vadd.f32 %v5288_v49, %v2166_v45  ;;  %vm9102_vm14 = vmmov %vm9095_vm5 }
 0xc22   :  { %vm9103_vm15 = vmmov %vm9096_vm1 }
 0xc23   :  { %v2221_v60 = vmul.f32 %v5579_v30, %v2220_v62 }
 0xc25   :  { %v5581_v5 = vpop.eup %5580  ;;  %v2222_v48 = vadd.f32 %v5579_v30, %v2221_v60 }
 0xc26   :  { %v2237_v24 = vadd.f32 1.0, %v5581_v5 }
 0xc27   :  { %v2226_v59 = vsel %vm2225_vm8, %v5579_v30, %v2222_v48  ;;  %vm9104_vm8 = vmmov %vm9097_vm11 }
 0xc28   :  { %5582 = vrcp.f32 %v2237_v24  ;;  %v2231_v28 = vsel %vm2228_vm9, %v2230_v63, %v2226_v59  ;;  %v2249_v37 = vand.u32 2147483648, %v2237_v24  ;;  %v2247_v30 = vand.u32 2147483647, %v2237_v24  ;;  %vm9105_vm9 = vmmov %vm9098_vm4 }
 0xc29   :  { %v2253_v16 = vmul.f32 %v2231_v28, %v2210_v6  ;;  %vm2243_vm10 = vweird.f32 %v2237_v24  ;;  %v9075_v6 = vld [vmem:[#allocation58_spill] sm:$0xff] }
 0xc2a   :  { %v2250_v42 = vor.u32 1.1754944e-38, %v2249_v37  ;;  %vm2248_vm3 = vcmp.eq.f32.partialorder %v2247_v30, 8.507059e+37 }
 0xc2b   :  { %v2254_v62 = vadd.f32 %v2253_v16, %v2172_v32 }
 0xc2d   :  { %5584 = vtanh.f32 %v2254_v62 }
 0xc2e   :  { %v5583_v8 = vpop.eup %5582 }
 0xc2f   :  { %v2239_v23 = vmul.f32 %v5583_v8, %v2237_v24  ;;  %vm2244_vm6 = vweird.f32 %v5583_v8 }
 0xc30   :  { %vm2245_vm7 = vmor %vm2243_vm10, %vm2244_vm6 }
 0xc31   :  { %v2240_v60 = vsub.f32 1.0, %v2239_v23  ;;  %vm9106_vm6 = vmmov %vm9099_vm12 }
 0xc32   :  { %vm9107_vm10 = vmmov %vm9100_vm2 }
 0xc33   :  { %v2241_v5 = vmul.f32 %v5583_v8, %v2240_v60  ;;  %v5585_v63 = vpop.eup %5584 }
 0xc35   :  { %v2242_v21 = vadd.f32 %v5583_v8, %v2241_v5  ;;  %v9077_v5 = vld [vmem:[#allocation37_spill] sm:$0xff] }
 0xc37   :  { %v2246_v19 = vsel %vm2245_vm7, %v5583_v8, %v2242_v21  ;;  %vm9108_vm7 = vmmov %vm9101_vm13 }
 0xc38   :  { %v2251_v48 = vsel %vm2248_vm3, %v2250_v42, %v2246_v19  ;;  %v9078_v19 = vld [vmem:[#allocation40_spill] sm:$0xff] }
 0xc39   :  { %v2256_v59 = vsub.f32 1.0, %v2251_v48  ;;  %v2258_v45 = vmul.f32 %v2251_v48, %v9075_v6 }
 0xc3b   :  { %v2257_v28 = vmul.f32 %v5585_v63, %v2256_v59  ;;  %v9079_v63 = vld [vmem:[#allocation42_spill] sm:$0xff] }
 0xc3d   :  { %v7393_v49 = vadd.f32 %v2258_v45, %v2257_v28  ;;  %v9080_v45 = vld [vmem:[#allocation45_spill] sm:$0xff] }
 0xc3f   :  { %9076 = vst [vmem:[#allocation59_spill] sm:$0xff] %v7393_v49  ;;  %v7397_v16 = vpack.c.bf16 %v7393_v49, %v7393_v49  ;;  %v2269_v32 = vperm.slane %v7393_v49, 0  ;;  %v2263_v24 = vrot.slane %v7393_v49, 2  ;;  %v2262_v23 = vrot.slane %v7393_v49, 1 }
 0xc40   :  { %v2264_v37 = vrot.slane %v7393_v49, 3  ;;  %v2265_v59 = vrot.slane %v7393_v49, 4 }
 0xc41   :  { %2781 = vmatmul.bf16.vlgmr.msra.gmra.mxu1 %v7397_v16  ;;  %v2285_v8 = vmul.f32 %v7300_v39, %v2269_v32  ;;  %v2271_v62 = vperm.slane %v2263_v24, 0  ;;  %v2270_v60 = vperm.slane %v2262_v23, 0  ;;  %v9082_v23 = vld [vmem:[#allocation50_spill] sm:$0xff] }
 0xc42   :  { %3398 = vmatpush.bf16.msra.mxu1 %v9077_v5  ;;  %v2272_v42 = vperm.slane %v2264_v37, 0  ;;  %v2273_v28 = vperm.slane %v2265_v59, 0  ;;  %v9084_v37 = vld [vmem:[#allocation53_spill] sm:$0xff] }
 0xc43   :  { %2293 = vadd.xlane.f32.xlu1 %v2285_v8  ;;  %v2287_v30 = vmul.f32 %v7080_v44, %v2271_v62  ;;  %v2286_v21 = vmul.f32 %v7086_v29, %v2270_v60  ;;  %v2266_v44 = vrot.slane %v7393_v49, 5  ;;  %v9081_v29 = vld [vmem:[#allocation48_spill] sm:$0xff]  ;;  %v2267_v8 = vrot.slane %v7393_v49, 6 }
 0xc44   :  { %v2288_v48 = vmul.f32 %v7094_v57, %v2272_v42  ;;  %v2289_v32 = vmul.f32 %v7315_v36, %v2273_v28  ;;  %v9083_v62 = vld [vmem:[#allocation52_spill] sm:$0xff]  ;;  %v9085_v28 = vld [vmem:[#allocation14_spill] sm:$0xff] }
 0xc45   :  { %2297 = vadd.xlane.f32.xlu2 %v2287_v30  ;;  %2295 = vadd.xlane.f32.xlu0 %v2286_v21  ;;  %v2274_v24 = vperm.slane %v2266_v44, 0  ;;  %v2275_v60 = vperm.slane %v2267_v8, 0  ;;  %v2268_v21 = vrot.slane %v7393_v49, 7 }
 0xc46   :  { %3399 = vmatpush.bf16.msra.mxu1 %v9078_v19 }
 0xc47   :  { %v2290_v57 = vmul.f32 %v7309_v26, %v2274_v24  ;;  %v2291_v30 = vmul.f32 %v7327_v3, %v2275_v60  ;;  %v2276_v42 = vperm.slane %v2268_v21, 0  ;;  %v9086_v24 = vld [vmem:[#allocation15_spill] sm:$0xff] }
 0xc4a   :  { %3400 = vmatpush.bf16.msra.mxu1 %v9079_v63 }
 0xc4b   :  { %2299 = vadd.xlane.f32.xlu1 %v2288_v48  ;;  %v2292_v48 = vmul.f32 %v7321_v14, %v2276_v42 }
 0xc4e   :  { %3401 = vmatpush.bf16.msra.mxu1 %v9080_v45 }
 0xc52   :  { %3402 = vmatpush.bf16.msra.mxu1 %v9081_v29  ;;  %v9093_v29 = vld [vmem:[#allocation16_spill] sm:$0xff] }
 0xc53   :  { %2301 = vadd.xlane.f32.xlu1 %v2289_v32 }
 0xc56   :  { %3403 = vmatpush.bf16.msra.mxu1 %v9082_v23 }
 0xc5a   :  { %3404 = vmatpush.bf16.msra.mxu1 %v9083_v62 }
 0xc5b   :  { %2303 = vadd.xlane.f32.xlu1 %v2290_v57  ;;  %v9087_v57 = vld [vmem:[#allocation9_spill] sm:$0xff] }
 0xc5e   :  { %3405 = vmatpush.bf16.msra.mxu1 %v9084_v37 }
 0xc63   :  { %2305 = vadd.xlane.f32.xlu1 %v2291_v30  ;;  %v9089_v30 = vld [vmem:[#allocation10_spill] sm:$0xff] }
 0xc6b   :  { %2307 = vadd.xlane.f32.xlu1 %v2292_v48  ;;  %v9090_v48 = vld [vmem:[#allocation11_spill] sm:$0xff] }
 0xcb6   :  { %v2294_v59 = vpop.xlane.xlu1 %2293 }
 0xcb7   :  { %v2309_v26 = vadd.f32 %v2294_v59, %v9085_v28  ;;  %v9091_v28 = vld [vmem:[#allocation12_spill] sm:$0xff] }
 0xcb8   :  { %v2298_v32 = vpop.xlane.xlu2 %2297  ;;  %v2296_v44 = vpop.xlane.xlu0 %2295 }
 0xcb9   :  { %v2311_v6 = vadd.f32 %v2298_v32, %v9086_v24  ;;  %v2310_v8 = vadd.f32 %v2296_v44, %v9087_v57  ;;  %2326 = vperm.xlu2 %5457, %v2309_v26   ;;  %v9092_v44 = vld [vmem:[#allocation13_spill] sm:$0xff] }
 0xcbb   :  { %2332 = vperm.xlu1 %5459, %v2311_v6   ;;  %2329 = vperm.xlu0 %5458, %v2310_v8  }
 0xcbe   :  { %v7427_v60 = vpop.f32.mrf.mxu1  ;;  %v2300_v37 = vpop.xlane.xlu1 %2299 }
 0xcbf   :  { %9088 = vst [vmem:[#allocation39_spill] sm:$0xff] %v7427_v60  ;;  %v2312_v21 = vadd.f32 %v2300_v37, %v9089_v30 }
 0xcc3   :  { %2335 = vperm.xlu0 %5458, %v2312_v21  }
 0xcc6   :  { %v2784_v14 = vpop.f32.mrf.mxu1  ;;  %v2302_v42 = vpop.xlane.xlu1 %2301 }
 0xcc7   :  { %v2313_v62 = vadd.f32 %v2302_v42, %v9090_v48  ;;  %v9094_v42 = vld [vmem:[#allocation17_spill] sm:$0xff] }
 0xcc9   :  { %2338 = vperm.xlu2 %5457, %v2313_v62  }
 0xcce   :  { %v2304_v59 = vpop.xlane.xlu1 %2303 }
 0xccf   :  { %v2314_v23 = vadd.f32 %v2304_v59, %v9091_v28 }
 0xcd1   :  { %2341 = vperm.xlu0 %5458, %v2314_v23  }
 0xcd6   :  { %v2306_v32 = vpop.xlane.xlu1 %2305 }
 0xcd7   :  { %v7433_v57 = vadd.f32 %v2306_v32, %v9092_v44 }
 0xcd9   :  { %2344 = vperm.xlu1 %5459, %v7433_v57  }
 0xcde   :  { %v2308_v24 = vpop.xlane.xlu1 %2307 }
 0xcdf   :  { %v2316_v45 = vadd.f32 %v2308_v24, %v9093_v29 }
 0xce1   :  { %2347 = vperm.xlu2 %5457, %v2316_v45  }
 0xd13   :  { %v2327_v14 = vpop.permute.xlu2 %2326 }
 0xd14   :  { %v2349_v59 = vperm.slane %v2327_v14, %v9094_v42 }
 0xd23   :  { %v2339_v19 = vpop.permute.xlu2 %2338 }
 0xd24   :  { %v2353_v17 = vperm.slane %v2339_v19, %v9094_v42 }
 0xd2d   :  { %v2330_v37 = vpop.permute.xlu0 %2329  ;;  %v2333_v63 = vpop.permute.xlu1 %2332 }
 0xd2e   :  { %v2350_v48 = vperm.slane %v2330_v37, %v9094_v42  ;;  %v2351_v28 = vperm.slane %v2333_v63, %v9094_v42 }
 0xd30   :  { %v2357_v32 = vsel %vm290_vm0, %v2350_v48, %v2349_v59 }
 0xd31   :  { %v2358_v49 = vsel %vm9095_vm5, %v2351_v28, %v2357_v32 }
 0xd35   :  { %v2336_v30 = vpop.permute.xlu0 %2335 }
 0xd36   :  { %v2352_v44 = vperm.slane %v2336_v30, %v9094_v42 }
 0xd38   :  { %v2359_v24 = vsel %vm9096_vm1, %v2352_v44, %v2358_v49 }
 0xd39   :  { %v2360_v60 = vsel %vm9097_vm11, %v2353_v17, %v2359_v24 }
 0xd3b   :  { %v2348_v55 = vpop.permute.xlu2 %2347 }
 0xd3c   :  { %v2356_v63 = vperm.slane %v2348_v55, %v9094_v42 }
 0xd43   :  { %v2342_v5 = vpop.permute.xlu0 %2341 }
 0xd44   :  { %v2354_v29 = vperm.slane %v2342_v5, %v9094_v42 }
 0xd46   :  { %v2361_v48 = vsel %vm9098_vm4, %v2354_v29, %v2360_v60 }
 0xd4b   :  { %v2345_v37 = vpop.permute.xlu1 %2344 }
 0xd4c   :  { %v2355_v14 = vperm.slane %v2345_v37, %v9094_v42 }
 0xd4e   :  { %v2362_v30 = vsel %vm9099_vm12, %v2355_v14, %v2361_v48 }
 0xd4f   :  { %v2363_v28 = vsel %vm9100_vm2, %v2356_v63, %v2362_v30 }
 0xd50   :  { %v2365_v49 = vsel %vm9101_vm13, %v2363_v28, -inf }
 0xd51   :  { %2366 = vmax.xlane.f32.xlu0 %v2365_v49 }
 0xdc4   :  { %v2367_v5 = vpop.xlane.xlu0 %2366 }
 0xdc5   :  { %v2370_v44 = vperm.slane %v2367_v5, 1  ;;  %v2369_v19 = vperm.slane %v2367_v5, 0  ;;  %v2372_v17 = vperm.slane %v2367_v5, 3  ;;  %v2371_v37 = vperm.slane %v2367_v5, 2 }
 0xdc6   :  { %v2374_v60 = vperm.slane %v2367_v5, 5  ;;  %v2373_v63 = vperm.slane %v2367_v5, 4 }
 0xdc7   :  { %v2386_v59 = vsub.f32 %v2310_v8, %v2370_v44  ;;  %v2385_v32 = vsub.f32 %v2309_v26, %v2369_v19  ;;  %v2388_v55 = vsub.f32 %v2312_v21, %v2372_v17  ;;  %v2387_v29 = vsub.f32 %v2311_v6, %v2371_v37 }
 0xdc8   :  { %v2390_v8 = vsub.f32 %v2314_v23, %v2374_v60  ;;  %v2389_v26 = vsub.f32 %v2313_v62, %v2373_v63  ;;  %v2375_v6 = vperm.slane %v2367_v5, 6 }
 0xdc9   :  { %v2395_v34 = vmul.f32 1.442695, %v2386_v59  ;;  %v2393_v24 = vmul.f32 1.442695, %v2385_v32  ;;  %v2399_v14 = vmul.f32 1.442695, %v2388_v55 }
 0xdca   :  { %v2397_v48 = vmul.f32 1.442695, %v2387_v29  ;;  %v2403_v21 = vmul.f32 1.442695, %v2390_v8  ;;  %v2401_v49 = vmul.f32 1.442695, %v2389_v26  ;;  %v2391_v23 = vsub.f32 %v7433_v57, %v2375_v6 }
 0xdcb   :  { %5586 = vpow2.f32 %v2395_v34  ;;  %v2376_v34 = vperm.slane %v2367_v5, 7 }
 0xdcc   :  { %5588 = vpow2.f32 %v2393_v24  ;;  %v2405_v17 = vmul.f32 1.442695, %v2391_v23 }
 0xdcd   :  { %5590 = vpow2.f32 %v2399_v14  ;;  %v2392_v59 = vsub.f32 %v2316_v45, %v2376_v34 }
 0xdce   :  { %5592 = vpow2.f32 %v2397_v48 }
 0xdcf   :  { %5594 = vpow2.f32 %v2403_v21  ;;  %v2407_v32 = vmul.f32 1.442695, %v2392_v59 }
 0xdd0   :  { %5596 = vpow2.f32 %v2401_v49 }
 0xdd1   :  { %v7453_v30 = vpop.eup %5586  ;;  %5598 = vpow2.f32 %v2407_v32 }
 0xdd2   :  { %v7455_v28 = vpop.eup %5588  ;;  %2421 = vperm.xlu2 %5457, %v7453_v30   ;;  %5600 = vpow2.f32 %v2405_v17 }
 0xdd3   :  { %2418 = vperm.xlu1 %5459, %v7455_v28   ;;  %v7459_v44 = vpop.eup %5590 }
 0xdd4   :  { %v7461_v19 = vpop.eup %5592 }
 0xdd5   :  { %v7466_v62 = vpop.eup %5594 }
 0xdd6   :  { %v7468_v24 = vpop.eup %5596 }
 0xdd7   :  { %v7472_v5 = vpop.eup %5598 }
 0xdd8   :  { %v7474_v45 = vpop.eup %5600 }
 0xdda   :  { %2427 = vperm.xlu2 %5457, %v7459_v44  }
 0xddb   :  { %2424 = vperm.xlu1 %5459, %v7461_v19  }
 0xde2   :  { %2433 = vperm.xlu2 %5457, %v7466_v62  }
 0xde3   :  { %2430 = vperm.xlu1 %5459, %v7468_v24  }
 0xdea   :  { %2439 = vperm.xlu2 %5457, %v7472_v5  }
 0xdeb   :  { %2436 = vperm.xlu1 %5459, %v7474_v45  }
 0xe2c   :  { %v2422_v57 = vpop.permute.xlu2 %2421 }
 0xe2d   :  { %v2442_v63 = vperm.slane %v2422_v57, %v9094_v42 }
 0xe34   :  { %v2428_v55 = vpop.permute.xlu2 %2427 }
 0xe35   :  { %v2444_v49 = vperm.slane %v2428_v55, %v9094_v42 }
 0xe3c   :  { %v2434_v60 = vpop.permute.xlu2 %2433 }
 0xe3d   :  { %v2446_v32 = vperm.slane %v2434_v60, %v9094_v42 }
 0xe44   :  { %v2440_v59 = vpop.permute.xlu2 %2439 }
 0xe45   :  { %v2419_v37 = vpop.permute.xlu1 %2418  ;;  %v2448_v57 = vperm.slane %v2440_v59, %v9094_v42 }
 0xe46   :  { %v2441_v14 = vperm.slane %v2419_v37, %v9094_v42 }
 0xe48   :  { %v2449_v26 = vsel %vm290_vm0, %v2442_v63, %v2441_v14 }
 0xe4d   :  { %v2425_v29 = vpop.permute.xlu1 %2424 }
 0xe4e   :  { %v2443_v48 = vperm.slane %v2425_v29, %v9094_v42 }
 0xe50   :  { %v2450_v34 = vsel %vm9102_vm14, %v2443_v48, %v2449_v26 }
 0xe51   :  { %v2451_v6 = vsel %vm9103_vm15, %v2444_v49, %v2450_v34 }
 0xe55   :  { %v2431_v8 = vpop.permute.xlu1 %2430 }
 0xe56   :  { %v2445_v21 = vperm.slane %v2431_v8, %v9094_v42 }
 0xe58   :  { %v2452_v23 = vsel %vm9104_vm8, %v2445_v21, %v2451_v6 }
 0xe59   :  { %v2453_v29 = vsel %vm9105_vm9, %v2446_v32, %v2452_v23 }
 0xe5d   :  { %v2437_v17 = vpop.permute.xlu1 %2436 }
 0xe5e   :  { %v2447_v37 = vperm.slane %v2437_v17, %v9094_v42 }
 0xe60   :  { %v2454_v14 = vsel %vm9106_vm6, %v2447_v37, %v2453_v29 }
 0xe61   :  { %v2455_v48 = vsel %vm9107_vm10, %v2448_v57, %v2454_v14 }
 0xe62   :  { %v2457_v55 = vsel %vm9108_vm7, %v2455_v48, 0.0 }
 0xe63   :  { %2458 = vadd.xlane.f32.xlu1 %v2457_v55 }
 0xed6   :  { %v7494_v63 = vpop.xlane.xlu1 %2458 }
 0xed7   :  { %v2462_v8 = vperm.slane %v7494_v63, 1  ;;  %v2461_v60 = vperm.slane %v7494_v63, 0  ;;  %v7499_v26 = vperm.slane %v7494_v63, 5  ;;  %v7502_v34 = vperm.slane %v7494_v63, 2 }
 0xed8   :  { %v7505_v21 = vperm.slane %v7494_v63, 7  ;;  %v7509_v49 = vperm.slane %v7494_v63, 3  ;;  %v7515_v57 = vperm.slane %v7494_v63, 4  ;;  %v7568_v25 = vperm.slane %v7494_v63, 6 }
 0xed9   :  { %5602 = vrcp.f32 %v2462_v8  ;;  %v2501_v6 = vand.u32 2147483647, %v2462_v8  ;;  %v2503_v59 = vand.u32 2147483648, %v2462_v8  ;;  %v2486_v32 = vand.u32 2147483647, %v2461_v60 }
 0xeda   :  { %5604 = vrcp.f32 %v2461_v60  ;;  %vm2497_vm3 = vweird.f32 %v2462_v8  ;;  %vm2482_vm5 = vweird.f32 %v2461_v60  ;;  %v2488_v48 = vand.u32 2147483648, %v2461_v60 }
 0xedb   :  { %5606 = vrcp.f32 %v7499_v26  ;;  %vm7519_vm1 = vcmp.eq.f32.partialorder %v2501_v6, 8.507059e+37  ;;  %v2504_v50 = vor.u32 1.1754944e-38, %v2503_v59  ;;  %vm7525_vm4 = vcmp.eq.f32.partialorder %v2486_v32, 8.507059e+37 }
 0xedc   :  { %5608 = vrcp.f32 %v7502_v34  ;;  %vm2557_vm12 = vweird.f32 %v7499_v26  ;;  %v2489_v4 = vor.u32 1.1754944e-38, %v2488_v48  ;;  %v2561_v22 = vand.u32 2147483647, %v7499_v26 }
 0xedd   :  { %5610 = vrcp.f32 %v7505_v21  ;;  %vm2512_vm6 = vweird.f32 %v7502_v34 }
 0xede   :  { %5612 = vrcp.f32 %v7509_v49  ;;  %vm2562_vm7 = vcmp.eq.f32.partialorder %v2561_v22, 8.507059e+37  ;;  %v2591_v22 = vand.u32 2147483647, %v7505_v21 }
 0xedf   :  { %v5603_v23 = vpop.eup %5602  ;;  %5614 = vrcp.f32 %v7515_v57 }
 0xee0   :  { %v5605_v17 = vpop.eup %5604  ;;  %v2493_v37 = vmul.f32 %v5603_v23, %v2462_v8  ;;  %vm2498_vm11 = vweird.f32 %v5603_v23  ;;  %5616 = vrcp.f32 %v7568_v25 }
 0xee1   :  { %v7517_v29 = vpop.eup %5606  ;;  %v2478_v14 = vmul.f32 %v5605_v17, %v2461_v60  ;;  %vm2483_vm2 = vweird.f32 %v5605_v17  ;;  %vm2499_vm13 = vmor %vm2497_vm3, %vm2498_vm11  ;;  %v2518_v60 = vand.u32 2147483648, %v7502_v34  ;;  %vm2587_vm11 = vweird.f32 %v7505_v21 }
 0xee2   :  { %v2494_v55 = vsub.f32 1.0, %v2493_v37  ;;  %v2553_v9 = vmul.f32 %v7517_v29, %v7499_v26  ;;  %v5609_v53 = vpop.eup %5608  ;;  %vm2558_vm14 = vweird.f32 %v7517_v29  ;;  %vm2484_vm15 = vmor %vm2482_vm5, %vm2483_vm2 }
 0xee3   :  { %v2479_v27 = vsub.f32 1.0, %v2478_v14  ;;  %v7530_v11 = vpop.eup %5610  ;;  %v2508_v47 = vmul.f32 %v5609_v53, %v7502_v34  ;;  %vm2513_vm8 = vweird.f32 %v5609_v53  ;;  %vm7561_vm9 = vmor %vm2557_vm12, %vm2558_vm14  ;;  %vm2527_vm12 = vweird.f32 %v7509_v49 }
 0xee4   :  { %v2495_v37 = vmul.f32 %v5603_v23, %v2494_v55  ;;  %v2554_v6 = vsub.f32 1.0, %v2553_v9  ;;  %v2583_v14 = vmul.f32 %v7530_v11, %v7505_v21  ;;  %v7536_v32 = vpop.eup %5612  ;;  %vm2514_vm10 = vmor %vm2512_vm6, %vm2513_vm8  ;;  %vm2588_vm5 = vweird.f32 %v7530_v11 }
 0xee5   :  { %v2480_v59 = vmul.f32 %v5605_v17, %v2479_v27  ;;  %v2509_v2 = vsub.f32 1.0, %v2508_v47  ;;  %v2563_v27 = vand.u32 2147483648, %v7499_v26  ;;  %v2523_v48 = vmul.f32 %v7536_v32, %v7509_v49  ;;  %v7550_v10 = vpop.eup %5614 }
 0xee6   :  { %v2496_v58 = vadd.f32 %v5603_v23, %v2495_v37  ;;  %v2555_v43 = vmul.f32 %v7517_v29, %v2554_v6  ;;  %v2584_v52 = vsub.f32 1.0, %v2583_v14  ;;  %v2538_v26 = vmul.f32 %v7550_v10, %v7515_v57 }
 0xee7   :  { %v2481_v9 = vadd.f32 %v5605_v17, %v2480_v59  ;;  %v2510_v6 = vmul.f32 %v5609_v53, %v2509_v2  ;;  %v2524_v59 = vsub.f32 1.0, %v2523_v48  ;;  %v2564_v42 = vor.u32 1.1754944e-38, %v2563_v27 }
 0xee8   :  { %v2500_v55 = vsel %vm2499_vm13, %v5603_v23, %v2496_v58  ;;  %v2556_v37 = vadd.f32 %v7517_v29, %v2555_v43  ;;  %v2533_v14 = vand.u32 2147483648, %v7509_v49  ;;  %v2531_v27 = vand.u32 2147483647, %v7509_v49 }
 0xee9   :  { %v2505_v47 = vsel %vm7519_vm1, %v2504_v50, %v2500_v55  ;;  %v2485_v8 = vsel %vm2484_vm15, %v5605_v17, %v2481_v9  ;;  %v2511_v58 = vadd.f32 %v5609_v53, %v2510_v6  ;;  %v2516_v50 = vand.u32 2147483647, %v7502_v34  ;;  %v5617_v55 = vpop.eup %5616 }
 0xeea   :  { %v2506_v61 = vmul.f32 %v7453_v30, %v2505_v47  ;;  %v2490_v46 = vsel %vm7525_vm4, %v2489_v4, %v2485_v8  ;;  %v2585_v4 = vmul.f32 %v7530_v11, %v2584_v52  ;;  %v2519_v34 = vor.u32 1.1754944e-38, %v2518_v60  ;;  %vm2589_vm4 = vmor %vm2587_vm11, %vm2588_vm5 }
 0xeeb   :  { %v2491_v43 = vmul.f32 %v7455_v28, %v2490_v46  ;;  %v2560_v46 = vsel %vm7561_vm9, %v7517_v29, %v2556_v37  ;;  %v2515_v30 = vsel %vm2514_vm10, %v5609_v53, %v2511_v58  ;;  %v2525_v28 = vmul.f32 %v7536_v32, %v2524_v59 }
 0xeec   :  { %2604 = vperm.xlu0 %5458, %v2506_v61   ;;  %v2565_v63 = vsel %vm2562_vm7, %v2564_v42, %v2560_v46  ;;  %vm2517_vm3 = vcmp.eq.f32.partialorder %v2516_v50, 8.507059e+37  ;;  %v2586_v23 = vadd.f32 %v7530_v11, %v2585_v4  ;;  %v2593_v52 = vand.u32 2147483648, %v7505_v21 }
 0xeed   :  { %2599 = vperm.xlu2 %5457, %v2491_v43   ;;  %v2520_v61 = vsel %vm2517_vm3, %v2519_v34, %v2515_v30  ;;  %v2526_v53 = vadd.f32 %v7536_v32, %v2525_v28  ;;  %vm2528_vm1 = vweird.f32 %v7536_v32  ;;  %v2539_v17 = vsub.f32 1.0, %v2538_v26 }
 0xeee   :  { %v2566_v29 = vmul.f32 %v7466_v62, %v2565_v63  ;;  %v2521_v9 = vmul.f32 %v7461_v19, %v2520_v61  ;;  %v2590_v48 = vsel %vm2589_vm4, %v7530_v11, %v2586_v23  ;;  %vm2529_vm2 = vmor %vm2527_vm12, %vm2528_vm1  ;;  %v2594_v62 = vor.u32 1.1754944e-38, %v2593_v52 }
 0xeef   :  { %v2530_v37 = vsel %vm2529_vm2, %v7536_v32, %v2526_v53  ;;  %v2540_v21 = vmul.f32 %v7550_v10, %v2539_v17  ;;  %vm2592_vm13 = vcmp.eq.f32.partialorder %v2591_v22, 8.507059e+37  ;;  %v2534_v6 = vor.u32 1.1754944e-38, %v2533_v14  ;;  %v7617_v53 = vld [vmem:[%s8756_s1 + $0x18] sm:$0xff] }
 0xef0   :  { %v2568_v19 = vmul.f32 %v5617_v55, %v7568_v25  ;;  %v2595_v47 = vsel %vm2592_vm13, %v2594_v62, %v2590_v48  ;;  %vm2532_vm14 = vcmp.eq.f32.partialorder %v2531_v27, 8.507059e+37  ;;  %vm2543_vm15 = vweird.f32 %v7550_v10  ;;  %v7623_v27 = vld [vmem:[%s8756_s1 + $0x8] sm:$0xff] }
 0xef1   :  { %v2535_v8 = vsel %vm2532_vm14, %v2534_v6, %v2530_v37  ;;  %v2541_v49 = vadd.f32 %v7550_v10, %v2540_v21  ;;  %v2596_v59 = vmul.f32 %v7472_v5, %v2595_v47  ;;  %v2548_v58 = vand.u32 2147483648, %v7515_v57 }
 0xef2   :  { %v2569_v11 = vsub.f32 1.0, %v2568_v19  ;;  %v2536_v32 = vmul.f32 %v7459_v44, %v2535_v8  ;;  %vm2542_vm8 = vweird.f32 %v7515_v57  ;;  %v2546_v60 = vand.u32 2147483647, %v7515_v57 }
 0xef3   :  { %vm2544_vm9 = vmor %vm2542_vm8, %vm2543_vm15  ;;  %v2549_v50 = vor.u32 1.1754944e-38, %v2548_v58  ;;  %vm2573_vm10 = vweird.f32 %v5617_v55  ;;  %v2578_v5 = vand.u32 2147483648, %v7568_v25  ;;  %vm2572_vm7 = vweird.f32 %v7568_v25 }
 0xef4   :  { %2624 = vperm.xlu0 %5458, %v2566_v29   ;;  %v2545_v43 = vsel %vm2544_vm9, %v7550_v10, %v2541_v49  ;;  %v2570_v2 = vmul.f32 %v5617_v55, %v2569_v11  ;;  %vm2547_vm6 = vcmp.eq.f32.partialorder %v2546_v60, 8.507059e+37  ;;  %v2576_v44 = vand.u32 2147483647, %v7568_v25  ;;  %vm2574_vm3 = vmor %vm2572_vm7, %vm2573_vm10 }
 0xef5   :  { %2609 = vperm.xlu2 %5457, %v2521_v9   ;;  %v2550_v46 = vsel %vm2547_vm6, %v2549_v50, %v2545_v43  ;;  %v2579_v30 = vor.u32 1.1754944e-38, %v2578_v5  ;;  %v7630_v50 = vld [vmem:[%s8756_s1 + $0x28] sm:$0xff]  ;;  %vm9115_vm1 = vcmask 1042434   ;;  %vm9116_vm11 = vcmask 1043459  }
 0xef6   :  { %v2571_v4 = vadd.f32 %v5617_v55, %v2570_v2  ;;  %v2551_v42 = vmul.f32 %v7468_v24, %v2550_v46  ;;  %vm2577_vm5 = vcmp.eq.f32.partialorder %v2576_v44, 8.507059e+37  ;;  %v7611_v24 = vld [vmem:[%s8756_s1 + $0x10] sm:$0xff]  ;;  %vm9117_vm4 = vcmask 1044484  }
 0xef7   :  { %vm9118_vm12 = vcmask 1045509   ;;  %vm9119_vm2 = vcmask 1046534   ;;  %vm9120_vm13 = vcmask 1047559  }
 0xef8   :  { %v2575_v57 = vsel %vm2574_vm3, %v5617_v55, %v2571_v4 }
 0xef9   :  { %v2580_v10 = vsel %vm2577_vm5, %v2579_v30, %v2575_v57  ;;  %vm9168_vm5 = vmmov %vm9115_vm1 }
 0xefa   :  { %v2581_v28 = vmul.f32 %v7474_v45, %v2580_v10 }
 0xefc   :  { %2634 = vperm.xlu0 %5458, %v2596_v59  }
 0xefd   :  { %2614 = vperm.xlu2 %5457, %v2536_v32  }
 0xf05   :  { %2619 = vperm.xlu2 %5457, %v2551_v42  }
 0xf0d   :  { %2629 = vperm.xlu2 %5457, %v2581_v28  }
 0xf47   :  { %v2600_v26 = vpop.permute.xlu2 %2599 }
 0xf48   :  { %v2637_v63 = vmul.f32 %v7300_v39, %v2600_v26 }
 0xf4a   :  { %v2645_v61 = vrot.slane %v2637_v63, 4 }
 0xf4c   :  { %v2646_v17 = vadd.f32 %v2645_v61, %v2637_v63 }
 0xf4e   :  { %v2647_v22 = vrot.slane %v2646_v17, 2 }
 0xf4f   :  { %v2610_v34 = vpop.permute.xlu2 %2609 }
 0xf50   :  { %v2639_v25 = vmul.f32 %v7611_v24, %v2610_v34  ;;  %v2648_v21 = vadd.f32 %v2647_v22, %v2646_v17 }
 0xf52   :  { %v2657_v52 = vrot.slane %v2639_v25, 4  ;;  %v2649_v59 = vrot.slane %v2648_v21, 1 }
 0xf54   :  { %v2658_v39 = vadd.f32 %v2657_v52, %v2639_v25  ;;  %v2650_v42 = vadd.f32 %v2649_v59, %v2648_v21 }
 0xf56   :  { %v2659_v62 = vrot.slane %v2658_v39, 2  ;;  %v2697_v61 = vpack.c.bf16 %v2650_v42, %v2650_v42 }
 0xf57   :  { %v2615_v23 = vpop.permute.xlu2 %2614 }
 0xf58   :  { %v2640_v45 = vmul.f32 %v7617_v53, %v2615_v23  ;;  %v2660_v49 = vadd.f32 %v2659_v62, %v2658_v39  ;;  %v2713_v62 = vunpack.c.l.b16 %v2697_v61 }
 0xf5a   :  { %v2663_v29 = vrot.slane %v2640_v45, 4  ;;  %v2661_v4 = vrot.slane %v2660_v49, 1 }
 0xf5c   :  { %v2664_v9 = vadd.f32 %v2663_v29, %v2640_v45  ;;  %v2662_v63 = vadd.f32 %v2661_v4, %v2660_v49 }
 0xf5e   :  { %v2605_v14 = vpop.permute.xlu0 %2604  ;;  %v2665_v47 = vrot.slane %v2664_v9, 2 }
 0xf5f   :  { %v2638_v48 = vmul.f32 %v7623_v27, %v2605_v14  ;;  %v2620_v55 = vpop.permute.xlu2 %2619 }
 0xf60   :  { %v2641_v37 = vmul.f32 %v7315_v36, %v2620_v55  ;;  %v2666_v43 = vadd.f32 %v2665_v47, %v2664_v9 }
 0xf61   :  { %v2651_v6 = vrot.slane %v2638_v48, 4 }
 0xf62   :  { %v2669_v19 = vrot.slane %v2641_v37, 4  ;;  %v2667_v28 = vrot.slane %v2666_v43, 1 }
 0xf63   :  { %v2652_v8 = vadd.f32 %v2651_v6, %v2638_v48  ;;  %v2699_v48 = vpack.c.bf16 %v2662_v63, %v2662_v63 }
 0xf64   :  { %v2670_v11 = vadd.f32 %v2669_v19, %v2641_v37  ;;  %v2668_v39 = vadd.f32 %v2667_v28, %v2666_v43 }
 0xf65   :  { %v2653_v58 = vrot.slane %v2652_v8, 2  ;;  %v2715_v59 = vunpack.c.l.b16 %v2699_v48  ;;  %v9130_v48 = vld [vmem:[#allocation19_spill] sm:$0xff] }
 0xf66   :  { %v2671_v32 = vrot.slane %v2670_v11, 2  ;;  %v2625_v60 = vpop.permute.xlu0 %2624  ;;  %v2700_v47 = vpack.c.bf16 %v2668_v39, %v2668_v39  ;;  %v9125_v39 = vld [vmem:[#allocation47_spill] sm:$0xff] }
 0xf67   :  { %v2654_v2 = vadd.f32 %v2653_v58, %v2652_v8  ;;  %v2642_v36 = vmul.f32 %v7630_v50, %v2625_v60  ;;  %v2630_v46 = vpop.permute.xlu2 %2629 }
 0xf68   :  { %v2643_v5 = vmul.f32 %v7327_v3, %v2630_v46  ;;  %v2672_v30 = vadd.f32 %v2671_v32, %v2670_v11  ;;  %v7637_v3 = vld [vmem:[%s8756_s1 + $0x38] sm:$0xff] }
 0xf69   :  { %v2655_v44 = vrot.slane %v2654_v2, 1  ;;  %v2675_v57 = vrot.slane %v2642_v36, 4 }
 0xf6a   :  { %v2681_v10 = vrot.slane %v2643_v5, 4  ;;  %v2673_v45 = vrot.slane %v2672_v30, 1 }
 0xf6b   :  { %v2656_v26 = vadd.f32 %v2655_v44, %v2654_v2  ;;  %v2676_v34 = vadd.f32 %v2675_v57, %v2642_v36  ;;  %v2716_v36 = vunpack.c.l.b16 %v2700_v47  ;;  %v9137_v47 = vld [vmem:[#allocation30_spill] sm:$0xff] }
 0xf6c   :  { %v2682_v25 = vadd.f32 %v2681_v10, %v2643_v5  ;;  %v2674_v6 = vadd.f32 %v2673_v45, %v2672_v30  ;;  %v9122_v45 = vld [vmem:[#allocation44_spill] sm:$0xff] }
 0xf6d   :  { %v2698_v23 = vpack.c.bf16 %v2656_v26, %v2656_v26  ;;  %v2677_v52 = vrot.slane %v2676_v34, 2 }
 0xf6e   :  { %v2683_v17 = vrot.slane %v2682_v25, 2  ;;  %v2635_v29 = vpop.permute.xlu0 %2634  ;;  %v2701_v2 = vpack.c.bf16 %v2674_v6, %v2674_v6  ;;  %v9135_v6 = vld [vmem:[#allocation28_spill] sm:$0xff] }
 0xf6f   :  { %v2714_v22 = vunpack.c.l.b16 %v2698_v23  ;;  %v2678_v14 = vadd.f32 %v2677_v52, %v2676_v34  ;;  %v2644_v9 = vmul.f32 %v7637_v3, %v2635_v29  ;;  %v9121_v52 = vld [vmem:[#allocation46_spill] sm:$0xff]  ;;  %v9124_v29 = vld [vmem:[#allocation49_spill] sm:$0xff] }
 0xf70   :  { %v2684_v55 = vadd.f32 %v2683_v17, %v2682_v25  ;;  %v2717_v57 = vunpack.c.l.b16 %v2701_v2  ;;  %v9123_v17 = vld [vmem:[#allocation36_spill] sm:$0xff] }
 0xf71   :  { %v2679_v37 = vrot.slane %v2678_v14, 1  ;;  %v2687_v21 = vrot.slane %v2644_v9, 4  ;;  %v2721_v8 = vsel %vm290_vm0, %v2714_v22, %v2713_v62  ;;  %v9127_v22 = vld [vmem:[#allocation51_spill] sm:$0xff]  ;;  %v9132_v62 = vld [vmem:[#allocation20_spill] sm:$0xff] }
 0xf72   :  { %v2685_v19 = vrot.slane %v2684_v55, 1  ;;  %v2722_v43 = vsel %vm9115_vm1, %v2715_v59, %v2721_v8  ;;  %v9138_v8 = vld [vmem:[#allocation25_spill] sm:$0xff]  ;;  %v9141_v59 = vld [vmem:[#allocation32_spill] sm:$0xff]  ;;  %vm9169_vm1 = vmmov %vm9116_vm11 }
 0xf73   :  { %v2680_v49 = vadd.f32 %v2679_v37, %v2678_v14  ;;  %v2688_v11 = vadd.f32 %v2687_v21, %v2644_v9  ;;  %v2723_v5 = vsel %vm9116_vm11, %v2716_v36, %v2722_v43  ;;  %v9128_v14 = vld [vmem:[#allocation18_spill] sm:$0xff]  ;;  %v9134_v21 = vld [vmem:[#allocation21_spill] sm:$0xff]  ;;  %vm9170_vm11 = vmmov %vm9117_vm4 }
 0xf74   :  { %v2686_v58 = vadd.f32 %v2685_v19, %v2684_v55  ;;  %v2724_v10 = vsel %vm9117_vm4, %v2717_v57, %v2723_v5  ;;  %v9129_v9 = vld [vmem:[#allocation22_spill] sm:$0xff]  ;;  %v9131_v55 = vld [vmem:[#allocation24_spill] sm:$0xff]  ;;  %v9136_v19 = vld [vmem:[#allocation23_spill] sm:$0xff] }
 0xf75   :  { %v2702_v32 = vpack.c.bf16 %v2680_v49, %v2680_v49  ;;  %v2689_v60 = vrot.slane %v2688_v11, 2  ;;  %v9133_v37 = vld [vmem:[#allocation26_spill] sm:$0xff]  ;;  %v9139_v49 = vld [vmem:[#allocation31_spill] sm:$0xff]  ;;  %vm9171_vm4 = vmmov %vm9118_vm12 }
 0xf76   :  { %v2703_v4 = vpack.c.bf16 %v2686_v58, %v2686_v58  ;;  %v9142_v58 = vld [vmem:[#allocation29_spill] sm:$0xff] }
 0xf77   :  { %v2690_v46 = vadd.f32 %v2689_v60, %v2688_v11  ;;  %v2718_v42 = vunpack.c.l.b16 %v2702_v32  ;;  %v9140_v11 = vld [vmem:[#allocation27_spill] sm:$0xff]  ;;  %v9143_v32 = vld [vmem:[#allocation33_spill] sm:$0xff] }
 0xf78   :  { %v2719_v28 = vunpack.c.l.b16 %v2703_v4  ;;  %v5291_v43 = vld [vmem:[%s8755_s0 + $0x48] sm:$0xff]  ;;  %v9145_v4 = vld [vmem:[#allocation39_spill] sm:$0xff] }
 0xf79   :  { %v2691_v44 = vrot.slane %v2690_v46, 1  ;;  %v2725_v26 = vsel %vm9118_vm12, %v2718_v42, %v2724_v10  ;;  %vm9172_vm12 = vmmov %vm9119_vm2 }
 0xf7a   :  { %v2726_v25 = vsel %vm9119_vm2, %v2719_v28, %v2725_v26  ;;  %vm9173_vm2 = vmmov %vm9120_vm13 }
 0xf7b   :  { %v2692_v30 = vadd.f32 %v2691_v44, %v2690_v46  ;;  %v9144_v46 = vld [vmem:[#allocation54_spill] sm:$0xff] }
 0xf7c   :  { %v2783_v5 = vadd.f32 %v9145_v4, %v9144_v46 }
 0xf7d   :  { %v2704_v34 = vpack.c.bf16 %v2692_v30, %v2692_v30 }
 0xf7f   :  { %v2720_v63 = vunpack.c.l.b16 %v2704_v34 }
 0xf81   :  { %v2727_v61 = vsel %vm9120_vm13, %v2720_v63, %v2726_v25  ;;  %v5292_v63 = vld [vmem:[%s8755_s0 + $0x50] sm:$0xff]  ;;  %vm9174_vm13 = vcmask 64512  }
 0xf82   :  { %v2728_v23 = vpack.c.b16 %v2727_v61, %v2727_v61 }
 0xf84   :  { %2738 = vmatmul.bf16.vlgmr.msrb.gmra.mxu2 %v2728_v23  ;;  %2751 = vmatmul.bf16.vlgmr.msrb.gmra.mxu3 %v2728_v23 }
 0xf85   :  { %2764 = vmatmul.bf16.vlgmr.msra.gmra.mxu0 %v2728_v23  ;;  %3372 = vmatpush.bf16.msrb.mxu3 %v6433_v20 }
 0xf86   :  { %3355 = vmatpush.bf16.msrb.mxu2 %v6367_v33  ;;  %3385 = vmatpush.bf16.msra.mxu0 %v6475_v54 }
 0xf89   :  { %3373 = vmatpush.bf16.msrb.mxu3 %v6457_v12 }
 0xf8a   :  { %3356 = vmatpush.bf16.msrb.mxu2 %v6385_v40  ;;  %3386 = vmatpush.bf16.msra.mxu0 %v6503_v18 }
 0xf8d   :  { %3374 = vmatpush.bf16.msrb.mxu3 %v6488_v35 }
 0xf8e   :  { %3357 = vmatpush.bf16.msrb.mxu2 %v6406_v31  ;;  %3387 = vmatpush.bf16.msra.mxu0 %v6538_v56 }
 0xf91   :  { %3375 = vmatpush.bf16.msrb.mxu3 %v6519_v38 }
 0xf92   :  { %3358 = vmatpush.bf16.msrb.mxu2 %v6431_v0  ;;  %3388 = vmatpush.bf16.msra.mxu0 %v6568_v13 }
 0xf94   :  { %2794 = vmatmul.bf16.vlgmr.msra.gmra.mxu2 %v7397_v16  ;;  %2807 = vmatmul.bf16.vlgmr.msra.gmra.mxu3 %v7397_v16  ;;  %v9126_v16 = vld [vmem:[#allocation38_spill] sm:$0xff] }
 0xf95   :  { %3376 = vmatpush.bf16.msrb.mxu3 %v8970_v7 }
 0xf96   :  { %3359 = vmatpush.bf16.msrb.mxu2 %v8971_v41  ;;  %3389 = vmatpush.bf16.msra.mxu0 %v8972_v15 }
 0xf99   :  { %3377 = vmatpush.bf16.msrb.mxu3 %v8973_v51 }
 0xf9a   :  { %3360 = vmatpush.bf16.msrb.mxu2 %v8974_v1  ;;  %3390 = vmatpush.bf16.msra.mxu0 %v9121_v52 }
 0xf9d   :  { %3378 = vmatpush.bf16.msrb.mxu3 %v9122_v45 }
 0xf9e   :  { %3361 = vmatpush.bf16.msrb.mxu2 %v9123_v17  ;;  %3391 = vmatpush.bf16.msra.mxu0 %v9124_v29 }
 0xfa1   :  { %3379 = vmatpush.bf16.msrb.mxu3 %v9125_v39 }
 0xfa2   :  { %3362 = vmatpush.bf16.msrb.mxu2 %v9126_v16  ;;  %3392 = vmatpush.bf16.msra.mxu0 %v9127_v22 }
 0xfa5   :  { %3941 = vmatpush.bf16.msra.mxu3 %v9129_v9 }
 0xfa6   :  { %3928 = vmatpush.bf16.msra.mxu2 %v9128_v14 }
 0xfa9   :  { %3942 = vmatpush.bf16.msra.mxu3 %v9131_v55 }
 0xfaa   :  { %3929 = vmatpush.bf16.msra.mxu2 %v9130_v48 }
 0xfad   :  { %3943 = vmatpush.bf16.msra.mxu3 %v9133_v37 }
 0xfae   :  { %3930 = vmatpush.bf16.msra.mxu2 %v9132_v62 }
 0xfb1   :  { %3944 = vmatpush.bf16.msra.mxu3 %v9135_v6 }
 0xfb2   :  { %3931 = vmatpush.bf16.msra.mxu2 %v9134_v21 }
 0xfb5   :  { %3945 = vmatpush.bf16.msra.mxu3 %v9137_v47 }
 0xfb6   :  { %3932 = vmatpush.bf16.msra.mxu2 %v9136_v19 }
 0xfb9   :  { %3946 = vmatpush.bf16.msra.mxu3 %v9139_v49 }
 0xfba   :  { %3933 = vmatpush.bf16.msra.mxu2 %v9138_v8 }
 0xfbd   :  { %3947 = vmatpush.bf16.msra.mxu3 %v9141_v59 }
 0xfbe   :  { %3934 = vmatpush.bf16.msra.mxu2 %v9140_v11  ;;  %v9167_v11 = vld [vmem:[#allocation17_spill] sm:$0xff] }
 0xfc1   :  { %3948 = vmatpush.bf16.msra.mxu3 %v9143_v32  ;;  %v9146_v32 = vld [vmem:[#allocation55_spill] sm:$0xff] }
 0xfc2   :  { %3935 = vmatpush.bf16.msra.mxu2 %v9142_v58 }
0x1002   :  { %v2765_v60 = vpop.f32.mrf.mxu0 }
0x1007   :  { %v2739_v2 = vpop.f32.mrf.mxu2  ;;  %v2752_v36 = vpop.f32.mrf.mxu3 }
0x1008   :  { %v2769_v42 = vadd.f32 %v5291_v43, %v2739_v2  ;;  %v2770_v23 = vadd.f32 %v5292_v63, %v2752_v36 }
0x100a   :  { %v2812_v44 = vadd.f32 %v2783_v5, %v2769_v42  ;;  %v2767_v57 = vpop.f32.mrf.mxu0 }
0x100c   :  { %v5294_v30 = vmul.f32 -1.442695, %v2812_v44 }
0x100e   :  { %5618 = vpow2.f32 %v5294_v30 }
0x100f   :  { %v2741_v10 = vpop.f32.mrf.mxu2  ;;  %v2754_v28 = vpop.f32.mrf.mxu3 }
0x1014   :  { %v5619_v26 = vpop.eup %5618 }
0x1015   :  { %v2816_v34 = vadd.f32 1.0, %v5619_v26 }
0x1017   :  { %5620 = vrcp.f32 %v2816_v34  ;;  %v2795_v25 = vpop.f32.mrf.mxu2  ;;  %v2808_v61 = vpop.f32.mrf.mxu3  ;;  %v2828_v10 = vand.u32 2147483648, %v2816_v34  ;;  %v2826_v28 = vand.u32 2147483647, %v2816_v34  ;;  %vm2822_vm15 = vweird.f32 %v2816_v34 }
0x1018   :  { %v2796_v58 = vadd.f32 %v2795_v25, %v9146_v32  ;;  %v9147_v25 = vld [vmem:[#allocation56_spill] sm:$0xff] }
0x1019   :  { %v2829_v63 = vor.u32 1.1754944e-38, %v2828_v10  ;;  %vm2827_vm9 = vcmp.eq.f32.partialorder %v2826_v28, 8.507059e+37 }
0x101a   :  { %v2832_v4 = vadd.f32 %v2796_v58, %v2770_v23  ;;  %v2809_v23 = vadd.f32 %v2808_v61, %v9147_v25 }
0x101c   :  { %v5295_v43 = vmul.f32 -1.442695, %v2832_v4  ;;  %v5293_v4 = vld [vmem:[%s8755_s0 + $0x58] sm:$0xff] }
0x101d   :  { %v5621_v2 = vpop.eup %5620 }
0x101e   :  { %5622 = vpow2.f32 %v5295_v43  ;;  %v2818_v5 = vmul.f32 %v5621_v2, %v2816_v34  ;;  %vm2823_vm14 = vweird.f32 %v5621_v2 }
0x101f   :  { %v2797_v42 = vpop.f32.mrf.mxu2  ;;  %v2810_v44 = vpop.f32.mrf.mxu3  ;;  %vm2824_vm8 = vmor %vm2822_vm15, %vm2823_vm14 }
0x1020   :  { %v2819_v57 = vsub.f32 1.0, %v2818_v5  ;;  %v2771_v42 = vadd.f32 %v5293_v4, %v2765_v60  ;;  %vm9175_vm14 = vmmov %vm9168_vm5 }
0x1021   :  { %vm9176_vm15 = vmmov %vm9169_vm1 }
0x1022   :  { %v2820_v30 = vmul.f32 %v5621_v2, %v2819_v57 }
0x1024   :  { %v5623_v26 = vpop.eup %5622  ;;  %v2821_v46 = vadd.f32 %v5621_v2, %v2820_v30 }
0x1025   :  { %v2836_v59 = vadd.f32 1.0, %v5623_v26 }
0x1026   :  { %v2825_v36 = vsel %vm2824_vm8, %v5621_v2, %v2821_v46  ;;  %vm9177_vm8 = vmmov %vm9170_vm11 }
0x1027   :  { %5624 = vrcp.f32 %v2836_v59  ;;  %v2830_v58 = vsel %vm2827_vm9, %v2829_v63, %v2825_v36  ;;  %v2848_v34 = vand.u32 2147483648, %v2836_v59  ;;  %v2846_v46 = vand.u32 2147483647, %v2836_v59  ;;  %vm9178_vm9 = vmmov %vm9171_vm4 }
0x1028   :  { %v2852_v43 = vmul.f32 %v2830_v58, %v2809_v23  ;;  %vm2842_vm10 = vweird.f32 %v2836_v59  ;;  %v9148_v23 = vld [vmem:[#allocation59_spill] sm:$0xff] }
0x1029   :  { %v2849_v10 = vor.u32 1.1754944e-38, %v2848_v34  ;;  %vm2847_vm3 = vcmp.eq.f32.partialorder %v2846_v46, 8.507059e+37  ;;  %v9150_v46 = vld [vmem:[#allocation37_spill] sm:$0xff] }
0x102a   :  { %v2853_v57 = vadd.f32 %v2852_v43, %v2771_v42 }
0x102c   :  { %5626 = vtanh.f32 %v2853_v57 }
0x102d   :  { %v5625_v5 = vpop.eup %5624 }
0x102e   :  { %v2838_v44 = vmul.f32 %v5625_v5, %v2836_v59  ;;  %vm2843_vm6 = vweird.f32 %v5625_v5 }
0x102f   :  { %vm2844_vm7 = vmor %vm2842_vm10, %vm2843_vm6 }
0x1030   :  { %v2839_v30 = vsub.f32 1.0, %v2838_v44  ;;  %vm9179_vm6 = vmmov %vm9172_vm12 }
0x1031   :  { %vm9180_vm10 = vmmov %vm9173_vm2 }
0x1032   :  { %v2840_v26 = vmul.f32 %v5625_v5, %v2839_v30  ;;  %v5627_v63 = vpop.eup %5626 }
0x1034   :  { %v2841_v2 = vadd.f32 %v5625_v5, %v2840_v26 }
0x1036   :  { %v2845_v61 = vsel %vm2844_vm7, %v5625_v5, %v2841_v2  ;;  %v7716_v5 = vld [vmem:[%s8756_s1] sm:$0xff]  ;;  %vm9181_vm7 = vmmov %vm9174_vm13 }
0x1037   :  { %v2850_v28 = vsel %vm2847_vm3, %v2849_v10, %v2845_v61 }
0x1038   :  { %v2855_v36 = vsub.f32 1.0, %v2850_v28  ;;  %v2857_v60 = vmul.f32 %v2850_v28, %v9148_v23  ;;  %v9151_v28 = vld [vmem:[#allocation40_spill] sm:$0xff]  ;;  %v9158_v23 = vld [vmem:[#allocation14_spill] sm:$0xff] }
0x103a   :  { %v2856_v58 = vmul.f32 %v5627_v63, %v2855_v36 }
0x103c   :  { %v7703_v4 = vadd.f32 %v2857_v60, %v2856_v58  ;;  %v9152_v58 = vld [vmem:[#allocation42_spill] sm:$0xff] }
0x103e   :  { %9149 = vst [vmem:[#allocation39_spill] sm:$0xff] %v7703_v4  ;;  %v7707_v43 = vpack.c.bf16 %v7703_v4, %v7703_v4  ;;  %v2868_v42 = vperm.slane %v7703_v4, 0  ;;  %v2862_v59 = vrot.slane %v7703_v4, 2  ;;  %v2861_v44 = vrot.slane %v7703_v4, 1 }
0x103f   :  { %v2863_v26 = vrot.slane %v7703_v4, 3  ;;  %v2864_v63 = vrot.slane %v7703_v4, 4 }
0x1040   :  { %3380 = vmatmul.bf16.vlgmr.msrb.gmra.mxu3 %v7707_v43  ;;  %v2884_v57 = vmul.f32 %v7716_v5, %v2868_v42  ;;  %v2870_v30 = vperm.slane %v2862_v59, 0  ;;  %v2869_v34 = vperm.slane %v2861_v44, 0  ;;  %v9153_v42 = vld [vmem:[#allocation45_spill] sm:$0xff]  ;;  %v2865_v44 = vrot.slane %v7703_v4, 5 }
0x1041   :  { %3997 = vmatpush.bf16.msrb.mxu3 %v9150_v46  ;;  %v2871_v61 = vperm.slane %v2863_v26, 0  ;;  %v2872_v60 = vperm.slane %v2864_v63, 0  ;;  %v7744_v63 = vld [vmem:[%s8756_s1 + $0x30] sm:$0xff] }
0x1042   :  { %2892 = vadd.xlane.f32.xlu1 %v2884_v57  ;;  %v2886_v2 = vmul.f32 %v7611_v24, %v2870_v30  ;;  %v2885_v10 = vmul.f32 %v7623_v27, %v2869_v34  ;;  %v7731_v24 = vld [vmem:[%s8756_s1 + $0x20] sm:$0xff]  ;;  %v2873_v30 = vperm.slane %v2865_v44, 0  ;;  %v9155_v34 = vld [vmem:[#allocation50_spill] sm:$0xff] }
0x1043   :  { %v2887_v36 = vmul.f32 %v7617_v53, %v2871_v61  ;;  %v2888_v59 = vmul.f32 %v7731_v24, %v2872_v60  ;;  %v9154_v57 = vld [vmem:[#allocation48_spill] sm:$0xff] }
0x1044   :  { %2896 = vadd.xlane.f32.xlu0 %v2886_v2  ;;  %2894 = vadd.xlane.f32.xlu2 %v2885_v10  ;;  %v2889_v26 = vmul.f32 %v7630_v50, %v2873_v30  ;;  %v2866_v2 = vrot.slane %v7703_v4, 6  ;;  %v9156_v10 = vld [vmem:[#allocation52_spill] sm:$0xff] }
0x1045   :  { %3998 = vmatpush.bf16.msrb.mxu3 %v9151_v28 }
0x1046   :  { %v2874_v61 = vperm.slane %v2866_v2, 0 }
0x1048   :  { %v2890_v60 = vmul.f32 %v7744_v63, %v2874_v61 }
0x1049   :  { %3999 = vmatpush.bf16.msrb.mxu3 %v9152_v58  ;;  %v9161_v58 = vld [vmem:[#allocation10_spill] sm:$0xff] }
0x104a   :  { %2898 = vadd.xlane.f32.xlu1 %v2887_v36  ;;  %v9157_v36 = vld [vmem:[#allocation53_spill] sm:$0xff] }
0x104d   :  { %4000 = vmatpush.bf16.msrb.mxu3 %v9153_v42 }
0x1051   :  { %4001 = vmatpush.bf16.msrb.mxu3 %v9154_v57  ;;  %v9160_v57 = vld [vmem:[#allocation9_spill] sm:$0xff] }
0x1052   :  { %2900 = vadd.xlane.f32.xlu1 %v2888_v59  ;;  %v2867_v59 = vrot.slane %v7703_v4, 7  ;;  %v9166_v4 = vld [vmem:[#allocation16_spill] sm:$0xff] }
0x1054   :  { %v2875_v44 = vperm.slane %v2867_v59, 0  ;;  %v9163_v59 = vld [vmem:[#allocation11_spill] sm:$0xff] }
0x1055   :  { %4002 = vmatpush.bf16.msrb.mxu3 %v9155_v34 }
0x1056   :  { %v2891_v50 = vmul.f32 %v7637_v3, %v2875_v44 }
0x1059   :  { %4003 = vmatpush.bf16.msrb.mxu3 %v9156_v10 }
0x105a   :  { %2902 = vadd.xlane.f32.xlu1 %v2889_v26 }
0x105d   :  { %4004 = vmatpush.bf16.msrb.mxu3 %v9157_v36  ;;  %v9159_v36 = vld [vmem:[#allocation15_spill] sm:$0xff] }
0x1062   :  { %2904 = vadd.xlane.f32.xlu1 %v2890_v60 }
0x106a   :  { %2906 = vadd.xlane.f32.xlu1 %v2891_v50 }
0x10b5   :  { %v2893_v30 = vpop.xlane.xlu1 %2892 }
0x10b6   :  { %v2908_v26 = vadd.f32 %v2893_v30, %v9158_v23  ;;  %v9164_v23 = vld [vmem:[#allocation12_spill] sm:$0xff] }
0x10b7   :  { %v2897_v2 = vpop.xlane.xlu0 %2896  ;;  %v2895_v10 = vpop.xlane.xlu2 %2894 }
0x10b8   :  { %v2910_v34 = vadd.f32 %v2897_v2, %v9159_v36  ;;  %v2909_v42 = vadd.f32 %v2895_v10, %v9160_v57  ;;  %2925 = vperm.xlu2 %5457, %v2908_v26   ;;  %v9165_v10 = vld [vmem:[#allocation13_spill] sm:$0xff] }
0x10ba   :  { %2931 = vperm.xlu1 %5459, %v2910_v34   ;;  %2928 = vperm.xlu0 %5458, %v2909_v42  }
0x10bd   :  { %v2899_v61 = vpop.xlane.xlu1 %2898 }
0x10be   :  { %v2911_v28 = vadd.f32 %v2899_v61, %v9161_v58 }
0x10c2   :  { %2934 = vperm.xlu0 %5458, %v2911_v28  }
0x10c3   :  { %v7753_v60 = vpop.f32.mrf.mxu3 }
0x10c4   :  { %9162 = vst [vmem:[#allocation60_spill] sm:$0xff] %v7753_v60 }
0x10c5   :  { %v2901_v3 = vpop.xlane.xlu1 %2900 }
0x10c6   :  { %v2912_v44 = vadd.f32 %v2901_v3, %v9163_v59 }
0x10c8   :  { %2937 = vperm.xlu2 %5457, %v2912_v44  }
0x10cb   :  { %v3383_v50 = vpop.f32.mrf.mxu3 }
0x10cd   :  { %v2903_v30 = vpop.xlane.xlu1 %2902 }
0x10ce   :  { %v2913_v46 = vadd.f32 %v2903_v30, %v9164_v23 }
0x10d0   :  { %2940 = vperm.xlu0 %5458, %v2913_v46  }
0x10d5   :  { %v2905_v2 = vpop.xlane.xlu1 %2904 }
0x10d6   :  { %v2914_v57 = vadd.f32 %v2905_v2, %v9165_v10 }
0x10d8   :  { %2943 = vperm.xlu1 %5459, %v2914_v57  }
0x10dd   :  { %v2907_v36 = vpop.xlane.xlu1 %2906 }
0x10de   :  { %v2915_v25 = vadd.f32 %v2907_v36, %v9166_v4 }
0x10e0   :  { %2946 = vperm.xlu2 %5457, %v2915_v25  }
0x1112   :  { %v2926_v58 = vpop.permute.xlu2 %2925 }
0x1113   :  { %v2948_v50 = vperm.slane %v2926_v58, %v9167_v11 }
0x1122   :  { %v2938_v59 = vpop.permute.xlu2 %2937 }
0x1123   :  { %v2952_v8 = vperm.slane %v2938_v59, %v9167_v11 }
0x112c   :  { %v2929_v61 = vpop.permute.xlu0 %2928  ;;  %v2932_v60 = vpop.permute.xlu1 %2931 }
0x112d   :  { %v2949_v3 = vperm.slane %v2929_v61, %v9167_v11  ;;  %v2950_v30 = vperm.slane %v2932_v60, %v9167_v11 }
0x112f   :  { %v2956_v23 = vsel %vm290_vm0, %v2949_v3, %v2948_v50 }
0x1130   :  { %v2957_v49 = vsel %vm9168_vm5, %v2950_v30, %v2956_v23 }
0x1134   :  { %v2935_v32 = vpop.permute.xlu0 %2934 }
0x1135   :  { %v2951_v2 = vperm.slane %v2935_v32, %v9167_v11 }
0x1137   :  { %v2958_v36 = vsel %vm9169_vm1, %v2951_v2, %v2957_v49 }
0x1138   :  { %v2959_v19 = vsel %vm9170_vm11, %v2952_v8, %v2958_v36 }
0x113a   :  { %v2947_v47 = vpop.permute.xlu2 %2946 }
0x113b   :  { %v2955_v60 = vperm.slane %v2947_v47, %v9167_v11 }
0x1142   :  { %v2941_v10 = vpop.permute.xlu0 %2940 }
0x1143   :  { %v2953_v4 = vperm.slane %v2941_v10, %v9167_v11 }
0x1145   :  { %v2960_v3 = vsel %vm9171_vm4, %v2953_v4, %v2959_v19 }
0x114a   :  { %v2944_v61 = vpop.permute.xlu1 %2943 }
0x114b   :  { %v2954_v58 = vperm.slane %v2944_v61, %v9167_v11 }
0x114d   :  { %v2961_v32 = vsel %vm9172_vm12, %v2954_v58, %v2960_v3 }
0x114e   :  { %v2962_v23 = vsel %vm9173_vm2, %v2955_v60, %v2961_v32 }
0x114f   :  { %v2964_v49 = vsel %vm9174_vm13, %v2962_v23, -inf }
0x1150   :  { %2965 = vmax.xlane.f32.xlu0 %v2964_v49 }
0x11c3   :  { %v2966_v10 = vpop.xlane.xlu0 %2965 }
0x11c4   :  { %v2968_v50 = vperm.slane %v2966_v10, 0  ;;  %v2969_v59 = vperm.slane %v2966_v10, 1  ;;  %v2970_v30 = vperm.slane %v2966_v10, 2  ;;  %v2971_v8 = vperm.slane %v2966_v10, 3 }
0x11c5   :  { %v2972_v19 = vperm.slane %v2966_v10, 4  ;;  %v2973_v58 = vperm.slane %v2966_v10, 5 }
0x11c6   :  { %v2984_v2 = vsub.f32 %v2908_v26, %v2968_v50  ;;  %v2985_v6 = vsub.f32 %v2909_v42, %v2969_v59  ;;  %v2986_v21 = vsub.f32 %v2910_v34, %v2970_v30  ;;  %v2987_v47 = vsub.f32 %v2911_v28, %v2971_v8 }
0x11c7   :  { %v2988_v23 = vsub.f32 %v2912_v44, %v2972_v19  ;;  %v2989_v42 = vsub.f32 %v2913_v46, %v2973_v58  ;;  %v2975_v28 = vperm.slane %v2966_v10, 7 }
0x11c8   :  { %v2992_v36 = vmul.f32 1.442695, %v2984_v2  ;;  %v2994_v61 = vmul.f32 1.442695, %v2985_v6  ;;  %v2996_v4 = vmul.f32 1.442695, %v2986_v21 }
0x11c9   :  { %v2998_v60 = vmul.f32 1.442695, %v2987_v47  ;;  %v2974_v6 = vperm.slane %v2966_v10, 6  ;;  %v3000_v34 = vmul.f32 1.442695, %v2988_v23  ;;  %v2991_v44 = vsub.f32 %v2915_v25, %v2975_v28 }
0x11ca   :  { %5628 = vpow2.f32 %v2992_v36  ;;  %v3002_v26 = vmul.f32 1.442695, %v2989_v42 }
0x11cb   :  { %5630 = vpow2.f32 %v2994_v61  ;;  %v2990_v50 = vsub.f32 %v2914_v57, %v2974_v6  ;;  %v3006_v30 = vmul.f32 1.442695, %v2991_v44 }
0x11cc   :  { %5632 = vpow2.f32 %v2996_v4 }
0x11cd   :  { %5634 = vpow2.f32 %v2998_v60  ;;  %v3004_v59 = vmul.f32 1.442695, %v2990_v50 }
0x11ce   :  { %5636 = vpow2.f32 %v3000_v34 }
0x11cf   :  { %5638 = vpow2.f32 %v3002_v26 }
0x11d0   :  { %v7775_v3 = vpop.eup %5628  ;;  %5640 = vpow2.f32 %v3004_v59 }
0x11d1   :  { %v7777_v32 = vpop.eup %5630  ;;  %3017 = vperm.xlu1 %5459, %v7775_v3   ;;  %5642 = vpow2.f32 %v3006_v30 }
0x11d2   :  { %3020 = vperm.xlu2 %5457, %v7777_v32   ;;  %v7781_v49 = vpop.eup %5632 }
0x11d3   :  { %v7783_v21 = vpop.eup %5634 }
0x11d4   :  { %v7787_v46 = vpop.eup %5636 }
0x11d5   :  { %v7789_v2 = vpop.eup %5638 }
0x11d6   :  { %v7793_v10 = vpop.eup %5640 }
0x11d7   :  { %v7795_v57 = vpop.eup %5642 }
0x11d9   :  { %3023 = vperm.xlu1 %5459, %v7781_v49  }
0x11da   :  { %3026 = vperm.xlu2 %5457, %v7783_v21  }
0x11e1   :  { %3029 = vperm.xlu1 %5459, %v7787_v46  }
0x11e2   :  { %3032 = vperm.xlu2 %5457, %v7789_v2  }
0x11e9   :  { %3035 = vperm.xlu1 %5459, %v7793_v10  }
0x11ea   :  { %3038 = vperm.xlu2 %5457, %v7795_v57  }
0x122c   :  { %v3021_v25 = vpop.permute.xlu2 %3020 }
0x122d   :  { %v3041_v58 = vperm.slane %v3021_v25, %v9167_v11 }
0x1234   :  { %v3027_v36 = vpop.permute.xlu2 %3026 }
0x1235   :  { %v3043_v34 = vperm.slane %v3027_v36, %v9167_v11 }
0x123c   :  { %v3033_v47 = vpop.permute.xlu2 %3032 }
0x123d   :  { %v3045_v44 = vperm.slane %v3033_v47, %v9167_v11 }
0x1243   :  { %v3018_v8 = vpop.permute.xlu1 %3017 }
0x1244   :  { %v3040_v19 = vperm.slane %v3018_v8, %v9167_v11  ;;  %v3039_v26 = vpop.permute.xlu2 %3038 }
0x1245   :  { %v3047_v25 = vperm.slane %v3039_v26, %v9167_v11 }
0x1246   :  { %v3048_v23 = vsel %vm290_vm0, %v3041_v58, %v3040_v19 }
0x124b   :  { %v3024_v61 = vpop.permute.xlu1 %3023 }
0x124c   :  { %v3042_v4 = vperm.slane %v3024_v61, %v9167_v11 }
0x124e   :  { %v3049_v42 = vsel %vm9175_vm14, %v3042_v4, %v3048_v23 }
0x124f   :  { %v3050_v28 = vsel %vm9176_vm15, %v3043_v34, %v3049_v42 }
0x1253   :  { %v3030_v60 = vpop.permute.xlu1 %3029 }
0x1254   :  { %v3044_v6 = vperm.slane %v3030_v60, %v9167_v11 }
0x1256   :  { %v3051_v50 = vsel %vm9177_vm8, %v3044_v6, %v3050_v28 }
0x1257   :  { %v3052_v8 = vsel %vm9178_vm9, %v3045_v44, %v3051_v50 }
0x125b   :  { %v3036_v59 = vpop.permute.xlu1 %3035 }
0x125c   :  { %v3046_v30 = vperm.slane %v3036_v59, %v9167_v11 }
0x125e   :  { %v3053_v61 = vsel %vm9179_vm6, %v3046_v30, %v3052_v8 }
0x125f   :  { %v3054_v19 = vsel %vm9180_vm10, %v3047_v25, %v3053_v61 }
0x1260   :  { %v3056_v36 = vsel %vm9181_vm7, %v3054_v19, 0.0 }
0x1261   :  { %3057 = vadd.xlane.f32.xlu1 %v3056_v36 }
0x12d4   :  { %v3058_v4 = vpop.xlane.xlu1 %3057 }
0x12d5   :  { %v3060_v58 = vperm.slane %v3058_v4, 0  ;;  %v7815_v60 = vperm.slane %v3058_v4, 1  ;;  %v3062_v23 = vperm.slane %v3058_v4, 2  ;;  %v7817_v47 = vperm.slane %v3058_v4, 3 }
0x12d6   :  { %v7819_v42 = vperm.slane %v3058_v4, 5  ;;  %v7822_v6 = vperm.slane %v3058_v4, 7  ;;  %v7826_v28 = vperm.slane %v3058_v4, 4  ;;  %v7831_v25 = vperm.slane %v3058_v4, 6 }
0x12d7   :  { %5644 = vrcp.f32 %v3060_v58  ;;  %v3115_v26 = vand.u32 2147483647, %v3062_v23  ;;  %v3117_v50 = vand.u32 2147483648, %v3062_v23  ;;  %v3085_v8 = vand.u32 2147483647, %v3060_v58 }
0x12d8   :  { %5646 = vrcp.f32 %v7815_v60  ;;  %v3087_v61 = vand.u32 2147483648, %v3060_v58  ;;  %vm3111_vm3 = vweird.f32 %v3062_v23  ;;  %vm3081_vm5 = vweird.f32 %v3060_v58 }
0x12d9   :  { %5648 = vrcp.f32 %v3062_v23  ;;  %vm7838_vm1 = vcmp.eq.f32.partialorder %v3115_v26, 8.507059e+37  ;;  %v3118_v55 = vor.u32 1.1754944e-38, %v3117_v50  ;;  %vm3156_vm4 = vweird.f32 %v7819_v42 }
0x12da   :  { %5650 = vrcp.f32 %v7817_v47  ;;  %vm7845_vm12 = vcmp.eq.f32.partialorder %v3085_v8, 8.507059e+37  ;;  %v3088_v16 = vor.u32 1.1754944e-38, %v3087_v61  ;;  %vm3096_vm14 = vweird.f32 %v7815_v60 }
0x12db   :  { %5652 = vrcp.f32 %v7819_v42  ;;  %v3102_v52 = vand.u32 2147483648, %v7815_v60 }
0x12dc   :  { %5654 = vrcp.f32 %v7822_v6 }
0x12dd   :  { %v5645_v34 = vpop.eup %5644  ;;  %5656 = vrcp.f32 %v7826_v28 }
0x12de   :  { %v7828_v44 = vpop.eup %5646  ;;  %v3077_v59 = vmul.f32 %v5645_v34, %v3060_v58  ;;  %vm3082_vm11 = vweird.f32 %v5645_v34  ;;  %5658 = vrcp.f32 %v7831_v25 }
0x12df   :  { %v5649_v30 = vpop.eup %5648  ;;  %v3092_v19 = vmul.f32 %v7828_v44, %v7815_v60  ;;  %vm3083_vm13 = vmor %vm3081_vm5, %vm3082_vm11  ;;  %vm3097_vm15 = vweird.f32 %v7828_v44 }
0x12e0   :  { %v7835_v36 = vpop.eup %5650  ;;  %v3107_v11 = vmul.f32 %v5649_v30, %v3062_v23  ;;  %v3078_v37 = vsub.f32 1.0, %v3077_v59  ;;  %vm3112_vm2 = vweird.f32 %v5649_v30  ;;  %v3162_v23 = vand.u32 2147483648, %v7819_v42  ;;  %vm3098_vm6 = vmor %vm3096_vm14, %vm3097_vm15 }
0x12e1   :  { %v3093_v4 = vsub.f32 1.0, %v3092_v19  ;;  %v5653_v48 = vpop.eup %5652  ;;  %v3122_v22 = vmul.f32 %v7835_v36, %v7817_v47  ;;  %vm3113_vm8 = vmor %vm3111_vm3, %vm3112_vm2  ;;  %vm3127_vm5 = vweird.f32 %v7835_v36  ;;  %v3130_v59 = vand.u32 2147483647, %v7817_v47 }
0x12e2   :  { %v3108_v9 = vsub.f32 1.0, %v3107_v11  ;;  %v3079_v14 = vmul.f32 %v5645_v34, %v3078_v37  ;;  %v3152_v26 = vmul.f32 %v5653_v48, %v7819_v42  ;;  %v7851_v50 = vpop.eup %5654  ;;  %v3160_v11 = vand.u32 2147483647, %v7819_v42 }
0x12e3   :  { %v3094_v39 = vmul.f32 %v7828_v44, %v3093_v4  ;;  %v3182_v8 = vmul.f32 %v7851_v50, %v7822_v6  ;;  %v3123_v45 = vsub.f32 1.0, %v3122_v22  ;;  %vm3157_vm9 = vweird.f32 %v5653_v48 }
0x12e4   :  { %v3109_v19 = vmul.f32 %v5649_v30, %v3108_v9  ;;  %v3080_v37 = vadd.f32 %v5645_v34, %v3079_v14  ;;  %v3153_v29 = vsub.f32 1.0, %v3152_v26  ;;  %v7860_v9 = vpop.eup %5656  ;;  %v3100_v26 = vand.u32 2147483647, %v7815_v60  ;;  %vm3158_vm10 = vmor %vm3156_vm4, %vm3157_vm9 }
0x12e5   :  { %v3095_v4 = vadd.f32 %v7828_v44, %v3094_v39  ;;  %v3163_v60 = vor.u32 1.1754944e-38, %v3162_v23  ;;  %vm3161_vm3 = vcmp.eq.f32.partialorder %v3160_v11, 8.507059e+37  ;;  %v3132_v42 = vand.u32 2147483648, %v7817_v47 }
0x12e6   :  { %v3110_v61 = vadd.f32 %v5649_v30, %v3109_v19  ;;  %v3084_v17 = vsel %vm3083_vm13, %v5645_v34, %v3080_v37  ;;  %v3154_v58 = vmul.f32 %v5653_v48, %v3153_v29  ;;  %v3183_v34 = vsub.f32 1.0, %v3182_v8 }
0x12e7   :  { %v3089_v14 = vsel %vm7845_vm12, %v3088_v16, %v3084_v17  ;;  %v3099_v29 = vsel %vm3098_vm6, %v7828_v44, %v3095_v4  ;;  %v3124_v16 = vmul.f32 %v7835_v36, %v3123_v45  ;;  %vm3101_vm7 = vcmp.eq.f32.partialorder %v3100_v26, 8.507059e+37 }
0x12e8   :  { %v3114_v1 = vsel %vm3113_vm8, %v5649_v30, %v3110_v61  ;;  %v3090_v51 = vmul.f32 %v7775_v3, %v3089_v14  ;;  %v3155_v22 = vadd.f32 %v5653_v48, %v3154_v58  ;;  %v3137_v3 = vmul.f32 %v7860_v9, %v7826_v28 }
0x12e9   :  { %v3119_v39 = vsel %vm7838_vm1, %v3118_v55, %v3114_v1  ;;  %v3103_v1 = vor.u32 1.1754944e-38, %v3102_v52  ;;  %v3184_v62 = vmul.f32 %v7851_v50, %v3183_v34  ;;  %vm3126_vm1 = vweird.f32 %v7817_v47 }
0x12ea   :  { %v3120_v17 = vmul.f32 %v7781_v49, %v3119_v39  ;;  %3198 = vperm.xlu2 %5457, %v3090_v51   ;;  %v3159_v55 = vsel %vm3158_vm10, %v5653_v48, %v3155_v22  ;;  %v3125_v51 = vadd.f32 %v7835_v36, %v3124_v16  ;;  %v3138_v45 = vsub.f32 1.0, %v3137_v3  ;;  %v5659_v49 = vpop.eup %5658  ;;  %vm3128_vm12 = vmor %vm3126_vm1, %vm3127_vm5 }
0x12eb   :  { %v3104_v30 = vsel %vm3101_vm7, %v3103_v1, %v3099_v29  ;;  %v3164_v44 = vsel %vm3161_vm3, %v3163_v60, %v3159_v55  ;;  %v3185_v48 = vadd.f32 %v7851_v50, %v3184_v62  ;;  %vm3187_vm11 = vweird.f32 %v7851_v50 }
0x12ec   :  { %3208 = vperm.xlu0 %5458, %v3120_v17   ;;  %v3105_v52 = vmul.f32 %v7777_v32, %v3104_v30  ;;  %vm3186_vm4 = vweird.f32 %v7822_v6  ;;  %v3190_v19 = vand.u32 2147483647, %v7822_v6  ;;  %v3192_v37 = vand.u32 2147483648, %v7822_v6 }
0x12ed   :  { %v3165_v11 = vmul.f32 %v7789_v2, %v3164_v44  ;;  %v3129_v8 = vsel %vm3128_vm12, %v7835_v36, %v3125_v51  ;;  %v3139_v32 = vmul.f32 %v7860_v9, %v3138_v45  ;;  %v3167_v61 = vmul.f32 %v5659_v49, %v7831_v25  ;;  %vm3188_vm2 = vmor %vm3186_vm4, %vm3187_vm11 }
0x12ee   :  { %v3133_v4 = vor.u32 1.1754944e-38, %v3132_v42  ;;  %v3189_v47 = vsel %vm3188_vm2, %v7851_v50, %v3185_v48  ;;  %vm3131_vm13 = vcmp.eq.f32.partialorder %v3130_v59, 8.507059e+37  ;;  %v3193_v14 = vor.u32 1.1754944e-38, %v3192_v37 }
0x12ef   :  { %vm3191_vm14 = vcmp.eq.f32.partialorder %v3190_v19, 8.507059e+37  ;;  %v3140_v6 = vadd.f32 %v7860_v9, %v3139_v32  ;;  %vm3142_vm15 = vweird.f32 %v7860_v9  ;;  %v3168_v2 = vsub.f32 1.0, %v3167_v61 }
0x12f0   :  { %v3134_v58 = vsel %vm3131_vm13, %v3133_v4, %v3129_v8  ;;  %v3194_v26 = vsel %vm3191_vm14, %v3193_v14, %v3189_v47  ;;  %v3147_v36 = vand.u32 2147483648, %v7826_v28  ;;  %vm3141_vm8 = vweird.f32 %v7826_v28 }
0x12f1   :  { %v3135_v34 = vmul.f32 %v7783_v21, %v3134_v58  ;;  %v3145_v39 = vand.u32 2147483647, %v7826_v28  ;;  %vm3143_vm9 = vmor %vm3141_vm8, %vm3142_vm15  ;;  %v3195_v50 = vmul.f32 %v7795_v57, %v3194_v26  ;;  %v3169_v23 = vmul.f32 %v5659_v49, %v3168_v2 }
0x12f2   :  { %3203 = vperm.xlu2 %5457, %v3105_v52   ;;  %v3144_v22 = vsel %vm3143_vm9, %v7860_v9, %v3140_v6  ;;  %v3148_v17 = vor.u32 1.1754944e-38, %v3147_v36  ;;  %vm3172_vm10 = vweird.f32 %v5659_v49  ;;  %v3177_v3 = vand.u32 2147483648, %v7831_v25 }
0x12f3   :  { %vm3146_vm6 = vcmp.eq.f32.partialorder %v3145_v39, 8.507059e+37  ;;  %v3170_v16 = vadd.f32 %v5659_v49, %v3169_v23  ;;  %vm3171_vm7 = vweird.f32 %v7831_v25  ;;  %v3175_v28 = vand.u32 2147483647, %v7831_v25  ;;  %v7927_v23 = vld [vmem:[%s8756_s1 + $0x28] sm:$0xff] }
0x12f4   :  { %3223 = vperm.xlu0 %5458, %v3165_v11   ;;  %v3149_v29 = vsel %vm3146_vm6, %v3148_v17, %v3144_v22  ;;  %vm3173_vm3 = vmor %vm3171_vm7, %vm3172_vm10  ;;  %v3178_v1 = vor.u32 1.1754944e-38, %v3177_v3  ;;  %vm9186_vm1 = vcmask 1042434   ;;  %vm9187_vm11 = vcmask 1043459  }
0x12f5   :  { %v3150_v21 = vmul.f32 %v7787_v46, %v3149_v29  ;;  %v3174_v57 = vsel %vm3173_vm3, %v5659_v49, %v3170_v16  ;;  %vm3176_vm5 = vcmp.eq.f32.partialorder %v3175_v28, 8.507059e+37  ;;  %vm9188_vm4 = vcmask 1044484  }
0x12f6   :  { %v3179_v9 = vsel %vm3176_vm5, %v3178_v1, %v3174_v57  ;;  %vm9189_vm12 = vcmask 1045509   ;;  %vm9190_vm2 = vcmask 1046534   ;;  %vm9191_vm13 = vcmask 1047559   ;;  %vm9241_vm5 = vmmov %vm9186_vm1 }
0x12f7   :  { %v3180_v55 = vmul.f32 %v7793_v10, %v3179_v9 }
0x12fa   :  { %3213 = vperm.xlu2 %5457, %v3135_v34  }
0x12fc   :  { %3233 = vperm.xlu0 %5458, %v3195_v50  }
0x1302   :  { %3218 = vperm.xlu2 %5457, %v3150_v21  }
0x130a   :  { %3228 = vperm.xlu2 %5457, %v3180_v55  }
0x1344   :  { %v3199_v62 = vpop.permute.xlu2 %3198 }
0x1345   :  { %v3236_v51 = vmul.f32 %v7716_v5, %v3199_v62 }
0x1347   :  { %v3244_v44 = vrot.slane %v3236_v51, 4 }
0x1349   :  { %v3245_v52 = vadd.f32 %v3244_v44, %v3236_v51 }
0x134b   :  { %v3246_v10 = vrot.slane %v3245_v52, 2 }
0x134c   :  { %v3204_v60 = vpop.permute.xlu2 %3203 }
0x134d   :  { %v3237_v30 = vmul.f32 %v7623_v27, %v3204_v60  ;;  %v7920_v27 = vld [vmem:[%s8756_s1 + $0x10] sm:$0xff]  ;;  %v3247_v4 = vadd.f32 %v3246_v10, %v3245_v52 }
0x134f   :  { %v3250_v45 = vrot.slane %v3237_v30, 4  ;;  %v3248_v36 = vrot.slane %v3247_v4, 1 }
0x1351   :  { %v3251_v42 = vadd.f32 %v3250_v45, %v3237_v30  ;;  %v3249_v57 = vadd.f32 %v3248_v36, %v3247_v4 }
0x1353   :  { %v3252_v59 = vrot.slane %v3251_v42, 2 }
0x1354   :  { %v3214_v46 = vpop.permute.xlu2 %3213 }
0x1355   :  { %v3239_v25 = vmul.f32 %v7617_v53, %v3214_v46  ;;  %v3253_v61 = vadd.f32 %v3252_v59, %v3251_v42 }
0x1357   :  { %v3262_v49 = vrot.slane %v3239_v25, 4  ;;  %v3254_v2 = vrot.slane %v3253_v61, 1 }
0x1359   :  { %v3263_v11 = vadd.f32 %v3262_v49, %v3239_v25  ;;  %v3255_v16 = vadd.f32 %v3254_v2, %v3253_v61  ;;  %v3296_v25 = vpack.c.bf16 %v3249_v57, %v3249_v57  ;;  %v7933_v49 = vld [vmem:[%s8756_s1 + $0x38] sm:$0xff] }
0x135b   :  { %v3264_v14 = vrot.slane %v3263_v11, 2  ;;  %v3297_v60 = vpack.c.bf16 %v3255_v16, %v3255_v16 }
0x135c   :  { %v3219_v48 = vpop.permute.xlu2 %3218 }
0x135d   :  { %v3240_v19 = vmul.f32 %v7731_v24, %v3219_v48  ;;  %v3265_v50 = vadd.f32 %v3264_v14, %v3263_v11 }
0x135e   :  { %v3209_v37 = vpop.permute.xlu0 %3208 }
0x135f   :  { %v3238_v8 = vmul.f32 %v7920_v27, %v3209_v37  ;;  %v3268_v32 = vrot.slane %v3240_v19, 4 }
0x1361   :  { %v3256_v53 = vrot.slane %v3238_v8, 4  ;;  %v3269_v47 = vadd.f32 %v3268_v32, %v3240_v19  ;;  %v3313_v19 = vunpack.c.l.b16 %v3297_v60  ;;  %v3312_v32 = vunpack.c.l.b16 %v3296_v25  ;;  %v9194_v60 = vld [vmem:[#allocation46_spill] sm:$0xff] }
0x1362   :  { %v9201_v25 = vld [vmem:[#allocation18_spill] sm:$0xff] }
0x1363   :  { %v3257_v58 = vadd.f32 %v3256_v53, %v3238_v8  ;;  %v3270_v34 = vrot.slane %v3269_v47, 2  ;;  %v3320_v14 = vsel %vm290_vm0, %v3313_v19, %v3312_v32  ;;  %v9206_v19 = vld [vmem:[#allocation26_spill] sm:$0xff]  ;;  %v9211_v32 = vld [vmem:[#allocation25_spill] sm:$0xff] }
0x1364   :  { %v3229_v6 = vpop.permute.xlu2 %3228 }
0x1365   :  { %v3258_v24 = vrot.slane %v3257_v58, 2  ;;  %v3242_v26 = vmul.f32 %v7744_v63, %v3229_v6  ;;  %v3271_v1 = vadd.f32 %v3270_v34, %v3269_v47  ;;  %v3266_v63 = vrot.slane %v3265_v50, 1 }
0x1366   :  { %v3224_v39 = vpop.permute.xlu0 %3223 }
0x1367   :  { %v3259_v22 = vadd.f32 %v3258_v24, %v3257_v58  ;;  %v3241_v17 = vmul.f32 %v7927_v23, %v3224_v39  ;;  %v3280_v29 = vrot.slane %v3242_v26, 4  ;;  %v3272_v45 = vrot.slane %v3271_v1, 1 }
0x1368   :  { %v3267_v42 = vadd.f32 %v3266_v63, %v3265_v50 }
0x1369   :  { %v3260_v3 = vrot.slane %v3259_v22, 1  ;;  %v3274_v21 = vrot.slane %v3241_v17, 4  ;;  %v3281_v28 = vadd.f32 %v3280_v29, %v3242_v26  ;;  %v3273_v8 = vadd.f32 %v3272_v45, %v3271_v1  ;;  %v9198_v45 = vld [vmem:[#allocation47_spill] sm:$0xff] }
0x136a   :  { %v3299_v61 = vpack.c.bf16 %v3267_v42, %v3267_v42  ;;  %v9202_v42 = vld [vmem:[#allocation22_spill] sm:$0xff] }
0x136b   :  { %v3261_v9 = vadd.f32 %v3260_v3, %v3259_v22  ;;  %v3275_v55 = vadd.f32 %v3274_v21, %v3241_v17  ;;  %v3282_v62 = vrot.slane %v3281_v28, 2  ;;  %v3300_v24 = vpack.c.bf16 %v3273_v8, %v3273_v8  ;;  %v9210_v8 = vld [vmem:[#allocation30_spill] sm:$0xff] }
0x136c   :  { %v3315_v26 = vunpack.c.l.b16 %v3299_v61  ;;  %v9212_v61 = vld [vmem:[#allocation31_spill] sm:$0xff] }
0x136d   :  { %v3276_v30 = vrot.slane %v3275_v55, 2  ;;  %v3283_v51 = vadd.f32 %v3282_v62, %v3281_v28  ;;  %v3298_v46 = vpack.c.bf16 %v3261_v9, %v3261_v9  ;;  %v3316_v17 = vunpack.c.l.b16 %v3300_v24  ;;  %v9193_v62 = vld [vmem:[#allocation35_spill] sm:$0xff]  ;;  %v9217_v24 = vld [vmem:[#allocation54_spill] sm:$0xff] }
0x136e   :  { %v3234_v44 = vpop.permute.xlu0 %3233 }
0x136f   :  { %v3277_v52 = vadd.f32 %v3276_v30, %v3275_v55  ;;  %v3243_v48 = vmul.f32 %v7933_v49, %v3234_v44  ;;  %v3284_v59 = vrot.slane %v3283_v51, 1  ;;  %v3314_v11 = vunpack.c.l.b16 %v3298_v46  ;;  %v9192_v55 = vld [vmem:[#allocation41_spill] sm:$0xff]  ;;  %v9195_v30 = vld [vmem:[#allocation44_spill] sm:$0xff]  ;;  %v9200_v44 = vld [vmem:[#allocation51_spill] sm:$0xff] }
0x1370   :  { %v9197_v46 = vld [vmem:[#allocation49_spill] sm:$0xff] }
0x1371   :  { %v3278_v10 = vrot.slane %v3277_v52, 1  ;;  %v3286_v37 = vrot.slane %v3243_v48, 4  ;;  %v3285_v47 = vadd.f32 %v3284_v59, %v3283_v51  ;;  %v3321_v2 = vsel %vm9186_vm1, %v3314_v11, %v3320_v14  ;;  %v9196_v51 = vld [vmem:[#allocation36_spill] sm:$0xff]  ;;  %v9209_v11 = vld [vmem:[#allocation23_spill] sm:$0xff]  ;;  %v9216_v14 = vld [vmem:[#allocation33_spill] sm:$0xff] }
0x1372   :  { %v3322_v39 = vsel %vm9187_vm11, %v3315_v26, %v3321_v2  ;;  %v9205_v59 = vld [vmem:[#allocation20_spill] sm:$0xff]  ;;  %vm9242_vm1 = vmmov %vm9187_vm11 }
0x1373   :  { %v3279_v53 = vadd.f32 %v3278_v10, %v3277_v52  ;;  %v3287_v4 = vadd.f32 %v3286_v37, %v3243_v48  ;;  %v3302_v34 = vpack.c.bf16 %v3285_v47, %v3285_v47  ;;  %v3323_v16 = vsel %vm9188_vm4, %v3316_v17, %v3322_v39  ;;  %v9203_v52 = vld [vmem:[#allocation19_spill] sm:$0xff]  ;;  %v9204_v48 = vld [vmem:[#allocation24_spill] sm:$0xff]  ;;  %v9207_v10 = vld [vmem:[#allocation21_spill] sm:$0xff] }
0x1374   :  { %v9208_v37 = vld [vmem:[#allocation28_spill] sm:$0xff]  ;;  %v9215_v47 = vld [vmem:[#allocation29_spill] sm:$0xff]  ;;  %vm9243_vm11 = vmmov %vm9188_vm4 }
0x1375   :  { %v3301_v58 = vpack.c.bf16 %v3279_v53, %v3279_v53  ;;  %v3288_v6 = vrot.slane %v3287_v4, 2  ;;  %v3318_v3 = vunpack.c.l.b16 %v3302_v34  ;;  %v9213_v53 = vld [vmem:[#allocation27_spill] sm:$0xff]  ;;  %v9218_v26 = vld [vmem:[#allocation60_spill] sm:$0xff]  ;;  %vm9244_vm4 = vmmov %vm9189_vm12 }
0x1377   :  { %v3289_v36 = vadd.f32 %v3288_v6, %v3287_v4  ;;  %v3317_v50 = vunpack.c.l.b16 %v3301_v58  ;;  %v9214_v4 = vld [vmem:[#allocation32_spill] sm:$0xff] }
0x1378   :  { %v5296_v58 = vld [vmem:[%s8755_s0 + $0x60] sm:$0xff] }
0x1379   :  { %v3290_v22 = vrot.slane %v3289_v36, 1  ;;  %v3324_v21 = vsel %vm9189_vm12, %v3317_v50, %v3323_v16  ;;  %vm9245_vm12 = vmmov %vm9190_vm2 }
0x137a   :  { %v3325_v1 = vsel %vm9190_vm2, %v3318_v3, %v3324_v21  ;;  %v5297_v21 = vld [vmem:[%s8755_s0 + $0x68] sm:$0xff]  ;;  %vm9246_vm2 = vmmov %vm9191_vm13 }
0x137b   :  { %v3291_v29 = vadd.f32 %v3290_v22, %v3289_v36  ;;  %v3382_v36 = vadd.f32 %v9218_v26, %v9217_v24  ;;  %v5298_v26 = vld [vmem:[%s8755_s0 + $0x70] sm:$0xff] }
0x137d   :  { %v3303_v28 = vpack.c.bf16 %v3291_v29, %v3291_v29 }
0x137f   :  { %v3319_v57 = vunpack.c.l.b16 %v3303_v28 }
0x1381   :  { %v3326_v63 = vsel %vm9191_vm13, %v3319_v57, %v3325_v1  ;;  %vm9247_vm13 = vcmask 64512  }
0x1382   :  { %v3327_v9 = vpack.c.b16 %v3326_v63, %v3326_v63 }
0x1384   :  { %3337 = vmatmul.bf16.vlgmr.msrb.gmra.mxu0 %v3327_v9  ;;  %3350 = vmatmul.bf16.vlgmr.msrb.gmra.mxu1 %v3327_v9 }
0x1385   :  { %3363 = vmatmul.bf16.vlgmr.msrb.gmra.mxu2 %v3327_v9  ;;  %3971 = vmatpush.bf16.msrb.mxu1 %v6433_v20  ;;  %v9219_v9 = vld [vmem:[#allocation55_spill] sm:$0xff] }
0x1386   :  { %3954 = vmatpush.bf16.msrb.mxu0 %v6367_v33  ;;  %3984 = vmatpush.bf16.msrb.mxu2 %v6475_v54 }
0x1389   :  { %3972 = vmatpush.bf16.msrb.mxu1 %v6457_v12 }
0x138a   :  { %3955 = vmatpush.bf16.msrb.mxu0 %v6385_v40  ;;  %3985 = vmatpush.bf16.msrb.mxu2 %v6503_v18 }
0x138d   :  { %3973 = vmatpush.bf16.msrb.mxu1 %v6488_v35 }
0x138e   :  { %3956 = vmatpush.bf16.msrb.mxu0 %v6406_v31  ;;  %3986 = vmatpush.bf16.msrb.mxu2 %v6538_v56 }
0x1391   :  { %3974 = vmatpush.bf16.msrb.mxu1 %v6519_v38 }
0x1392   :  { %3957 = vmatpush.bf16.msrb.mxu0 %v6431_v0  ;;  %3987 = vmatpush.bf16.msrb.mxu2 %v6568_v13 }
0x1394   :  { %3393 = vmatmul.bf16.vlgmr.msra.gmra.mxu0 %v7707_v43  ;;  %3406 = vmatmul.bf16.vlgmr.msra.gmra.mxu1 %v7707_v43  ;;  %v9199_v43 = vld [vmem:[#allocation38_spill] sm:$0xff] }
0x1395   :  { %3975 = vmatpush.bf16.msrb.mxu1 %v8970_v7 }
0x1396   :  { %3958 = vmatpush.bf16.msrb.mxu0 %v8971_v41  ;;  %3988 = vmatpush.bf16.msrb.mxu2 %v8972_v15 }
0x1399   :  { %3976 = vmatpush.bf16.msrb.mxu1 %v9192_v55 }
0x139a   :  { %3959 = vmatpush.bf16.msrb.mxu0 %v9193_v62  ;;  %3989 = vmatpush.bf16.msrb.mxu2 %v9194_v60 }
0x139d   :  { %3977 = vmatpush.bf16.msrb.mxu1 %v9195_v30 }
0x139e   :  { %3960 = vmatpush.bf16.msrb.mxu0 %v9196_v51  ;;  %3990 = vmatpush.bf16.msrb.mxu2 %v9197_v46 }
0x13a1   :  { %3978 = vmatpush.bf16.msrb.mxu1 %v9198_v45 }
0x13a2   :  { %3961 = vmatpush.bf16.msrb.mxu0 %v9199_v43  ;;  %3991 = vmatpush.bf16.msrb.mxu2 %v9200_v44 }
0x13a5   :  { %4540 = vmatpush.bf16.msra.mxu1 %v9202_v42 }
0x13a6   :  { %4527 = vmatpush.bf16.msra.mxu0 %v9201_v25 }
0x13a9   :  { %4541 = vmatpush.bf16.msra.mxu1 %v9204_v48 }
0x13aa   :  { %4528 = vmatpush.bf16.msra.mxu0 %v9203_v52 }
0x13ad   :  { %4542 = vmatpush.bf16.msra.mxu1 %v9206_v19 }
0x13ae   :  { %4529 = vmatpush.bf16.msra.mxu0 %v9205_v59 }
0x13b1   :  { %4543 = vmatpush.bf16.msra.mxu1 %v9208_v37 }
0x13b2   :  { %4530 = vmatpush.bf16.msra.mxu0 %v9207_v10 }
0x13b5   :  { %4544 = vmatpush.bf16.msra.mxu1 %v9210_v8 }
0x13b6   :  { %4531 = vmatpush.bf16.msra.mxu0 %v9209_v11 }
0x13b9   :  { %4545 = vmatpush.bf16.msra.mxu1 %v9212_v61 }
0x13ba   :  { %4532 = vmatpush.bf16.msra.mxu0 %v9211_v32 }
0x13bd   :  { %4546 = vmatpush.bf16.msra.mxu1 %v9214_v4 }
0x13be   :  { %4533 = vmatpush.bf16.msra.mxu0 %v9213_v53 }
0x13c1   :  { %4547 = vmatpush.bf16.msra.mxu1 %v9216_v14 }
0x13c2   :  { %4534 = vmatpush.bf16.msra.mxu0 %v9215_v47 }
0x1401   :  { %v3338_v6 = vpop.f32.mrf.mxu0  ;;  %v3351_v2 = vpop.f32.mrf.mxu1 }
0x1402   :  { %v3368_v34 = vadd.f32 %v5296_v58, %v3338_v6  ;;  %v3369_v63 = vadd.f32 %v5297_v21, %v3351_v2  ;;  %v9220_v6 = vld [vmem:[#allocation56_spill] sm:$0xff] }
0x1404   :  { %v3411_v39 = vadd.f32 %v3382_v36, %v3368_v34 }
0x1406   :  { %v5299_v50 = vmul.f32 -1.442695, %v3411_v39 }
0x1408   :  { %5660 = vpow2.f32 %v5299_v50  ;;  %v3364_v22 = vpop.f32.mrf.mxu2 }
0x1409   :  { %v3340_v17 = vpop.f32.mrf.mxu0  ;;  %v3353_v29 = vpop.f32.mrf.mxu1  ;;  %v3370_v39 = vadd.f32 %v5298_v26, %v3364_v22  ;;  %v9224_v26 = vld [vmem:[#allocation40_spill] sm:$0xff] }
0x140e   :  { %v5661_v16 = vpop.eup %5660 }
0x140f   :  { %v3415_v3 = vadd.f32 1.0, %v5661_v16 }
0x1410   :  { %v3366_v28 = vpop.f32.mrf.mxu2 }
0x1411   :  { %5662 = vrcp.f32 %v3415_v3  ;;  %v3394_v57 = vpop.f32.mrf.mxu0  ;;  %v3407_v1 = vpop.f32.mrf.mxu1  ;;  %v3427_v8 = vand.u32 2147483648, %v3415_v3  ;;  %v3425_v32 = vand.u32 2147483647, %v3415_v3  ;;  %vm3421_vm15 = vweird.f32 %v3415_v3 }
0x1412   :  { %v3395_v25 = vadd.f32 %v3394_v57, %v9219_v9  ;;  %v3408_v2 = vadd.f32 %v3407_v1, %v9220_v6 }
0x1413   :  { %v3428_v14 = vor.u32 1.1754944e-38, %v3427_v8  ;;  %vm3426_vm9 = vcmp.eq.f32.partialorder %v3425_v32, 8.507059e+37 }
0x1414   :  { %v3431_v42 = vadd.f32 %v3395_v25, %v3369_v63 }
0x1416   :  { %v5300_v52 = vmul.f32 -1.442695, %v3431_v42 }
0x1417   :  { %v5663_v48 = vpop.eup %5662 }
0x1418   :  { %5664 = vpow2.f32 %v5300_v52  ;;  %v3417_v59 = vmul.f32 %v5663_v48, %v3415_v3  ;;  %vm3422_vm14 = vweird.f32 %v5663_v48 }
0x1419   :  { %v3396_v19 = vpop.f32.mrf.mxu0  ;;  %v3409_v10 = vpop.f32.mrf.mxu1  ;;  %vm3423_vm8 = vmor %vm3421_vm15, %vm3422_vm14 }
0x141a   :  { %v3418_v37 = vsub.f32 1.0, %v3417_v59  ;;  %vm9248_vm14 = vmmov %vm9241_vm5 }
0x141b   :  { %vm9249_vm15 = vmmov %vm9242_vm1 }
0x141c   :  { %v3419_v11 = vmul.f32 %v5663_v48, %v3418_v37 }
0x141e   :  { %v5665_v61 = vpop.eup %5664  ;;  %v3420_v53 = vadd.f32 %v5663_v48, %v3419_v11 }
0x141f   :  { %v3435_v4 = vadd.f32 1.0, %v5665_v61 }
0x1420   :  { %v3424_v47 = vsel %vm3423_vm8, %v5663_v48, %v3420_v53  ;;  %v9221_v48 = vld [vmem:[#allocation39_spill] sm:$0xff]  ;;  %vm9250_vm8 = vmmov %vm9243_vm11 }
0x1421   :  { %5666 = vrcp.f32 %v3435_v4  ;;  %v3429_v58 = vsel %vm3426_vm9, %v3428_v14, %v3424_v47  ;;  %v3447_v16 = vand.u32 2147483648, %v3435_v4  ;;  %v3445_v21 = vand.u32 2147483647, %v3435_v4  ;;  %v8016_v14 = vld [vmem:[%s8756_s1 + $0x8] sm:$0xff]  ;;  %vm9251_vm9 = vmmov %vm9244_vm4 }
0x1422   :  { %v3451_v36 = vmul.f32 %v3429_v58, %v3408_v2  ;;  %vm3441_vm10 = vweird.f32 %v3435_v4 }
0x1423   :  { %v3448_v57 = vor.u32 1.1754944e-38, %v3447_v16  ;;  %vm3446_vm3 = vcmp.eq.f32.partialorder %v3445_v21, 8.507059e+37  ;;  %v9226_v16 = vld [vmem:[#allocation45_spill] sm:$0xff]  ;;  %v9227_v21 = vld [vmem:[#allocation48_spill] sm:$0xff] }
0x1424   :  { %v3452_v17 = vadd.f32 %v3451_v36, %v3370_v39  ;;  %v9225_v39 = vld [vmem:[#allocation42_spill] sm:$0xff] }
0x1426   :  { %5668 = vtanh.f32 %v3452_v17 }
0x1427   :  { %v5667_v34 = vpop.eup %5666 }
0x1428   :  { %v3437_v50 = vmul.f32 %v5667_v34, %v3435_v4  ;;  %vm3442_vm6 = vweird.f32 %v5667_v34  ;;  %v9223_v4 = vld [vmem:[#allocation37_spill] sm:$0xff] }
0x1429   :  { %vm3443_vm7 = vmor %vm3441_vm10, %vm3442_vm6 }
0x142a   :  { %v3438_v29 = vsub.f32 1.0, %v3437_v50  ;;  %v8026_v50 = vld [vmem:[%s8756_s1 + $0x18] sm:$0xff]  ;;  %vm9252_vm6 = vmmov %vm9245_vm12 }
0x142b   :  { %vm9253_vm10 = vmmov %vm9246_vm2 }
0x142c   :  { %v3439_v3 = vmul.f32 %v5667_v34, %v3438_v29  ;;  %v5669_v42 = vpop.eup %5668 }
0x142e   :  { %v3440_v28 = vadd.f32 %v5667_v34, %v3439_v3 }
0x1430   :  { %v3444_v1 = vsel %vm3443_vm7, %v5667_v34, %v3440_v28  ;;  %v8035_v28 = vld [vmem:[%s8756_s1 + $0x20] sm:$0xff]  ;;  %vm9254_vm7 = vmmov %vm9247_vm13 }
0x1431   :  { %v3449_v63 = vsel %vm3446_vm3, %v3448_v57, %v3444_v1 }
0x1432   :  { %v3454_v25 = vsub.f32 1.0, %v3449_v63  ;;  %v3456_v22 = vmul.f32 %v3449_v63, %v9221_v48  ;;  %v9228_v63 = vld [vmem:[#allocation50_spill] sm:$0xff] }
0x1434   :  { %v3455_v52 = vmul.f32 %v5669_v42, %v3454_v25  ;;  %v9229_v42 = vld [vmem:[#allocation52_spill] sm:$0xff] }
0x1436   :  { %v7999_v59 = vadd.f32 %v3456_v22, %v3455_v52 }
0x1438   :  { %9222 = vst [vmem:[#allocation18_spill] sm:$0xff] %v7999_v59  ;;  %v8003_v19 = vpack.c.bf16 %v7999_v59, %v7999_v59  ;;  %v3467_v10 = vperm.slane %v7999_v59, 0  ;;  %v3461_v37 = vrot.slane %v7999_v59, 2  ;;  %v3460_v11 = vrot.slane %v7999_v59, 1 }
0x1439   :  { %v3466_v53 = vrot.slane %v7999_v59, 7  ;;  %v3462_v2 = vrot.slane %v7999_v59, 3  ;;  %v3463_v29 = vrot.slane %v7999_v59, 4  ;;  %v3464_v1 = vrot.slane %v7999_v59, 5 }
0x143a   :  { %3979 = vmatmul.bf16.vlgmr.msrb.gmra.mxu1 %v8003_v19  ;;  %v3483_v8 = vmul.f32 %v7716_v5, %v3467_v10  ;;  %v3469_v32 = vperm.slane %v3461_v37, 0  ;;  %v3468_v61 = vperm.slane %v3460_v11, 0  ;;  %v3465_v22 = vrot.slane %v7999_v59, 6  ;;  %v9230_v10 = vld [vmem:[#allocation53_spill] sm:$0xff]  ;;  %v8047_v11 = vld [vmem:[%s8756_s1 + $0x30] sm:$0xff] }
0x143b   :  { %4596 = vmatpush.bf16.msrb.mxu1 %v9223_v4  ;;  %v3474_v5 = vperm.slane %v3466_v53, 0  ;;  %v3470_v36 = vperm.slane %v3462_v2, 0  ;;  %v3471_v3 = vperm.slane %v3463_v29, 0  ;;  %v3472_v25 = vperm.slane %v3464_v1, 0 }
0x143c   :  { %3491 = vadd.xlane.f32.xlu2 %v3483_v8  ;;  %v3485_v47 = vmul.f32 %v7920_v27, %v3469_v32  ;;  %v3484_v58 = vmul.f32 %v8016_v14, %v3468_v61  ;;  %v3473_v37 = vperm.slane %v3465_v22, 0  ;;  %v9231_v61 = vld [vmem:[#allocation14_spill] sm:$0xff] }
0x143d   :  { %v3490_v34 = vmul.f32 %v7933_v49, %v3474_v5  ;;  %v3486_v17 = vmul.f32 %v8026_v50, %v3470_v36  ;;  %v3487_v57 = vmul.f32 %v8035_v28, %v3471_v3  ;;  %v3488_v52 = vmul.f32 %v7927_v23, %v3472_v25  ;;  %v9233_v5 = vld [vmem:[#allocation9_spill] sm:$0xff]  ;;  %v9236_v3 = vld [vmem:[#allocation11_spill] sm:$0xff] }
0x143e   :  { %3495 = vadd.xlane.f32.xlu0 %v3485_v47  ;;  %3493 = vadd.xlane.f32.xlu1 %v3484_v58  ;;  %v3489_v8 = vmul.f32 %v8047_v11, %v3473_v37  ;;  %v9232_v58 = vld [vmem:[#allocation15_spill] sm:$0xff] }
0x143f   :  { %4597 = vmatpush.bf16.msrb.mxu1 %v9224_v26 }
0x1443   :  { %4598 = vmatpush.bf16.msrb.mxu1 %v9225_v39  ;;  %v9235_v39 = vld [vmem:[#allocation10_spill] sm:$0xff] }
0x1444   :  { %3505 = vadd.xlane.f32.xlu2 %v3490_v34 }
0x1446   :  { %3497 = vadd.xlane.f32.xlu1 %v3486_v17 }
0x1447   :  { %4599 = vmatpush.bf16.msrb.mxu1 %v9226_v16 }
0x144b   :  { %4600 = vmatpush.bf16.msrb.mxu1 %v9227_v21 }
0x144e   :  { %3499 = vadd.xlane.f32.xlu1 %v3487_v57 }
0x144f   :  { %4601 = vmatpush.bf16.msrb.mxu1 %v9228_v63  ;;  %v9237_v63 = vld [vmem:[#allocation16_spill] sm:$0xff] }
0x1453   :  { %4602 = vmatpush.bf16.msrb.mxu1 %v9229_v42  ;;  %v9238_v42 = vld [vmem:[#allocation12_spill] sm:$0xff] }
0x1456   :  { %3501 = vadd.xlane.f32.xlu1 %v3488_v52 }
0x1457   :  { %4603 = vmatpush.bf16.msrb.mxu1 %v9230_v10  ;;  %v9239_v10 = vld [vmem:[#allocation13_spill] sm:$0xff] }
0x145e   :  { %3503 = vadd.xlane.f32.xlu1 %v3489_v8 }
0x14af   :  { %v3492_v32 = vpop.xlane.xlu2 %3491 }
0x14b0   :  { %v3507_v53 = vadd.f32 %v3492_v32, %v9231_v61 }
0x14b1   :  { %v3496_v4 = vpop.xlane.xlu0 %3495  ;;  %v3494_v47 = vpop.xlane.xlu1 %3493 }
0x14b2   :  { %v3509_v2 = vadd.f32 %v3496_v4, %v9232_v58  ;;  %v3508_v26 = vadd.f32 %v3494_v47, %v9233_v5  ;;  %3524 = vperm.xlu1 %5459, %v3507_v53  }
0x14b4   :  { %3530 = vperm.xlu2 %5457, %v3509_v2   ;;  %3527 = vperm.xlu0 %5458, %v3508_v26  }
0x14b7   :  { %v8053_v36 = vpop.f32.mrf.mxu1  ;;  %v3506_v57 = vpop.xlane.xlu2 %3505 }
0x14b8   :  { %9234 = vst [vmem:[#allocation22_spill] sm:$0xff] %v8053_v36  ;;  %v8058_v25 = vadd.f32 %v3506_v57, %v9237_v63 }
0x14b9   :  { %v3498_v34 = vpop.xlane.xlu1 %3497 }
0x14ba   :  { %v3510_v17 = vadd.f32 %v3498_v34, %v9235_v39  ;;  %v9240_v34 = vld [vmem:[#allocation17_spill] sm:$0xff] }
0x14bc   :  { %3533 = vperm.xlu1 %5459, %v3510_v17  }
0x14bf   :  { %v3982_v29 = vpop.f32.mrf.mxu1 }
0x14c1   :  { %v3500_v16 = vpop.xlane.xlu1 %3499 }
0x14c2   :  { %v3511_v21 = vadd.f32 %v3500_v16, %v9236_v3 }
0x14c4   :  { %3536 = vperm.xlu0 %5458, %v3511_v21  }
0x14c9   :  { %v3502_v1 = vpop.xlane.xlu1 %3501 }
0x14ca   :  { %v3512_v52 = vadd.f32 %v3502_v1, %v9238_v42 }
0x14cc   :  { %3545 = vperm.xlu0 %5458, %v8058_v25   ;;  %3539 = vperm.xlu2 %5457, %v3512_v52  }
0x14d1   :  { %v3504_v22 = vpop.xlane.xlu1 %3503 }
0x14d2   :  { %v3513_v37 = vadd.f32 %v3504_v22, %v9239_v10 }
0x14d4   :  { %3542 = vperm.xlu1 %5459, %v3513_v37  }
0x150e   :  { %v3531_v4 = vpop.permute.xlu2 %3530 }
0x150f   :  { %v3549_v63 = vperm.slane %v3531_v4, %v9240_v34 }
0x1524   :  { %v3525_v32 = vpop.permute.xlu1 %3524 }
0x1525   :  { %v3547_v3 = vperm.slane %v3525_v32, %v9240_v34 }
0x1526   :  { %v3528_v8 = vpop.permute.xlu0 %3527  ;;  %v3540_v39 = vpop.permute.xlu2 %3539 }
0x1527   :  { %v3548_v29 = vperm.slane %v3528_v8, %v9240_v34  ;;  %v3552_v8 = vperm.slane %v3540_v39, %v9240_v34 }
0x1529   :  { %v3555_v57 = vsel %vm290_vm0, %v3548_v29, %v3547_v3 }
0x152a   :  { %v3556_v22 = vsel %vm9241_vm5, %v3549_v63, %v3555_v57 }
0x152e   :  { %v3534_v16 = vpop.permute.xlu1 %3533 }
0x152f   :  { %v3550_v1 = vperm.slane %v3534_v16, %v9240_v34 }
0x1531   :  { %v3557_v10 = vsel %vm9242_vm1, %v3550_v1, %v3556_v22 }
0x1536   :  { %v3537_v47 = vpop.permute.xlu0 %3536 }
0x1537   :  { %v3551_v42 = vperm.slane %v3537_v47, %v9240_v34 }
0x1539   :  { %v3558_v5 = vsel %vm9243_vm11, %v3551_v42, %v3557_v10 }
0x153a   :  { %v3559_v29 = vsel %vm9244_vm4, %v3552_v8, %v3558_v5 }
0x153e   :  { %v3546_v58 = vpop.permute.xlu0 %3545 }
0x153f   :  { %v3554_v3 = vperm.slane %v3546_v58, %v9240_v34 }
0x1546   :  { %v3543_v61 = vpop.permute.xlu1 %3542 }
0x1547   :  { %v3553_v32 = vperm.slane %v3543_v61, %v9240_v34 }
0x1549   :  { %v3560_v4 = vsel %vm9245_vm12, %v3553_v32, %v3559_v29 }
0x154a   :  { %v3561_v47 = vsel %vm9246_vm2, %v3554_v3, %v3560_v4 }
0x154b   :  { %v3563_v63 = vsel %vm9247_vm13, %v3561_v47, -inf }
0x154c   :  { %3564 = vmax.xlane.f32.xlu2 %v3563_v63 }
0x15bf   :  { %v3565_v16 = vpop.xlane.xlu2 %3564 }
0x15c0   :  { %v3567_v57 = vperm.slane %v3565_v16, 0  ;;  %v3568_v42 = vperm.slane %v3565_v16, 1  ;;  %v3569_v10 = vperm.slane %v3565_v16, 2  ;;  %v3570_v22 = vperm.slane %v3565_v16, 3 }
0x15c1   :  { %v3571_v5 = vperm.slane %v3565_v16, 4  ;;  %v3572_v32 = vperm.slane %v3565_v16, 5 }
0x15c2   :  { %v3583_v1 = vsub.f32 %v3507_v53, %v3567_v57  ;;  %v3584_v39 = vsub.f32 %v3508_v26, %v3568_v42  ;;  %v3585_v59 = vsub.f32 %v3509_v2, %v3569_v10  ;;  %v3586_v58 = vsub.f32 %v3510_v17, %v3570_v22 }
0x15c3   :  { %v3587_v47 = vsub.f32 %v3511_v21, %v3571_v5  ;;  %v3588_v53 = vsub.f32 %v3512_v52, %v3572_v32  ;;  %v3573_v2 = vperm.slane %v3565_v16, 6  ;;  %v3574_v26 = vperm.slane %v3565_v16, 7 }
0x15c4   :  { %v3591_v48 = vmul.f32 1.442695, %v3583_v1  ;;  %v3593_v61 = vmul.f32 1.442695, %v3584_v39  ;;  %v3595_v8 = vmul.f32 1.442695, %v3585_v59 }
0x15c5   :  { %v3597_v3 = vmul.f32 1.442695, %v3586_v58  ;;  %v3601_v17 = vmul.f32 1.442695, %v3588_v53  ;;  %v3589_v57 = vsub.f32 %v3513_v37, %v3573_v2  ;;  %v3590_v21 = vsub.f32 %v8058_v25, %v3574_v26 }
0x15c6   :  { %5670 = vpow2.f32 %v3591_v48  ;;  %v3599_v48 = vmul.f32 1.442695, %v3587_v47 }
0x15c7   :  { %5672 = vpow2.f32 %v3593_v61  ;;  %v3603_v42 = vmul.f32 1.442695, %v3589_v57  ;;  %v3605_v52 = vmul.f32 1.442695, %v3590_v21 }
0x15c8   :  { %5674 = vpow2.f32 %v3595_v8 }
0x15c9   :  { %5676 = vpow2.f32 %v3597_v3 }
0x15ca   :  { %5678 = vpow2.f32 %v3599_v48 }
0x15cb   :  { %5680 = vpow2.f32 %v3601_v17 }
0x15cc   :  { %v8079_v29 = vpop.eup %5670  ;;  %5682 = vpow2.f32 %v3603_v42 }
0x15cd   :  { %v8081_v4 = vpop.eup %5672  ;;  %3616 = vperm.xlu1 %5459, %v8079_v29   ;;  %5684 = vpow2.f32 %v3605_v52 }
0x15ce   :  { %3619 = vperm.xlu0 %5458, %v8081_v4   ;;  %v8085_v63 = vpop.eup %5674 }
0x15cf   :  { %v8087_v59 = vpop.eup %5676 }
0x15d0   :  { %v8092_v10 = vpop.eup %5678 }
0x15d1   :  { %v8094_v1 = vpop.eup %5680 }
0x15d2   :  { %v8098_v16 = vpop.eup %5682 }
0x15d3   :  { %v8100_v37 = vpop.eup %5684 }
0x15d5   :  { %3622 = vperm.xlu1 %5459, %v8085_v63  }
0x15d6   :  { %3625 = vperm.xlu0 %5458, %v8087_v59  }
0x15dd   :  { %3628 = vperm.xlu1 %5459, %v8092_v10  }
0x15de   :  { %3631 = vperm.xlu0 %5458, %v8094_v1  }
0x15e5   :  { %3634 = vperm.xlu1 %5459, %v8098_v16  }
0x15e6   :  { %3637 = vperm.xlu0 %5458, %v8100_v37  }
0x163f   :  { %v3617_v25 = vpop.permute.xlu1 %3616 }
0x1640   :  { %v3620_v39 = vpop.permute.xlu0 %3619  ;;  %v3639_v5 = vperm.slane %v3617_v25, %v9240_v34 }
0x1641   :  { %v3640_v58 = vperm.slane %v3620_v39, %v9240_v34 }
0x1643   :  { %v3647_v47 = vsel %vm290_vm0, %v3640_v58, %v3639_v5 }
0x1647   :  { %v3623_v22 = vpop.permute.xlu1 %3622 }
0x1648   :  { %v3626_v61 = vpop.permute.xlu0 %3625  ;;  %v3641_v8 = vperm.slane %v3623_v22, %v9240_v34 }
0x1649   :  { %v3642_v53 = vperm.slane %v3626_v61, %v9240_v34 }
0x164a   :  { %v3648_v2 = vsel %vm9248_vm14, %v3641_v8, %v3647_v47 }
0x164b   :  { %v3649_v17 = vsel %vm9249_vm15, %v3642_v53, %v3648_v2 }
0x164f   :  { %v3629_v32 = vpop.permute.xlu1 %3628 }
0x1650   :  { %v3632_v3 = vpop.permute.xlu0 %3631  ;;  %v3643_v48 = vperm.slane %v3629_v32, %v9240_v34 }
0x1651   :  { %v3644_v26 = vperm.slane %v3632_v3, %v9240_v34 }
0x1652   :  { %v3650_v57 = vsel %vm9250_vm8, %v3643_v48, %v3649_v17 }
0x1653   :  { %v3651_v39 = vsel %vm9251_vm9, %v3644_v26, %v3650_v57 }
0x1657   :  { %v3635_v21 = vpop.permute.xlu1 %3634 }
0x1658   :  { %v3638_v42 = vpop.permute.xlu0 %3637  ;;  %v3645_v52 = vperm.slane %v3635_v21, %v9240_v34 }
0x1659   :  { %v3646_v25 = vperm.slane %v3638_v42, %v9240_v34 }
0x165a   :  { %v3652_v22 = vsel %vm9252_vm6, %v3645_v52, %v3651_v39 }
0x165b   :  { %v3653_v61 = vsel %vm9253_vm10, %v3646_v25, %v3652_v22 }
0x165c   :  { %v3655_v58 = vsel %vm9254_vm7, %v3653_v61, 0.0 }
0x165d   :  { %3656 = vadd.xlane.f32.xlu1 %v3655_v58 }
0x16d0   :  { %v3657_v5 = vpop.xlane.xlu1 %3656 }
0x16d1   :  { %v3659_v8 = vperm.slane %v3657_v5, 0  ;;  %v3660_v32 = vperm.slane %v3657_v5, 1  ;;  %v8120_v3 = vperm.slane %v3657_v5, 2  ;;  %v8122_v47 = vperm.slane %v3657_v5, 3 }
0x16d2   :  { %v8124_v53 = vperm.slane %v3657_v5, 5  ;;  %v8127_v2 = vperm.slane %v3657_v5, 7  ;;  %v8131_v57 = vperm.slane %v3657_v5, 4  ;;  %v8133_v52 = vperm.slane %v3657_v5, 6 }
0x16d3   :  { %5686 = vrcp.f32 %v3659_v8  ;;  %v3699_v48 = vand.u32 2147483647, %v3660_v32  ;;  %v3701_v26 = vand.u32 2147483648, %v3660_v32  ;;  %v3684_v21 = vand.u32 2147483647, %v3659_v8 }
0x16d4   :  { %5688 = vrcp.f32 %v3660_v32  ;;  %vm3695_vm3 = vweird.f32 %v3660_v32  ;;  %vm3680_vm5 = vweird.f32 %v3659_v8  ;;  %v3686_v61 = vand.u32 2147483648, %v3659_v8 }
0x16d5   :  { %5690 = vrcp.f32 %v8120_v3  ;;  %vm8140_vm1 = vcmp.eq.f32.partialorder %v3699_v48, 8.507059e+37  ;;  %v3702_v6 = vor.u32 1.1754944e-38, %v3701_v26  ;;  %vm8147_vm11 = vcmp.eq.f32.partialorder %v3684_v21, 8.507059e+37 }
0x16d6   :  { %5692 = vrcp.f32 %v8122_v47  ;;  %vm3755_vm4 = vweird.f32 %v8124_v53  ;;  %v3687_v45 = vor.u32 1.1754944e-38, %v3686_v61  ;;  %v3716_v60 = vand.u32 2147483648, %v8120_v3 }
0x16d7   :  { %5694 = vrcp.f32 %v8124_v53  ;;  %vm3710_vm9 = vweird.f32 %v8120_v3 }
0x16d8   :  { %5696 = vrcp.f32 %v8127_v2  ;;  %v3717_v34 = vor.u32 1.1754944e-38, %v3716_v60 }
0x16d9   :  { %v5687_v17 = vpop.eup %5686  ;;  %5698 = vrcp.f32 %v8131_v57 }
0x16da   :  { %v5689_v42 = vpop.eup %5688  ;;  %v3676_v25 = vmul.f32 %v5687_v17, %v3659_v8  ;;  %vm3681_vm12 = vweird.f32 %v5687_v17  ;;  %5700 = vrcp.f32 %v8133_v52 }
0x16db   :  { %v8136_v39 = vpop.eup %5690  ;;  %v3691_v22 = vmul.f32 %v5689_v42, %v3660_v32  ;;  %vm3696_vm2 = vweird.f32 %v5689_v42  ;;  %vm3682_vm13 = vmor %vm3680_vm5, %vm3681_vm12  ;;  %v3714_v32 = vand.u32 2147483647, %v8120_v3 }
0x16dc   :  { %v8138_v58 = vpop.eup %5692  ;;  %v3677_v9 = vsub.f32 1.0, %v3676_v25  ;;  %v3706_v5 = vmul.f32 %v8136_v39, %v8120_v3  ;;  %vm3711_vm14 = vweird.f32 %v8136_v39  ;;  %vm3697_vm15 = vmor %vm3695_vm3, %vm3696_vm2 }
0x16dd   :  { %v3692_v36 = vsub.f32 1.0, %v3691_v22  ;;  %v5695_v44 = vpop.eup %5694  ;;  %v3721_v26 = vmul.f32 %v8138_v58, %v8122_v47  ;;  %v3761_v22 = vand.u32 2147483648, %v8124_v53  ;;  %vm3712_vm6 = vmor %vm3710_vm9, %vm3711_vm14  ;;  %vm3715_vm7 = vcmp.eq.f32.partialorder %v3714_v32, 8.507059e+37 }
0x16de   :  { %v3678_v43 = vmul.f32 %v5687_v17, %v3677_v9  ;;  %v3707_v48 = vsub.f32 1.0, %v3706_v5  ;;  %v3751_v46 = vmul.f32 %v5695_v44, %v8124_v53  ;;  %v8155_v51 = vpop.eup %5696  ;;  %vm3756_vm8 = vweird.f32 %v5695_v44 }
0x16df   :  { %v3693_v25 = vmul.f32 %v5689_v42, %v3692_v36  ;;  %v3781_v36 = vmul.f32 %v8155_v51, %v8127_v2  ;;  %v3722_v62 = vsub.f32 1.0, %v3721_v26  ;;  %v8166_v55 = vpop.eup %5698  ;;  %vm3757_vm10 = vmor %vm3755_vm4, %vm3756_vm8  ;;  %vm3726_vm5 = vweird.f32 %v8138_v58 }
0x16e0   :  { %v3679_v21 = vadd.f32 %v5687_v17, %v3678_v43  ;;  %v3708_v30 = vmul.f32 %v8136_v39, %v3707_v48  ;;  %v3752_v5 = vsub.f32 1.0, %v3751_v46  ;;  %v5701_v26 = vpop.eup %5700  ;;  %vm3785_vm4 = vweird.f32 %v8127_v2 }
0x16e1   :  { %v3694_v9 = vadd.f32 %v5689_v42, %v3693_v25  ;;  %v3782_v46 = vsub.f32 1.0, %v3781_v36  ;;  %v3723_v24 = vmul.f32 %v8138_v58, %v3722_v62  ;;  %vm3740_vm8 = vweird.f32 %v8131_v57 }
0x16e2   :  { %v3683_v61 = vsel %vm3682_vm13, %v5687_v17, %v3679_v21  ;;  %v3709_v43 = vadd.f32 %v8136_v39, %v3708_v30  ;;  %v3753_v25 = vmul.f32 %v5695_v44, %v3752_v5  ;;  %v3791_v21 = vand.u32 2147483648, %v8127_v2 }
0x16e3   :  { %v3698_v48 = vsel %vm3697_vm15, %v5689_v42, %v3694_v9  ;;  %v3688_v8 = vsel %vm8147_vm11, %v3687_v45, %v3683_v61  ;;  %v3759_v42 = vand.u32 2147483647, %v8124_v53  ;;  %v3724_v53 = vadd.f32 %v8138_v58, %v3723_v24 }
0x16e4   :  { %v3703_v15 = vsel %vm8140_vm1, %v3702_v6, %v3698_v48  ;;  %v3689_v41 = vmul.f32 %v8079_v29, %v3688_v8  ;;  %v3754_v17 = vadd.f32 %v5695_v44, %v3753_v25  ;;  %v3713_v45 = vsel %vm3712_vm6, %v8136_v39, %v3709_v43 }
0x16e5   :  { %v3704_v30 = vmul.f32 %v8081_v4, %v3703_v15  ;;  %v3736_v6 = vmul.f32 %v8166_v55, %v8131_v57  ;;  %v3783_v29 = vmul.f32 %v8155_v51, %v3782_v46  ;;  %v3762_v4 = vor.u32 1.1754944e-38, %v3761_v22 }
0x16e6   :  { %3797 = vperm.xlu0 %5458, %v3689_v41   ;;  %v3758_v15 = vsel %vm3757_vm10, %v5695_v44, %v3754_v17  ;;  %vm3760_vm3 = vcmp.eq.f32.partialorder %v3759_v42, 8.507059e+37  ;;  %v3718_v41 = vsel %vm3715_vm7, %v3717_v34, %v3713_v45  ;;  %vm3786_vm1 = vweird.f32 %v8155_v51 }
0x16e7   :  { %3802 = vperm.xlu2 %5457, %v3704_v30   ;;  %v3763_v3 = vsel %vm3760_vm3, %v3762_v4, %v3758_v15  ;;  %v3737_v39 = vsub.f32 1.0, %v3736_v6  ;;  %v3784_v62 = vadd.f32 %v8155_v51, %v3783_v29  ;;  %v3731_v44 = vand.u32 2147483648, %v8122_v47  ;;  %vm3787_vm2 = vmor %vm3785_vm4, %vm3786_vm1 }
0x16e8   :  { %v3719_v60 = vmul.f32 %v8085_v63, %v3718_v41  ;;  %vm3725_vm11 = vweird.f32 %v8122_v47  ;;  %v3729_v22 = vand.u32 2147483647, %v8122_v47  ;;  %v3764_v9 = vmul.f32 %v8094_v1, %v3763_v3 }
0x16e9   :  { %v3789_v5 = vand.u32 2147483647, %v8127_v2  ;;  %vm3727_vm12 = vmor %vm3725_vm11, %vm3726_vm5  ;;  %v3738_v61 = vmul.f32 %v8166_v55, %v3737_v39  ;;  %v3766_v63 = vmul.f32 %v5701_v26, %v8133_v52  ;;  %v3788_v43 = vsel %vm3787_vm2, %v8155_v51, %v3784_v62 }
0x16ea   :  { %v3728_v36 = vsel %vm3727_vm12, %v8138_v58, %v3724_v53  ;;  %v3732_v48 = vor.u32 1.1754944e-38, %v3731_v44  ;;  %v3792_v47 = vor.u32 1.1754944e-38, %v3791_v21  ;;  %vm3730_vm13 = vcmp.eq.f32.partialorder %v3729_v22, 8.507059e+37 }
0x16eb   :  { %vm3790_vm14 = vcmp.eq.f32.partialorder %v3789_v5, 8.507059e+37  ;;  %v3739_v2 = vadd.f32 %v8166_v55, %v3738_v61  ;;  %vm3741_vm15 = vweird.f32 %v8166_v55  ;;  %v3767_v25 = vsub.f32 1.0, %v3766_v63 }
0x16ec   :  { %v3733_v1 = vsel %vm3730_vm13, %v3732_v48, %v3728_v36  ;;  %v3793_v8 = vsel %vm3790_vm14, %v3792_v47, %v3788_v43  ;;  %v3746_v58 = vand.u32 2147483648, %v8131_v57  ;;  %v3744_v32 = vand.u32 2147483647, %v8131_v57  ;;  %vm3742_vm9 = vmor %vm3740_vm8, %vm3741_vm15 }
0x16ed   :  { %v3734_v46 = vmul.f32 %v8087_v59, %v3733_v1  ;;  %v3794_v51 = vmul.f32 %v8100_v37, %v3793_v8  ;;  %v3743_v30 = vsel %vm3742_vm9, %v8166_v55, %v3739_v2  ;;  %v3768_v17 = vmul.f32 %v5701_v26, %v3767_v25 }
0x16ee   :  { %3807 = vperm.xlu0 %5458, %v3719_v60   ;;  %v3747_v42 = vor.u32 1.1754944e-38, %v3746_v58  ;;  %vm3745_vm6 = vcmp.eq.f32.partialorder %v3744_v32, 8.507059e+37  ;;  %vm3771_vm10 = vweird.f32 %v5701_v26  ;;  %v3776_v6 = vand.u32 2147483648, %v8133_v52 }
0x16ef   :  { %3822 = vperm.xlu2 %5457, %v3764_v9   ;;  %v3769_v24 = vadd.f32 %v5701_v26, %v3768_v17  ;;  %vm3770_vm7 = vweird.f32 %v8133_v52  ;;  %v3774_v57 = vand.u32 2147483647, %v8133_v52  ;;  %vm9259_vm1 = vcmask 1042434  }
0x16f0   :  { %v3748_v45 = vsel %vm3745_vm6, %v3747_v42, %v3743_v30  ;;  %vm3772_vm3 = vmor %vm3770_vm7, %vm3771_vm10  ;;  %v3777_v15 = vor.u32 1.1754944e-38, %v3776_v6  ;;  %vm9260_vm11 = vcmask 1043459   ;;  %vm9261_vm4 = vcmask 1044484  }
0x16f1   :  { %v3749_v59 = vmul.f32 %v8092_v10, %v3748_v45  ;;  %v3773_v37 = vsel %vm3772_vm3, %v5701_v26, %v3769_v24  ;;  %vm3775_vm5 = vcmp.eq.f32.partialorder %v3774_v57, 8.507059e+37  ;;  %v8220_v10 = vld [vmem:[%s8756_s1] sm:$0xff]  ;;  %vm9262_vm12 = vcmask 1045509  }
0x16f2   :  { %v3778_v55 = vsel %vm3775_vm5, %v3777_v15, %v3773_v37  ;;  %vm9263_vm2 = vcmask 1046534   ;;  %vm9264_vm13 = vcmask 1047559   ;;  %vm9294_vm5 = vmmov %vm9259_vm1 }
0x16f3   :  { %v3779_v34 = vmul.f32 %v8098_v16, %v3778_v55 }
0x16f6   :  { %3812 = vperm.xlu0 %5458, %v3734_v46  }
0x16f7   :  { %3832 = vperm.xlu2 %5457, %v3794_v51  }
0x16fe   :  { %3817 = vperm.xlu0 %5458, %v3749_v59  }
0x1706   :  { %3827 = vperm.xlu0 %5458, %v3779_v34  }
0x1741   :  { %v3803_v29 = vpop.permute.xlu2 %3802 }
0x1742   :  { %v3836_v39 = vmul.f32 %v8016_v14, %v3803_v29 }
0x1744   :  { %v3849_v44 = vrot.slane %v3836_v39, 4 }
0x1746   :  { %v3850_v36 = vadd.f32 %v3849_v44, %v3836_v39 }
0x1748   :  { %v3851_v14 = vrot.slane %v3850_v36, 2 }
0x1749   :  { %v3823_v41 = vpop.permute.xlu2 %3822 }
0x174a   :  { %v3840_v60 = vmul.f32 %v7927_v23, %v3823_v41  ;;  %v3852_v32 = vadd.f32 %v3851_v14, %v3850_v36 }
0x174c   :  { %v3873_v43 = vrot.slane %v3840_v60, 4  ;;  %v3853_v24 = vrot.slane %v3852_v32, 1 }
0x174e   :  { %v3874_v2 = vadd.f32 %v3873_v43, %v3840_v60 }
0x1750   :  { %v3875_v17 = vrot.slane %v3874_v2, 2 }
0x1751   :  { %v3833_v16 = vpop.permute.xlu2 %3832 }
0x1752   :  { %v3842_v61 = vmul.f32 %v7933_v49, %v3833_v16  ;;  %v3876_v37 = vadd.f32 %v3875_v17, %v3874_v2 }
0x1754   :  { %v3885_v1 = vrot.slane %v3842_v61, 4  ;;  %v3877_v39 = vrot.slane %v3876_v37, 1 }
0x1756   :  { %v3886_v51 = vadd.f32 %v3885_v1, %v3842_v61  ;;  %v3878_v36 = vadd.f32 %v3877_v39, %v3876_v37 }
0x1758   :  { %v3798_v4 = vpop.permute.xlu0 %3797  ;;  %v3887_v6 = vrot.slane %v3886_v51, 2  ;;  %v3900_v1 = vpack.c.bf16 %v3878_v36, %v3878_v36  ;;  %v5363_v36 = vld [vmem:[#allocation3 + $0x68] sm:$0xf0] }
0x1759   :  { %v3835_v3 = vmul.f32 %v8220_v10, %v3798_v4 }
0x175a   :  { %v3888_v41 = vadd.f32 %v3887_v6, %v3886_v51  ;;  %v3916_v51 = vunpack.c.l.b16 %v3900_v1  ;;  %v9276_v6 = vld [vmem:[#allocation54_spill] sm:$0xff] }
0x175b   :  { %v3843_v26 = vrot.slane %v3835_v3, 4 }
0x175d   :  { %v3844_v21 = vadd.f32 %v3843_v26, %v3835_v3 }
0x175f   :  { %v3845_v48 = vrot.slane %v3844_v21, 2 }
0x1760   :  { %v3808_v52 = vpop.permute.xlu0 %3807 }
0x1761   :  { %v3837_v53 = vmul.f32 %v7920_v27, %v3808_v52  ;;  %v3846_v25 = vadd.f32 %v3845_v48, %v3844_v21  ;;  %v3889_v21 = vrot.slane %v3888_v41, 1 }
0x1763   :  { %v3855_v62 = vrot.slane %v3837_v53, 4  ;;  %v3847_v49 = vrot.slane %v3846_v25, 1  ;;  %v3890_v48 = vadd.f32 %v3889_v21, %v3888_v41  ;;  %v5371_v21 = vld [vmem:[#allocation3 + $0x78] sm:$0xf0] }
0x1765   :  { %v3856_v9 = vadd.f32 %v3855_v62, %v3837_v53  ;;  %v3848_v15 = vadd.f32 %v3847_v49, %v3846_v25 }
0x1767   :  { %v3857_v27 = vrot.slane %v3856_v9, 2  ;;  %v3895_v26 = vpack.c.bf16 %v3848_v15, %v3848_v15 }
0x1768   :  { %v3813_v22 = vpop.permute.xlu0 %3812 }
0x1769   :  { %v3838_v5 = vmul.f32 %v8026_v50, %v3813_v22  ;;  %v3858_v23 = vadd.f32 %v3857_v27, %v3856_v9  ;;  %v3911_v61 = vunpack.c.l.b16 %v3895_v26  ;;  %v9278_v26 = vld [vmem:[#allocation55_spill] sm:$0xff] }
0x176b   :  { %v3861_v63 = vrot.slane %v3838_v5, 4  ;;  %v3859_v42 = vrot.slane %v3858_v23, 1 }
0x176d   :  { %v3862_v47 = vadd.f32 %v3861_v63, %v3838_v5  ;;  %v3860_v34 = vadd.f32 %v3859_v42, %v3858_v23 }
0x176f   :  { %v3863_v8 = vrot.slane %v3862_v47, 2  ;;  %v3897_v62 = vpack.c.bf16 %v3860_v34, %v3860_v34 }
0x1770   :  { %v3818_v58 = vpop.permute.xlu0 %3817 }
0x1771   :  { %v3839_v46 = vmul.f32 %v8035_v28, %v3818_v58  ;;  %v3864_v50 = vadd.f32 %v3863_v8, %v3862_v47  ;;  %v3854_v28 = vadd.f32 %v3853_v24, %v3852_v32  ;;  %v3913_v63 = vunpack.c.l.b16 %v3897_v62 }
0x1772   :  { %v3902_v58 = vpack.c.bf16 %v3890_v48, %v3890_v48 }
0x1773   :  { %v3867_v30 = vrot.slane %v3839_v46, 4  ;;  %v3865_v59 = vrot.slane %v3864_v50, 1  ;;  %v3896_v60 = vpack.c.bf16 %v3854_v28, %v3854_v28 }
0x1775   :  { %v3868_v45 = vadd.f32 %v3867_v30, %v3839_v46  ;;  %v3866_v3 = vadd.f32 %v3865_v59, %v3864_v50  ;;  %v3918_v30 = vunpack.c.l.b16 %v3902_v58  ;;  %v9277_v59 = vld [vmem:[#allocation22_spill] sm:$0xff] }
0x1777   :  { %v3869_v57 = vrot.slane %v3868_v45, 2  ;;  %v3898_v22 = vpack.c.bf16 %v3866_v3, %v3866_v3  ;;  %v5302_v3 = vld [vmem:[%s8755_s0 + $0x80] sm:$0xff] }
0x1778   :  { %v3828_v55 = vpop.permute.xlu0 %3827 }
0x1779   :  { %v3870_v29 = vadd.f32 %v3869_v57, %v3868_v45  ;;  %v3841_v4 = vmul.f32 %v8047_v11, %v3828_v55  ;;  %v3912_v11 = vunpack.c.l.b16 %v3896_v60  ;;  %v3914_v27 = vunpack.c.l.b16 %v3898_v22  ;;  %v5444_v60 = vld [vmem:[#allocation3 + $0x74] sm:$0xf] }
0x177a   :  { %v3981_v57 = vadd.f32 %v9277_v59, %v9276_v6 }
0x177b   :  { %v3871_v52 = vrot.slane %v3870_v29, 1  ;;  %v3879_v53 = vrot.slane %v3841_v4, 4  ;;  %v3919_v8 = vsel %vm290_vm0, %v3912_v11, %v3911_v61 }
0x177c   :  { %v3920_v2 = vsel %vm9259_vm1, %v3913_v63, %v3919_v8  ;;  %vm9295_vm1 = vmmov %vm9260_vm11 }
0x177d   :  { %v3872_v44 = vadd.f32 %v3871_v52, %v3870_v29  ;;  %v3880_v16 = vadd.f32 %v3879_v53, %v3841_v4  ;;  %v3921_v23 = vsel %vm9260_vm11, %v3914_v27, %v3920_v2  ;;  %v5440_v27 = vld [vmem:[#allocation3 + $0x54] sm:$0xf]  ;;  %vm9296_vm11 = vmmov %vm9261_vm4 }
0x177f   :  { %v3899_v9 = vpack.c.bf16 %v3872_v44, %v3872_v44  ;;  %v3881_v5 = vrot.slane %v3880_v16, 2 }
0x1781   :  { %v3882_v43 = vadd.f32 %v3881_v5, %v3880_v16  ;;  %v3915_v47 = vunpack.c.l.b16 %v3899_v9  ;;  %v5374_v9 = vor.u32 %v5444_v60, %v5371_v21  ;;  %v5442_v5 = vld [vmem:[#allocation3 + $0x64] sm:$0xf] }
0x1782   :  { %v5366_v11 = vor.u32 %v5442_v5, %v5363_v36 }
0x1783   :  { %v3883_v14 = vrot.slane %v3882_v43, 1  ;;  %v3922_v46 = vsel %vm9261_vm4, %v3915_v47, %v3921_v23  ;;  %v5355_v47 = vld [vmem:[#allocation3 + $0x58] sm:$0xf0]  ;;  %v5438_v23 = vld [vmem:[#allocation3 + $0x44] sm:$0xf]  ;;  %vm9297_vm4 = vmmov %vm9262_vm12 }
0x1784   :  { %v3923_v17 = vsel %vm9262_vm12, %v3916_v51, %v3922_v46  ;;  %v5358_v2 = vor.u32 %v5440_v27, %v5355_v47  ;;  %v5347_v46 = vld [vmem:[#allocation3 + $0x48] sm:$0xf0]  ;;  %v8307_v27 = vld [vmem:[%s8756_s1 + $0x18] sm:$0xff]  ;;  %vm9298_vm12 = vmmov %vm9263_vm2 }
0x1785   :  { %v3884_v25 = vadd.f32 %v3883_v14, %v3882_v43 }
0x1787   :  { %v3901_v32 = vpack.c.bf16 %v3884_v25, %v3884_v25 }
0x1789   :  { %v3917_v50 = vunpack.c.l.b16 %v3901_v32 }
0x178b   :  { %v3924_v49 = vsel %vm9263_vm2, %v3917_v50, %v3923_v17  ;;  %vm9299_vm2 = vmmov %vm9264_vm13 }
0x178c   :  { %v3925_v42 = vsel %vm9264_vm13, %v3918_v30, %v3924_v49  ;;  %v5350_v30 = vor.u32 %v5438_v23, %v5347_v46  ;;  %v5436_v49 = vld [vmem:[#allocation3 + $0x34] sm:$0xf]  ;;  %vm9300_vm13 = vcmask 64512  }
0x178d   :  { %v3926_v45 = vpack.c.b16 %v3925_v42, %v3925_v42  ;;  %v5339_v42 = vld [vmem:[#allocation3 + $0x38] sm:$0xf0] }
0x178f   :  { %3936 = vmatmul.bf16.vlgmr.msra.gmra.mxu2 %v3926_v45  ;;  %3949 = vmatmul.bf16.vlgmr.msra.gmra.mxu3 %v3926_v45 }
0x1790   :  { %3962 = vmatmul.bf16.vlgmr.msrb.gmra.mxu0 %v3926_v45  ;;  %4570 = vmatpush.bf16.msra.mxu3 %v6433_v20  ;;  %v9267_v20 = vld [vmem:[#allocation41_spill] sm:$0xff]  ;;  %v9279_v45 = vld [vmem:[#allocation56_spill] sm:$0xff] }
0x1791   :  { %4553 = vmatpush.bf16.msra.mxu2 %v6367_v33  ;;  %4583 = vmatpush.bf16.msrb.mxu0 %v6475_v54  ;;  %v9265_v33 = vld [vmem:[#allocation34_spill] sm:$0xff]  ;;  %v9270_v54 = vld [vmem:[#allocation44_spill] sm:$0xff] }
0x1794   :  { %4571 = vmatpush.bf16.msra.mxu3 %v6457_v12  ;;  %v9269_v12 = vld [vmem:[#allocation46_spill] sm:$0xff] }
0x1795   :  { %4554 = vmatpush.bf16.msra.mxu2 %v6385_v40  ;;  %4584 = vmatpush.bf16.msrb.mxu0 %v6503_v18  ;;  %v9266_v40 = vld [vmem:[#allocation43_spill] sm:$0xff] }
0x1796   :  { %v9273_v18 = vld [vmem:[#allocation47_spill] sm:$0xff] }
0x1798   :  { %4572 = vmatpush.bf16.msra.mxu3 %v6488_v35  ;;  %v9272_v35 = vld [vmem:[#allocation49_spill] sm:$0xff] }
0x1799   :  { %4555 = vmatpush.bf16.msra.mxu2 %v6406_v31  ;;  %4585 = vmatpush.bf16.msrb.mxu0 %v6538_v56  ;;  %v9268_v31 = vld [vmem:[#allocation35_spill] sm:$0xff] }
0x179a   :  { %v9275_v56 = vld [vmem:[#allocation51_spill] sm:$0xff] }
0x179c   :  { %4573 = vmatpush.bf16.msra.mxu3 %v6519_v38  ;;  %v9274_v38 = vld [vmem:[#allocation38_spill] sm:$0xff] }
0x179d   :  { %4556 = vmatpush.bf16.msra.mxu2 %v6431_v0  ;;  %4586 = vmatpush.bf16.msrb.mxu0 %v6568_v13  ;;  %v9271_v0 = vld [vmem:[#allocation36_spill] sm:$0xff] }
0x179f   :  { %3992 = vmatmul.bf16.vlgmr.msrb.gmra.mxu2 %v8003_v19  ;;  %4005 = vmatmul.bf16.vlgmr.msrb.gmra.mxu3 %v8003_v19 }
0x17a0   :  { %4574 = vmatpush.bf16.msra.mxu3 %v8970_v7  ;;  %v5301_v7 = vld [vmem:[%s8755_s0 + $0x78] sm:$0xff] }
0x17a1   :  { %4557 = vmatpush.bf16.msra.mxu2 %v9265_v33  ;;  %4587 = vmatpush.bf16.msrb.mxu0 %v9266_v40  ;;  %v5303_v40 = vld [vmem:[%s8755_s0 + $0x88] sm:$0xff] }
0x17a4   :  { %4575 = vmatpush.bf16.msra.mxu3 %v9267_v20 }
0x17a5   :  { %4558 = vmatpush.bf16.msra.mxu2 %v9268_v31  ;;  %4588 = vmatpush.bf16.msrb.mxu0 %v9269_v12  ;;  %v5342_v31 = vor.u32 %v5436_v49, %v5339_v42  ;;  %v5434_v12 = vld [vmem:[#allocation3 + $0x24] sm:$0xf]  ;;  %v9284_v49 = vld [vmem:[#allocation39_spill] sm:$0xff] }
0x17a8   :  { %4576 = vmatpush.bf16.msra.mxu3 %v9270_v54  ;;  %v5331_v54 = vld [vmem:[#allocation3 + $0x28] sm:$0xf0] }
0x17a9   :  { %4559 = vmatpush.bf16.msra.mxu2 %v9271_v0  ;;  %4589 = vmatpush.bf16.msrb.mxu0 %v9272_v35 }
0x17ac   :  { %4577 = vmatpush.bf16.msra.mxu3 %v9273_v18 }
0x17ad   :  { %4560 = vmatpush.bf16.msra.mxu2 %v9274_v38  ;;  %4590 = vmatpush.bf16.msrb.mxu0 %v9275_v56  ;;  %v5334_v56 = vor.u32 %v5434_v12, %v5331_v54  ;;  %v8345_v54 = vld [vmem:[%s8756_s1 + $0x38] sm:$0xff] }
0x17b0   :  { %4798 = vmatpush.bf16.msrb.mxu3 %v5374_v9 }
0x17b4   :  { %4799 = vmatpush.bf16.msrb.mxu3 %v5366_v11 }
0x17b8   :  { %4800 = vmatpush.bf16.msrb.mxu3 %v5358_v2 }
0x17bc   :  { %4801 = vmatpush.bf16.msrb.mxu3 %v5350_v30 }
0x17c0   :  { %4802 = vmatpush.bf16.msrb.mxu3 %v5342_v31 }
0x17c4   :  { %4803 = vmatpush.bf16.msrb.mxu3 %v5334_v56 }
0x180d   :  { %v8263_v13 = vpop.f32.mrf.mxu0 }
0x180e   :  { %v3969_v35 = vadd.f32 %v5303_v40, %v8263_v13  ;;  %v8338_v40 = vld [vmem:[%s8756_s1 + $0x30] sm:$0xff] }
0x1812   :  { %v3937_v19 = vpop.f32.mrf.mxu2  ;;  %v3950_v24 = vpop.f32.mrf.mxu3 }
0x1813   :  { %v3967_v37 = vadd.f32 %v5301_v7, %v3937_v19  ;;  %v3968_v39 = vadd.f32 %v5302_v3, %v3950_v24  ;;  %v5432_v19 = vld [vmem:[#allocation3 + $0x14] sm:$0xf]  ;;  %v5323_v24 = vld [vmem:[#allocation3 + $0x18] sm:$0xf0] }
0x1815   :  { %v4010_v15 = vadd.f32 %v3981_v57, %v3967_v37  ;;  %v3965_v55 = vpop.f32.mrf.mxu0 }
0x1817   :  { %v5304_v34 = vmul.f32 -1.442695, %v4010_v15  ;;  %v5326_v15 = vor.u32 %v5432_v19, %v5323_v24  ;;  %v9286_v24 = vld [vmem:[#allocation15_spill] sm:$0xff] }
0x1819   :  { %5702 = vpow2.f32 %v5304_v34  ;;  %v5430_v34 = vld [vmem:[#allocation3 + $0x4] sm:$0xf]  ;;  %4804 = vmatpush.bf16.msrb.mxu3 %v5326_v15 }
0x181a   :  { %v3939_v29 = vpop.f32.mrf.mxu2  ;;  %v3952_v4 = vpop.f32.mrf.mxu3 }
0x181b   :  { %v5315_v29 = vld [vmem:[#allocation3 + $0x8] sm:$0xf0] }
0x181f   :  { %v5703_v28 = vpop.eup %5702 }
0x1820   :  { %v4014_v41 = vadd.f32 1.0, %v5703_v28 }
0x1822   :  { %5704 = vrcp.f32 %v4014_v41  ;;  %v3993_v52 = vpop.f32.mrf.mxu2  ;;  %v4006_v53 = vpop.f32.mrf.mxu3  ;;  %v4026_v1 = vand.u32 2147483648, %v4014_v41  ;;  %v4024_v8 = vand.u32 2147483647, %v4014_v41  ;;  %vm4020_vm15 = vweird.f32 %v4014_v41 }
0x1823   :  { %v3994_v62 = vadd.f32 %v3993_v52, %v9278_v26  ;;  %v4007_v33 = vadd.f32 %v4006_v53, %v9279_v45 }
0x1824   :  { %v4027_v50 = vor.u32 1.1754944e-38, %v4026_v1  ;;  %vm4025_vm9 = vcmp.eq.f32.partialorder %v4024_v8, 8.507059e+37  ;;  %v9281_v1 = vld [vmem:[#allocation57_spill] sm:$0xff]  ;;  %v9282_v8 = vld [vmem:[#allocation58_spill] sm:$0xff] }
0x1825   :  { %v4030_v44 = vadd.f32 %v3994_v62, %v3968_v39  ;;  %v9280_v39 = vld [vmem:[#allocation18_spill] sm:$0xff]  ;;  %v8313_v2 = vpack.c.bf16 %v9282_v8, %v9281_v1 }
0x1827   :  { %v5305_v16 = vmul.f32 -1.442695, %v4030_v44 }
0x1828   :  { %v5705_v22 = vpop.eup %5704 }
0x1829   :  { %5706 = vpow2.f32 %v5305_v16  ;;  %v4016_v61 = vmul.f32 %v5705_v22, %v4014_v41  ;;  %vm4021_vm14 = vweird.f32 %v5705_v22  ;;  %v5318_v41 = vor.u32 %v5430_v34, %v5315_v29 }
0x182a   :  { %v3995_v63 = vpop.f32.mrf.mxu2  ;;  %v4008_v43 = vpop.f32.mrf.mxu3  ;;  %vm4022_vm8 = vmor %vm4020_vm15, %vm4021_vm14 }
0x182b   :  { %v4017_v48 = vsub.f32 1.0, %v4016_v61  ;;  %4805 = vmatpush.bf16.msrb.mxu3 %v5318_v41  ;;  %v8294_v61 = vld [vmem:[%s8756_s1 + $0x10] sm:$0xff]  ;;  %v8300_v43 = vld [vmem:[%s8756_s1 + $0x8] sm:$0xff]  ;;  %vm9301_vm14 = vmmov %vm9294_vm5 }
0x182c   :  { %vm9302_vm15 = vmmov %vm9295_vm1 }
0x182d   :  { %v4018_v14 = vmul.f32 %v5705_v22, %v4017_v48 }
0x182f   :  { %v5707_v25 = vpop.eup %5706  ;;  %v4019_v58 = vadd.f32 %v5705_v22, %v4018_v14 }
0x1830   :  { %v4034_v32 = vadd.f32 1.0, %v5707_v25 }
0x1831   :  { %v4023_v51 = vsel %vm4022_vm8, %v5705_v22, %v4019_v58  ;;  %v8319_v58 = vld [vmem:[%s8756_s1 + $0x20] sm:$0xff]  ;;  %vm9303_vm8 = vmmov %vm9296_vm11 }
0x1832   :  { %5708 = vrcp.f32 %v4034_v32  ;;  %v4028_v17 = vsel %vm4025_vm9, %v4027_v50, %v4023_v51  ;;  %v4046_v59 = vand.u32 2147483648, %v4034_v32  ;;  %v4044_v37 = vand.u32 2147483647, %v4034_v32  ;;  %v8326_v51 = vld [vmem:[%s8756_s1 + $0x28] sm:$0xff]  ;;  %vm9304_vm9 = vmmov %vm9297_vm4 }
0x1833   :  { %v4050_v20 = vmul.f32 %v4028_v17, %v4007_v33  ;;  %vm4040_vm10 = vweird.f32 %v4034_v32  ;;  %v9283_v17 = vld [vmem:[#allocation59_spill] sm:$0xff] }
0x1834   :  { %v4047_v13 = vor.u32 1.1754944e-38, %v4046_v59  ;;  %vm4045_vm3 = vcmp.eq.f32.partialorder %v4044_v37, 8.507059e+37  ;;  %v8332_v42 = vpack.c.bf16 %v9284_v49, %v9283_v17 }
0x1835   :  { %v4051_v38 = vadd.f32 %v4050_v20, %v3969_v35 }
0x1837   :  { %5710 = vtanh.f32 %v4051_v38  ;;  %v9285_v38 = vld [vmem:[#allocation14_spill] sm:$0xff] }
0x1838   :  { %v5709_v0 = vpop.eup %5708 }
0x1839   :  { %v4036_v18 = vmul.f32 %v5709_v0, %v4034_v32  ;;  %vm4041_vm6 = vweird.f32 %v5709_v0 }
0x183a   :  { %vm4042_vm7 = vmor %vm4040_vm10, %vm4041_vm6 }
0x183b   :  { %v4037_v7 = vsub.f32 1.0, %v4036_v18  ;;  %vm9305_vm6 = vmmov %vm9298_vm12 }
0x183c   :  { %vm9306_vm10 = vmmov %vm9299_vm2 }
0x183d   :  { %v4038_v57 = vmul.f32 %v5709_v0, %v4037_v7  ;;  %v5711_v52 = vpop.eup %5710 }
0x183f   :  { %v4039_v55 = vadd.f32 %v5709_v0, %v4038_v57  ;;  %v9287_v57 = vld [vmem:[#allocation9_spill] sm:$0xff] }
0x1841   :  { %v4043_v4 = vsel %vm4042_vm7, %v5709_v0, %v4039_v55  ;;  %v9288_v55 = vld [vmem:[#allocation10_spill] sm:$0xff]  ;;  %vm9307_vm7 = vmmov %vm9300_vm13 }
0x1842   :  { %v4048_v28 = vsel %vm4045_vm3, %v4047_v13, %v4043_v4  ;;  %v9289_v4 = vld [vmem:[#allocation11_spill] sm:$0xff] }
0x1843   :  { %v4053_v3 = vsub.f32 1.0, %v4048_v28  ;;  %v4055_v62 = vmul.f32 %v4048_v28, %v9280_v39 }
0x1845   :  { %v4054_v53 = vmul.f32 %v5711_v52, %v4053_v3  ;;  %v9290_v52 = vld [vmem:[#allocation12_spill] sm:$0xff] }
0x1847   :  { %v8280_v44 = vadd.f32 %v4055_v62, %v4054_v53  ;;  %v9291_v62 = vld [vmem:[#allocation13_spill] sm:$0xff] }
0x1849   :  { %v8284_v16 = vpack.c.bf16 %v8280_v44, %v8280_v44  ;;  %v4066_v60 = vperm.slane %v8280_v44, 0  ;;  %v4060_v21 = vrot.slane %v8280_v44, 2  ;;  %v4059_v22 = vrot.slane %v8280_v44, 1 }
0x184a   :  { %v4061_v48 = vrot.slane %v8280_v44, 3  ;;  %v4062_v14 = vrot.slane %v8280_v44, 4  ;;  %v4063_v46 = vrot.slane %v8280_v44, 5  ;;  %v4064_v30 = vrot.slane %v8280_v44, 6 }
0x184b   :  { %4578 = vmatmul.bf16.vlgmr.msra.gmra.mxu3 %v8284_v16  ;;  %v4082_v9 = vmul.f32 %v8220_v10, %v4066_v60  ;;  %v4068_v5 = vperm.slane %v4060_v21, 0  ;;  %v4067_v36 = vperm.slane %v4059_v22, 0  ;;  %v4065_v31 = vrot.slane %v8280_v44, 7  ;;  %v9292_v22 = vld [vmem:[#allocation16_spill] sm:$0xff] }
0x184c   :  { %v4069_v10 = vperm.slane %v4061_v48, 0  ;;  %v4070_v25 = vperm.slane %v4062_v14, 0  ;;  %v4071_v32 = vperm.slane %v4063_v46, 0  ;;  %v4072_v33 = vperm.slane %v4064_v30, 0  ;;  %v9293_v48 = vld [vmem:[#allocation17_spill] sm:$0xff] }
0x184d   :  { %4090 = vadd.xlane.f32.xlu0 %v4082_v9  ;;  %v4084_v63 = vmul.f32 %v8294_v61, %v4068_v5  ;;  %v4083_v11 = vmul.f32 %v8300_v43, %v4067_v36  ;;  %v4073_v12 = vperm.slane %v4065_v31, 0  ;;  %v8350_v35 = vpack.c.bf16 %v8280_v44, %v9280_v39 }
0x184e   :  { %v4085_v47 = vmul.f32 %v8307_v27, %v4069_v10  ;;  %v4086_v23 = vmul.f32 %v8319_v58, %v4070_v25  ;;  %v4087_v50 = vmul.f32 %v8326_v51, %v4071_v32  ;;  %v4088_v20 = vmul.f32 %v8338_v40, %v4072_v33 }
0x184f   :  { %4094 = vadd.xlane.f32.xlu2 %v4084_v63  ;;  %4092 = vadd.xlane.f32.xlu1 %v4083_v11  ;;  %v4089_v0 = vmul.f32 %v8345_v54, %v4073_v12 }
0x1857   :  { %4096 = vadd.xlane.f32.xlu1 %v4085_v47 }
0x185b   :  { %4806 = vmatmul.bf16.vlgmr.msrb.gmra.mxu3 %v8313_v2 }
0x185f   :  { %4098 = vadd.xlane.f32.xlu1 %v4086_v23 }
0x1867   :  { %4100 = vadd.xlane.f32.xlu1 %v4087_v50 }
0x186b   :  { %4811 = vmatmul.bf16.gmra.mxu3 %v8332_v42 }
0x186f   :  { %4102 = vadd.xlane.f32.xlu1 %v4088_v20 }
0x1877   :  { %4104 = vadd.xlane.f32.xlu1 %v4089_v0 }
0x187b   :  { %4816 = vmatmul.bf16.gmra.mxu3 %v8350_v35 }
0x18c0   :  { %v4091_v18 = vpop.xlane.xlu0 %4090 }
0x18c1   :  { %v4106_v56 = vadd.f32 %v4091_v18, %v9285_v38 }
0x18c2   :  { %v4095_v7 = vpop.xlane.xlu2 %4094  ;;  %v4093_v19 = vpop.xlane.xlu1 %4092 }
0x18c3   :  { %v4108_v59 = vadd.f32 %v4095_v7, %v9286_v24  ;;  %v4107_v37 = vadd.f32 %v4093_v19, %v9287_v57  ;;  %4123 = vperm.xlu0 %5458, %v4106_v56  }
0x18c5   :  { %4129 = vperm.xlu1 %5459, %v4108_v59   ;;  %4126 = vperm.xlu2 %5457, %v4107_v37  }
0x18ca   :  { %v4097_v15 = vpop.xlane.xlu1 %4096 }
0x18cb   :  { %v4109_v34 = vadd.f32 %v4097_v15, %v9288_v55 }
0x18cd   :  { %4132 = vperm.xlu0 %5458, %v4109_v34  }
0x18ce   :  { %v8357_v29 = vpop.f32.mrf.mxu3 }
0x18d2   :  { %v4099_v13 = vpop.xlane.xlu1 %4098 }
0x18d3   :  { %v4110_v28 = vadd.f32 %v4099_v13, %v9289_v4 }
0x18d5   :  { %4135 = vperm.xlu0 %5458, %v4110_v28  }
0x18d6   :  { %v4581_v41 = vpop.f32.mrf.mxu3 }
0x18da   :  { %v4101_v3 = vpop.xlane.xlu1 %4100 }
0x18db   :  { %v4111_v53 = vadd.f32 %v4101_v3, %v9290_v52 }
0x18dd   :  { %4138 = vperm.xlu2 %5457, %v4111_v53  }
0x18e2   :  { %v4103_v39 = vpop.xlane.xlu1 %4102 }
0x18e3   :  { %v4112_v60 = vadd.f32 %v4103_v39, %v9291_v62 }
0x18e5   :  { %4141 = vperm.xlu1 %5459, %v4112_v60  }
0x18ea   :  { %v4105_v21 = vpop.xlane.xlu1 %4104 }
0x18eb   :  { %v4113_v9 = vadd.f32 %v4105_v21, %v9292_v22 }
0x18ed   :  { %4144 = vperm.xlu0 %5458, %v4113_v9  }
0x191f   :  { %v4127_v11 = vpop.permute.xlu2 %4126 }
0x1920   :  { %v4147_v47 = vperm.slane %v4127_v11, %v9293_v48 }
0x1935   :  { %v4124_v5 = vpop.permute.xlu0 %4123 }
0x1936   :  { %v4146_v10 = vperm.slane %v4124_v5, %v9293_v48 }
0x1937   :  { %v4130_v63 = vpop.permute.xlu1 %4129  ;;  %v4139_v32 = vpop.permute.xlu2 %4138 }
0x1938   :  { %v4148_v1 = vperm.slane %v4130_v63, %v9293_v48  ;;  %v4154_v8 = vsel %vm290_vm0, %v4147_v47, %v4146_v10  ;;  %v4151_v33 = vperm.slane %v4139_v32, %v9293_v48 }
0x193a   :  { %v4155_v50 = vsel %vm9294_vm5, %v4148_v1, %v4154_v8 }
0x193f   :  { %v4133_v36 = vpop.permute.xlu0 %4132 }
0x1940   :  { %v4149_v25 = vperm.slane %v4133_v36, %v9293_v48 }
0x1942   :  { %v4156_v30 = vsel %vm9295_vm1, %v4149_v25, %v4155_v50 }
0x1947   :  { %v4136_v14 = vpop.permute.xlu0 %4135 }
0x1948   :  { %v4150_v23 = vperm.slane %v4136_v14, %v9293_v48 }
0x194a   :  { %v4157_v17 = vsel %vm9296_vm11, %v4150_v23, %v4156_v30 }
0x194b   :  { %v4158_v12 = vsel %vm9297_vm4, %v4151_v33, %v4157_v17 }
0x1957   :  { %v4142_v46 = vpop.permute.xlu1 %4141 }
0x1958   :  { %v4152_v49 = vperm.slane %v4142_v46, %v9293_v48 }
0x195a   :  { %v4159_v0 = vsel %vm9298_vm12, %v4152_v49, %v4158_v12 }
0x195f   :  { %v4145_v20 = vpop.permute.xlu0 %4144 }
0x1960   :  { %v4153_v31 = vperm.slane %v4145_v20, %v9293_v48 }
0x1962   :  { %v4160_v18 = vsel %vm9299_vm2, %v4153_v31, %v4159_v0 }
0x1963   :  { %v4162_v38 = vsel %vm9300_vm13, %v4160_v18, -inf }
0x1964   :  { %4163 = vmax.xlane.f32.xlu2 %v4162_v38 }
0x19d7   :  { %v4164_v7 = vpop.xlane.xlu2 %4163 }
0x19d8   :  { %v4166_v19 = vperm.slane %v4164_v7, 0  ;;  %v4167_v24 = vperm.slane %v4164_v7, 1  ;;  %v4168_v57 = vperm.slane %v4164_v7, 2  ;;  %v4169_v13 = vperm.slane %v4164_v7, 3 }
0x19d9   :  { %v4170_v39 = vperm.slane %v4164_v7, 4  ;;  %v4171_v21 = vperm.slane %v4164_v7, 5 }
0x19da   :  { %v4182_v15 = vsub.f32 %v4106_v56, %v4166_v19  ;;  %v4183_v55 = vsub.f32 %v4107_v37, %v4167_v24  ;;  %v4184_v3 = vsub.f32 %v4108_v59, %v4168_v57  ;;  %v4185_v52 = vsub.f32 %v4109_v34, %v4169_v13 }
0x19db   :  { %v4186_v63 = vsub.f32 %v4110_v28, %v4170_v39  ;;  %v4187_v56 = vsub.f32 %v4111_v53, %v4171_v21  ;;  %v4172_v59 = vperm.slane %v4164_v7, 6  ;;  %v4173_v34 = vperm.slane %v4164_v7, 7 }
0x19dc   :  { %v4190_v4 = vmul.f32 1.442695, %v4182_v15  ;;  %v4192_v41 = vmul.f32 1.442695, %v4183_v55  ;;  %v4194_v62 = vmul.f32 1.442695, %v4184_v3 }
0x19dd   :  { %v4196_v22 = vmul.f32 1.442695, %v4185_v52  ;;  %v4198_v37 = vmul.f32 1.442695, %v4186_v63  ;;  %v4200_v11 = vmul.f32 1.442695, %v4187_v56  ;;  %v4188_v14 = vsub.f32 %v4112_v60, %v4172_v59 }
0x19de   :  { %5712 = vpow2.f32 %v4190_v4  ;;  %v4189_v28 = vsub.f32 %v4113_v9, %v4173_v34  ;;  %v4931_v52 = vld [vmem:[%s8762_s7] sm:$0xff] }
0x19df   :  { %5714 = vpow2.f32 %v4192_v41  ;;  %v4202_v1 = vmul.f32 1.442695, %v4188_v14 }
0x19e0   :  { %5716 = vpow2.f32 %v4194_v62  ;;  %v4204_v8 = vmul.f32 1.442695, %v4189_v28 }
0x19e1   :  { %5718 = vpow2.f32 %v4196_v22 }
0x19e2   :  { %5720 = vpow2.f32 %v4198_v37 }
0x19e3   :  { %5722 = vpow2.f32 %v4200_v11 }
0x19e4   :  { %v8379_v5 = vpop.eup %5712  ;;  %5724 = vpow2.f32 %v4202_v1 }
0x19e5   :  { %v8381_v36 = vpop.eup %5714  ;;  %4215 = vperm.xlu1 %5459, %v8379_v5   ;;  %5726 = vpow2.f32 %v4204_v8 }
0x19e6   :  { %4218 = vperm.xlu0 %5458, %v8381_v36   ;;  %v8385_v10 = vpop.eup %5716 }
0x19e7   :  { %v8387_v47 = vpop.eup %5718 }
0x19e8   :  { %v8391_v53 = vpop.eup %5720 }
0x19e9   :  { %v8393_v25 = vpop.eup %5722 }
0x19ea   :  { %v8397_v23 = vpop.eup %5724 }
0x19eb   :  { %v8399_v60 = vpop.eup %5726 }
0x19ed   :  { %4221 = vperm.xlu1 %5459, %v8385_v10  }
0x19ee   :  { %4224 = vperm.xlu0 %5458, %v8387_v47  }
0x19f5   :  { %4227 = vperm.xlu1 %5459, %v8391_v53  }
0x19f6   :  { %4230 = vperm.xlu0 %5458, %v8393_v25  }
0x19fd   :  { %4233 = vperm.xlu1 %5459, %v8397_v23  }
0x19fe   :  { %4236 = vperm.xlu0 %5458, %v8399_v60  }
0x1a57   :  { %v4216_v9 = vpop.permute.xlu1 %4215 }
0x1a58   :  { %v4219_v46 = vpop.permute.xlu0 %4218  ;;  %v4238_v17 = vperm.slane %v4216_v9, %v9293_v48 }
0x1a59   :  { %v4239_v30 = vperm.slane %v4219_v46, %v9293_v48 }
0x1a5b   :  { %v4246_v31 = vsel %vm290_vm0, %v4239_v30, %v4238_v17 }
0x1a5f   :  { %v4222_v32 = vpop.permute.xlu1 %4221 }
0x1a60   :  { %v4225_v50 = vpop.permute.xlu0 %4224  ;;  %v4240_v49 = vperm.slane %v4222_v32, %v9293_v48 }
0x1a61   :  { %v4241_v12 = vperm.slane %v4225_v50, %v9293_v48 }
0x1a62   :  { %v4247_v0 = vsel %vm9301_vm14, %v4240_v49, %v4246_v31 }
0x1a63   :  { %v4248_v7 = vsel %vm9302_vm15, %v4241_v12, %v4247_v0 }
0x1a67   :  { %v4228_v33 = vpop.permute.xlu1 %4227 }
0x1a68   :  { %v4231_v20 = vpop.permute.xlu0 %4230  ;;  %v4242_v18 = vperm.slane %v4228_v33, %v9293_v48 }
0x1a69   :  { %v4243_v38 = vperm.slane %v4231_v20, %v9293_v48 }
0x1a6a   :  { %v4249_v19 = vsel %vm9303_vm8, %v4242_v18, %v4248_v7 }
0x1a6b   :  { %v4250_v13 = vsel %vm9304_vm9, %v4243_v38, %v4249_v19 }
0x1a6f   :  { %v4234_v24 = vpop.permute.xlu1 %4233 }
0x1a70   :  { %v4237_v57 = vpop.permute.xlu0 %4236  ;;  %v4244_v15 = vperm.slane %v4234_v24, %v9293_v48 }
0x1a71   :  { %v4245_v55 = vperm.slane %v4237_v57, %v9293_v48 }
0x1a72   :  { %v4251_v4 = vsel %vm9305_vm6, %v4244_v15, %v4250_v13 }
0x1a73   :  { %v4252_v41 = vsel %vm9306_vm10, %v4245_v55, %v4251_v4 }
0x1a74   :  { %v4254_v3 = vsel %vm9307_vm7, %v4252_v41, 0.0 }
0x1a75   :  { %4255 = vadd.xlane.f32.xlu1 %v4254_v3 }
0x1a8e   :  { %4940 = vperm.xlu1 %5459, %v4931_v52  }
0x1ae8   :  { %v4256_v39 = vpop.xlane.xlu1 %4255 }
0x1ae9   :  { %v4258_v62 = vperm.slane %v4256_v39, 0  ;;  %v4259_v21 = vperm.slane %v4256_v39, 1  ;;  %v8422_v22 = vperm.slane %v4256_v39, 2  ;;  %v8424_v63 = vperm.slane %v4256_v39, 3 }
0x1aea   :  { %v8426_v56 = vperm.slane %v4256_v39, 5  ;;  %v8429_v59 = vperm.slane %v4256_v39, 7  ;;  %v8433_v14 = vperm.slane %v4256_v39, 4  ;;  %v8435_v8 = vperm.slane %v4256_v39, 6 }
0x1aeb   :  { %5728 = vrcp.f32 %v4258_v62  ;;  %v4298_v37 = vand.u32 2147483647, %v4259_v21  ;;  %v4300_v34 = vand.u32 2147483648, %v4259_v21  ;;  %v4283_v28 = vand.u32 2147483647, %v4258_v62 }
0x1aec   :  { %5730 = vrcp.f32 %v4259_v21  ;;  %vm4294_vm3 = vweird.f32 %v4259_v21  ;;  %vm4279_vm5 = vweird.f32 %v4258_v62  ;;  %v4285_v50 = vand.u32 2147483648, %v4258_v62 }
0x1aed   :  { %5732 = vrcp.f32 %v8422_v22  ;;  %vm8442_vm1 = vcmp.eq.f32.partialorder %v4298_v37, 8.507059e+37  ;;  %v4301_v49 = vor.u32 1.1754944e-38, %v4300_v34  ;;  %vm8449_vm11 = vcmp.eq.f32.partialorder %v4283_v28, 8.507059e+37 }
0x1aee   :  { %5734 = vrcp.f32 %v8424_v63  ;;  %vm4354_vm4 = vweird.f32 %v8426_v56  ;;  %v4286_v24 = vor.u32 1.1754944e-38, %v4285_v50  ;;  %v4360_v13 = vand.u32 2147483648, %v8426_v56 }
0x1aef   :  { %5736 = vrcp.f32 %v8426_v56  ;;  %v4315_v41 = vand.u32 2147483648, %v8422_v22  ;;  %vm4309_vm9 = vweird.f32 %v8422_v22 }
0x1af0   :  { %5738 = vrcp.f32 %v8429_v59 }
0x1af1   :  { %v5729_v11 = vpop.eup %5728  ;;  %5740 = vrcp.f32 %v8433_v14 }
0x1af2   :  { %v5731_v1 = vpop.eup %5730  ;;  %v4275_v9 = vmul.f32 %v5729_v11, %v4258_v62  ;;  %vm4280_vm12 = vweird.f32 %v5729_v11  ;;  %5742 = vrcp.f32 %v8435_v8 }
0x1af3   :  { %v8438_v46 = vpop.eup %5732  ;;  %v4290_v32 = vmul.f32 %v5731_v1, %v4259_v21  ;;  %vm4295_vm2 = vweird.f32 %v5731_v1  ;;  %vm4281_vm13 = vmor %vm4279_vm5, %vm4280_vm12  ;;  %v4313_v21 = vand.u32 2147483647, %v8422_v22 }
0x1af4   :  { %v8440_v30 = vpop.eup %5734  ;;  %v4276_v33 = vsub.f32 1.0, %v4275_v9  ;;  %v4305_v20 = vmul.f32 %v8438_v46, %v8422_v22  ;;  %vm4310_vm14 = vweird.f32 %v8438_v46  ;;  %vm4296_vm15 = vmor %vm4294_vm3, %vm4295_vm2 }
0x1af5   :  { %v4291_v31 = vsub.f32 1.0, %v4290_v32  ;;  %v5737_v0 = vpop.eup %5736  ;;  %v4320_v7 = vmul.f32 %v8440_v30, %v8424_v63  ;;  %vm4311_vm6 = vmor %vm4309_vm9, %vm4310_vm14  ;;  %vm4314_vm7 = vcmp.eq.f32.partialorder %v4313_v21, 8.507059e+37  ;;  %vm4325_vm5 = vweird.f32 %v8440_v30 }
0x1af6   :  { %v4277_v18 = vmul.f32 %v5729_v11, %v4276_v33  ;;  %v4306_v38 = vsub.f32 1.0, %v4305_v20  ;;  %v4350_v57 = vmul.f32 %v5737_v0, %v8426_v56  ;;  %v8457_v15 = vpop.eup %5738  ;;  %vm4355_vm8 = vweird.f32 %v5737_v0 }
0x1af7   :  { %v4292_v19 = vmul.f32 %v5731_v1, %v4291_v31  ;;  %v4380_v39 = vmul.f32 %v8457_v15, %v8429_v59  ;;  %v4321_v28 = vsub.f32 1.0, %v4320_v7  ;;  %v8468_v9 = vpop.eup %5740  ;;  %vm4356_vm10 = vmor %vm4354_vm4, %vm4355_vm8  ;;  %vm4384_vm4 = vweird.f32 %v8429_v59 }
0x1af8   :  { %v4278_v55 = vadd.f32 %v5729_v11, %v4277_v18  ;;  %v4307_v4 = vmul.f32 %v8438_v46, %v4306_v38  ;;  %v4351_v52 = vsub.f32 1.0, %v4350_v57  ;;  %v4335_v22 = vmul.f32 %v8468_v9, %v8433_v14 }
0x1af9   :  { %v4293_v3 = vadd.f32 %v5731_v1, %v4292_v19  ;;  %v4381_v33 = vsub.f32 1.0, %v4380_v39  ;;  %v4322_v17 = vmul.f32 %v8440_v30, %v4321_v28  ;;  %v4361_v38 = vor.u32 1.1754944e-38, %v4360_v13 }
0x1afa   :  { %v4282_v37 = vsel %vm4281_vm13, %v5729_v11, %v4278_v55  ;;  %v4308_v34 = vadd.f32 %v8438_v46, %v4307_v4  ;;  %v4352_v50 = vmul.f32 %v5737_v0, %v4351_v52  ;;  %v4390_v13 = vand.u32 2147483648, %v8429_v59 }
0x1afb   :  { %v4297_v32 = vsel %vm4296_vm15, %v5731_v1, %v4293_v3  ;;  %v4287_v62 = vsel %vm8449_vm11, %v4286_v24, %v4282_v37  ;;  %v4358_v1 = vand.u32 2147483647, %v8426_v56  ;;  %v4382_v12 = vmul.f32 %v8457_v15, %v4381_v33  ;;  %v5743_v24 = vpop.eup %5742 }
0x1afc   :  { %v4302_v20 = vsel %vm8442_vm1, %v4301_v49, %v4297_v32  ;;  %v4288_v31 = vmul.f32 %v8379_v5, %v4287_v62  ;;  %v4353_v18 = vadd.f32 %v5737_v0, %v4352_v50  ;;  %v4312_v5 = vsel %vm4311_vm6, %v8438_v46, %v4308_v34 }
0x1afd   :  { %v4303_v11 = vmul.f32 %v8381_v36, %v4302_v20  ;;  %v4316_v49 = vor.u32 1.1754944e-38, %v4315_v41  ;;  %vm4359_vm3 = vcmp.eq.f32.partialorder %v4358_v1, 8.507059e+37  ;;  %v4323_v56 = vadd.f32 %v8440_v30, %v4322_v17 }
0x1afe   :  { %4396 = vperm.xlu0 %5458, %v4288_v31   ;;  %v4357_v36 = vsel %vm4356_vm10, %v5737_v0, %v4353_v18  ;;  %v4336_v46 = vsub.f32 1.0, %v4335_v22  ;;  %v4383_v57 = vadd.f32 %v8457_v15, %v4382_v12  ;;  %vm4385_vm1 = vweird.f32 %v8457_v15  ;;  %v8528_v22 = vld [vmem:[%s8762_s7 + $0x8] sm:$0xff] }
0x1aff   :  { %4401 = vperm.xlu2 %5457, %v4303_v11   ;;  %v4317_v7 = vsel %vm4314_vm7, %v4316_v49, %v4312_v5  ;;  %v4362_v19 = vsel %vm4359_vm3, %v4361_v38, %v4357_v36  ;;  %v4330_v0 = vand.u32 2147483648, %v8424_v63  ;;  %vm4324_vm11 = vweird.f32 %v8424_v63  ;;  %vm4386_vm2 = vmor %vm4384_vm4, %vm4385_vm1 }
0x1b00   :  { %v4318_v55 = vmul.f32 %v8385_v10, %v4317_v7  ;;  %v4328_v4 = vand.u32 2147483647, %v8424_v63  ;;  %v4363_v41 = vmul.f32 %v8393_v25, %v4362_v19  ;;  %v4388_v3 = vand.u32 2147483647, %v8429_v59  ;;  %vm4326_vm12 = vmor %vm4324_vm11, %vm4325_vm5 }
0x1b01   :  { %v4327_v52 = vsel %vm4326_vm12, %v8440_v30, %v4323_v56  ;;  %v4337_v39 = vmul.f32 %v8468_v9, %v4336_v46  ;;  %v4365_v10 = vmul.f32 %v5743_v24, %v8435_v8  ;;  %v4387_v37 = vsel %vm4386_vm2, %v8457_v15, %v4383_v57 }
0x1b02   :  { %v4331_v34 = vor.u32 1.1754944e-38, %v4330_v0  ;;  %v4391_v63 = vor.u32 1.1754944e-38, %v4390_v13  ;;  %vm4329_vm13 = vcmp.eq.f32.partialorder %v4328_v4, 8.507059e+37  ;;  %vm4389_vm14 = vcmp.eq.f32.partialorder %v4388_v3, 8.507059e+37  ;;  %v5369_v3 = vld [vmem:[#allocation3 + $0x70] sm:$0xf] }
0x1b03   :  { %v4338_v59 = vadd.f32 %v8468_v9, %v4337_v39  ;;  %vm4340_vm15 = vweird.f32 %v8468_v9  ;;  %v4366_v32 = vsub.f32 1.0, %v4365_v10  ;;  %v4345_v30 = vand.u32 2147483648, %v8433_v14  ;;  %v5361_v39 = vld [vmem:[#allocation3 + $0x60] sm:$0xf] }
0x1b04   :  { %v4332_v25 = vsel %vm4329_vm13, %v4331_v34, %v4327_v52  ;;  %v4392_v28 = vsel %vm4389_vm14, %v4391_v63, %v4387_v37  ;;  %vm4339_vm8 = vweird.f32 %v8433_v14  ;;  %v4343_v50 = vand.u32 2147483647, %v8433_v14  ;;  %v5445_v52 = vld [vmem:[#allocation3 + $0x74] sm:$0xf0]  ;;  %v5443_v34 = vld [vmem:[#allocation3 + $0x64] sm:$0xf0] }
0x1b05   :  { %v4333_v62 = vmul.f32 %v8387_v47, %v4332_v25  ;;  %v4393_v15 = vmul.f32 %v8399_v60, %v4392_v28  ;;  %vm4341_vm9 = vmor %vm4339_vm8, %vm4340_vm15  ;;  %v4367_v20 = vmul.f32 %v5743_v24, %v4366_v32  ;;  %v4346_v31 = vor.u32 1.1754944e-38, %v4345_v30  ;;  %v8518_v47 = vld [vmem:[%s8762_s7 + $0x10] sm:$0xff]  ;;  %v5441_v30 = vld [vmem:[#allocation3 + $0x54] sm:$0xf0] }
0x1b06   :  { %4406 = vperm.xlu0 %5458, %v4318_v55   ;;  %v4342_v33 = vsel %vm4341_vm9, %v8468_v9, %v4338_v59  ;;  %vm4344_vm6 = vcmp.eq.f32.partialorder %v4343_v50, 8.507059e+37  ;;  %vm4370_vm10 = vweird.f32 %v5743_v24  ;;  %v4375_v18 = vand.u32 2147483648, %v8435_v8  ;;  %v5353_v32 = vld [vmem:[#allocation3 + $0x50] sm:$0xf] }
0x1b07   :  { %4421 = vperm.xlu2 %5457, %v4363_v41   ;;  %v4347_v21 = vsel %vm4344_vm6, %v4346_v31, %v4342_v33  ;;  %v4368_v11 = vadd.f32 %v5743_v24, %v4367_v20  ;;  %vm4369_vm7 = vweird.f32 %v8435_v8  ;;  %v4373_v14 = vand.u32 2147483647, %v8435_v8 }
0x1b08   :  { %v4348_v60 = vmul.f32 %v8391_v53, %v4347_v21  ;;  %vm4371_vm3 = vmor %vm4369_vm7, %vm4370_vm10  ;;  %v4376_v1 = vor.u32 1.1754944e-38, %v4375_v18  ;;  %v8534_v53 = vld [vmem:[%s8762_s7 + $0x18] sm:$0xff]  ;;  %v5362_v28 = vor.u32 %v5443_v34, %v5361_v39  ;;  %v5354_v31 = vor.u32 %v5441_v30, %v5353_v32  ;;  %v5439_v18 = vld [vmem:[#allocation3 + $0x44] sm:$0xf0] }
0x1b09   :  { %v4372_v9 = vsel %vm4371_vm3, %v5743_v24, %v4368_v11  ;;  %vm4374_vm5 = vcmp.eq.f32.partialorder %v4373_v14, 8.507059e+37  ;;  %v5345_v11 = vld [vmem:[#allocation3 + $0x40] sm:$0xf]  ;;  %vm9312_vm1 = vcmask 1042434   ;;  %vm9313_vm11 = vcmask 1043459  }
0x1b0a   :  { %v4377_v5 = vsel %vm4374_vm5, %v4376_v1, %v4372_v9  ;;  %vm9314_vm4 = vcmask 1044484   ;;  %vm9315_vm12 = vcmask 1045509   ;;  %vm9316_vm2 = vcmask 1046534  }
0x1b0b   :  { %v4378_v17 = vmul.f32 %v8397_v23, %v4377_v5  ;;  %v5836_v23 = vld [vmem:[%s8756_s1] sm:$0xff] }
0x1b0e   :  { %4411 = vperm.xlu0 %5458, %v4333_v62  }
0x1b0f   :  { %4431 = vperm.xlu2 %5457, %v4393_v15  }
0x1b16   :  { %4416 = vperm.xlu0 %5458, %v4348_v60  }
0x1b17   :  { %4946 = vperm.xlu2 %5457, %v8518_v47  }
0x1b1e   :  { %4426 = vperm.xlu0 %5458, %v4378_v17  }
0x1b26   :  { %4943 = vperm.xlu0 %5458, %v8528_v22  }
0x1b2e   :  { %4949 = vperm.xlu0 %5458, %v8534_v53  }
0x1b59   :  { %v4402_v8 = vpop.permute.xlu2 %4401 }
0x1b5a   :  { %v4435_v19 = vmul.f32 %v8300_v43, %v4402_v8  ;;  %v5346_v8 = vor.u32 %v5439_v18, %v5345_v11 }
0x1b5c   :  { %v4448_v24 = vrot.slane %v4435_v19, 4 }
0x1b5e   :  { %v4449_v10 = vadd.f32 %v4448_v24, %v4435_v19 }
0x1b60   :  { %v4450_v62 = vrot.slane %v4449_v10, 2 }
0x1b61   :  { %v4422_v49 = vpop.permute.xlu2 %4421 }
0x1b62   :  { %v4439_v0 = vmul.f32 %v8326_v51, %v4422_v49  ;;  %v4451_v60 = vadd.f32 %v4450_v62, %v4449_v10 }
0x1b64   :  { %v4472_v63 = vrot.slane %v4439_v0, 4 }
0x1b66   :  { %v4473_v15 = vadd.f32 %v4472_v63, %v4439_v0 }
0x1b68   :  { %v4474_v5 = vrot.slane %v4473_v15, 2 }
0x1b69   :  { %v4432_v57 = vpop.permute.xlu2 %4431 }
0x1b6a   :  { %v4441_v37 = vmul.f32 %v8345_v54, %v4432_v57 }
0x1b6c   :  { %v4484_v50 = vrot.slane %v4441_v37, 4 }
0x1b6e   :  { %v4485_v14 = vadd.f32 %v4484_v50, %v4441_v37 }
0x1b70   :  { %v4397_v36 = vpop.permute.xlu0 %4396 }
0x1b71   :  { %v4434_v12 = vmul.f32 %v5836_v23, %v4397_v36  ;;  %v5337_v23 = vld [vmem:[#allocation3 + $0x30] sm:$0xf] }
0x1b73   :  { %v4442_v56 = vrot.slane %v4434_v12, 4 }
0x1b75   :  { %v4443_v55 = vadd.f32 %v4442_v56, %v4434_v12  ;;  %v5437_v12 = vld [vmem:[#allocation3 + $0x34] sm:$0xf0] }
0x1b76   :  { %v5338_v57 = vor.u32 %v5437_v12, %v5337_v23 }
0x1b77   :  { %v4444_v25 = vrot.slane %v4443_v55, 2 }
0x1b78   :  { %v4407_v38 = vpop.permute.xlu0 %4406 }
0x1b79   :  { %v4436_v7 = vmul.f32 %v8294_v61, %v4407_v38  ;;  %v5370_v61 = vor.u32 %v5445_v52, %v5369_v3  ;;  %v4445_v33 = vadd.f32 %v4444_v25, %v4443_v55  ;;  %v4452_v38 = vrot.slane %v4451_v60, 1 }
0x1b7b   :  { %v4454_v46 = vrot.slane %v4436_v7, 4  ;;  %4770 = vmatpush.bf16.msrb.mxu2 %v5370_v61  ;;  %v4446_v17 = vrot.slane %v4445_v33, 1  ;;  %v4453_v3 = vadd.f32 %v4452_v38, %v4451_v60 }
0x1b7d   :  { %v4455_v4 = vadd.f32 %v4454_v46, %v4436_v7  ;;  %v4486_v7 = vrot.slane %v4485_v14, 2  ;;  %v4475_v46 = vadd.f32 %v4474_v5, %v4473_v15  ;;  %v4495_v32 = vpack.c.bf16 %v4453_v3, %v4453_v3 }
0x1b7f   :  { %v4456_v59 = vrot.slane %v4455_v4, 2  ;;  %4771 = vmatpush.bf16.msrb.mxu2 %v5362_v28  ;;  %v4487_v52 = vadd.f32 %v4486_v7, %v4485_v14  ;;  %v4476_v61 = vrot.slane %v4475_v46, 1  ;;  %v4511_v11 = vunpack.c.l.b16 %v4495_v32 }
0x1b80   :  { %v4412_v13 = vpop.permute.xlu0 %4411 }
0x1b81   :  { %v4437_v41 = vmul.f32 %v8307_v27, %v4412_v13  ;;  %v4457_v54 = vadd.f32 %v4456_v59, %v4455_v4  ;;  %v5329_v4 = vld [vmem:[#allocation3 + $0x20] sm:$0xf]  ;;  %v5321_v59 = vld [vmem:[#allocation3 + $0x10] sm:$0xf]  ;;  %v4488_v30 = vrot.slane %v4487_v52, 1 }
0x1b83   :  { %v4460_v43 = vrot.slane %v4437_v41, 4  ;;  %4772 = vmatpush.bf16.msrb.mxu2 %v5354_v31  ;;  %v4458_v36 = vrot.slane %v4457_v54, 1  ;;  %v4489_v18 = vadd.f32 %v4488_v30, %v4487_v52 }
0x1b85   :  { %v4461_v51 = vadd.f32 %v4460_v43, %v4437_v41  ;;  %v4459_v0 = vadd.f32 %v4458_v36, %v4457_v54  ;;  %v5435_v41 = vld [vmem:[#allocation3 + $0x24] sm:$0xf0]  ;;  %v5313_v54 = vld [vmem:[#allocation3] sm:$0xf] }
0x1b86   :  { %v5330_v43 = vor.u32 %v5435_v41, %v5329_v4  ;;  %v4580_v4 = vadd.f32 %v8357_v29, %v9276_v6  ;;  %v4684_v6 = vld [vmem:[%s8764_s9] sm:$0x3] }
0x1b87   :  { %v4462_v27 = vrot.slane %v4461_v51, 2  ;;  %4773 = vmatpush.bf16.msrb.mxu2 %v5346_v8  ;;  %v4496_v63 = vpack.c.bf16 %v4459_v0, %v4459_v0  ;;  %v5306_v0 = vld [vmem:[%s8755_s0 + $0x90] sm:$0xff] }
0x1b88   :  { %v4417_v20 = vpop.permute.xlu0 %4416 }
0x1b89   :  { %v4438_v21 = vmul.f32 %v8319_v58, %v4417_v20  ;;  %v4463_v9 = vadd.f32 %v4462_v27, %v4461_v51  ;;  %v4447_v58 = vadd.f32 %v4446_v17, %v4445_v33  ;;  %v5433_v51 = vld [vmem:[#allocation3 + $0x14] sm:$0xf0]  ;;  %v4477_v27 = vadd.f32 %v4476_v61, %v4475_v46 }
0x1b8a   :  { %v5322_v33 = vor.u32 %v5433_v51, %v5321_v59  ;;  %v4512_v20 = vunpack.c.l.b16 %v4496_v63  ;;  %v8573_v59 = vperm.slane %v4684_v6, 0 }
0x1b8b   :  { %v4466_v1 = vrot.slane %v4438_v21, 4  ;;  %v4464_v19 = vrot.slane %v4463_v9, 1  ;;  %v4494_v34 = vpack.c.bf16 %v4447_v58, %v4447_v58  ;;  %4774 = vmatpush.bf16.msrb.mxu2 %v5338_v57 }
0x1b8d   :  { %v4467_v49 = vadd.f32 %v4466_v1, %v4438_v21  ;;  %v4465_v39 = vadd.f32 %v4464_v19, %v4463_v9  ;;  %v4510_v15 = vunpack.c.l.b16 %v4494_v34  ;;  %v5431_v21 = vld [vmem:[#allocation3 + $0x4] sm:$0xf0]  ;;  %v4499_v1 = vpack.c.bf16 %v4477_v27, %v4477_v27 }
0x1b8e   :  { %v5314_v17 = vor.u32 %v5431_v21, %v5313_v54 }
0x1b8f   :  { %v4468_v56 = vrot.slane %v4467_v49, 2  ;;  %v4497_v62 = vpack.c.bf16 %v4465_v39, %v4465_v39  ;;  %4775 = vmatpush.bf16.msrb.mxu2 %v5330_v43  ;;  %v4518_v5 = vsel %vm290_vm0, %v4511_v11, %v4510_v15  ;;  %v4515_v7 = vunpack.c.l.b16 %v4499_v1 }
0x1b90   :  { %v4427_v24 = vpop.permute.xlu0 %4426  ;;  %v4519_v8 = vsel %vm9312_vm1, %v4512_v20, %v4518_v5  ;;  %vm9317_vm0 = vcmask 1047559  }
0x1b91   :  { %v4469_v55 = vadd.f32 %v4468_v56, %v4467_v49  ;;  %v4440_v13 = vmul.f32 %v8338_v40, %v4427_v24  ;;  %v4513_v60 = vunpack.c.l.b16 %v4497_v62  ;;  %v4501_v49 = vpack.c.bf16 %v4489_v18, %v4489_v18 }
0x1b93   :  { %v4470_v10 = vrot.slane %v4469_v55, 1  ;;  %v4478_v37 = vrot.slane %v4440_v13, 4  ;;  %4776 = vmatpush.bf16.msrb.mxu2 %v5322_v33  ;;  %v4520_v23 = vsel %vm9313_vm11, %v4513_v60, %v4519_v8  ;;  %v4517_v56 = vunpack.c.l.b16 %v4501_v49 }
0x1b95   :  { %v4471_v25 = vadd.f32 %v4470_v10, %v4469_v55  ;;  %v4479_v28 = vadd.f32 %v4478_v37, %v4440_v13  ;;  %v4807_v10 = vpop.f32.mrf.mxu3 }
0x1b97   :  { %v4498_v40 = vpack.c.bf16 %v4471_v25, %v4471_v25  ;;  %v4480_v50 = vrot.slane %v4479_v28, 2  ;;  %4777 = vmatpush.bf16.msrb.mxu2 %v5314_v17 }
0x1b99   :  { %v4481_v31 = vadd.f32 %v4480_v50, %v4479_v28  ;;  %v4514_v14 = vunpack.c.l.b16 %v4498_v40  ;;  %v8571_v28 = vperm.slane %v4684_v6, 1 }
0x1b9b   :  { %v4482_v9 = vrot.slane %v4481_v31, 1  ;;  %v4521_v12 = vsel %vm9314_vm4, %v4514_v14, %v4520_v23  ;;  %v8576_v50 = vadd.f32 %v4807_v10, %v8571_v28 }
0x1b9c   :  { %v4522_v46 = vsel %vm9315_vm12, %v4515_v7, %v4521_v12  ;;  %v5308_v12 = vld [vmem:[%s8755_s0 + $0xa0] sm:$0xff] }
0x1b9d   :  { %v4483_v36 = vadd.f32 %v4482_v9, %v4481_v31  ;;  %v4809_v51 = vpop.f32.mrf.mxu3 }
0x1b9e   :  { %v8584_v17 = vadd.f32 %v4809_v51, %v8571_v28 }
0x1b9f   :  { %v4500_v38 = vpack.c.bf16 %v4483_v36, %v4483_v36 }
0x1ba1   :  { %v4516_v19 = vunpack.c.l.b16 %v4500_v38 }
0x1ba3   :  { %v4523_v58 = vsel %vm9316_vm2, %v4516_v19, %v4522_v46 }
0x1ba4   :  { %v4524_v24 = vsel %vm9317_vm0, %v4517_v56, %v4523_v58 }
0x1ba5   :  { %v4525_v57 = vpack.c.b16 %v4524_v24, %v4524_v24  ;;  %v4812_v14 = vpop.f32.mrf.mxu3 }
0x1ba6   :  { %v8596_v58 = vadd.f32 %v4812_v14, %v8571_v28 }
0x1ba7   :  { %4535 = vmatmul.bf16.vlgmr.msra.gmra.mxu0 %v4525_v57  ;;  %4548 = vmatmul.bf16.vlgmr.msra.gmra.mxu1 %v4525_v57 }
0x1ba8   :  { %4561 = vmatmul.bf16.vlgmr.msra.gmra.mxu2 %v4525_v57 }
0x1bb7   :  { %4591 = vmatmul.bf16.vlgmr.msrb.gmra.mxu0 %v8284_v16  ;;  %4604 = vmatmul.bf16.vlgmr.msrb.gmra.mxu1 %v8284_v16 }
0x1bb8   :  { %4778 = vmatmul.bf16.vlgmr.msrb.gmra.mxu2 %v8313_v2 }
0x1bc8   :  { %4783 = vmatmul.bf16.gmra.mxu2 %v8332_v42 }
0x1bd8   :  { %4788 = vmatmul.bf16.gmra.mxu2 %v8350_v35  ;;  %v5307_v35 = vld [vmem:[%s8755_s0 + $0x98] sm:$0xff] }
0x1c24   :  { %v4536_v55 = vpop.f32.mrf.mxu0  ;;  %v4549_v13 = vpop.f32.mrf.mxu1 }
0x1c25   :  { %v4566_v41 = vadd.f32 %v5306_v0, %v4536_v55  ;;  %v4567_v29 = vadd.f32 %v5307_v35, %v4549_v13 }
0x1c27   :  { %v4609_v3 = vadd.f32 %v4580_v4, %v4566_v41 }
0x1c29   :  { %v5309_v52 = vmul.f32 -1.442695, %v4609_v3 }
0x1c2b   :  { %5744 = vpow2.f32 %v5309_v52  ;;  %v4562_v16 = vpop.f32.mrf.mxu2 }
0x1c2c   :  { %v4538_v39 = vpop.f32.mrf.mxu0  ;;  %v4551_v2 = vpop.f32.mrf.mxu1  ;;  %v4568_v19 = vadd.f32 %v5308_v12, %v4562_v16 }
0x1c31   :  { %v5745_v42 = vpop.eup %5744 }
0x1c32   :  { %v4613_v37 = vadd.f32 1.0, %v5745_v42 }
0x1c33   :  { %v4564_v61 = vpop.f32.mrf.mxu2 }
0x1c34   :  { %5746 = vrcp.f32 %v4613_v37  ;;  %v4592_v34 = vpop.f32.mrf.mxu0  ;;  %v4605_v43 = vpop.f32.mrf.mxu1  ;;  %v4625_v54 = vand.u32 2147483648, %v4613_v37  ;;  %v4623_v21 = vand.u32 2147483647, %v4613_v37  ;;  %vm4619_vm14 = vweird.f32 %v4613_v37 }
0x1c35   :  { %v4593_v63 = vadd.f32 %v4592_v34, %v9278_v26  ;;  %v4606_v49 = vadd.f32 %v4605_v43, %v9279_v45  ;;  %v4814_v45 = vpop.f32.mrf.mxu3 }
0x1c36   :  { %v4626_v1 = vor.u32 1.1754944e-38, %v4625_v54  ;;  %vm4624_vm8 = vcmp.eq.f32.partialorder %v4623_v21, 8.507059e+37  ;;  %v8604_v2 = vadd.f32 %v4814_v45, %v8571_v28  ;;  %v4941_v21 = vpop.permute.xlu1 %4940 }
0x1c37   :  { %v4629_v25 = vadd.f32 %v4593_v63, %v4567_v29  ;;  %v8615_v29 = vld [vmem:[%s8762_s7 + $0x30] sm:$0xff]  ;;  %vm4960_vm3 = vcmp.eq.s32.totalorder %v9293_v48, %v4941_v21 }
0x1c39   :  { %v5310_v32 = vmul.f32 -1.442695, %v4629_v25 }
0x1c3a   :  { %v5747_v30 = vpop.eup %5746 }
0x1c3b   :  { %5748 = vpow2.f32 %v5310_v32  ;;  %v4615_v62 = vmul.f32 %v5747_v30, %v4613_v37  ;;  %v4779_v40 = vpop.f32.mrf.mxu2  ;;  %vm4620_vm13 = vweird.f32 %v5747_v30 }
0x1c3c   :  { %v8579_v27 = vadd.f32 %v4779_v40, %v8573_v59  ;;  %v4594_v15 = vpop.f32.mrf.mxu0  ;;  %v4607_v33 = vpop.f32.mrf.mxu1  ;;  %vm4621_vm15 = vmor %vm4619_vm14, %vm4620_vm13 }
0x1c3d   :  { %v4616_v26 = vsub.f32 1.0, %v4615_v62  ;;  %v4817_v34 = vpop.f32.mrf.mxu3 }
0x1c3e   :  { %v4826_v20 = vmax.f32 %v8579_v27, %v8576_v50  ;;  %v8618_v32 = vadd.f32 %v4817_v34, %v8571_v28  ;;  %v8675_v34 = vadd.s32 128, %v9293_v48 }
0x1c3f   :  { %v4617_v31 = vmul.f32 %v5747_v30, %v4616_v26  ;;  %v8635_v26 = vld [vmem:[%s8762_s7 + $0x28] sm:$0xff] }
0x1c40   :  { %4827 = vmax.xlane.f32.xlu1 %v4826_v20  ;;  %vm4961_vm5 = vcmp.eq.s32.totalorder %v8675_v34, %v4941_v21 }
0x1c41   :  { %v5749_v11 = vpop.eup %5748  ;;  %v4618_v18 = vadd.f32 %v5747_v30, %v4617_v31  ;;  %v8640_v31 = vpop.permute.xlu0 %4943 }
0x1c42   :  { %v4633_v60 = vadd.f32 1.0, %v5749_v11  ;;  %v8644_v11 = vpop.permute.xlu2 %4946  ;;  %vm4962_vm1 = vcmp.eq.s32.totalorder %v9293_v48, %v8640_v31  ;;  %vm4963_vm11 = vcmp.eq.s32.totalorder %v8675_v34, %v8640_v31 }
0x1c43   :  { %v4622_v9 = vsel %vm4621_vm15, %v5747_v30, %v4618_v18  ;;  %v4781_v5 = vpop.f32.mrf.mxu2  ;;  %v4977_v21 = vsel %vm4963_vm11, %v8584_v17, 0.0  ;;  %vm4964_vm13 = vcmp.eq.s32.totalorder %v9293_v48, %v8644_v11  ;;  %vm4965_vm14 = vcmp.eq.s32.totalorder %v8675_v34, %v8644_v11 }
0x1c44   :  { %5750 = vrcp.f32 %v4633_v60  ;;  %v8587_v8 = vadd.f32 %v4781_v5, %v8573_v59  ;;  %v4627_v36 = vsel %vm4624_vm8, %v4626_v1, %v4622_v9  ;;  %v4645_v13 = vand.u32 2147483648, %v4633_v60 }
0x1c45   :  { %v4649_v38 = vmul.f32 %v4627_v36, %v4606_v49  ;;  %v4643_v41 = vand.u32 2147483647, %v4633_v60  ;;  %vm4639_vm6 = vweird.f32 %v4633_v60  ;;  %v4819_v62 = vpop.f32.mrf.mxu3 }
0x1c46   :  { %v4829_v23 = vmax.f32 %v8587_v8, %v8584_v17  ;;  %v4646_v52 = vor.u32 1.1754944e-38, %v4645_v13  ;;  %v8627_v15 = vadd.f32 %v4819_v62, %v8571_v28  ;;  %v4974_v62 = vsel %vm4960_vm3, %v8579_v27, 0.0 }
0x1c47   :  { %v4650_v24 = vadd.f32 %v4649_v38, %v4568_v19  ;;  %vm4644_vm7 = vcmp.eq.f32.partialorder %v4643_v41, 8.507059e+37  ;;  %vm5012_vm3 = vcmp.ne.s32.totalorder %v8534_v53, 0 }
0x1c48   :  { %4830 = vmax.xlane.f32.xlu0 %v4829_v23 }
0x1c49   :  { %5752 = vtanh.f32 %v4650_v24  ;;  %v8642_v54 = vpop.permute.xlu0 %4949 }
0x1c4a   :  { %v5751_v7 = vpop.eup %5750  ;;  %vm4966_vm4 = vcmp.eq.s32.totalorder %v9293_v48, %v8642_v54  ;;  %vm4967_vm12 = vcmp.eq.s32.totalorder %v8675_v34, %v8642_v54 }
0x1c4b   :  { %v4635_v56 = vmul.f32 %v5751_v7, %v4633_v60  ;;  %v4784_v46 = vpop.f32.mrf.mxu2  ;;  %vm4640_vm9 = vweird.f32 %v5751_v7 }
0x1c4c   :  { %v8599_v57 = vadd.f32 %v4784_v46, %v8573_v59  ;;  %vm4641_vm10 = vmor %vm4639_vm6, %vm4640_vm9 }
0x1c4d   :  { %v4636_v0 = vsub.f32 1.0, %v4635_v56 }
0x1c4e   :  { %v4832_v55 = vmax.f32 %v8599_v57, %v8596_v58 }
0x1c4f   :  { %v4637_v4 = vmul.f32 %v5751_v7, %v4636_v0  ;;  %v5753_v35 = vpop.eup %5752 }
0x1c50   :  { %4833 = vmax.xlane.f32.xlu2 %v4832_v55 }
0x1c51   :  { %v4638_v3 = vadd.f32 %v5751_v7, %v4637_v4 }
0x1c53   :  { %v4786_v16 = vpop.f32.mrf.mxu2  ;;  %v4642_v39 = vsel %vm4641_vm10, %v5751_v7, %v4638_v3 }
0x1c54   :  { %v8607_v10 = vadd.f32 %v4786_v16, %v8573_v59  ;;  %v4647_v42 = vsel %vm4644_vm7, %v4646_v52, %v4642_v39  ;;  %vm5010_vm7 = vcmp.ne.s32.totalorder %v8528_v22, 0 }
0x1c55   :  { %v4652_v37 = vsub.f32 1.0, %v4647_v42  ;;  %v4654_v6 = vmul.f32 %v4647_v42, %v8280_v44 }
0x1c56   :  { %v4835_v61 = vmax.f32 %v8607_v10, %v8604_v2 }
0x1c57   :  { %v4653_v43 = vmul.f32 %v5753_v35, %v4652_v37 }
0x1c58   :  { %4836 = vmax.xlane.f32.xlu1 %v4835_v61 }
0x1c59   :  { %v4655_v63 = vadd.f32 %v4654_v6, %v4653_v43 }
0x1c5b   :  { %v4789_v25 = vpop.f32.mrf.mxu2  ;;  %v4667_v51 = vpack.c.bf16 %v4655_v63, %v4655_v63 }
0x1c5c   :  { %v8621_v30 = vadd.f32 %v4789_v25, %v8573_v59  ;;  %4958 = vperm.xlu0 %5458, %v8615_v29  }
0x1c5d   :  { %4793 = vmatmul.bf16.gmra.mxu2 %v4667_v51  ;;  %4821 = vmatmul.bf16.gmra.mxu3 %v4667_v51 }
0x1c5e   :  { %v4838_v44 = vmax.f32 %v8621_v30, %v8618_v32 }
0x1c60   :  { %4839 = vmax.xlane.f32.xlu1 %v4838_v44 }
0x1c63   :  { %v4791_v40 = vpop.f32.mrf.mxu2 }
0x1c64   :  { %v8630_v33 = vadd.f32 %v4791_v40, %v8573_v59 }
0x1c66   :  { %v4841_v20 = vmax.f32 %v8630_v33, %v8627_v15 }
0x1c68   :  { %4955 = vperm.xlu2 %5457, %v8635_v26   ;;  %4842 = vmax.xlane.f32.xlu1 %v4841_v20 }
0x1cb3   :  { %v8652_v5 = vpop.xlane.xlu1 %4827 }
0x1cbb   :  { %v8646_v18 = vpop.xlane.xlu0 %4830 }
0x1cbc   :  { %v4849_v60 = vsub.f32 %v8587_v8, %v8646_v18  ;;  %v4850_v14 = vsub.f32 %v8584_v17, %v8646_v18  ;;  %v4847_v17 = vsub.f32 %v8579_v27, %v8652_v5 }
0x1cbe   :  { %v4865_v9 = vmul.f32 1.442695, %v4849_v60  ;;  %v4867_v1 = vmul.f32 1.442695, %v4850_v14  ;;  %v4975_v60 = vsel %vm4961_vm5, %v8576_v50, 0.0  ;;  %vm5011_vm5 = vcmp.ne.s32.totalorder %v8518_v47, 0 }
0x1cc0   :  { %5754 = vpow2.f32 %v4865_v9 }
0x1cc1   :  { %5756 = vpow2.f32 %v4867_v1  ;;  %v4988_v1 = vadd.f32 %v4975_v60, %v4974_v62 }
0x1cc3   :  { %v8654_v36 = vpop.xlane.xlu2 %4833 }
0x1cc4   :  { %v4851_v49 = vsub.f32 %v8599_v57, %v8654_v36  ;;  %v4852_v23 = vsub.f32 %v8596_v58, %v8654_v36 }
0x1cc6   :  { %v5755_v12 = vpop.eup %5754  ;;  %v4869_v38 = vmul.f32 1.442695, %v4851_v49  ;;  %v4871_v7 = vmul.f32 1.442695, %v4852_v23  ;;  %v4981_v23 = vsel %vm4967_vm12, %v8604_v2, 0.0  ;;  %vm5014_vm12 = vcmp.ne.s32.totalorder %v8635_v26, 0 }
0x1cc7   :  { %v5757_v19 = vpop.eup %5756 }
0x1cc8   :  { %5758 = vpow2.f32 %v4869_v38  ;;  %v4892_v56 = vadd.f32 %v5757_v19, %v5755_v12 }
0x1cc9   :  { %5760 = vpow2.f32 %v4871_v7 }
0x1cca   :  { %4893 = vadd.xlane.f32.xlu2 %v4892_v56  ;;  %v4848_v56 = vsub.f32 %v8576_v50, %v8652_v5 }
0x1ccb   :  { %v8660_v46 = vpop.xlane.xlu1 %4836  ;;  %v4956_v62 = vpop.permute.xlu2 %4955 }
0x1ccc   :  { %vm4970_vm15 = vcmp.eq.s32.totalorder %v9293_v48, %v4956_v62  ;;  %vm4971_vm8 = vcmp.eq.s32.totalorder %v8675_v34, %v4956_v62 }
0x1ccd   :  { %v4985_v11 = vsel %vm4971_vm8, %v8627_v15, 0.0 }
0x1cce   :  { %v5759_v24 = vpop.eup %5758  ;;  %v4959_v7 = vpop.permute.xlu0 %4958 }
0x1ccf   :  { %v5761_v45 = vpop.eup %5760  ;;  %vm4972_vm2 = vcmp.eq.s32.totalorder %v9293_v48, %v4959_v7  ;;  %vm4973_vm0 = vcmp.eq.s32.totalorder %v8675_v34, %v4959_v7 }
0x1cd0   :  { %v4895_v0 = vadd.f32 %v5761_v45, %v5759_v24  ;;  %v4861_v24 = vmul.f32 1.442695, %v4847_v17  ;;  %v4863_v45 = vmul.f32 1.442695, %v4848_v56  ;;  %v5894_v56 = vmov 0.0  }
0x1cd2   :  { %4896 = vadd.xlane.f32.xlu0 %v4895_v0  ;;  %v4853_v0 = vsub.f32 %v8607_v10, %v8660_v46 }
0x1cd3   :  { %v8662_v55 = vpop.xlane.xlu1 %4839 }
0x1cd4   :  { %v4855_v13 = vsub.f32 %v8621_v30, %v8662_v55  ;;  %v4856_v4 = vsub.f32 %v8618_v32, %v8662_v55 }
0x1cd6   :  { %v4877_v41 = vmul.f32 1.442695, %v4855_v13  ;;  %v4879_v3 = vmul.f32 1.442695, %v4856_v4  ;;  %v4854_v13 = vsub.f32 %v8604_v2, %v8660_v46  ;;  %v4873_v4 = vmul.f32 1.442695, %v4853_v0 }
0x1cd7   :  { %v5376_v0 = vsel %vm5010_vm7, 1.0, %v5894_v56 }
0x1cd8   :  { %5762 = vpow2.f32 %v4877_v41  ;;  %v4875_v41 = vmul.f32 1.442695, %v4854_v13 }
0x1cd9   :  { %5764 = vpow2.f32 %v4879_v3 }
0x1cdb   :  { %v8668_v52 = vpop.xlane.xlu1 %4842 }
0x1cdc   :  { %v4857_v16 = vsub.f32 %v8630_v33, %v8668_v52  ;;  %v4858_v39 = vsub.f32 %v8627_v15, %v8668_v52 }
0x1cde   :  { %v5763_v42 = vpop.eup %5762  ;;  %v4881_v37 = vmul.f32 1.442695, %v4857_v16  ;;  %v4883_v35 = vmul.f32 1.442695, %v4858_v39 }
0x1cdf   :  { %v5765_v61 = vpop.eup %5764 }
0x1ce0   :  { %5766 = vpow2.f32 %v4881_v37  ;;  %v4794_v43 = vpop.f32.mrf.mxu2  ;;  %v4822_v6 = vpop.f32.mrf.mxu3  ;;  %v4901_v63 = vadd.f32 %v5765_v61, %v5763_v42 }
0x1ce1   :  { %5768 = vpow2.f32 %v4883_v35  ;;  %v4795_v25 = vadd.f32 %v4794_v43, %v8573_v59  ;;  %v4823_v51 = vadd.f32 %v4822_v6, %v8571_v28  ;;  %v4980_v28 = vsel %vm4966_vm4, %v8607_v10, 0.0 }
0x1ce2   :  { %4902 = vadd.xlane.f32.xlu2 %v4901_v63  ;;  %v4976_v59 = vsel %vm4962_vm1, %v8587_v8, 0.0  ;;  %v4997_v12 = vadd.f32 %v4981_v23, %v4980_v28  ;;  %v8700_v8 = vld [vmem:[%s8762_s7 + $0x20] sm:$0xff]  ;;  %5770 = vpow2.f32 %v4861_v24  ;;  %vm5044_vm1 = vcmask 7168  }
0x1ce3   :  { %v4844_v44 = vmax.f32 %v4795_v25, %v4823_v51  ;;  %v4991_v38 = vadd.f32 %v4977_v21, %v4976_v59  ;;  %v4986_v31 = vsel %vm4972_vm2, %v4795_v25, 0.0  ;;  %v4987_v19 = vsel %vm4973_vm0, %v4823_v51, 0.0 }
0x1ce4   :  { %v5006_v54 = vadd.f32 %v4987_v19, %v4986_v31  ;;  %5772 = vpow2.f32 %v4863_v45  ;;  %vm5013_vm11 = vcmp.ne.s32.totalorder %v8700_v8, 0  ;;  %vm5015_vm4 = vcmp.ne.s32.totalorder %v8615_v29, 0 }
0x1ce5   :  { %4845 = vmax.xlane.f32.xlu1 %v4844_v44  ;;  %5774 = vpow2.f32 %v4873_v4  ;;  %v4978_v44 = vsel %vm4964_vm13, %v8599_v57, 0.0  ;;  %vm5068_vm2 = vcmask 0  }
0x1ce6   :  { %v5767_v40 = vpop.eup %5766  ;;  %5776 = vpow2.f32 %v4875_v41 }
0x1ce7   :  { %v5769_v20 = vpop.eup %5768 }
0x1ce8   :  { %v4796_v14 = vpop.f32.mrf.mxu2  ;;  %v4824_v9 = vpop.f32.mrf.mxu3  ;;  %v4904_v49 = vadd.f32 %v5769_v20, %v5767_v40  ;;  %v4984_v20 = vsel %vm4970_vm15, %v8630_v33, 0.0 }
0x1ce9   :  { %v5771_v3 = vpop.eup %5770  ;;  %v5003_v14 = vadd.f32 %v4985_v11, %v4984_v20 }
0x1cea   :  { %4989 = vadd.xlane.f32.xlu2 %v4988_v1  ;;  %4905 = vadd.xlane.f32.xlu0 %v4904_v49  ;;  %v5773_v16 = vpop.eup %5772 }
0x1ceb   :  { %v4889_v27 = vadd.f32 %v5773_v16, %v5771_v3  ;;  %v5775_v39 = vpop.eup %5774 }
0x1cec   :  { %v5777_v50 = vpop.eup %5776 }
0x1ced   :  { %v4898_v42 = vadd.f32 %v5777_v50, %v5775_v39  ;;  %v5378_v50 = vsel %vm5012_vm3, 1.0, %v5894_v56 }
0x1cf2   :  { %4998 = vadd.xlane.f32.xlu2 %v4997_v12  ;;  %4992 = vadd.xlane.f32.xlu0 %v4991_v38  ;;  %v5837_v12 = vld [vmem:[%s8762_s7] sm:$0xff] }
0x1cf3   :  { %vm5009_vm10 = vcmp.ne.s32.totalorder %v5837_v12, 0 }
0x1cf4   :  { %v5375_v24 = vsel %vm5009_vm10, 1.0, %v5894_v56 }
0x1cfa   :  { %5007 = vadd.xlane.f32.xlu2 %v5006_v54 }
0x1cfe   :  { %4952 = vperm.xlu1 %5459, %v8700_v8   ;;  %v5381_v8 = vsel %vm5015_vm4, 1.0, %v5894_v56 }
0x1d28   :  { %4890 = vadd.xlane.f32.xlu1 %v4889_v27 }
0x1d30   :  { %4899 = vadd.xlane.f32.xlu1 %v4898_v42 }
0x1d3d   :  { %v4894_v9 = vpop.xlane.xlu2 %4893 }
0x1d45   :  { %v4897_v49 = vpop.xlane.xlu0 %4896 }
0x1d55   :  { %v4903_v28 = vpop.xlane.xlu2 %4902 }
0x1d58   :  { %v8711_v37 = vpop.xlane.xlu1 %4845 }
0x1d59   :  { %v4859_v10 = vsub.f32 %v4795_v25, %v8711_v37  ;;  %v4860_v35 = vsub.f32 %v4823_v51, %v8711_v37  ;;  %v4979_v25 = vsel %vm4965_vm14, %v8596_v58, 0.0 }
0x1d5a   :  { %v4994_v51 = vadd.f32 %v4979_v25, %v4978_v44 }
0x1d5b   :  { %v4885_v61 = vmul.f32 1.442695, %v4859_v10  ;;  %v4887_v2 = vmul.f32 1.442695, %v4860_v35  ;;  %v5377_v10 = vsel %vm5011_vm5, 1.0, %v5894_v56 }
0x1d5d   :  { %5778 = vpow2.f32 %v4885_v61 }
0x1d5e   :  { %5780 = vpow2.f32 %v4887_v2 }
0x1d63   :  { %v5779_v43 = vpop.eup %5778 }
0x1d64   :  { %v5781_v6 = vpop.eup %5780 }
0x1d65   :  { %v4907_v63 = vadd.f32 %v5781_v6, %v5779_v43 }
0x1d67   :  { %4908 = vadd.xlane.f32.xlu1 %v4907_v63 }
0x1d6f   :  { %4995 = vadd.xlane.f32.xlu1 %v4994_v51 }
0x1d70   :  { %v4953_v40 = vpop.permute.xlu1 %4952 }
0x1d71   :  { %vm4968_vm9 = vcmp.eq.s32.totalorder %v9293_v48, %v4953_v40  ;;  %vm4969_vm6 = vcmp.eq.s32.totalorder %v8675_v34, %v4953_v40  ;;  %v4906_v34 = vpop.xlane.xlu0 %4905  ;;  %v5379_v40 = vsel %vm5013_vm11, 1.0, %v5894_v56 }
0x1d72   :  { %v4982_v57 = vsel %vm4968_vm9, %v8621_v30, 0.0  ;;  %v4983_v58 = vsel %vm4969_vm6, %v8618_v32, 0.0  ;;  %v4990_v30 = vpop.xlane.xlu2 %4989 }
0x1d73   :  { %v5000_v60 = vadd.f32 %v4983_v58, %v4982_v57 }
0x1d75   :  { %5001 = vadd.xlane.f32.xlu0 %v5000_v60 }
0x1d77   :  { %5004 = vadd.xlane.f32.xlu1 %v5003_v14  ;;  %v5380_v14 = vsel %vm5014_vm12, 1.0, %v5894_v56 }
0x1d79   :  { %v4993_v38 = vpop.xlane.xlu0 %4992 }
0x1d7a   :  { %v4999_v4 = vpop.xlane.xlu2 %4998 }
0x1d82   :  { %v5008_v62 = vpop.xlane.xlu2 %5007 }
0x1d9b   :  { %v4891_v1 = vpop.xlane.xlu1 %4890 }
0x1d9c   :  { %5782 = vlog2.f32 %v4891_v1 }
0x1d9d   :  { %5784 = vlog2.f32 %v4894_v9 }
0x1da2   :  { %v5783_v59 = vpop.eup %5782 }
0x1da3   :  { %v4900_v48 = vpop.xlane.xlu1 %4899  ;;  %v5785_v33 = vpop.eup %5784  ;;  %v4911_v15 = vmul.f32 0.6931472, %v5783_v59 }
0x1da4   :  { %5786 = vlog2.f32 %v4900_v48  ;;  %v4913_v32 = vmul.f32 0.6931472, %v5785_v33 }
0x1da5   :  { %5788 = vlog2.f32 %v4897_v49  ;;  %v4924_v23 = vadd.f32 %v4911_v15, %v8652_v5 }
0x1da6   :  { %5790 = vlog2.f32 %v4903_v28  ;;  %v4925_v19 = vadd.f32 %v4913_v32, %v8646_v18 }
0x1da7   :  { %5792 = vlog2.f32 %v4906_v34  ;;  %v5030_v17 = vsub.f32 %v4924_v23, %v4990_v30 }
0x1da8   :  { %v5031_v5 = vsub.f32 %v4925_v19, %v4993_v38 }
0x1da9   :  { %v5037_v3 = vmul.f32 %v5375_v24, %v5030_v17 }
0x1daa   :  { %v5787_v21 = vpop.eup %5786  ;;  %v5038_v16 = vmul.f32 %v5376_v0, %v5031_v5 }
0x1dab   :  { %v4917_v7 = vmul.f32 0.6931472, %v5787_v21  ;;  %v5789_v31 = vpop.eup %5788 }
0x1dac   :  { %v4915_v45 = vmul.f32 0.6931472, %v5789_v31  ;;  %v5791_v41 = vpop.eup %5790  ;;  %v5046_v53 = vsel %vm5044_vm1, %v5038_v16, 0.0 }
0x1dad   :  { %v4927_v13 = vadd.f32 %v4917_v7, %v8660_v46  ;;  %v5793_v18 = vpop.eup %5792  ;;  %v4919_v61 = vmul.f32 0.6931472, %v5791_v41  ;;  %v5045_v46 = vsel %vm5044_vm1, %v5037_v3, 0.0 }
0x1dae   :  { %v4926_v39 = vadd.f32 %v4915_v45, %v8654_v36  ;;  %v4921_v43 = vmul.f32 0.6931472, %v5793_v18  ;;  %v5047_v44 = vadd.f32 %v5046_v53, %v5045_v46 }
0x1daf   :  { %v5033_v27 = vsub.f32 %v4927_v13, %v4999_v4  ;;  %v4928_v25 = vadd.f32 %v4919_v61, %v8662_v55 }
0x1db0   :  { %v4929_v58 = vadd.f32 %v4921_v43, %v8668_v52 }
0x1db1   :  { %v5040_v6 = vmul.f32 %v5378_v50, %v5033_v27 }
0x1dda   :  { %v4909_v54 = vpop.xlane.xlu1 %4908 }
0x1ddb   :  { %5794 = vlog2.f32 %v4909_v54 }
0x1de1   :  { %v5795_v22 = vpop.eup %5794 }
0x1de2   :  { %v4923_v42 = vmul.f32 0.6931472, %v5795_v22  ;;  %v4996_v35 = vpop.xlane.xlu1 %4995 }
0x1de3   :  { %v5032_v2 = vsub.f32 %v4926_v39, %v4996_v35 }
0x1de4   :  { %v4930_v47 = vadd.f32 %v4923_v42, %v8711_v37  ;;  %v5050_v37 = vsel %vm5044_vm1, %v5040_v6, 0.0 }
0x1de5   :  { %v5039_v63 = vmul.f32 %v5377_v10, %v5032_v2 }
0x1de6   :  { %v5036_v11 = vsub.f32 %v4930_v47, %v5008_v62 }
0x1de7   :  { %v5048_v36 = vsel %vm5044_vm1, %v5039_v63, 0.0 }
0x1de8   :  { %v5049_v51 = vadd.f32 %v5048_v36, %v5047_v44  ;;  %v5002_v20 = vpop.xlane.xlu0 %5001  ;;  %v5043_v26 = vmul.f32 %v5381_v8, %v5036_v11 }
0x1de9   :  { %v5034_v57 = vsub.f32 %v4928_v25, %v5002_v20 }
0x1dea   :  { %v5051_v60 = vadd.f32 %v5050_v37, %v5049_v51  ;;  %v5005_v29 = vpop.xlane.xlu1 %5004  ;;  %v5056_v59 = vsel %vm5044_vm1, %v5043_v26, 0.0 }
0x1deb   :  { %v5041_v9 = vmul.f32 %v5379_v40, %v5034_v57  ;;  %v5035_v1 = vsub.f32 %v4929_v58, %v5005_v29 }
0x1ded   :  { %v5052_v55 = vsel %vm5044_vm1, %v5041_v9, 0.0  ;;  %v5042_v49 = vmul.f32 %v5380_v14, %v5035_v1 }
0x1dee   :  { %v5053_v28 = vadd.f32 %v5052_v55, %v5051_v60 }
0x1def   :  { %v5054_v48 = vsel %vm5044_vm1, %v5042_v49, 0.0 }
0x1df0   :  { %v5055_v34 = vadd.f32 %v5054_v48, %v5053_v28 }
0x1df2   :  { %v5057_v33 = vadd.f32 %v5056_v59, %v5055_v34 }
0x1df4   :  { %5058 = vadd.xlane.f32.xlu0 %v5057_v33 }
0x1e67   :  { %v5059_v15 = vpop.xlane.xlu0 %5058 }
0x1e68   :  { %v5060_v52 = vrot.slane %v5059_v15, 4 }
0x1e6a   :  { %v5061_v30 = vadd.f32 %v5060_v52, %v5059_v15 }
0x1e6c   :  { %v5062_v21 = vrot.slane %v5061_v30, 2 }
0x1e6e   :  { %v5063_v32 = vadd.f32 %v5062_v21, %v5061_v30 }
0x1e70   :  { %v5064_v23 = vrot.slane %v5063_v32, 1 }
0x1e72   :  { %v5065_v12 = vadd.f32 %v5064_v23, %v5063_v32 }
0x1e74   :  { %5446 = vpush %v5065_v12 }
0x1ea5   :  { %s5447_s20 = spop %5446 }
0x1ea6   :  { %v5067_v38 = vstv %s5447_s20 }
0x1ea7   :  { %5069 = vst.msk [vmem:[#allocation6] sm:$0x1] %vm5068_vm2, %v5067_v38 }
0x1ea8   :  { %5080 = dma.vmem_to_hbm [thread:$0]  %s5076_s19, 16, %s5078_s4, [#allocation5]  }
0x1ea9   :  { %5888 = dma.done.wait [#allocation5], 16  }
0x1eaa   :  { %5889 = vsyncadd [#allocation5], 4294967280 }
0x1eab   :  { %5085 = vsyncpa [#allocation4], 1 }
0x1eac   :  { %5086 = vsyncpa [#allocation5], 1 }

</bundles_post_ra>
